<compile_context>
chip_gen: v6e
topology: v6e:2x2x1
jax: 0.10.0
libtpu: 0.0.40
codegen_flags: <defaults>
</compile_context>

<pallas_src>
import functools

import jax
import jax.numpy as jnp
from jax import lax
from jax.experimental import pallas as pl
from jax.experimental.pallas import tpu as pltpu

MXU_DTYPE = jnp.bfloat16   # matmul operand dtype (weights + per-tap casts)
ACT_DTYPE = jnp.float32    # VMEM activation storage dtype
                           # TODO(synk): flip ACT_DTYPE to bf16 on v6e/v7x to also
                           # halve vld/vst bytes once misaligned packed slices are
                           # confirmed on the target Mosaic version.
TILE_M = 128               # rows per register-accumulated tile (128x128 f32 = 16 vregs)


def _round_up(v, mult):
    return ((v + mult - 1) // mult) * mult


# ----------------------------- Pallas kernel ------------------------------ #

def _fused_conv_stack_kernel(*refs, layer_cfg, img_w, tile_m, n_tiles, pad_lead):
    """Fused chain of 3x3 stride-1 'same' convs (+ optional ReLU), one image per
    grid step.

    refs = (mask, x, w_0, b_0, ..., w_{L-1}, b_{L-1}, out, scratch_0, ...)
    layer_cfg = tuple of (cin_padded, cout_padded, apply_relu) per layer.

    Per-image activation layout: the spatially zero-padded (H+2, W+2) plane is
    row-flattened (channels in lanes) with `pad_lead` spare rows on both ends,
    so each 3x3 tap is a plain shifted row slice.  Each layer is computed in
    `tile_m`-row tiles: bias + 9 tap matmuls accumulate in an f32 register
    accumulator and are stored exactly once per tile.
    """
    n_layers = len(layer_cfg)
    mask_ref = refs[0]
    x_ref = refs[1]
    wb_refs = refs[2:2 + 2 * n_layers]
    o_ref = refs[2 + 2 * n_layers]
    scratch_refs = refs[3 + 2 * n_layers:]

    wp2 = img_w + 2
    src_ref = x_ref
    for li, (cin_p, cout_p, apply_relu) in enumerate(layer_cfg):
        w_ref = wb_refs[2 * li]
        b_ref = wb_refs[2 * li + 1]
        is_last = li == n_layers - 1
        if is_last:
            dst_ref, dst_off = o_ref, 0
        else:
            dst_ref, dst_off = scratch_refs[li], pad_lead

        b_row = b_ref[...].astype(jnp.float32)          # (1, cout_p), hoisted

        for ti in range(n_tiles):                       # static: all offsets constant
            row0 = ti * tile_m
            # Accumulator starts at the bias: one vreg broadcast per M-tile.
            acc = jnp.broadcast_to(b_row, (tile_m, cout_p))
            for t in range(9):
                dy, dx = divmod(t, 3)
                shift = (dy - 1) * wp2 + (dx - 1)
                tap = src_ref[pl.ds(pad_lead + row0 + shift, tile_m), :]
                acc = acc + jnp.dot(
                    tap.astype(MXU_DTYPE),
                    w_ref[pl.ds(t * cin_p, cin_p), :],
                    preferred_element_type=jnp.float32)
            if apply_relu:
                acc = jnp.maximum(acc, 0.0)
            if not is_last:
                # Zero the spatial-halo rows so they act as true padding for the
                # next layer's taps.  Select (not multiply) so uninitialized-scratch
                # garbage read by halo-centred windows can never leak through.
                keep = mask_ref[pl.ds(row0, tile_m), pl.ds(0, cout_p)] != 0.0
                acc = jnp.where(keep, acc, 0.0)
            dst_ref[pl.ds(dst_off + row0, tile_m), :] = acc.astype(dst_ref.dtype)
        src_ref = dst_ref


# ------------------------------- Glue (JAX) -------------------------------- #

def _prep_weight(wgt, cin_p, cout_p, dtype):
    """(cout, cin, 3, 3) torch-layout -> (9*cin_p, cout_p); tap t occupies rows
    [t*cin_p, (t+1)*cin_p), zero-padded channels."""
    cout, cin, kh, kw = wgt.shape
    wt = jnp.transpose(wgt, (2, 3, 1, 0)).reshape(kh * kw, cin, cout)
    wt = jnp.pad(wt, ((0, 0), (0, cin_p - cin), (0, cout_p - cout)))
    return wt.reshape(kh * kw * cin_p, cout_p).astype(dtype)


def fused_conv_stack_pallas(x_nchw, conv_params, relu_flags):
    """Apply a chained stack of 3x3 stride-1 'same' Conv2d(+ReLU) layers in one
    fused Pallas kernel.  conv_params: [(w(cout,cin,3,3), b(cout,)), ...]."""
    n, c_in, h, w = x_nchw.shape
    hp2, wp2 = h + 2, w + 2
    rows_img = hp2 * wp2                          # spatially padded rows per image
    tile_m = TILE_M
    n_tiles = (rows_img + tile_m - 1) // tile_m
    rows_c = n_tiles * tile_m                     # rows computed/stored per image
    halo = wp2 + 1                                # max |row shift| of a 3x3 tap
    pad_lead = _round_up(halo, 32)                # keep tile stores sublane-aligned
    rows_buf = pad_lead + rows_c + pad_lead       # per-image input/scratch rows

    # Per-layer channel padding: every conv output is padded to 128 lanes so all
    # intermediate loads/stores (and the HBM store) are lane-dense and later
    # layers contract over K=128.  First-layer cin pads to 16 (bf16 packing) so
    # per-tap weight-row slices stay aligned.
    layer_cfg, wb_inputs = [], []
    cin_prev, cin_prev_p = c_in, _round_up(c_in, 16)
    for (wgt, b), apply_relu in zip(conv_params, relu_flags):
        cout, cin, kh, kw = wgt.shape
        assert (kh, kw) == (3, 3) and cin == cin_prev, "expected chained 3x3 convs"
        cout_p = _round_up(cout, 128)
        wb_inputs.append(_prep_weight(wgt, cin_prev_p, cout_p, MXU_DTYPE))
        wb_inputs.append(jnp.pad(b, (0, cout_p - cout)).reshape(1, cout_p)
                         .astype(jnp.float32))
        layer_cfg.append((cin_prev_p, cout_p, bool(apply_relu)))
        cin_prev, cin_prev_p = cout, cout_p

    c0_p = layer_cfg[0][0]
    out_cp = layer_cfg[-1][1]
    cout_last = conv_params[-1][0].shape[0]

    # Interior-row mask (1 for real pixels, 0 for halo / tile-padding rows),
    # pre-broadcast across lanes so the in-kernel select is lane-dense.
    mask_w = max([cp for _, cp, _ in layer_cfg[:-1]], default=128)
    interior = jnp.zeros((hp2, wp2), jnp.float32).at[1:h + 1, 1:w + 1].set(1.0)
    interior = jnp.pad(interior.reshape(rows_img), (0, rows_c - rows_img))
    mask = jnp.broadcast_to(interior[:, None], (rows_c, mask_w))

    # NCHW -> per-image haloed, row-flattened, channel-padded layout.
    x_rows = jnp.transpose(x_nchw, (0, 2, 3, 1))
    x_rows = jnp.pad(x_rows, ((0, 0), (1, 1), (1, 1), (0, c0_p - c_in)))
    x_rows = x_rows.reshape(n, rows_img, c0_p)
    x_rows = jnp.pad(
        x_rows, ((0, 0), (pad_lead, rows_buf - pad_lead - rows_img), (0, 0)))
    x_rows = x_rows.reshape(n * rows_buf, c0_p).astype(ACT_DTYPE)

    in_specs = [pl.BlockSpec((rows_c, mask_w), lambda i: (0, 0)),
                pl.BlockSpec((rows_buf, c0_p), lambda i: (i, 0))]
    for arr in wb_inputs:
        in_specs.append(pl.BlockSpec(arr.shape, lambda i: (0, 0)))
    scratch_shapes = [pltpu.VMEM((rows_buf, cp), ACT_DTYPE)
                      for _, cp, _ in layer_cfg[:-1]]

    kernel = functools.partial(
        _fused_conv_stack_kernel, layer_cfg=tuple(layer_cfg), img_w=w,
        tile_m=tile_m, n_tiles=n_tiles, pad_lead=pad_lead)

    out = pl.pallas_call(
        kernel,
        out_shape=jax.ShapeDtypeStruct((n * rows_c, out_cp), jnp.float32),
        grid_spec=pltpu.PrefetchScalarGridSpec(
            num_scalar_prefetch=0,
            grid=(n,),                           # one image per grid step
            in_specs=in_specs,
            out_specs=pl.BlockSpec((rows_c, out_cp), lambda i: (i, 0)),
            scratch_shapes=scratch_shapes),
        compiler_params=pltpu.CompilerParams(
            dimension_semantics=("parallel",)),  # batch axis -> both v7x cores
    )(mask, x_rows, *wb_inputs)

    # Cheap XLA slice back to dense NCHW (interior rows, real channels).
    out = out.reshape(n, rows_c, out_cp)[:, :rows_img, :cout_last]
    out = out.reshape(n, hp2, wp2, cout_last)[:, 1:h + 1, 1:w + 1, :]
    return jnp.transpose(out, (0, 3, 1, 2)).astype(x_nchw.dtype)


# ----------------------- ModelLeftPart equivalent -------------------------- #

def init_convs(key):
    """Deterministic synthetic `original_model.convs` (Conv2d/ReLU sequence)."""
    specs = [(3, 8), (8, 16), (16, 32)]
    layers = []
    for cin, cout in specs:
        key, k1, k2 = jax.random.split(key, 3)
        fan_in = cin * 3 * 3
        bound = 1.0 / (fan_in ** 0.5)            # PyTorch default init range
        wgt = jax.random.uniform(k1, (cout, cin, 3, 3), jnp.float32, -bound, bound)
        b = jax.random.uniform(k2, (cout,), jnp.float32, -bound, bound)
        layers.append(("conv", (wgt, b)))
        layers.append(("relu", None))
    return layers


def model_left_part_forward(x, layers, cut_at):
    """forward(x) = convs[:cut_at](x); consecutive conv(+ReLU) blocks run as one
    fused Pallas kernel call."""
    layers = layers[:cut_at]
    i = 0
    while i < len(layers):
        kind, _ = layers[i]
        if kind == "conv":
            conv_params, relu_flags = [], []
            while i < len(layers) and layers[i][0] == "conv":
                conv_params.append(layers[i][1])
                if i + 1 < len(layers) and layers[i + 1][0] == "relu":
                    relu_flags.append(True)
                    i += 2
                else:
                    relu_flags.append(False)
                    i += 1
            x = fused_conv_stack_pallas(x, conv_params, relu_flags)
        else:                                    # standalone ReLU (not hit here)
            x = jnp.maximum(x, 0.0)
            i += 1
    return x


def _reference_forward(x, layers, cut_at):
    """Pure-JAX reference mirroring the kernel's quantization points: inputs,
    weights and activations rounded to MXU_DTYPE, accumulation in f32."""
    def q(v):
        return v.astype(MXU_DTYPE).astype(jnp.float32)
    x = q(x)
    for kind, params in layers[:cut_at]:
        if kind == "conv":
            wgt, b = params
            x = lax.conv_general_dilated(
                x, q(wgt), window_strides=(1, 1), padding="SAME",
                dimension_numbers=("NCHW", "OIHW", "NCHW"))
            x = q(x + b[None, :, None, None])
        else:
            x = jnp.maximum(x, 0.0)
    return x


if __name__ == "__main__":
    key = jax.random.PRNGKey(0)
    k_x, k_p = jax.random.split(key)

    # Small CIFAR-like input: batch=2, channels=3, spatial=16.
    x = jax.random.normal(k_x, (2, 3, 16, 16), dtype=jnp.float32)
    layers = init_convs(k_p)
    cut_at = 4   # -> Conv(3,8)+ReLU, Conv(8,16)+ReLU  (one fused kernel call)

    y = jax.block_until_ready(model_left_part_forward(x, layers, cut_at))

    y_ref = _reference_forward(x, layers, cut_at)
    assert y.shape == (2, 16, 16, 16), y.shape
    # Kernel keeps the final layer in f32 while the reference rounds every layer
    # to bf16, so allow ~1 bf16 ulp of slack (structural bugs would be O(0.1-1)).
    assert jnp.allclose(y, y_ref, atol=1e-2, rtol=1e-2), (
        float(jnp.max(jnp.abs(y - y_ref))))

    print("KERNEL_OK")
</pallas_src>

<mosaic_0001>
module attributes {stable_mosaic.version = 11 : i64} {
  func.func @_fused_conv_stack_kernel(%arg0: i32, %arg1: memref<384x128xf32, #tpu.memory_space<vmem>>, %arg2: memref<448x16xf32, #tpu.memory_space<vmem>>, %arg3: memref<144x128xbf16, #tpu.memory_space<vmem>>, %arg4: memref<1x128xf32, #tpu.memory_space<vmem>>, %arg5: memref<1152x128xbf16, #tpu.memory_space<vmem>>, %arg6: memref<1x128xf32, #tpu.memory_space<vmem>>, %arg7: memref<384x128xf32, #tpu.memory_space<vmem>>, %arg8: memref<448x128xf32, #tpu.memory_space<vmem>>) attributes {dimension_semantics = [#tpu.dimension_semantics<parallel>], iteration_bounds = array<i64: 2>, scalar_prefetch = 0 : i64, scratch_operands = 1 : i64, tpu.core_type = #tpu.core_type<tc>, window_params = [{pipeline_mode = #tpu.pipeline_mode<synchronous>, transform_indices = @transform_0, window_bounds = array<i64: 384, 128>}, {transform_indices = @transform_1, window_bounds = array<i64: 448, 16>}, {pipeline_mode = #tpu.pipeline_mode<synchronous>, transform_indices = @transform_2, window_bounds = array<i64: 144, 128>}, {pipeline_mode = #tpu.pipeline_mode<synchronous>, transform_indices = @transform_3, window_bounds = array<i64: 1, 128>}, {pipeline_mode = #tpu.pipeline_mode<synchronous>, transform_indices = @transform_4, window_bounds = array<i64: 1152, 128>}, {pipeline_mode = #tpu.pipeline_mode<synchronous>, transform_indices = @transform_5, window_bounds = array<i64: 1, 128>}, {transform_indices = @transform_6, window_bounds = array<i64: 384, 128>}]} {
    %c0 = arith.constant 0 : index
    %c0_0 = arith.constant 0 : index
    %0 = vector.load %arg4[%c0, %c0_0] : memref<1x128xf32, #tpu.memory_space<vmem>>, vector<1x128xf32>
    %1 = vector.shape_cast %0 : vector<1x128xf32> to vector<1x128xf32>
    %2 = vector.broadcast %1 : vector<1x128xf32> to vector<128x128xf32>
    %c13 = arith.constant 13 : index
    %c0_1 = arith.constant 0 : index
    %3 = vector.load %arg2[%c13, %c0_1] : memref<448x16xf32, #tpu.memory_space<vmem>>, vector<128x16xf32>
    %4 = arith.truncf %3 : vector<128x16xf32> to vector<128x16xbf16>
    %c0_2 = arith.constant 0 : index
    %c0_3 = arith.constant 0 : index
    %5 = vector.load %arg3[%c0_2, %c0_3] : memref<144x128xbf16, #tpu.memory_space<vmem>>, vector<16x128xbf16>
    %cst = arith.constant dense<0.000000e+00> : vector<128x128xf32>
    %6 = tpu.matmul %4, %5, %cst {dimension_numbers = #tpu.dot_dimension_numbers<[1], [0], [0], [1], [0, 0, 1, 1], [], []>} : vector<128x16xbf16>, vector<16x128xbf16>, vector<128x128xf32> -> vector<128x128xf32>
    %7 = arith.addf %2, %6 : vector<128x128xf32>
    %c14 = arith.constant 14 : index
    %c0_4 = arith.constant 0 : index
    %8 = vector.load %arg2[%c14, %c0_4] : memref<448x16xf32, #tpu.memory_space<vmem>>, vector<128x16xf32>
    %9 = arith.truncf %8 : vector<128x16xf32> to vector<128x16xbf16>
    %c16 = arith.constant 16 : index
    %c0_5 = arith.constant 0 : index
    %10 = vector.load %arg3[%c16, %c0_5] : memref<144x128xbf16, #tpu.memory_space<vmem>>, vector<16x128xbf16>
    %cst_6 = arith.constant dense<0.000000e+00> : vector<128x128xf32>
    %11 = tpu.matmul %9, %10, %cst_6 {dimension_numbers = #tpu.dot_dimension_numbers<[1], [0], [0], [1], [0, 0, 1, 1], [], []>} : vector<128x16xbf16>, vector<16x128xbf16>, vector<128x128xf32> -> vector<128x128xf32>
    %12 = arith.addf %7, %11 : vector<128x128xf32>
    %c15 = arith.constant 15 : index
    %c0_7 = arith.constant 0 : index
    %13 = vector.load %arg2[%c15, %c0_7] : memref<448x16xf32, #tpu.memory_space<vmem>>, vector<128x16xf32>
    %14 = arith.truncf %13 : vector<128x16xf32> to vector<128x16xbf16>
    %c32 = arith.constant 32 : index
    %c0_8 = arith.constant 0 : index
    %15 = vector.load %arg3[%c32, %c0_8] : memref<144x128xbf16, #tpu.memory_space<vmem>>, vector<16x128xbf16>
    %cst_9 = arith.constant dense<0.000000e+00> : vector<128x128xf32>
    %16 = tpu.matmul %14, %15, %cst_9 {dimension_numbers = #tpu.dot_dimension_numbers<[1], [0], [0], [1], [0, 0, 1, 1], [], []>} : vector<128x16xbf16>, vector<16x128xbf16>, vector<128x128xf32> -> vector<128x128xf32>
    %17 = arith.addf %12, %16 : vector<128x128xf32>
    %c31 = arith.constant 31 : index
    %c0_10 = arith.constant 0 : index
    %18 = vector.load %arg2[%c31, %c0_10] : memref<448x16xf32, #tpu.memory_space<vmem>>, vector<128x16xf32>
    %19 = arith.truncf %18 : vector<128x16xf32> to vector<128x16xbf16>
    %c48 = arith.constant 48 : index
    %c0_11 = arith.constant 0 : index
    %20 = vector.load %arg3[%c48, %c0_11] : memref<144x128xbf16, #tpu.memory_space<vmem>>, vector<16x128xbf16>
    %cst_12 = arith.constant dense<0.000000e+00> : vector<128x128xf32>
    %21 = tpu.matmul %19, %20, %cst_12 {dimension_numbers = #tpu.dot_dimension_numbers<[1], [0], [0], [1], [0, 0, 1, 1], [], []>} : vector<128x16xbf16>, vector<16x128xbf16>, vector<128x128xf32> -> vector<128x128xf32>
    %22 = arith.addf %17, %21 : vector<128x128xf32>
    %c32_13 = arith.constant 32 : index
    %c0_14 = arith.constant 0 : index
    %23 = vector.load %arg2[%c32_13, %c0_14] : memref<448x16xf32, #tpu.memory_space<vmem>>, vector<128x16xf32>
    %24 = arith.truncf %23 : vector<128x16xf32> to vector<128x16xbf16>
    %c64 = arith.constant 64 : index
    %c0_15 = arith.constant 0 : index
    %25 = vector.load %arg3[%c64, %c0_15] : memref<144x128xbf16, #tpu.memory_space<vmem>>, vector<16x128xbf16>
    %cst_16 = arith.constant dense<0.000000e+00> : vector<128x128xf32>
    %26 = tpu.matmul %24, %25, %cst_16 {dimension_numbers = #tpu.dot_dimension_numbers<[1], [0], [0], [1], [0, 0, 1, 1], [], []>} : vector<128x16xbf16>, vector<16x128xbf16>, vector<128x128xf32> -> vector<128x128xf32>
    %27 = arith.addf %22, %26 : vector<128x128xf32>
    %c33 = arith.constant 33 : index
    %c0_17 = arith.constant 0 : index
    %28 = vector.load %arg2[%c33, %c0_17] : memref<448x16xf32, #tpu.memory_space<vmem>>, vector<128x16xf32>
    %29 = arith.truncf %28 : vector<128x16xf32> to vector<128x16xbf16>
    %c80 = arith.constant 80 : index
    %c0_18 = arith.constant 0 : index
    %30 = vector.load %arg3[%c80, %c0_18] : memref<144x128xbf16, #tpu.memory_space<vmem>>, vector<16x128xbf16>
    %cst_19 = arith.constant dense<0.000000e+00> : vector<128x128xf32>
    %31 = tpu.matmul %29, %30, %cst_19 {dimension_numbers = #tpu.dot_dimension_numbers<[1], [0], [0], [1], [0, 0, 1, 1], [], []>} : vector<128x16xbf16>, vector<16x128xbf16>, vector<128x128xf32> -> vector<128x128xf32>
    %32 = arith.addf %27, %31 : vector<128x128xf32>
    %c49 = arith.constant 49 : index
    %c0_20 = arith.constant 0 : index
    %33 = vector.load %arg2[%c49, %c0_20] : memref<448x16xf32, #tpu.memory_space<vmem>>, vector<128x16xf32>
    %34 = arith.truncf %33 : vector<128x16xf32> to vector<128x16xbf16>
    %c96 = arith.constant 96 : index
    %c0_21 = arith.constant 0 : index
    %35 = vector.load %arg3[%c96, %c0_21] : memref<144x128xbf16, #tpu.memory_space<vmem>>, vector<16x128xbf16>
    %cst_22 = arith.constant dense<0.000000e+00> : vector<128x128xf32>
    %36 = tpu.matmul %34, %35, %cst_22 {dimension_numbers = #tpu.dot_dimension_numbers<[1], [0], [0], [1], [0, 0, 1, 1], [], []>} : vector<128x16xbf16>, vector<16x128xbf16>, vector<128x128xf32> -> vector<128x128xf32>
    %37 = arith.addf %32, %36 : vector<128x128xf32>
    %c50 = arith.constant 50 : index
    %c0_23 = arith.constant 0 : index
    %38 = vector.load %arg2[%c50, %c0_23] : memref<448x16xf32, #tpu.memory_space<vmem>>, vector<128x16xf32>
    %39 = arith.truncf %38 : vector<128x16xf32> to vector<128x16xbf16>
    %c112 = arith.constant 112 : index
    %c0_24 = arith.constant 0 : index
    %40 = vector.load %arg3[%c112, %c0_24] : memref<144x128xbf16, #tpu.memory_space<vmem>>, vector<16x128xbf16>
    %cst_25 = arith.constant dense<0.000000e+00> : vector<128x128xf32>
    %41 = tpu.matmul %39, %40, %cst_25 {dimension_numbers = #tpu.dot_dimension_numbers<[1], [0], [0], [1], [0, 0, 1, 1], [], []>} : vector<128x16xbf16>, vector<16x128xbf16>, vector<128x128xf32> -> vector<128x128xf32>
    %42 = arith.addf %37, %41 : vector<128x128xf32>
    %c51 = arith.constant 51 : index
    %c0_26 = arith.constant 0 : index
    %43 = vector.load %arg2[%c51, %c0_26] : memref<448x16xf32, #tpu.memory_space<vmem>>, vector<128x16xf32>
    %44 = arith.truncf %43 : vector<128x16xf32> to vector<128x16xbf16>
    %c128 = arith.constant 128 : index
    %c0_27 = arith.constant 0 : index
    %45 = vector.load %arg3[%c128, %c0_27] : memref<144x128xbf16, #tpu.memory_space<vmem>>, vector<16x128xbf16>
    %cst_28 = arith.constant dense<0.000000e+00> : vector<128x128xf32>
    %46 = tpu.matmul %44, %45, %cst_28 {dimension_numbers = #tpu.dot_dimension_numbers<[1], [0], [0], [1], [0, 0, 1, 1], [], []>} : vector<128x16xbf16>, vector<16x128xbf16>, vector<128x128xf32> -> vector<128x128xf32>
    %47 = arith.addf %42, %46 : vector<128x128xf32>
    %cst_29 = arith.constant 0.000000e+00 : f32
    %48 = vector.broadcast %cst_29 : f32 to vector<128x128xf32>
    %49 = arith.maximumf %47, %48 : vector<128x128xf32>
    %c0_30 = arith.constant 0 : index
    %c0_31 = arith.constant 0 : index
    %50 = vector.load %arg1[%c0_30, %c0_31] : memref<384x128xf32, #tpu.memory_space<vmem>>, vector<128x128xf32>
    %cst_32 = arith.constant 0.000000e+00 : f32
    %51 = vector.broadcast %cst_32 : f32 to vector<128x128xf32>
    %52 = arith.cmpf one, %50, %51 : vector<128x128xf32>
    %cst_33 = arith.constant 0.000000e+00 : f32
    %53 = vector.broadcast %cst_33 : f32 to vector<128x128xf32>
    %54 = arith.select %52, %49, %53 : vector<128x128xi1>, vector<128x128xf32>
    %c32_34 = arith.constant 32 : index
    %c0_35 = arith.constant 0 : index
    %55 = vector.load %arg8[%c32_34, %c0_35] : memref<448x128xf32, #tpu.memory_space<vmem>>, vector<128x128xf32>
    tpu.vector_store %arg8[%c32_34, %c0_35], %54 {strides = array<i32>} : memref<448x128xf32, #tpu.memory_space<vmem>>, vector<128x128xf32>,
    %56 = vector.shape_cast %0 : vector<1x128xf32> to vector<1x128xf32>
    %57 = vector.broadcast %56 : vector<1x128xf32> to vector<128x128xf32>
    %c141 = arith.constant 141 : index
    %c0_36 = arith.constant 0 : index
    %58 = vector.load %arg2[%c141, %c0_36] : memref<448x16xf32, #tpu.memory_space<vmem>>, vector<128x16xf32>
    %59 = arith.truncf %58 : vector<128x16xf32> to vector<128x16xbf16>
    %c0_37 = arith.constant 0 : index
    %c0_38 = arith.constant 0 : index
    %60 = vector.load %arg3[%c0_37, %c0_38] : memref<144x128xbf16, #tpu.memory_space<vmem>>, vector<16x128xbf16>
    %cst_39 = arith.constant dense<0.000000e+00> : vector<128x128xf32>
    %61 = tpu.matmul %59, %60, %cst_39 {dimension_numbers = #tpu.dot_dimension_numbers<[1], [0], [0], [1], [0, 0, 1, 1], [], []>} : vector<128x16xbf16>, vector<16x128xbf16>, vector<128x128xf32> -> vector<128x128xf32>
    %62 = arith.addf %57, %61 : vector<128x128xf32>
    %c142 = arith.constant 142 : index
    %c0_40 = arith.constant 0 : index
    %63 = vector.load %arg2[%c142, %c0_40] : memref<448x16xf32, #tpu.memory_space<vmem>>, vector<128x16xf32>
    %64 = arith.truncf %63 : vector<128x16xf32> to vector<128x16xbf16>
    %c16_41 = arith.constant 16 : index
    %c0_42 = arith.constant 0 : index
    %65 = vector.load %arg3[%c16_41, %c0_42] : memref<144x128xbf16, #tpu.memory_space<vmem>>, vector<16x128xbf16>
    %cst_43 = arith.constant dense<0.000000e+00> : vector<128x128xf32>
    %66 = tpu.matmul %64, %65, %cst_43 {dimension_numbers = #tpu.dot_dimension_numbers<[1], [0], [0], [1], [0, 0, 1, 1], [], []>} : vector<128x16xbf16>, vector<16x128xbf16>, vector<128x128xf32> -> vector<128x128xf32>
    %67 = arith.addf %62, %66 : vector<128x128xf32>
    %c143 = arith.constant 143 : index
    %c0_44 = arith.constant 0 : index
    %68 = vector.load %arg2[%c143, %c0_44] : memref<448x16xf32, #tpu.memory_space<vmem>>, vector<128x16xf32>
    %69 = arith.truncf %68 : vector<128x16xf32> to vector<128x16xbf16>
    %c32_45 = arith.constant 32 : index
    %c0_46 = arith.constant 0 : index
    %70 = vector.load %arg3[%c32_45, %c0_46] : memref<144x128xbf16, #tpu.memory_space<vmem>>, vector<16x128xbf16>
    %cst_47 = arith.constant dense<0.000000e+00> : vector<128x128xf32>
    %71 = tpu.matmul %69, %70, %cst_47 {dimension_numbers = #tpu.dot_dimension_numbers<[1], [0], [0], [1], [0, 0, 1, 1], [], []>} : vector<128x16xbf16>, vector<16x128xbf16>, vector<128x128xf32> -> vector<128x128xf32>
    %72 = arith.addf %67, %71 : vector<128x128xf32>
    %c159 = arith.constant 159 : index
    %c0_48 = arith.constant 0 : index
    %73 = vector.load %arg2[%c159, %c0_48] : memref<448x16xf32, #tpu.memory_space<vmem>>, vector<128x16xf32>
    %74 = arith.truncf %73 : vector<128x16xf32> to vector<128x16xbf16>
    %c48_49 = arith.constant 48 : index
    %c0_50 = arith.constant 0 : index
    %75 = vector.load %arg3[%c48_49, %c0_50] : memref<144x128xbf16, #tpu.memory_space<vmem>>, vector<16x128xbf16>
    %cst_51 = arith.constant dense<0.000000e+00> : vector<128x128xf32>
    %76 = tpu.matmul %74, %75, %cst_51 {dimension_numbers = #tpu.dot_dimension_numbers<[1], [0], [0], [1], [0, 0, 1, 1], [], []>} : vector<128x16xbf16>, vector<16x128xbf16>, vector<128x128xf32> -> vector<128x128xf32>
    %77 = arith.addf %72, %76 : vector<128x128xf32>
    %c160 = arith.constant 160 : index
    %c0_52 = arith.constant 0 : index
    %78 = vector.load %arg2[%c160, %c0_52] : memref<448x16xf32, #tpu.memory_space<vmem>>, vector<128x16xf32>
    %79 = arith.truncf %78 : vector<128x16xf32> to vector<128x16xbf16>
    %c64_53 = arith.constant 64 : index
    %c0_54 = arith.constant 0 : index
    %80 = vector.load %arg3[%c64_53, %c0_54] : memref<144x128xbf16, #tpu.memory_space<vmem>>, vector<16x128xbf16>
    %cst_55 = arith.constant dense<0.000000e+00> : vector<128x128xf32>
    %81 = tpu.matmul %79, %80, %cst_55 {dimension_numbers = #tpu.dot_dimension_numbers<[1], [0], [0], [1], [0, 0, 1, 1], [], []>} : vector<128x16xbf16>, vector<16x128xbf16>, vector<128x128xf32> -> vector<128x128xf32>
    %82 = arith.addf %77, %81 : vector<128x128xf32>
    %c161 = arith.constant 161 : index
    %c0_56 = arith.constant 0 : index
    %83 = vector.load %arg2[%c161, %c0_56] : memref<448x16xf32, #tpu.memory_space<vmem>>, vector<128x16xf32>
    %84 = arith.truncf %83 : vector<128x16xf32> to vector<128x16xbf16>
    %c80_57 = arith.constant 80 : index
    %c0_58 = arith.constant 0 : index
    %85 = vector.load %arg3[%c80_57, %c0_58] : memref<144x128xbf16, #tpu.memory_space<vmem>>, vector<16x128xbf16>
    %cst_59 = arith.constant dense<0.000000e+00> : vector<128x128xf32>
    %86 = tpu.matmul %84, %85, %cst_59 {dimension_numbers = #tpu.dot_dimension_numbers<[1], [0], [0], [1], [0, 0, 1, 1], [], []>} : vector<128x16xbf16>, vector<16x128xbf16>, vector<128x128xf32> -> vector<128x128xf32>
    %87 = arith.addf %82, %86 : vector<128x128xf32>
    %c177 = arith.constant 177 : index
    %c0_60 = arith.constant 0 : index
    %88 = vector.load %arg2[%c177, %c0_60] : memref<448x16xf32, #tpu.memory_space<vmem>>, vector<128x16xf32>
    %89 = arith.truncf %88 : vector<128x16xf32> to vector<128x16xbf16>
    %c96_61 = arith.constant 96 : index
    %c0_62 = arith.constant 0 : index
    %90 = vector.load %arg3[%c96_61, %c0_62] : memref<144x128xbf16, #tpu.memory_space<vmem>>, vector<16x128xbf16>
    %cst_63 = arith.constant dense<0.000000e+00> : vector<128x128xf32>
    %91 = tpu.matmul %89, %90, %cst_63 {dimension_numbers = #tpu.dot_dimension_numbers<[1], [0], [0], [1], [0, 0, 1, 1], [], []>} : vector<128x16xbf16>, vector<16x128xbf16>, vector<128x128xf32> -> vector<128x128xf32>
    %92 = arith.addf %87, %91 : vector<128x128xf32>
    %c178 = arith.constant 178 : index
    %c0_64 = arith.constant 0 : index
    %93 = vector.load %arg2[%c178, %c0_64] : memref<448x16xf32, #tpu.memory_space<vmem>>, vector<128x16xf32>
    %94 = arith.truncf %93 : vector<128x16xf32> to vector<128x16xbf16>
    %c112_65 = arith.constant 112 : index
    %c0_66 = arith.constant 0 : index
    %95 = vector.load %arg3[%c112_65, %c0_66] : memref<144x128xbf16, #tpu.memory_space<vmem>>, vector<16x128xbf16>
    %cst_67 = arith.constant dense<0.000000e+00> : vector<128x128xf32>
    %96 = tpu.matmul %94, %95, %cst_67 {dimension_numbers = #tpu.dot_dimension_numbers<[1], [0], [0], [1], [0, 0, 1, 1], [], []>} : vector<128x16xbf16>, vector<16x128xbf16>, vector<128x128xf32> -> vector<128x128xf32>
    %97 = arith.addf %92, %96 : vector<128x128xf32>
    %c179 = arith.constant 179 : index
    %c0_68 = arith.constant 0 : index
    %98 = vector.load %arg2[%c179, %c0_68] : memref<448x16xf32, #tpu.memory_space<vmem>>, vector<128x16xf32>
    %99 = arith.truncf %98 : vector<128x16xf32> to vector<128x16xbf16>
    %c128_69 = arith.constant 128 : index
    %c0_70 = arith.constant 0 : index
    %100 = vector.load %arg3[%c128_69, %c0_70] : memref<144x128xbf16, #tpu.memory_space<vmem>>, vector<16x128xbf16>
    %cst_71 = arith.constant dense<0.000000e+00> : vector<128x128xf32>
    %101 = tpu.matmul %99, %100, %cst_71 {dimension_numbers = #tpu.dot_dimension_numbers<[1], [0], [0], [1], [0, 0, 1, 1], [], []>} : vector<128x16xbf16>, vector<16x128xbf16>, vector<128x128xf32> -> vector<128x128xf32>
    %102 = arith.addf %97, %101 : vector<128x128xf32>
    %cst_72 = arith.constant 0.000000e+00 : f32
    %103 = vector.broadcast %cst_72 : f32 to vector<128x128xf32>
    %104 = arith.maximumf %102, %103 : vector<128x128xf32>
    %c128_73 = arith.constant 128 : index
    %c0_74 = arith.constant 0 : index
    %105 = vector.load %arg1[%c128_73, %c0_74] : memref<384x128xf32, #tpu.memory_space<vmem>>, vector<128x128xf32>
    %cst_75 = arith.constant 0.000000e+00 : f32
    %106 = vector.broadcast %cst_75 : f32 to vector<128x128xf32>
    %107 = arith.cmpf one, %105, %106 : vector<128x128xf32>
    %cst_76 = arith.constant 0.000000e+00 : f32
    %108 = vector.broadcast %cst_76 : f32 to vector<128x128xf32>
    %109 = arith.select %107, %104, %108 : vector<128x128xi1>, vector<128x128xf32>
    %c160_77 = arith.constant 160 : index
    %c0_78 = arith.constant 0 : index
    %110 = vector.load %arg8[%c160_77, %c0_78] : memref<448x128xf32, #tpu.memory_space<vmem>>, vector<128x128xf32>
    tpu.vector_store %arg8[%c160_77, %c0_78], %109 {strides = array<i32>} : memref<448x128xf32, #tpu.memory_space<vmem>>, vector<128x128xf32>,
    %111 = vector.shape_cast %0 : vector<1x128xf32> to vector<1x128xf32>
    %112 = vector.broadcast %111 : vector<1x128xf32> to vector<128x128xf32>
    %c269 = arith.constant 269 : index
    %c0_79 = arith.constant 0 : index
    %113 = vector.load %arg2[%c269, %c0_79] : memref<448x16xf32, #tpu.memory_space<vmem>>, vector<128x16xf32>
    %114 = arith.truncf %113 : vector<128x16xf32> to vector<128x16xbf16>
    %c0_80 = arith.constant 0 : index
    %c0_81 = arith.constant 0 : index
    %115 = vector.load %arg3[%c0_80, %c0_81] : memref<144x128xbf16, #tpu.memory_space<vmem>>, vector<16x128xbf16>
    %cst_82 = arith.constant dense<0.000000e+00> : vector<128x128xf32>
    %116 = tpu.matmul %114, %115, %cst_82 {dimension_numbers = #tpu.dot_dimension_numbers<[1], [0], [0], [1], [0, 0, 1, 1], [], []>} : vector<128x16xbf16>, vector<16x128xbf16>, vector<128x128xf32> -> vector<128x128xf32>
    %117 = arith.addf %112, %116 : vector<128x128xf32>
    %c270 = arith.constant 270 : index
    %c0_83 = arith.constant 0 : index
    %118 = vector.load %arg2[%c270, %c0_83] : memref<448x16xf32, #tpu.memory_space<vmem>>, vector<128x16xf32>
    %119 = arith.truncf %118 : vector<128x16xf32> to vector<128x16xbf16>
    %c16_84 = arith.constant 16 : index
    %c0_85 = arith.constant 0 : index
    %120 = vector.load %arg3[%c16_84, %c0_85] : memref<144x128xbf16, #tpu.memory_space<vmem>>, vector<16x128xbf16>
    %cst_86 = arith.constant dense<0.000000e+00> : vector<128x128xf32>
    %121 = tpu.matmul %119, %120, %cst_86 {dimension_numbers = #tpu.dot_dimension_numbers<[1], [0], [0], [1], [0, 0, 1, 1], [], []>} : vector<128x16xbf16>, vector<16x128xbf16>, vector<128x128xf32> -> vector<128x128xf32>
    %122 = arith.addf %117, %121 : vector<128x128xf32>
    %c271 = arith.constant 271 : index
    %c0_87 = arith.constant 0 : index
    %123 = vector.load %arg2[%c271, %c0_87] : memref<448x16xf32, #tpu.memory_space<vmem>>, vector<128x16xf32>
    %124 = arith.truncf %123 : vector<128x16xf32> to vector<128x16xbf16>
    %c32_88 = arith.constant 32 : index
    %c0_89 = arith.constant 0 : index
    %125 = vector.load %arg3[%c32_88, %c0_89] : memref<144x128xbf16, #tpu.memory_space<vmem>>, vector<16x128xbf16>
    %cst_90 = arith.constant dense<0.000000e+00> : vector<128x128xf32>
    %126 = tpu.matmul %124, %125, %cst_90 {dimension_numbers = #tpu.dot_dimension_numbers<[1], [0], [0], [1], [0, 0, 1, 1], [], []>} : vector<128x16xbf16>, vector<16x128xbf16>, vector<128x128xf32> -> vector<128x128xf32>
    %127 = arith.addf %122, %126 : vector<128x128xf32>
    %c287 = arith.constant 287 : index
    %c0_91 = arith.constant 0 : index
    %128 = vector.load %arg2[%c287, %c0_91] : memref<448x16xf32, #tpu.memory_space<vmem>>, vector<128x16xf32>
    %129 = arith.truncf %128 : vector<128x16xf32> to vector<128x16xbf16>
    %c48_92 = arith.constant 48 : index
    %c0_93 = arith.constant 0 : index
    %130 = vector.load %arg3[%c48_92, %c0_93] : memref<144x128xbf16, #tpu.memory_space<vmem>>, vector<16x128xbf16>
    %cst_94 = arith.constant dense<0.000000e+00> : vector<128x128xf32>
    %131 = tpu.matmul %129, %130, %cst_94 {dimension_numbers = #tpu.dot_dimension_numbers<[1], [0], [0], [1], [0, 0, 1, 1], [], []>} : vector<128x16xbf16>, vector<16x128xbf16>, vector<128x128xf32> -> vector<128x128xf32>
    %132 = arith.addf %127, %131 : vector<128x128xf32>
    %c288 = arith.constant 288 : index
    %c0_95 = arith.constant 0 : index
    %133 = vector.load %arg2[%c288, %c0_95] : memref<448x16xf32, #tpu.memory_space<vmem>>, vector<128x16xf32>
    %134 = arith.truncf %133 : vector<128x16xf32> to vector<128x16xbf16>
    %c64_96 = arith.constant 64 : index
    %c0_97 = arith.constant 0 : index
    %135 = vector.load %arg3[%c64_96, %c0_97] : memref<144x128xbf16, #tpu.memory_space<vmem>>, vector<16x128xbf16>
    %cst_98 = arith.constant dense<0.000000e+00> : vector<128x128xf32>
    %136 = tpu.matmul %134, %135, %cst_98 {dimension_numbers = #tpu.dot_dimension_numbers<[1], [0], [0], [1], [0, 0, 1, 1], [], []>} : vector<128x16xbf16>, vector<16x128xbf16>, vector<128x128xf32> -> vector<128x128xf32>
    %137 = arith.addf %132, %136 : vector<128x128xf32>
    %c289 = arith.constant 289 : index
    %c0_99 = arith.constant 0 : index
    %138 = vector.load %arg2[%c289, %c0_99] : memref<448x16xf32, #tpu.memory_space<vmem>>, vector<128x16xf32>
    %139 = arith.truncf %138 : vector<128x16xf32> to vector<128x16xbf16>
    %c80_100 = arith.constant 80 : index
    %c0_101 = arith.constant 0 : index
    %140 = vector.load %arg3[%c80_100, %c0_101] : memref<144x128xbf16, #tpu.memory_space<vmem>>, vector<16x128xbf16>
    %cst_102 = arith.constant dense<0.000000e+00> : vector<128x128xf32>
    %141 = tpu.matmul %139, %140, %cst_102 {dimension_numbers = #tpu.dot_dimension_numbers<[1], [0], [0], [1], [0, 0, 1, 1], [], []>} : vector<128x16xbf16>, vector<16x128xbf16>, vector<128x128xf32> -> vector<128x128xf32>
    %142 = arith.addf %137, %141 : vector<128x128xf32>
    %c305 = arith.constant 305 : index
    %c0_103 = arith.constant 0 : index
    %143 = vector.load %arg2[%c305, %c0_103] : memref<448x16xf32, #tpu.memory_space<vmem>>, vector<128x16xf32>
    %144 = arith.truncf %143 : vector<128x16xf32> to vector<128x16xbf16>
    %c96_104 = arith.constant 96 : index
    %c0_105 = arith.constant 0 : index
    %145 = vector.load %arg3[%c96_104, %c0_105] : memref<144x128xbf16, #tpu.memory_space<vmem>>, vector<16x128xbf16>
    %cst_106 = arith.constant dense<0.000000e+00> : vector<128x128xf32>
    %146 = tpu.matmul %144, %145, %cst_106 {dimension_numbers = #tpu.dot_dimension_numbers<[1], [0], [0], [1], [0, 0, 1, 1], [], []>} : vector<128x16xbf16>, vector<16x128xbf16>, vector<128x128xf32> -> vector<128x128xf32>
    %147 = arith.addf %142, %146 : vector<128x128xf32>
    %c306 = arith.constant 306 : index
    %c0_107 = arith.constant 0 : index
    %148 = vector.load %arg2[%c306, %c0_107] : memref<448x16xf32, #tpu.memory_space<vmem>>, vector<128x16xf32>
    %149 = arith.truncf %148 : vector<128x16xf32> to vector<128x16xbf16>
    %c112_108 = arith.constant 112 : index
    %c0_109 = arith.constant 0 : index
    %150 = vector.load %arg3[%c112_108, %c0_109] : memref<144x128xbf16, #tpu.memory_space<vmem>>, vector<16x128xbf16>
    %cst_110 = arith.constant dense<0.000000e+00> : vector<128x128xf32>
    %151 = tpu.matmul %149, %150, %cst_110 {dimension_numbers = #tpu.dot_dimension_numbers<[1], [0], [0], [1], [0, 0, 1, 1], [], []>} : vector<128x16xbf16>, vector<16x128xbf16>, vector<128x128xf32> -> vector<128x128xf32>
    %152 = arith.addf %147, %151 : vector<128x128xf32>
    %c307 = arith.constant 307 : index
    %c0_111 = arith.constant 0 : index
    %153 = vector.load %arg2[%c307, %c0_111] : memref<448x16xf32, #tpu.memory_space<vmem>>, vector<128x16xf32>
    %154 = arith.truncf %153 : vector<128x16xf32> to vector<128x16xbf16>
    %c128_112 = arith.constant 128 : index
    %c0_113 = arith.constant 0 : index
    %155 = vector.load %arg3[%c128_112, %c0_113] : memref<144x128xbf16, #tpu.memory_space<vmem>>, vector<16x128xbf16>
    %cst_114 = arith.constant dense<0.000000e+00> : vector<128x128xf32>
    %156 = tpu.matmul %154, %155, %cst_114 {dimension_numbers = #tpu.dot_dimension_numbers<[1], [0], [0], [1], [0, 0, 1, 1], [], []>} : vector<128x16xbf16>, vector<16x128xbf16>, vector<128x128xf32> -> vector<128x128xf32>
    %157 = arith.addf %152, %156 : vector<128x128xf32>
    %cst_115 = arith.constant 0.000000e+00 : f32
    %158 = vector.broadcast %cst_115 : f32 to vector<128x128xf32>
    %159 = arith.maximumf %157, %158 : vector<128x128xf32>
    %c256 = arith.constant 256 : index
    %c0_116 = arith.constant 0 : index
    %160 = vector.load %arg1[%c256, %c0_116] : memref<384x128xf32, #tpu.memory_space<vmem>>, vector<128x128xf32>
    %cst_117 = arith.constant 0.000000e+00 : f32
    %161 = vector.broadcast %cst_117 : f32 to vector<128x128xf32>
    %162 = arith.cmpf one, %160, %161 : vector<128x128xf32>
    %cst_118 = arith.constant 0.000000e+00 : f32
    %163 = vector.broadcast %cst_118 : f32 to vector<128x128xf32>
    %164 = arith.select %162, %159, %163 : vector<128x128xi1>, vector<128x128xf32>
    %c288_119 = arith.constant 288 : index
    %c0_120 = arith.constant 0 : index
    %165 = vector.load %arg8[%c288_119, %c0_120] : memref<448x128xf32, #tpu.memory_space<vmem>>, vector<128x128xf32>
    tpu.vector_store %arg8[%c288_119, %c0_120], %164 {strides = array<i32>} : memref<448x128xf32, #tpu.memory_space<vmem>>, vector<128x128xf32>,
    %c0_121 = arith.constant 0 : index
    %c0_122 = arith.constant 0 : index
    %166 = vector.load %arg6[%c0_121, %c0_122] : memref<1x128xf32, #tpu.memory_space<vmem>>, vector<1x128xf32>
    %167 = vector.shape_cast %166 : vector<1x128xf32> to vector<1x128xf32>
    %168 = vector.broadcast %167 : vector<1x128xf32> to vector<128x128xf32>
    %c13_123 = arith.constant 13 : index
    %c0_124 = arith.constant 0 : index
    %169 = vector.load %arg8[%c13_123, %c0_124] : memref<448x128xf32, #tpu.memory_space<vmem>>, vector<128x128xf32>
    %170 = arith.truncf %169 : vector<128x128xf32> to vector<128x128xbf16>
    %c0_125 = arith.constant 0 : index
    %c0_126 = arith.constant 0 : index
    %171 = vector.load %arg5[%c0_125, %c0_126] : memref<1152x128xbf16, #tpu.memory_space<vmem>>, vector<128x128xbf16>
    %cst_127 = arith.constant dense<0.000000e+00> : vector<128x128xf32>
    %172 = tpu.matmul %170, %171, %cst_127 {dimension_numbers = #tpu.dot_dimension_numbers<[1], [0], [0], [1], [0, 0, 1, 1], [], []>} : vector<128x128xbf16>, vector<128x128xbf16>, vector<128x128xf32> -> vector<128x128xf32>
    %173 = arith.addf %168, %172 : vector<128x128xf32>
    %c14_128 = arith.constant 14 : index
    %c0_129 = arith.constant 0 : index
    %174 = vector.load %arg8[%c14_128, %c0_129] : memref<448x128xf32, #tpu.memory_space<vmem>>, vector<128x128xf32>
    %175 = arith.truncf %174 : vector<128x128xf32> to vector<128x128xbf16>
    %c128_130 = arith.constant 128 : index
    %c0_131 = arith.constant 0 : index
    %176 = vector.load %arg5[%c128_130, %c0_131] : memref<1152x128xbf16, #tpu.memory_space<vmem>>, vector<128x128xbf16>
    %cst_132 = arith.constant dense<0.000000e+00> : vector<128x128xf32>
    %177 = tpu.matmul %175, %176, %cst_132 {dimension_numbers = #tpu.dot_dimension_numbers<[1], [0], [0], [1], [0, 0, 1, 1], [], []>} : vector<128x128xbf16>, vector<128x128xbf16>, vector<128x128xf32> -> vector<128x128xf32>
    %178 = arith.addf %173, %177 : vector<128x128xf32>
    %c15_133 = arith.constant 15 : index
    %c0_134 = arith.constant 0 : index
    %179 = vector.load %arg8[%c15_133, %c0_134] : memref<448x128xf32, #tpu.memory_space<vmem>>, vector<128x128xf32>
    %180 = arith.truncf %179 : vector<128x128xf32> to vector<128x128xbf16>
    %c256_135 = arith.constant 256 : index
    %c0_136 = arith.constant 0 : index
    %181 = vector.load %arg5[%c256_135, %c0_136] : memref<1152x128xbf16, #tpu.memory_space<vmem>>, vector<128x128xbf16>
    %cst_137 = arith.constant dense<0.000000e+00> : vector<128x128xf32>
    %182 = tpu.matmul %180, %181, %cst_137 {dimension_numbers = #tpu.dot_dimension_numbers<[1], [0], [0], [1], [0, 0, 1, 1], [], []>} : vector<128x128xbf16>, vector<128x128xbf16>, vector<128x128xf32> -> vector<128x128xf32>
    %183 = arith.addf %178, %182 : vector<128x128xf32>
    %c31_138 = arith.constant 31 : index
    %c0_139 = arith.constant 0 : index
    %184 = vector.load %arg8[%c31_138, %c0_139] : memref<448x128xf32, #tpu.memory_space<vmem>>, vector<128x128xf32>
    %185 = arith.truncf %184 : vector<128x128xf32> to vector<128x128xbf16>
    %c384 = arith.constant 384 : index
    %c0_140 = arith.constant 0 : index
    %186 = vector.load %arg5[%c384, %c0_140] : memref<1152x128xbf16, #tpu.memory_space<vmem>>, vector<128x128xbf16>
    %cst_141 = arith.constant dense<0.000000e+00> : vector<128x128xf32>
    %187 = tpu.matmul %185, %186, %cst_141 {dimension_numbers = #tpu.dot_dimension_numbers<[1], [0], [0], [1], [0, 0, 1, 1], [], []>} : vector<128x128xbf16>, vector<128x128xbf16>, vector<128x128xf32> -> vector<128x128xf32>
    %188 = arith.addf %183, %187 : vector<128x128xf32>
    %c32_142 = arith.constant 32 : index
    %c0_143 = arith.constant 0 : index
    %189 = vector.load %arg8[%c32_142, %c0_143] : memref<448x128xf32, #tpu.memory_space<vmem>>, vector<128x128xf32>
    %190 = arith.truncf %189 : vector<128x128xf32> to vector<128x128xbf16>
    %c512 = arith.constant 512 : index
    %c0_144 = arith.constant 0 : index
    %191 = vector.load %arg5[%c512, %c0_144] : memref<1152x128xbf16, #tpu.memory_space<vmem>>, vector<128x128xbf16>
    %cst_145 = arith.constant dense<0.000000e+00> : vector<128x128xf32>
    %192 = tpu.matmul %190, %191, %cst_145 {dimension_numbers = #tpu.dot_dimension_numbers<[1], [0], [0], [1], [0, 0, 1, 1], [], []>} : vector<128x128xbf16>, vector<128x128xbf16>, vector<128x128xf32> -> vector<128x128xf32>
    %193 = arith.addf %188, %192 : vector<128x128xf32>
    %c33_146 = arith.constant 33 : index
    %c0_147 = arith.constant 0 : index
    %194 = vector.load %arg8[%c33_146, %c0_147] : memref<448x128xf32, #tpu.memory_space<vmem>>, vector<128x128xf32>
    %195 = arith.truncf %194 : vector<128x128xf32> to vector<128x128xbf16>
    %c640 = arith.constant 640 : index
    %c0_148 = arith.constant 0 : index
    %196 = vector.load %arg5[%c640, %c0_148] : memref<1152x128xbf16, #tpu.memory_space<vmem>>, vector<128x128xbf16>
    %cst_149 = arith.constant dense<0.000000e+00> : vector<128x128xf32>
    %197 = tpu.matmul %195, %196, %cst_149 {dimension_numbers = #tpu.dot_dimension_numbers<[1], [0], [0], [1], [0, 0, 1, 1], [], []>} : vector<128x128xbf16>, vector<128x128xbf16>, vector<128x128xf32> -> vector<128x128xf32>
    %198 = arith.addf %193, %197 : vector<128x128xf32>
    %c49_150 = arith.constant 49 : index
    %c0_151 = arith.constant 0 : index
    %199 = vector.load %arg8[%c49_150, %c0_151] : memref<448x128xf32, #tpu.memory_space<vmem>>, vector<128x128xf32>
    %200 = arith.truncf %199 : vector<128x128xf32> to vector<128x128xbf16>
    %c768 = arith.constant 768 : index
    %c0_152 = arith.constant 0 : index
    %201 = vector.load %arg5[%c768, %c0_152] : memref<1152x128xbf16, #tpu.memory_space<vmem>>, vector<128x128xbf16>
    %cst_153 = arith.constant dense<0.000000e+00> : vector<128x128xf32>
    %202 = tpu.matmul %200, %201, %cst_153 {dimension_numbers = #tpu.dot_dimension_numbers<[1], [0], [0], [1], [0, 0, 1, 1], [], []>} : vector<128x128xbf16>, vector<128x128xbf16>, vector<128x128xf32> -> vector<128x128xf32>
    %203 = arith.addf %198, %202 : vector<128x128xf32>
    %c50_154 = arith.constant 50 : index
    %c0_155 = arith.constant 0 : index
    %204 = vector.load %arg8[%c50_154, %c0_155] : memref<448x128xf32, #tpu.memory_space<vmem>>, vector<128x128xf32>
    %205 = arith.truncf %204 : vector<128x128xf32> to vector<128x128xbf16>
    %c896 = arith.constant 896 : index
    %c0_156 = arith.constant 0 : index
    %206 = vector.load %arg5[%c896, %c0_156] : memref<1152x128xbf16, #tpu.memory_space<vmem>>, vector<128x128xbf16>
    %cst_157 = arith.constant dense<0.000000e+00> : vector<128x128xf32>
    %207 = tpu.matmul %205, %206, %cst_157 {dimension_numbers = #tpu.dot_dimension_numbers<[1], [0], [0], [1], [0, 0, 1, 1], [], []>} : vector<128x128xbf16>, vector<128x128xbf16>, vector<128x128xf32> -> vector<128x128xf32>
    %208 = arith.addf %203, %207 : vector<128x128xf32>
    %c51_158 = arith.constant 51 : index
    %c0_159 = arith.constant 0 : index
    %209 = vector.load %arg8[%c51_158, %c0_159] : memref<448x128xf32, #tpu.memory_space<vmem>>, vector<128x128xf32>
    %210 = arith.truncf %209 : vector<128x128xf32> to vector<128x128xbf16>
    %c1024 = arith.constant 1024 : index
    %c0_160 = arith.constant 0 : index
    %211 = vector.load %arg5[%c1024, %c0_160] : memref<1152x128xbf16, #tpu.memory_space<vmem>>, vector<128x128xbf16>
    %cst_161 = arith.constant dense<0.000000e+00> : vector<128x128xf32>
    %212 = tpu.matmul %210, %211, %cst_161 {dimension_numbers = #tpu.dot_dimension_numbers<[1], [0], [0], [1], [0, 0, 1, 1], [], []>} : vector<128x128xbf16>, vector<128x128xbf16>, vector<128x128xf32> -> vector<128x128xf32>
    %213 = arith.addf %208, %212 : vector<128x128xf32>
    %cst_162 = arith.constant 0.000000e+00 : f32
    %214 = vector.broadcast %cst_162 : f32 to vector<128x128xf32>
    %215 = arith.maximumf %213, %214 : vector<128x128xf32>
    %c0_163 = arith.constant 0 : index
    %c0_164 = arith.constant 0 : index
    %216 = vector.load %arg7[%c0_163, %c0_164] : memref<384x128xf32, #tpu.memory_space<vmem>>, vector<128x128xf32>
    tpu.vector_store %arg7[%c0_163, %c0_164], %215 {strides = array<i32>} : memref<384x128xf32, #tpu.memory_space<vmem>>, vector<128x128xf32>,
    %217 = vector.shape_cast %166 : vector<1x128xf32> to vector<1x128xf32>
    %218 = vector.broadcast %217 : vector<1x128xf32> to vector<128x128xf32>
    %c141_165 = arith.constant 141 : index
    %c0_166 = arith.constant 0 : index
    %219 = vector.load %arg8[%c141_165, %c0_166] : memref<448x128xf32, #tpu.memory_space<vmem>>, vector<128x128xf32>
    %220 = arith.truncf %219 : vector<128x128xf32> to vector<128x128xbf16>
    %c0_167 = arith.constant 0 : index
    %c0_168 = arith.constant 0 : index
    %221 = vector.load %arg5[%c0_167, %c0_168] : memref<1152x128xbf16, #tpu.memory_space<vmem>>, vector<128x128xbf16>
    %cst_169 = arith.constant dense<0.000000e+00> : vector<128x128xf32>
    %222 = tpu.matmul %220, %221, %cst_169 {dimension_numbers = #tpu.dot_dimension_numbers<[1], [0], [0], [1], [0, 0, 1, 1], [], []>} : vector<128x128xbf16>, vector<128x128xbf16>, vector<128x128xf32> -> vector<128x128xf32>
    %223 = arith.addf %218, %222 : vector<128x128xf32>
    %c142_170 = arith.constant 142 : index
    %c0_171 = arith.constant 0 : index
    %224 = vector.load %arg8[%c142_170, %c0_171] : memref<448x128xf32, #tpu.memory_space<vmem>>, vector<128x128xf32>
    %225 = arith.truncf %224 : vector<128x128xf32> to vector<128x128xbf16>
    %c128_172 = arith.constant 128 : index
    %c0_173 = arith.constant 0 : index
    %226 = vector.load %arg5[%c128_172, %c0_173] : memref<1152x128xbf16, #tpu.memory_space<vmem>>, vector<128x128xbf16>
    %cst_174 = arith.constant dense<0.000000e+00> : vector<128x128xf32>
    %227 = tpu.matmul %225, %226, %cst_174 {dimension_numbers = #tpu.dot_dimension_numbers<[1], [0], [0], [1], [0, 0, 1, 1], [], []>} : vector<128x128xbf16>, vector<128x128xbf16>, vector<128x128xf32> -> vector<128x128xf32>
    %228 = arith.addf %223, %227 : vector<128x128xf32>
    %c143_175 = arith.constant 143 : index
    %c0_176 = arith.constant 0 : index
    %229 = vector.load %arg8[%c143_175, %c0_176] : memref<448x128xf32, #tpu.memory_space<vmem>>, vector<128x128xf32>
    %230 = arith.truncf %229 : vector<128x128xf32> to vector<128x128xbf16>
    %c256_177 = arith.constant 256 : index
    %c0_178 = arith.constant 0 : index
    %231 = vector.load %arg5[%c256_177, %c0_178] : memref<1152x128xbf16, #tpu.memory_space<vmem>>, vector<128x128xbf16>
    %cst_179 = arith.constant dense<0.000000e+00> : vector<128x128xf32>
    %232 = tpu.matmul %230, %231, %cst_179 {dimension_numbers = #tpu.dot_dimension_numbers<[1], [0], [0], [1], [0, 0, 1, 1], [], []>} : vector<128x128xbf16>, vector<128x128xbf16>, vector<128x128xf32> -> vector<128x128xf32>
    %233 = arith.addf %228, %232 : vector<128x128xf32>
    %c159_180 = arith.constant 159 : index
    %c0_181 = arith.constant 0 : index
    %234 = vector.load %arg8[%c159_180, %c0_181] : memref<448x128xf32, #tpu.memory_space<vmem>>, vector<128x128xf32>
    %235 = arith.truncf %234 : vector<128x128xf32> to vector<128x128xbf16>
    %c384_182 = arith.constant 384 : index
    %c0_183 = arith.constant 0 : index
    %236 = vector.load %arg5[%c384_182, %c0_183] : memref<1152x128xbf16, #tpu.memory_space<vmem>>, vector<128x128xbf16>
    %cst_184 = arith.constant dense<0.000000e+00> : vector<128x128xf32>
    %237 = tpu.matmul %235, %236, %cst_184 {dimension_numbers = #tpu.dot_dimension_numbers<[1], [0], [0], [1], [0, 0, 1, 1], [], []>} : vector<128x128xbf16>, vector<128x128xbf16>, vector<128x128xf32> -> vector<128x128xf32>
    %238 = arith.addf %233, %237 : vector<128x128xf32>
    %c160_185 = arith.constant 160 : index
    %c0_186 = arith.constant 0 : index
    %239 = vector.load %arg8[%c160_185, %c0_186] : memref<448x128xf32, #tpu.memory_space<vmem>>, vector<128x128xf32>
    %240 = arith.truncf %239 : vector<128x128xf32> to vector<128x128xbf16>
    %c512_187 = arith.constant 512 : index
    %c0_188 = arith.constant 0 : index
    %241 = vector.load %arg5[%c512_187, %c0_188] : memref<1152x128xbf16, #tpu.memory_space<vmem>>, vector<128x128xbf16>
    %cst_189 = arith.constant dense<0.000000e+00> : vector<128x128xf32>
    %242 = tpu.matmul %240, %241, %cst_189 {dimension_numbers = #tpu.dot_dimension_numbers<[1], [0], [0], [1], [0, 0, 1, 1], [], []>} : vector<128x128xbf16>, vector<128x128xbf16>, vector<128x128xf32> -> vector<128x128xf32>
    %243 = arith.addf %238, %242 : vector<128x128xf32>
    %c161_190 = arith.constant 161 : index
    %c0_191 = arith.constant 0 : index
    %244 = vector.load %arg8[%c161_190, %c0_191] : memref<448x128xf32, #tpu.memory_space<vmem>>, vector<128x128xf32>
    %245 = arith.truncf %244 : vector<128x128xf32> to vector<128x128xbf16>
    %c640_192 = arith.constant 640 : index
    %c0_193 = arith.constant 0 : index
    %246 = vector.load %arg5[%c640_192, %c0_193] : memref<1152x128xbf16, #tpu.memory_space<vmem>>, vector<128x128xbf16>
    %cst_194 = arith.constant dense<0.000000e+00> : vector<128x128xf32>
    %247 = tpu.matmul %245, %246, %cst_194 {dimension_numbers = #tpu.dot_dimension_numbers<[1], [0], [0], [1], [0, 0, 1, 1], [], []>} : vector<128x128xbf16>, vector<128x128xbf16>, vector<128x128xf32> -> vector<128x128xf32>
    %248 = arith.addf %243, %247 : vector<128x128xf32>
    %c177_195 = arith.constant 177 : index
    %c0_196 = arith.constant 0 : index
    %249 = vector.load %arg8[%c177_195, %c0_196] : memref<448x128xf32, #tpu.memory_space<vmem>>, vector<128x128xf32>
    %250 = arith.truncf %249 : vector<128x128xf32> to vector<128x128xbf16>
    %c768_197 = arith.constant 768 : index
    %c0_198 = arith.constant 0 : index
    %251 = vector.load %arg5[%c768_197, %c0_198] : memref<1152x128xbf16, #tpu.memory_space<vmem>>, vector<128x128xbf16>
    %cst_199 = arith.constant dense<0.000000e+00> : vector<128x128xf32>
    %252 = tpu.matmul %250, %251, %cst_199 {dimension_numbers = #tpu.dot_dimension_numbers<[1], [0], [0], [1], [0, 0, 1, 1], [], []>} : vector<128x128xbf16>, vector<128x128xbf16>, vector<128x128xf32> -> vector<128x128xf32>
    %253 = arith.addf %248, %252 : vector<128x128xf32>
    %c178_200 = arith.constant 178 : index
    %c0_201 = arith.constant 0 : index
    %254 = vector.load %arg8[%c178_200, %c0_201] : memref<448x128xf32, #tpu.memory_space<vmem>>, vector<128x128xf32>
    %255 = arith.truncf %254 : vector<128x128xf32> to vector<128x128xbf16>
    %c896_202 = arith.constant 896 : index
    %c0_203 = arith.constant 0 : index
    %256 = vector.load %arg5[%c896_202, %c0_203] : memref<1152x128xbf16, #tpu.memory_space<vmem>>, vector<128x128xbf16>
    %cst_204 = arith.constant dense<0.000000e+00> : vector<128x128xf32>
    %257 = tpu.matmul %255, %256, %cst_204 {dimension_numbers = #tpu.dot_dimension_numbers<[1], [0], [0], [1], [0, 0, 1, 1], [], []>} : vector<128x128xbf16>, vector<128x128xbf16>, vector<128x128xf32> -> vector<128x128xf32>
    %258 = arith.addf %253, %257 : vector<128x128xf32>
    %c179_205 = arith.constant 179 : index
    %c0_206 = arith.constant 0 : index
    %259 = vector.load %arg8[%c179_205, %c0_206] : memref<448x128xf32, #tpu.memory_space<vmem>>, vector<128x128xf32>
    %260 = arith.truncf %259 : vector<128x128xf32> to vector<128x128xbf16>
    %c1024_207 = arith.constant 1024 : index
    %c0_208 = arith.constant 0 : index
    %261 = vector.load %arg5[%c1024_207, %c0_208] : memref<1152x128xbf16, #tpu.memory_space<vmem>>, vector<128x128xbf16>
    %cst_209 = arith.constant dense<0.000000e+00> : vector<128x128xf32>
    %262 = tpu.matmul %260, %261, %cst_209 {dimension_numbers = #tpu.dot_dimension_numbers<[1], [0], [0], [1], [0, 0, 1, 1], [], []>} : vector<128x128xbf16>, vector<128x128xbf16>, vector<128x128xf32> -> vector<128x128xf32>
    %263 = arith.addf %258, %262 : vector<128x128xf32>
    %cst_210 = arith.constant 0.000000e+00 : f32
    %264 = vector.broadcast %cst_210 : f32 to vector<128x128xf32>
    %265 = arith.maximumf %263, %264 : vector<128x128xf32>
    %c128_211 = arith.constant 128 : index
    %c0_212 = arith.constant 0 : index
    %266 = vector.load %arg7[%c128_211, %c0_212] : memref<384x128xf32, #tpu.memory_space<vmem>>, vector<128x128xf32>
    tpu.vector_store %arg7[%c128_211, %c0_212], %265 {strides = array<i32>} : memref<384x128xf32, #tpu.memory_space<vmem>>, vector<128x128xf32>,
    %267 = vector.shape_cast %166 : vector<1x128xf32> to vector<1x128xf32>
    %268 = vector.broadcast %267 : vector<1x128xf32> to vector<128x128xf32>
    %c269_213 = arith.constant 269 : index
    %c0_214 = arith.constant 0 : index
    %269 = vector.load %arg8[%c269_213, %c0_214] : memref<448x128xf32, #tpu.memory_space<vmem>>, vector<128x128xf32>
    %270 = arith.truncf %269 : vector<128x128xf32> to vector<128x128xbf16>
    %c0_215 = arith.constant 0 : index
    %c0_216 = arith.constant 0 : index
    %271 = vector.load %arg5[%c0_215, %c0_216] : memref<1152x128xbf16, #tpu.memory_space<vmem>>, vector<128x128xbf16>
    %cst_217 = arith.constant dense<0.000000e+00> : vector<128x128xf32>
    %272 = tpu.matmul %270, %271, %cst_217 {dimension_numbers = #tpu.dot_dimension_numbers<[1], [0], [0], [1], [0, 0, 1, 1], [], []>} : vector<128x128xbf16>, vector<128x128xbf16>, vector<128x128xf32> -> vector<128x128xf32>
    %273 = arith.addf %268, %272 : vector<128x128xf32>
    %c270_218 = arith.constant 270 : index
    %c0_219 = arith.constant 0 : index
    %274 = vector.load %arg8[%c270_218, %c0_219] : memref<448x128xf32, #tpu.memory_space<vmem>>, vector<128x128xf32>
    %275 = arith.truncf %274 : vector<128x128xf32> to vector<128x128xbf16>
    %c128_220 = arith.constant 128 : index
    %c0_221 = arith.constant 0 : index
    %276 = vector.load %arg5[%c128_220, %c0_221] : memref<1152x128xbf16, #tpu.memory_space<vmem>>, vector<128x128xbf16>
    %cst_222 = arith.constant dense<0.000000e+00> : vector<128x128xf32>
    %277 = tpu.matmul %275, %276, %cst_222 {dimension_numbers = #tpu.dot_dimension_numbers<[1], [0], [0], [1], [0, 0, 1, 1], [], []>} : vector<128x128xbf16>, vector<128x128xbf16>, vector<128x128xf32> -> vector<128x128xf32>
    %278 = arith.addf %273, %277 : vector<128x128xf32>
    %c271_223 = arith.constant 271 : index
    %c0_224 = arith.constant 0 : index
    %279 = vector.load %arg8[%c271_223, %c0_224] : memref<448x128xf32, #tpu.memory_space<vmem>>, vector<128x128xf32>
    %280 = arith.truncf %279 : vector<128x128xf32> to vector<128x128xbf16>
    %c256_225 = arith.constant 256 : index
    %c0_226 = arith.constant 0 : index
    %281 = vector.load %arg5[%c256_225, %c0_226] : memref<1152x128xbf16, #tpu.memory_space<vmem>>, vector<128x128xbf16>
    %cst_227 = arith.constant dense<0.000000e+00> : vector<128x128xf32>
    %282 = tpu.matmul %280, %281, %cst_227 {dimension_numbers = #tpu.dot_dimension_numbers<[1], [0], [0], [1], [0, 0, 1, 1], [], []>} : vector<128x128xbf16>, vector<128x128xbf16>, vector<128x128xf32> -> vector<128x128xf32>
    %283 = arith.addf %278, %282 : vector<128x128xf32>
    %c287_228 = arith.constant 287 : index
    %c0_229 = arith.constant 0 : index
    %284 = vector.load %arg8[%c287_228, %c0_229] : memref<448x128xf32, #tpu.memory_space<vmem>>, vector<128x128xf32>
    %285 = arith.truncf %284 : vector<128x128xf32> to vector<128x128xbf16>
    %c384_230 = arith.constant 384 : index
    %c0_231 = arith.constant 0 : index
    %286 = vector.load %arg5[%c384_230, %c0_231] : memref<1152x128xbf16, #tpu.memory_space<vmem>>, vector<128x128xbf16>
    %cst_232 = arith.constant dense<0.000000e+00> : vector<128x128xf32>
    %287 = tpu.matmul %285, %286, %cst_232 {dimension_numbers = #tpu.dot_dimension_numbers<[1], [0], [0], [1], [0, 0, 1, 1], [], []>} : vector<128x128xbf16>, vector<128x128xbf16>, vector<128x128xf32> -> vector<128x128xf32>
    %288 = arith.addf %283, %287 : vector<128x128xf32>
    %c288_233 = arith.constant 288 : index
    %c0_234 = arith.constant 0 : index
    %289 = vector.load %arg8[%c288_233, %c0_234] : memref<448x128xf32, #tpu.memory_space<vmem>>, vector<128x128xf32>
    %290 = arith.truncf %289 : vector<128x128xf32> to vector<128x128xbf16>
    %c512_235 = arith.constant 512 : index
    %c0_236 = arith.constant 0 : index
    %291 = vector.load %arg5[%c512_235, %c0_236] : memref<1152x128xbf16, #tpu.memory_space<vmem>>, vector<128x128xbf16>
    %cst_237 = arith.constant dense<0.000000e+00> : vector<128x128xf32>
    %292 = tpu.matmul %290, %291, %cst_237 {dimension_numbers = #tpu.dot_dimension_numbers<[1], [0], [0], [1], [0, 0, 1, 1], [], []>} : vector<128x128xbf16>, vector<128x128xbf16>, vector<128x128xf32> -> vector<128x128xf32>
    %293 = arith.addf %288, %292 : vector<128x128xf32>
    %c289_238 = arith.constant 289 : index
    %c0_239 = arith.constant 0 : index
    %294 = vector.load %arg8[%c289_238, %c0_239] : memref<448x128xf32, #tpu.memory_space<vmem>>, vector<128x128xf32>
    %295 = arith.truncf %294 : vector<128x128xf32> to vector<128x128xbf16>
    %c640_240 = arith.constant 640 : index
    %c0_241 = arith.constant 0 : index
    %296 = vector.load %arg5[%c640_240, %c0_241] : memref<1152x128xbf16, #tpu.memory_space<vmem>>, vector<128x128xbf16>
    %cst_242 = arith.constant dense<0.000000e+00> : vector<128x128xf32>
    %297 = tpu.matmul %295, %296, %cst_242 {dimension_numbers = #tpu.dot_dimension_numbers<[1], [0], [0], [1], [0, 0, 1, 1], [], []>} : vector<128x128xbf16>, vector<128x128xbf16>, vector<128x128xf32> -> vector<128x128xf32>
    %298 = arith.addf %293, %297 : vector<128x128xf32>
    %c305_243 = arith.constant 305 : index
    %c0_244 = arith.constant 0 : index
    %299 = vector.load %arg8[%c305_243, %c0_244] : memref<448x128xf32, #tpu.memory_space<vmem>>, vector<128x128xf32>
    %300 = arith.truncf %299 : vector<128x128xf32> to vector<128x128xbf16>
    %c768_245 = arith.constant 768 : index
    %c0_246 = arith.constant 0 : index
    %301 = vector.load %arg5[%c768_245, %c0_246] : memref<1152x128xbf16, #tpu.memory_space<vmem>>, vector<128x128xbf16>
    %cst_247 = arith.constant dense<0.000000e+00> : vector<128x128xf32>
    %302 = tpu.matmul %300, %301, %cst_247 {dimension_numbers = #tpu.dot_dimension_numbers<[1], [0], [0], [1], [0, 0, 1, 1], [], []>} : vector<128x128xbf16>, vector<128x128xbf16>, vector<128x128xf32> -> vector<128x128xf32>
    %303 = arith.addf %298, %302 : vector<128x128xf32>
    %c306_248 = arith.constant 306 : index
    %c0_249 = arith.constant 0 : index
    %304 = vector.load %arg8[%c306_248, %c0_249] : memref<448x128xf32, #tpu.memory_space<vmem>>, vector<128x128xf32>
    %305 = arith.truncf %304 : vector<128x128xf32> to vector<128x128xbf16>
    %c896_250 = arith.constant 896 : index
    %c0_251 = arith.constant 0 : index
    %306 = vector.load %arg5[%c896_250, %c0_251] : memref<1152x128xbf16, #tpu.memory_space<vmem>>, vector<128x128xbf16>
    %cst_252 = arith.constant dense<0.000000e+00> : vector<128x128xf32>
    %307 = tpu.matmul %305, %306, %cst_252 {dimension_numbers = #tpu.dot_dimension_numbers<[1], [0], [0], [1], [0, 0, 1, 1], [], []>} : vector<128x128xbf16>, vector<128x128xbf16>, vector<128x128xf32> -> vector<128x128xf32>
    %308 = arith.addf %303, %307 : vector<128x128xf32>
    %c307_253 = arith.constant 307 : index
    %c0_254 = arith.constant 0 : index
    %309 = vector.load %arg8[%c307_253, %c0_254] : memref<448x128xf32, #tpu.memory_space<vmem>>, vector<128x128xf32>
    %310 = arith.truncf %309 : vector<128x128xf32> to vector<128x128xbf16>
    %c1024_255 = arith.constant 1024 : index
    %c0_256 = arith.constant 0 : index
    %311 = vector.load %arg5[%c1024_255, %c0_256] : memref<1152x128xbf16, #tpu.memory_space<vmem>>, vector<128x128xbf16>
    %cst_257 = arith.constant dense<0.000000e+00> : vector<128x128xf32>
    %312 = tpu.matmul %310, %311, %cst_257 {dimension_numbers = #tpu.dot_dimension_numbers<[1], [0], [0], [1], [0, 0, 1, 1], [], []>} : vector<128x128xbf16>, vector<128x128xbf16>, vector<128x128xf32> -> vector<128x128xf32>
    %313 = arith.addf %308, %312 : vector<128x128xf32>
    %cst_258 = arith.constant 0.000000e+00 : f32
    %314 = vector.broadcast %cst_258 : f32 to vector<128x128xf32>
    %315 = arith.maximumf %313, %314 : vector<128x128xf32>
    %c256_259 = arith.constant 256 : index
    %c0_260 = arith.constant 0 : index
    %316 = vector.load %arg7[%c256_259, %c0_260] : memref<384x128xf32, #tpu.memory_space<vmem>>, vector<128x128xf32>
    tpu.vector_store %arg7[%c256_259, %c0_260], %315 {strides = array<i32>} : memref<384x128xf32, #tpu.memory_space<vmem>>, vector<128x128xf32>,
    return
  }
  func.func @transform_0(%arg0: i32) -> (i32, i32) {
    %c0_i32 = arith.constant 0 : i32
    %c0_i32_0 = arith.constant 0 : i32
    %c0_i32_1 = arith.constant 0 : i32
    return %c0_i32, %c0_i32_0 : i32, i32
  }
  func.func @transform_1(%arg0: i32) -> (i32, i32) {
    %c0_i32 = arith.constant 0 : i32
    %c0_i32_0 = arith.constant 0 : i32
    return %arg0, %c0_i32 : i32, i32
  }
  func.func @transform_2(%arg0: i32) -> (i32, i32) {
    %c0_i32 = arith.constant 0 : i32
    %c0_i32_0 = arith.constant 0 : i32
    %c0_i32_1 = arith.constant 0 : i32
    return %c0_i32, %c0_i32_0 : i32, i32
  }
  func.func @transform_3(%arg0: i32) -> (i32, i32) {
    %c0_i32 = arith.constant 0 : i32
    %c0_i32_0 = arith.constant 0 : i32
    %c0_i32_1 = arith.constant 0 : i32
    return %c0_i32, %c0_i32_0 : i32, i32
  }
  func.func @transform_4(%arg0: i32) -> (i32, i32) {
    %c0_i32 = arith.constant 0 : i32
    %c0_i32_0 = arith.constant 0 : i32
    %c0_i32_1 = arith.constant 0 : i32
    return %c0_i32, %c0_i32_0 : i32, i32
  }
  func.func @transform_5(%arg0: i32) -> (i32, i32) {
    %c0_i32 = arith.constant 0 : i32
    %c0_i32_0 = arith.constant 0 : i32
    %c0_i32_1 = arith.constant 0 : i32
    return %c0_i32, %c0_i32_0 : i32, i32
  }
  func.func @transform_6(%arg0: i32) -> (i32, i32) {
    %c0_i32 = arith.constant 0 : i32
    %c0_i32_0 = arith.constant 0 : i32
    return %arg0, %c0_i32 : i32, i32
  }
}

</mosaic_0001>

<bundles_post_ra>
// kernel: tpu_custom_call.1
= control target key start
LH: loop header
LB: loop body
LE: loop exit
PB: predicated region body
PF: predicated region fallthrough
CT: control target
= control target key end

     0   :  { %11 = vsyncpa [#allocation4], 0  ;;  %s17417_s0 = inlined_call_operand.vmem [shape: f32[384,128], index: 0, kind: input, shape index: {}]   ;;  %s17418_s1 = inlined_call_operand.vmem [shape: f32[896,16], index: 1, kind: input, shape index: {}]   ;;  %s17419_s2 = inlined_call_operand.hbm [shape: bf16[144,128], index: 2, kind: input, shape index: {}]   ;;  %s17420_s3 = inlined_call_operand.vmem [shape: f32[1,128], index: 3, kind: input, shape index: {}]   ;;  %s17421_s4 = inlined_call_operand.vmem [shape: bf16[1152,128], index: 4, kind: input, shape index: {}]   ;;  %s17422_s5 = inlined_call_operand.vmem [shape: f32[1,128], index: 5, kind: input, shape index: {}]   ;;  %s17423_s6 = inlined_call_operand.hbm [shape: f32[768,128], index: 6, kind: output, shape index: {}]  }
   0x1   :  { %12 = vsyncpa [#allocation5], 0 }
   0x2   :  { %14 = vsyncpa [#allocation5 + $0x1], 0  ;;  %s13630_s21 = smov 0   ;;  %s13632_s22 = smov 0  }
   0x3   :  { %s13634_s23 = smov 0   ;;  %s13636_s24 = smov 0  }
   0x4 LB: > { %s13651_s25 = sadd.s32 4294967295, %s13587_s24   ;;  %s10698_s26 = sadd.s32 4294967294, %s13587_s24   ;;  %s13587_s24 = sphi %s13636_s24, %s17740_s24   ;;  %s13583_s23 = sphi %s13634_s23, %s17739_s23   ;;  %s13579_s22 = sphi %s13632_s22, %s17738_s22   ;;  %s13575_s21 = sphi %s13630_s21, %s17737_s21  }
   0x5   : > { %s13655_s27 = sadd.s32 1, %s13587_s24   ;;  %s158_s28 = sadd.s32 1, %s13583_s23 }
   0x6   : > { %s155_s29 = ssub.s32 %s13587_s24, %s13655_s27  ;;  %p168_p0 = scmp.ne.s32.totalorder %s13583_s23, %s13579_s22 }
   0x7   : > { %p156_p1 = scmp.eq.s32.totalorder %s155_s29, 0  ;;  %p169_p2 = scmp.eq.s32.totalorder %s13651_s25, 1 }
   0x8   : > { %p174_p3 = scmp.ne.s32.totalorder %s13579_s22, %s13575_s21  ;;  %p175_p4 = scmp.eq.s32.totalorder %s10698_s26, 1 }
   0x9   : > { %s13666_s30 = scalar_select %p156_p1, %s13583_s23, %s158_s28  }
   0xa   : > { %p13668_p5 = por %p169_p2, %p168_p0  ;;  %p13672_p6 = por %p175_p4, %p174_p3 }
   0xb   : > { %p10699_p7 = scmp.ge.s32.totalorder %s13587_s24, 1  ;;  %p182_p8 = scmp.lt.s32.totalorder %s13587_s24, 3 }
   0xc   : > { %s17426_s8 = scalar_select %p13672_p6, 1, 0 }
   0xd   : > { %p13210_p9 = scmp.eq.s32.totalorder %s13651_s25, 0  ;;  %p13679_p10 = pnand %p10699_p7, %p182_p8 }
   0xe   : > { %s13589_s10 = smov [#allocation3]  }
   0xf   : > { %s197_s11 = sshll.u32 %s13589_s10, 4  ;;  %p13202_p11 = pneg %p13679_p10  ;;  %s198_s11 = int_to_ptr.vmem [resolvable:$true] %s197_s11 }
  0x10   : > { %s13508_s12 = scalar_lea.vmem %s198_s11, 1152  ;;  %p13516_p3 = scmp.lt.s32.totalorder %s198_s11, %s198_s11 }
  0x11   : > { %p13203_p12 = pnand %p13210_p9, %p13202_p11  ;;  %p13509_p0 = scmp.ne.s32.totalorder %s198_s11, %s13508_s12 }
  0x12   : > { %p13517_p4 = scmp.lt.s32.totalorder %s13508_s12, %s13508_s12 }
  0x13   : > { %p13499_p13 = pneg %p13203_p12 }
  0x14   : > { %p13518_p6 = por %p13517_p4, %p13516_p3 }
  0x15   : > { %p13511_p1 = pnand %p13509_p0, %p13499_p13 }
  0x17   : > { %p13512_p2 = pneg %p13511_p1 }
  0x19   : > { %p13519_p7 = pnand %p13518_p6, %p13512_p2 }
  0x1b   : > { %13522 = shalt.err (!%p13519_p7)
}
  0x1c   : > { %s13590_s13 = smov 64   ;;  %s13591_s14 = smov 4  }
  0x1d   : > { %13205 = dma.hbm_to_vmem [thread:$0]  (!%p13203_p12), %s17419_s2, 1152, %s198_s11, [#allocation4], %s13590_s13, %s13590_s13, %s13591_s14  }
  0x1e   : > { %231 = sbr.rel (%p13679_p10) target bundleno = 1136 (0x470), region = 44 }
  0x23   : > { %13566 = dma.done.wait (%p13210_p9), [#allocation4], 1152  }
  0x24   : > { %13568 = vsyncadd (%p13210_p9), [#allocation4], 4294966144  ;;  %s261_s17 = smul.u32 56, %s13651_s25  ;;  %v13250_v0 = vld [vmem:[#allocation3] sm:$0xff]   ;;  %v13251_v1 = vld [vmem:[#allocation3 + $0x8] sm:$0xff]   ;;  %vm308_vm0 = vcmask 130048  }
  0x25   : > { %11845 = vmatprep.subr.bf16.mxu0 %v13250_v0  ;;  %11863 = vmatprep.subr.bf16.mxu1 %v13251_v1  ;;  %v13252_v14 = vld [vmem:[#allocation3 + $0x10] sm:$0xff]   ;;  %v13253_v15 = vld [vmem:[#allocation3 + $0x18] sm:$0xff]   ;;  %v13254_v42 = vld [vmem:[#allocation3 + $0x20] sm:$0xff]   ;;  %s11169_s14 = smul.u32 6144, %s13651_s25  ;;  %s13592_s20 = smov [#allocation6]  }
  0x26   : > { %p262_p8 = scmp.lt.s32.totalorder %s261_s17, 111  ;;  %11846 = vmatpush3.bf16.msra.mxu0 %v13250_v0  ;;  %11864 = vmatpush3.bf16.msra.mxu1 %v13251_v1  ;;  %v13255_v44 = vld [vmem:[#allocation3 + $0x28] sm:$0xff]   ;;  %s13527_s28 = sshll.u32 %s13592_s20, 4  ;;  %s13528_s28 = int_to_ptr.vmem [resolvable:$false] %s13527_s28 }
  0x27   : > { %11881 = vmatprep.subr.bf16.mxu0 %v13252_v14  ;;  %11899 = vmatprep.subr.bf16.mxu1 %v13253_v15  ;;  %s13529_s29 = scalar_lea.vmem %s13528_s28, 12288 }
  0x28   : > { %s17742_s17 = smov (!%p262_p8, %s261_s17), 111 }
  0x29   : > { %s10704_s18 = sshll.u32 %s17742_s17, 3 }
  0x2a   : > { %s13700_s26 = scalar_lea.vmem %s17418_s1, %s10704_s18  ;;  %s17369_s18 = scalar_lea.hbm %s17423_s6, %s11169_s14 }
  0x2b   : > { %v276_v2 = vld [vmem:[%s13700_s26 + $0xd] sm:$0xff]  ;;  %v277_v3 = vld [vmem:[%s13700_s26 + $0x15] sm:$0xff]  ;;  %v278_v7 = vld [vmem:[%s13700_s26 + $0x1d] sm:$0xff] }
  0x2c   : > { %v446_v4 = vld [vmem:[%s13700_s26 + $0xe] sm:$0xff]  ;;  %v292_v5 = vpack.c.bf16 %v277_v3, %v276_v2  ;;  %v447_v6 = vld [vmem:[%s13700_s26 + $0x16] sm:$0xff]  ;;  %v279_v8 = vld [vmem:[%s13700_s26 + $0x25] sm:$0xff] }
  0x2d   : > { %v462_v9 = vpack.c.bf16 %v447_v6, %v446_v4  ;;  %v293_v10 = vpack.c.bf16 %v279_v8, %v278_v7  ;;  %v448_v11 = vld [vmem:[%s13700_s26 + $0x1e] sm:$0xff]  ;;  %v449_v12 = vld [vmem:[%s13700_s26 + $0x26] sm:$0xff]  ;;  %v281_v17 = vld [vmem:[%s13700_s26 + $0x35] sm:$0xff] }
  0x2e   : > { %11847 = vmatprep.mubr.msk.bf16.mxu0 %vm308_vm0, %v292_v5  ;;  %v463_v13 = vpack.c.bf16 %v449_v12, %v448_v11  ;;  %v280_v16 = vld [vmem:[%s13700_s26 + $0x2d] sm:$0xff]  ;;  %v451_v19 = vld [vmem:[%s13700_s26 + $0x36] sm:$0xff]  ;;  %v283_v23 = vld [vmem:[%s13700_s26 + $0x45] sm:$0xff] }
  0x2f   : > { %11865 = vmatprep.mubr.msk.bf16.mxu1 %vm308_vm0, %v462_v9  ;;  %11848 = vmatmul.mubr.msk.bf16.vlgmr.msra.gmra.mxu0 %vm308_vm0, %v293_v10  ;;  %v450_v18 = vld [vmem:[%s13700_s26 + $0x2e] sm:$0xff]  ;;  %v294_v20 = vpack.c.bf16 %v281_v17, %v280_v16  ;;  %v282_v22 = vld [vmem:[%s13700_s26 + $0x3d] sm:$0xff]  ;;  %v453_v25 = vld [vmem:[%s13700_s26 + $0x46] sm:$0xff] }
  0x30   : > { %11866 = vmatmul.mubr.msk.bf16.vlgmr.msra.gmra.mxu1 %vm308_vm0, %v463_v13  ;;  %11882 = vmatpush3.bf16.msra.mxu0 %v13252_v14  ;;  %v464_v21 = vpack.c.bf16 %v451_v19, %v450_v18  ;;  %v452_v24 = vld [vmem:[%s13700_s26 + $0x3e] sm:$0xff]  ;;  %v284_v26 = vld [vmem:[%s13700_s26 + $0x4d] sm:$0xff]  ;;  %v285_v27 = vld [vmem:[%s13700_s26 + $0x55] sm:$0xff]  ;;  %v295_v28 = vpack.c.bf16 %v283_v23, %v282_v22 }
  0x31   : > { %11900 = vmatpush3.bf16.msra.mxu1 %v13253_v15  ;;  %11851 = vmatprep.mubr.msk.bf16.mxu0 %vm308_vm0, %v294_v20  ;;  %v454_v29 = vld [vmem:[%s13700_s26 + $0x4e] sm:$0xff]  ;;  %v455_v30 = vld [vmem:[%s13700_s26 + $0x56] sm:$0xff]  ;;  %v465_v31 = vpack.c.bf16 %v453_v25, %v452_v24  ;;  %v296_v32 = vpack.c.bf16 %v285_v27, %v284_v26  ;;  %v287_v35 = vld [vmem:[%s13700_s26 + $0x65] sm:$0xff] }
  0x32   : > { %11869 = vmatprep.mubr.msk.bf16.mxu1 %vm308_vm0, %v464_v21  ;;  %v466_v33 = vpack.c.bf16 %v455_v30, %v454_v29  ;;  %v286_v34 = vld [vmem:[%s13700_s26 + $0x5d] sm:$0xff]  ;;  %v457_v37 = vld [vmem:[%s13700_s26 + $0x66] sm:$0xff]  ;;  %v289_v39 = vld [vmem:[%s13700_s26 + $0x75] sm:$0xff]  ;;  %11917 = vmatprep.subr.bf16.mxu0 %v13254_v42 }
  0x33   : > { %v456_v36 = vld [vmem:[%s13700_s26 + $0x5e] sm:$0xff]  ;;  %v288_v38 = vld [vmem:[%s13700_s26 + $0x6d] sm:$0xff]  ;;  %v459_v41 = vld [vmem:[%s13700_s26 + $0x76] sm:$0xff]  ;;  %v297_v43 = vpack.c.bf16 %v287_v35, %v286_v34  ;;  %11935 = vmatprep.subr.bf16.mxu1 %v13255_v44 }
  0x34   : > { %v458_v40 = vld [vmem:[%s13700_s26 + $0x6e] sm:$0xff]  ;;  %v467_v45 = vpack.c.bf16 %v457_v37, %v456_v36  ;;  %v298_v46 = vpack.c.bf16 %v289_v39, %v288_v38  ;;  %v290_v48 = vld [vmem:[%s13700_s26 + $0x7d] sm:$0xff]  ;;  %v291_v49 = vld [vmem:[%s13700_s26 + $0x85] sm:$0xff] }
  0x35   : > { %v468_v47 = vpack.c.bf16 %v459_v41, %v458_v40  ;;  %v460_v50 = vld [vmem:[%s13700_s26 + $0x7e] sm:$0xff]  ;;  %v461_v51 = vld [vmem:[%s13700_s26 + $0x86] sm:$0xff]  ;;  %v615_v52 = vld [vmem:[%s13700_s26 + $0xf] sm:$0xff]  ;;  %v299_v56 = vpack.c.bf16 %v291_v49, %v290_v48 }
  0x36   : > { %v616_v53 = vld [vmem:[%s13700_s26 + $0x17] sm:$0xff]  ;;  %v784_v54 = vld [vmem:[%s13700_s26 + $0x1f] sm:$0xff]  ;;  %v785_v55 = vld [vmem:[%s13700_s26 + $0x27] sm:$0xff]  ;;  %v469_v57 = vpack.c.bf16 %v461_v51, %v460_v50 }
  0x37   : > { %11852 = vmatmul.mubr.msk.bf16.gmra.mxu0 %vm308_vm0, %v295_v28  ;;  %v631_v58 = vpack.c.bf16 %v616_v53, %v615_v52  ;;  %v800_v59 = vpack.c.bf16 %v785_v55, %v784_v54  ;;  %v786_v60 = vld [vmem:[%s13700_s26 + $0x2f] sm:$0xff]  ;;  %v787_v61 = vld [vmem:[%s13700_s26 + $0x37] sm:$0xff]  ;;  %v788_v62 = vld [vmem:[%s13700_s26 + $0x3f] sm:$0xff] }
  0x38   : > { %11870 = vmatmul.mubr.msk.bf16.gmra.mxu1 %vm308_vm0, %v465_v31  ;;  %11855 = vmatprep.mubr.msk.bf16.mxu0 %vm308_vm0, %v296_v32  ;;  %v789_v63 = vld [vmem:[%s13700_s26 + $0x47] sm:$0xff]  ;;  %v801_v0 = vpack.c.bf16 %v787_v61, %v786_v60  ;;  %v13760_v2 = vld [vmem:[#allocation3 + $0x30] sm:$0xff]   ;;  %v13763_v3 = vld [vmem:[#allocation3 + $0x38] sm:$0xff]  }
  0x39   : > { %11873 = vmatprep.mubr.msk.bf16.mxu1 %vm308_vm0, %v466_v33  ;;  %v802_v1 = vpack.c.bf16 %v789_v63, %v788_v62  ;;  %v790_v4 = vld [vmem:[%s13700_s26 + $0x4f] sm:$0xff]  ;;  %v791_v5 = vld [vmem:[%s13700_s26 + $0x57] sm:$0xff]  ;;  %v792_v6 = vld [vmem:[%s13700_s26 + $0x5f] sm:$0xff] }
  0x3a   : > { %v793_v7 = vld [vmem:[%s13700_s26 + $0x67] sm:$0xff]  ;;  %v803_v8 = vpack.c.bf16 %v791_v5, %v790_v4  ;;  %v794_v10 = vld [vmem:[%s13700_s26 + $0x6f] sm:$0xff]  ;;  %v795_v11 = vld [vmem:[%s13700_s26 + $0x77] sm:$0xff] }
  0x3b   : > { %v804_v9 = vpack.c.bf16 %v793_v7, %v792_v6  ;;  %v796_v12 = vld [vmem:[%s13700_s26 + $0x7f] sm:$0xff]  ;;  %v797_v13 = vld [vmem:[%s13700_s26 + $0x87] sm:$0xff]  ;;  %v805_v14 = vpack.c.bf16 %v795_v11, %v794_v10  ;;  %v798_v16 = vld [vmem:[%s13700_s26 + $0x8f] sm:$0xff] }
  0x3c   : > { %v806_v15 = vpack.c.bf16 %v797_v13, %v796_v12  ;;  %v799_v17 = vld [vmem:[%s13700_s26 + $0x97] sm:$0xff]  ;;  %v953_v18 = vld [vmem:[%s13700_s26 + $0x20] sm:$0xff]  ;;  %v954_v19 = vld [vmem:[%s13700_s26 + $0x28] sm:$0xff] }
  0x3d   : > { %v1122_v20 = vld [vmem:[%s13700_s26 + $0x21] sm:$0xff]  ;;  %v1123_v21 = vld [vmem:[%s13700_s26 + $0x29] sm:$0xff]  ;;  %v13792_v22 = vpack.c.bf16 %v799_v17, %v798_v16  ;;  %v969_v23 = vpack.c.bf16 %v954_v19, %v953_v18  ;;  %v956_v26 = vld [vmem:[%s13700_s26 + $0x38] sm:$0xff] }
  0x3e   : > { %v1138_v24 = vpack.c.bf16 %v1123_v21, %v1122_v20  ;;  %v955_v25 = vld [vmem:[%s13700_s26 + $0x30] sm:$0xff]  ;;  %v1125_v28 = vld [vmem:[%s13700_s26 + $0x39] sm:$0xff]  ;;  %v958_v30 = vld [vmem:[%s13700_s26 + $0x48] sm:$0xff] }
  0x3f   : > { %11856 = vmatmul.mubr.msk.bf16.gmra.mxu0 %vm308_vm0, %v297_v43  ;;  %v1124_v27 = vld [vmem:[%s13700_s26 + $0x31] sm:$0xff]  ;;  %v957_v29 = vld [vmem:[%s13700_s26 + $0x40] sm:$0xff]  ;;  %v970_v31 = vpack.c.bf16 %v956_v26, %v955_v25  ;;  %v1127_v33 = vld [vmem:[%s13700_s26 + $0x49] sm:$0xff] }
  0x40   : > { %11874 = vmatmul.mubr.msk.bf16.gmra.mxu1 %vm308_vm0, %v467_v45  ;;  %11859 = vmatprep.mubr.msk.bf16.mxu0 %vm308_vm0, %v298_v46  ;;  %v1126_v32 = vld [vmem:[%s13700_s26 + $0x41] sm:$0xff]  ;;  %v1139_v34 = vpack.c.bf16 %v1125_v28, %v1124_v27  ;;  %v971_v35 = vpack.c.bf16 %v958_v30, %v957_v29  ;;  %v959_v37 = vld [vmem:[%s13700_s26 + $0x50] sm:$0xff]  ;;  %v960_v38 = vld [vmem:[%s13700_s26 + $0x58] sm:$0xff] }
  0x41   : > { %11877 = vmatprep.mubr.msk.bf16.mxu1 %vm308_vm0, %v468_v47  ;;  %v13807_v36 = vpack.c.bf16 %v1127_v33, %v1126_v32  ;;  %v13811_v39 = vld [vmem:[#allocation3 + $0x40] sm:$0xff]   ;;  %v1128_v41 = vld [vmem:[%s13700_s26 + $0x51] sm:$0xff]  ;;  %v1131_v46 = vld [vmem:[%s13700_s26 + $0x69] sm:$0xff]  ;;  %v972_v47 = vpack.c.bf16 %v960_v38, %v959_v37 }
  0x42   : > { %v13813_v40 = vld [vmem:[#allocation3] sm:$0xff]   ;;  %v963_v51 = vld [vmem:[%s13700_s26 + $0x70] sm:$0xff]  ;;  %v964_v52 = vld [vmem:[%s13700_s26 + $0x78] sm:$0xff] }
  0x43   : > { %v961_v43 = vld [vmem:[%s13700_s26 + $0x60] sm:$0xff]  ;;  %v1132_v53 = vld [vmem:[%s13700_s26 + $0x71] sm:$0xff]  ;;  %v13860_v13 = vld [vmem:[#allocation3 + $0x8] sm:$0xff]  }
  0x44   : > { %v1130_v45 = vld [vmem:[%s13700_s26 + $0x61] sm:$0xff]  ;;  %v1133_v54 = vld [vmem:[%s13700_s26 + $0x79] sm:$0xff]  ;;  %v967_v63 = vld [vmem:[%s13700_s26 + $0x90] sm:$0xff] }
  0x45   : > { %v1142_v50 = vpack.c.bf16 %v1131_v46, %v1130_v45  ;;  %v965_v55 = vld [vmem:[%s13700_s26 + $0x80] sm:$0xff]  ;;  %v1143_v60 = vpack.c.bf16 %v1133_v54, %v1132_v53  ;;  %v1464_v10 = vld [vmem:[%s13700_s26 + $0x52] sm:$0xff]  ;;  %v1467_v17 = vld [vmem:[%s13700_s26 + $0x6a] sm:$0xff] }
  0x46   : > { %v1461_v4 = vld [vmem:[%s13700_s26 + $0x3a] sm:$0xff]  ;;  %v1466_v16 = vld [vmem:[%s13700_s26 + $0x62] sm:$0xff]  ;;  %v1468_v18 = vld [vmem:[%s13700_s26 + $0x72] sm:$0xff] }
  0x47   : > { %11860 = vmatmul.mubr.msk.bf16.gmra.mxu0 %vm308_vm0, %v299_v56  ;;  %v966_v56 = vld [vmem:[%s13700_s26 + $0x88] sm:$0xff]  ;;  %v1465_v11 = vld [vmem:[%s13700_s26 + $0x5a] sm:$0xff]  ;;  %v1479_v20 = vpack.c.bf16 %v1467_v17, %v1466_v16  ;;  %v1472_v25 = vld [vmem:[%s13700_s26 + $0x92] sm:$0xff] }
  0x48   : > { %11878 = vmatmul.mubr.msk.bf16.gmra.mxu1 %vm308_vm0, %v469_v57  ;;  %11883 = vmatprep.mubr.msk.bf16.mxu0 %vm308_vm0, %v631_v58  ;;  %v1134_v57 = vld [vmem:[%s13700_s26 + $0x81] sm:$0xff]  ;;  %v1135_v58 = vld [vmem:[%s13700_s26 + $0x89] sm:$0xff]  ;;  %v975_v61 = vpack.c.bf16 %v966_v56, %v965_v55  ;;  %v1629_v33 = vld [vmem:[%s13700_s26 + $0x33] sm:$0xff] }
  0x49   : > { %11901 = vmatprep.mubr.msk.bf16.mxu1 %vm308_vm0, %v800_v59  ;;  %v1144_v62 = vpack.c.bf16 %v1135_v58, %v1134_v57  ;;  %v1469_v19 = vld [vmem:[%s13700_s26 + $0x7a] sm:$0xff]  ;;  %v1306_v30 = vld [vmem:[%s13700_s26 + $0xa9] sm:$0xff] }
  0x4a   : > { %v1480_v21 = vpack.c.bf16 %v1469_v19, %v1468_v18  ;;  %v1473_v26 = vld [vmem:[%s13700_s26 + $0x9a] sm:$0xff]  ;;  %v1475_v32 = vld [vmem:[%s13700_s26 + $0xaa] sm:$0xff] }
  0x4b   : > { %v1482_v28 = vpack.c.bf16 %v1473_v26, %v1472_v25  ;;  %v1305_v29 = vld [vmem:[%s13700_s26 + $0xa1] sm:$0xff]  ;;  %v1633_v45 = vld [vmem:[%s13700_s26 + $0x53] sm:$0xff]  ;;  %v1636_v54 = vld [vmem:[%s13700_s26 + $0x6b] sm:$0xff] }
  0x4c   : > { %v13897_v37 = vpack.c.bf16 %v1306_v30, %v1305_v29  ;;  %v1634_v46 = vld [vmem:[%s13700_s26 + $0x5b] sm:$0xff]  ;;  %v1635_v53 = vld [vmem:[%s13700_s26 + $0x63] sm:$0xff]  ;;  %v1644_v16 = vld [vmem:[%s13700_s26 + $0xab] sm:$0xff] }
  0x4d   : > { %v13914_v55 = vld [vmem:[#allocation3 + $0x18] sm:$0xff]   ;;  %v13916_v56 = vld [vmem:[#allocation3 + $0x20] sm:$0xff]   ;;  %v2047_v19 = vld [vmem:[%s13700_s26 + $0x8e] sm:$0xff] }
  0x4e   : > { %v1884_v57 = vld [vmem:[%s13700_s26 + $0xbd] sm:$0xff]  ;;  %v1885_v58 = vld [vmem:[%s13700_s26 + $0xc5] sm:$0xff]  ;;  %v2051_v29 = vld [vmem:[%s13700_s26 + $0xae] sm:$0xff] }
  0x4f   : > { %11884 = vmatmul.mubr.msk.bf16.vlgmr.msra.gmra.mxu0 %vm308_vm0, %v800_v59  ;;  %v974_v59 = vpack.c.bf16 %v964_v52, %v963_v51  ;;  %v1647_v51 = vpack.c.bf16 %v1634_v46, %v1633_v45  ;;  %v1892_v17 = vld [vmem:[%s13700_s26 + $0xfd] sm:$0xff]  ;;  %v1893_v18 = vld [vmem:[%s13700_s26 + $0x105] sm:$0xff]  ;;  %v2224_v45 = vld [vmem:[%s13700_s26 + $0xcf] sm:$0xff] }
  0x50   : > { %11902 = vmatmul.mubr.msk.bf16.vlgmr.msra.gmra.mxu1 %vm308_vm0, %v801_v0  ;;  %11918 = vmatpush3.bf16.msra.mxu0 %v13254_v42  ;;  %v1129_v42 = vld [vmem:[%s13700_s26 + $0x59] sm:$0xff]  ;;  %v2050_v26 = vld [vmem:[%s13700_s26 + $0xa6] sm:$0xff] }
  0x51   : > { %11936 = vmatpush3.bf16.msra.mxu1 %v13255_v44  ;;  %11887 = vmatprep.mubr.msk.bf16.mxu0 %vm308_vm0, %v801_v0  ;;  %v962_v44 = vld [vmem:[%s13700_s26 + $0x68] sm:$0xff]  ;;  %v1141_v48 = vpack.c.bf16 %v1129_v42, %v1128_v41  ;;  %v968_v0 = vld [vmem:[%s13700_s26 + $0x98] sm:$0xff] }
  0x52   : > { %11905 = vmatprep.mubr.msk.bf16.mxu1 %vm308_vm0, %v802_v1  ;;  %11953 = vmatprep.subr.bf16.mxu0 %v13760_v2  ;;  %v973_v49 = vpack.c.bf16 %v962_v44, %v961_v43  ;;  %v976_v5 = vpack.c.bf16 %v968_v0, %v967_v63  ;;  %v1631_v41 = vld [vmem:[%s13700_s26 + $0x43] sm:$0xff]  ;;  %v1632_v42 = vld [vmem:[%s13700_s26 + $0x4b] sm:$0xff]  ;;  %v1648_v63 = vpack.c.bf16 %v1636_v54, %v1635_v53  ;;  %v2052_v30 = vld [vmem:[%s13700_s26 + $0xb6] sm:$0xff] }
  0x53   : > { %11971 = vmatprep.subr.bf16.mxu1 %v13763_v3  ;;  %v1880_v43 = vld [vmem:[%s13700_s26 + $0x9d] sm:$0xff]  ;;  %v1881_v44 = vld [vmem:[%s13700_s26 + $0xa5] sm:$0xff]  ;;  %v1897_v0 = vpack.c.bf16 %v1885_v58, %v1884_v57  ;;  %v2228_v57 = vld [vmem:[%s13700_s26 + $0xef] sm:$0xff] }
  0x54   : > { %v2049_v25 = vld [vmem:[%s13700_s26 + $0x9e] sm:$0xff]  ;;  %v2227_v54 = vld [vmem:[%s13700_s26 + $0xe7] sm:$0xff] }
  0x55   : > { %v2225_v46 = vld [vmem:[%s13700_s26 + $0xd7] sm:$0xff]  ;;  %v2226_v53 = vld [vmem:[%s13700_s26 + $0xdf] sm:$0xff] }
  0x56   : > { %v2229_v58 = vld [vmem:[%s13700_s26 + $0xf7] sm:$0xff] }
  0x57   : > { %11888 = vmatmul.mubr.msk.bf16.gmra.mxu0 %vm308_vm0, %v802_v1  ;;  %v1136_v1 = vld [vmem:[%s13700_s26 + $0x91] sm:$0xff] }
  0x58   : > { %11906 = vmatmul.mubr.msk.bf16.gmra.mxu1 %vm308_vm0, %v803_v8  ;;  %11891 = vmatprep.mubr.msk.bf16.mxu0 %vm308_vm0, %v803_v8  ;;  %v1462_v8 = vld [vmem:[%s13700_s26 + $0x42] sm:$0xff] }
  0x59   : > { %11909 = vmatprep.mubr.msk.bf16.mxu1 %vm308_vm0, %v804_v9 }
  0x5f   : > { %11892 = vmatmul.mubr.msk.bf16.gmra.mxu0 %vm308_vm0, %v804_v9  ;;  %v1463_v9 = vld [vmem:[%s13700_s26 + $0x4a] sm:$0xff] }
  0x60   : > { %11910 = vmatmul.mubr.msk.bf16.gmra.mxu1 %vm308_vm0, %v805_v14  ;;  %11895 = vmatprep.mubr.msk.bf16.mxu0 %vm308_vm0, %v805_v14  ;;  %v1477_v12 = vpack.c.bf16 %v1463_v9, %v1462_v8  ;;  %v13862_v14 = vld [vmem:[#allocation3 + $0x10] sm:$0xff]   ;;  %v1642_v8 = vld [vmem:[%s13700_s26 + $0x9b] sm:$0xff] }
  0x61   : > { %11913 = vmatprep.mubr.msk.bf16.mxu1 %vm308_vm0, %v806_v15  ;;  %v1890_v9 = vld [vmem:[%s13700_s26 + $0xed] sm:$0xff] }
  0x67   : > { %11896 = vmatmul.mubr.msk.bf16.gmra.mxu0 %vm308_vm0, %v806_v15  ;;  %v1478_v15 = vpack.c.bf16 %v1465_v11, %v1464_v10  ;;  %v1891_v10 = vld [vmem:[%s13700_s26 + $0xf5] sm:$0xff] }
  0x68   : > { %11914 = vmatmul.mubr.msk.bf16.gmra.mxu1 %vm308_vm0, %v13792_v22  ;;  %11919 = vmatprep.mubr.msk.bf16.mxu0 %vm308_vm0, %v969_v23  ;;  %v1470_v23 = vld [vmem:[%s13700_s26 + $0x82] sm:$0xff] }
  0x69   : > { %11937 = vmatprep.mubr.msk.bf16.mxu1 %vm308_vm0, %v1138_v24  ;;  %v1471_v24 = vld [vmem:[%s13700_s26 + $0x8a] sm:$0xff] }
  0x6a   : > { %v1481_v27 = vpack.c.bf16 %v1471_v24, %v1470_v23  ;;  %v1901_v23 = vpack.c.bf16 %v1893_v18, %v1892_v17  ;;  %v2560_v18 = vld [vmem:[%s13700_s26 + $0xd0] sm:$0xff] }
  0x6f   : > { %11920 = vmatmul.mubr.msk.bf16.vlgmr.msra.gmra.mxu0 %vm308_vm0, %v970_v31  ;;  %v1474_v31 = vld [vmem:[%s13700_s26 + $0xa2] sm:$0xff] }
  0x70   : > { %11938 = vmatmul.mubr.msk.bf16.vlgmr.msra.gmra.mxu1 %vm308_vm0, %v1139_v34  ;;  %11954 = vmatpush3.bf16.msra.mxu0 %v13760_v2  ;;  %v1137_v2 = vld [vmem:[%s13700_s26 + $0x99] sm:$0xff]  ;;  %v1483_v38 = vpack.c.bf16 %v1475_v32, %v1474_v31  ;;  %v2220_v31 = vld [vmem:[%s13700_s26 + $0xaf] sm:$0xff] }
  0x71   : > { %11972 = vmatpush3.bf16.msra.mxu1 %v13763_v3  ;;  %11923 = vmatprep.mubr.msk.bf16.mxu0 %vm308_vm0, %v971_v35  ;;  %v1460_v3 = vld [vmem:[%s13700_s26 + $0x32] sm:$0xff]  ;;  %v1145_v6 = vpack.c.bf16 %v1137_v2, %v1136_v1 }
  0x72   : > { %11941 = vmatprep.mubr.msk.bf16.mxu1 %vm308_vm0, %v13807_v36  ;;  %11989 = vmatprep.subr.bf16.mxu0 %v13811_v39  ;;  %v1476_v7 = vpack.c.bf16 %v1461_v4, %v1460_v3  ;;  %v1878_v35 = vld [vmem:[%s13700_s26 + $0x8d] sm:$0xff]  ;;  %v1639_v3 = vld [vmem:[%s13700_s26 + $0x83] sm:$0xff]  ;;  %v2221_v32 = vld [vmem:[%s13700_s26 + $0xb7] sm:$0xff] }
  0x73   : > { %12007 = vmatprep.subr.bf16.mxu1 %v13813_v40  ;;  %v1640_v4 = vld [vmem:[%s13700_s26 + $0x8b] sm:$0xff] }
  0x74   : > { %v1650_v11 = vpack.c.bf16 %v1640_v4, %v1639_v3  ;;  %v2554_v3 = vld [vmem:[%s13700_s26 + $0xa0] sm:$0xff]  ;;  %v2555_v4 = vld [vmem:[%s13700_s26 + $0xa8] sm:$0xff] }
  0x77   : > { %11924 = vmatmul.mubr.msk.bf16.gmra.mxu0 %vm308_vm0, %v972_v47  ;;  %v1882_v47 = vld [vmem:[%s13700_s26 + $0xad] sm:$0xff] }
  0x78   : > { %11942 = vmatmul.mubr.msk.bf16.gmra.mxu1 %vm308_vm0, %v1141_v48  ;;  %11927 = vmatprep.mubr.msk.bf16.mxu0 %vm308_vm0, %v973_v49  ;;  %v1646_v49 = vpack.c.bf16 %v1632_v42, %v1631_v41  ;;  %v13973_v41 = vld [vmem:[#allocation3 + $0x30] sm:$0xff]   ;;  %v2222_v42 = vld [vmem:[%s13700_s26 + $0xbf] sm:$0xff] }
  0x79   : > { %11945 = vmatprep.mubr.msk.bf16.mxu1 %vm308_vm0, %v1142_v50 }
  0x7f   : > { %11928 = vmatmul.mubr.msk.bf16.gmra.mxu0 %vm308_vm0, %v974_v59  ;;  %v1637_v59 = vld [vmem:[%s13700_s26 + $0x73] sm:$0xff] }
  0x80   : > { %11946 = vmatmul.mubr.msk.bf16.gmra.mxu1 %vm308_vm0, %v1143_v60  ;;  %11931 = vmatprep.mubr.msk.bf16.mxu0 %vm308_vm0, %v975_v61  ;;  %v1886_v61 = vld [vmem:[%s13700_s26 + $0xcd] sm:$0xff] }
  0x81   : > { %11949 = vmatprep.mubr.msk.bf16.mxu1 %vm308_vm0, %v1144_v62 }
  0x87   : > { %11932 = vmatmul.mubr.msk.bf16.gmra.mxu0 %vm308_vm0, %v976_v5  ;;  %v1888_v5 = vld [vmem:[%s13700_s26 + $0xdd] sm:$0xff] }
  0x88   : > { %11950 = vmatmul.mubr.msk.bf16.gmra.mxu1 %vm308_vm0, %v1145_v6  ;;  %11955 = vmatprep.mubr.msk.bf16.mxu0 %vm308_vm0, %v1139_v34  ;;  %v1630_v34 = vld [vmem:[%s13700_s26 + $0x3b] sm:$0xff] }
  0x89   : > { %11973 = vmatprep.mubr.msk.bf16.mxu1 %vm308_vm0, %v1476_v7  ;;  %v1641_v7 = vld [vmem:[%s13700_s26 + $0x93] sm:$0xff] }
  0x8f   : > { %11956 = vmatmul.mubr.msk.bf16.vlgmr.msra.gmra.mxu0 %vm308_vm0, %v13807_v36  ;;  %v1879_v36 = vld [vmem:[%s13700_s26 + $0x95] sm:$0xff] }
  0x90   : > { %11974 = vmatmul.mubr.msk.bf16.vlgmr.msra.gmra.mxu1 %vm308_vm0, %v1477_v12  ;;  %11990 = vmatpush3.bf16.msra.mxu0 %v13811_v39  ;;  %v1645_v39 = vpack.c.bf16 %v1630_v34, %v1629_v33  ;;  %v2064_v33 = vpack.c.bf16 %v2050_v26, %v2049_v25 }
  0x91   : > { %12008 = vmatpush3.bf16.msra.mxu1 %v13813_v40  ;;  %11959 = vmatprep.mubr.msk.bf16.mxu0 %vm308_vm0, %v1141_v48  ;;  %v1894_v40 = vpack.c.bf16 %v1879_v36, %v1878_v35  ;;  %v1883_v48 = vld [vmem:[%s13700_s26 + $0xb5] sm:$0xff]  ;;  %v2065_v35 = vpack.c.bf16 %v2052_v30, %v2051_v29  ;;  %v13967_v36 = vpack.c.bf16 %v2221_v32, %v2220_v31 }
  0x92   : > { %11977 = vmatprep.mubr.msk.bf16.mxu1 %vm308_vm0, %v1478_v15  ;;  %12025 = vmatprep.subr.bf16.mxu0 %v13860_v13  ;;  %v1896_v52 = vpack.c.bf16 %v1883_v48, %v1882_v47  ;;  %v1643_v15 = vld [vmem:[%s13700_s26 + $0xa3] sm:$0xff] }
  0x93   : > { %12043 = vmatprep.subr.bf16.mxu1 %v13862_v14 }
  0x97   : > { %11960 = vmatmul.mubr.msk.bf16.gmra.mxu0 %vm308_vm0, %v1142_v50  ;;  %v1895_v50 = vpack.c.bf16 %v1881_v44, %v1880_v43  ;;  %v2223_v43 = vld [vmem:[%s13700_s26 + $0xc7] sm:$0xff]  ;;  %v2056_v44 = vld [vmem:[%s13700_s26 + $0xd6] sm:$0xff] }
  0x98   : > { %11978 = vmatmul.mubr.msk.bf16.gmra.mxu1 %vm308_vm0, %v1479_v20  ;;  %11963 = vmatprep.mubr.msk.bf16.mxu0 %vm308_vm0, %v1143_v60  ;;  %v1638_v60 = vld [vmem:[%s13700_s26 + $0x7b] sm:$0xff]  ;;  %v2235_v48 = vpack.c.bf16 %v2223_v43, %v2222_v42 }
  0x99   : > { %11981 = vmatprep.mubr.msk.bf16.mxu1 %vm308_vm0, %v1480_v21  ;;  %v1649_v1 = vpack.c.bf16 %v1638_v60, %v1637_v59  ;;  %v2048_v20 = vld [vmem:[%s13700_s26 + $0x96] sm:$0xff]  ;;  %v1652_v21 = vpack.c.bf16 %v1644_v16, %v1643_v15  ;;  %v14005_v60 = vpack.c.bf16 %v2227_v54, %v2226_v53  ;;  %v14039_v15 = vld [vmem:[#allocation3 + $0x40] sm:$0xff]  }
  0x9a   : > { %v2063_v24 = vpack.c.bf16 %v2048_v20, %v2047_v19  ;;  %v2561_v19 = vld [vmem:[%s13700_s26 + $0xd8] sm:$0xff] }
  0x9f   : > { %11964 = vmatmul.mubr.msk.bf16.gmra.mxu0 %vm308_vm0, %v1144_v62  ;;  %v1887_v62 = vld [vmem:[%s13700_s26 + $0xd5] sm:$0xff] }
  0xa0   : > { %11982 = vmatmul.mubr.msk.bf16.gmra.mxu1 %vm308_vm0, %v1481_v27  ;;  %11967 = vmatprep.mubr.msk.bf16.mxu0 %vm308_vm0, %v1145_v6  ;;  %v1898_v2 = vpack.c.bf16 %v1887_v62, %v1886_v61  ;;  %v1889_v6 = vld [vmem:[%s13700_s26 + $0xe5] sm:$0xff]  ;;  %v14007_v62 = vpack.c.bf16 %v2229_v58, %v2228_v57 }
  0xa1   : > { %11985 = vmatprep.mubr.msk.bf16.mxu1 %vm308_vm0, %v1482_v28  ;;  %v1899_v12 = vpack.c.bf16 %v1889_v6, %v1888_v5  ;;  %v2218_v27 = vld [vmem:[%s13700_s26 + $0x9f] sm:$0xff]  ;;  %v2219_v28 = vld [vmem:[%s13700_s26 + $0xa7] sm:$0xff] }
  0xa2   : > { %v2233_v34 = vpack.c.bf16 %v2219_v28, %v2218_v27  ;;  %v2563_v28 = vld [vmem:[%s13700_s26 + $0xe8] sm:$0xff] }
  0xa7   : > { %11968 = vmatmul.mubr.msk.bf16.gmra.mxu0 %vm308_vm0, %v13897_v37 }
  0xa8   : > { %11986 = vmatmul.mubr.msk.bf16.gmra.mxu1 %vm308_vm0, %v1483_v38  ;;  %11991 = vmatprep.mubr.msk.bf16.mxu0 %vm308_vm0, %v1645_v39  ;;  %v2053_v38 = vld [vmem:[%s13700_s26 + $0xbe] sm:$0xff]  ;;  %v2054_v39 = vld [vmem:[%s13700_s26 + $0xc6] sm:$0xff] }
  0xa9   : > { %12009 = vmatprep.mubr.msk.bf16.mxu1 %vm308_vm0, %v1894_v40  ;;  %v13971_v40 = vld [vmem:[#allocation3 + $0x28] sm:$0xff]   ;;  %v2066_v47 = vpack.c.bf16 %v2054_v39, %v2053_v38 }
  0xaf   : > { %11992 = vmatmul.mubr.msk.bf16.vlgmr.msra.gmra.mxu0 %vm308_vm0, %v1646_v49 }
  0xb0   : > { %12010 = vmatmul.mubr.msk.bf16.vlgmr.msra.gmra.mxu1 %vm308_vm0, %v1895_v50  ;;  %12026 = vmatpush3.bf16.msra.mxu0 %v13860_v13  ;;  %v1651_v13 = vpack.c.bf16 %v1642_v8, %v1641_v7  ;;  %v13990_v50 = vpack.c.bf16 %v2225_v46, %v2224_v45  ;;  %v2570_v7 = vpack.c.bf16 %v2555_v4, %v2554_v3  ;;  %v2556_v8 = vld [vmem:[%s13700_s26 + $0xb0] sm:$0xff]  ;;  %v2566_v46 = vld [vmem:[%s13700_s26 + $0x100] sm:$0xff] }
  0xb1   : > { %12044 = vmatpush3.bf16.msra.mxu1 %v13862_v14  ;;  %11995 = vmatprep.mubr.msk.bf16.mxu0 %vm308_vm0, %v1647_v51  ;;  %v1900_v14 = vpack.c.bf16 %v1891_v10, %v1890_v9  ;;  %v2057_v51 = vld [vmem:[%s13700_s26 + $0xde] sm:$0xff] }
  0xb2   : > { %12013 = vmatprep.mubr.msk.bf16.mxu1 %vm308_vm0, %v1896_v52  ;;  %12061 = vmatprep.subr.bf16.mxu0 %v13914_v55  ;;  %v2058_v52 = vld [vmem:[%s13700_s26 + $0xe6] sm:$0xff]  ;;  %v2557_v9 = vld [vmem:[%s13700_s26 + $0xb8] sm:$0xff] }
  0xb3   : > { %12079 = vmatprep.subr.bf16.mxu1 %v13916_v56  ;;  %v2068_v59 = vpack.c.bf16 %v2058_v52, %v2057_v51  ;;  %v2558_v10 = vld [vmem:[%s13700_s26 + $0xc0] sm:$0xff] }
  0xb7   : > { %11996 = vmatmul.mubr.msk.bf16.gmra.mxu0 %vm308_vm0, %v1648_v63  ;;  %v2061_v63 = vld [vmem:[%s13700_s26 + $0xfe] sm:$0xff] }
  0xb8   : > { %12014 = vmatmul.mubr.msk.bf16.gmra.mxu1 %vm308_vm0, %v1897_v0  ;;  %11999 = vmatprep.mubr.msk.bf16.mxu0 %vm308_vm0, %v1649_v1  ;;  %v2062_v0 = vld [vmem:[%s13700_s26 + $0x106] sm:$0xff] }
  0xb9   : > { %12017 = vmatprep.mubr.msk.bf16.mxu1 %vm308_vm0, %v1898_v2  ;;  %v2230_v1 = vld [vmem:[%s13700_s26 + $0xff] sm:$0xff]  ;;  %v2231_v2 = vld [vmem:[%s13700_s26 + $0x107] sm:$0xff]  ;;  %v2070_v5 = vpack.c.bf16 %v2062_v0, %v2061_v63  ;;  %v2400_v63 = vld [vmem:[%s13700_s26 + $0x117] sm:$0xff] }
  0xba   : > { %v14021_v6 = vpack.c.bf16 %v2231_v2, %v2230_v1  ;;  %v2568_v1 = vld [vmem:[%s13700_s26 + $0x110] sm:$0xff] }
  0xbf   : > { %12000 = vmatmul.mubr.msk.bf16.gmra.mxu0 %vm308_vm0, %v1650_v11  ;;  %v2559_v11 = vld [vmem:[%s13700_s26 + $0xc8] sm:$0xff] }
  0xc0   : > { %12018 = vmatmul.mubr.msk.bf16.gmra.mxu1 %vm308_vm0, %v1899_v12  ;;  %12003 = vmatprep.mubr.msk.bf16.mxu0 %vm308_vm0, %v1651_v13  ;;  %v14035_v12 = vld [vmem:[%s17420_s3] ss:$0 sm:$0xff]  ;;  %v2571_v13 = vpack.c.bf16 %v2557_v9, %v2556_v8  ;;  %v2572_v16 = vpack.c.bf16 %v2559_v11, %v2558_v10  ;;  %v2892_v8 = vld [vmem:[%s13700_s26 + $0xb1] sm:$0xff] }
  0xc1   : > { %12021 = vmatprep.mubr.msk.bf16.mxu1 %vm308_vm0, %v1900_v14  ;;  %v14037_v14 = vld [vmem:[#allocation3 + $0x38] sm:$0xff]  }
  0xc2   : > { %v2893_v11 = vld [vmem:[%s13700_s26 + $0xb9] sm:$0xff] }
  0xc7   : > { %12004 = vmatmul.mubr.msk.bf16.gmra.mxu0 %vm308_vm0, %v1652_v21 }
  0xc8   : > { %12022 = vmatmul.mubr.msk.bf16.gmra.mxu1 %vm308_vm0, %v1901_v23  ;;  %12027 = vmatprep.mubr.msk.bf16.mxu0 %vm308_vm0, %v2063_v24  ;;  %v2562_v23 = vld [vmem:[%s13700_s26 + $0xe0] sm:$0xff] }
  0xc9   : > { %12045 = vmatprep.mubr.msk.bf16.mxu1 %vm308_vm0, %v13792_v22  ;;  %v2055_v22 = vld [vmem:[%s13700_s26 + $0xce] sm:$0xff] }
  0xca   : > { %v2067_v49 = vpack.c.bf16 %v2056_v44, %v2055_v22  ;;  %v2565_v44 = vld [vmem:[%s13700_s26 + $0xf8] sm:$0xff] }
  0xcf   : > { %12028 = vmatmul.mubr.msk.bf16.vlgmr.msra.gmra.mxu0 %vm308_vm0, %v2064_v33  ;;  %v2573_v33 = vpack.c.bf16 %v2561_v19, %v2560_v18 }
  0xd0   : > { %12046 = vmatmul.mubr.msk.bf16.vlgmr.msra.gmra.mxu1 %vm308_vm0, %v2233_v34  ;;  %12062 = vmatpush3.bf16.msra.mxu0 %v13914_v55  ;;  %v2059_v55 = vld [vmem:[%s13700_s26 + $0xee] sm:$0xff] }
  0xd1   : > { %12080 = vmatpush3.bf16.msra.mxu1 %v13916_v56  ;;  %12031 = vmatprep.mubr.msk.bf16.mxu0 %vm308_vm0, %v2065_v35  ;;  %v2060_v56 = vld [vmem:[%s13700_s26 + $0xf6] sm:$0xff]  ;;  %v2574_v35 = vpack.c.bf16 %v2563_v28, %v2562_v23 }
  0xd2   : > { %12049 = vmatprep.mubr.msk.bf16.mxu1 %vm308_vm0, %v13967_v36  ;;  %12097 = vmatprep.subr.bf16.mxu0 %v13971_v40  ;;  %v2069_v61 = vpack.c.bf16 %v2060_v56, %v2059_v55 }
  0xd3   : > { %12115 = vmatprep.subr.bf16.mxu1 %v13973_v41 }
  0xd7   : > { %12032 = vmatmul.mubr.msk.bf16.gmra.mxu0 %vm308_vm0, %v2066_v47 }
  0xd8   : > { %12050 = vmatmul.mubr.msk.bf16.gmra.mxu1 %vm308_vm0, %v2235_v48  ;;  %12035 = vmatprep.mubr.msk.bf16.mxu0 %vm308_vm0, %v2067_v49 }
  0xd9   : > { %12053 = vmatprep.mubr.msk.bf16.mxu1 %vm308_vm0, %v13990_v50 }
  0xdf   : > { %12036 = vmatmul.mubr.msk.bf16.gmra.mxu0 %vm308_vm0, %v2068_v59 }
  0xe0   : > { %12054 = vmatmul.mubr.msk.bf16.gmra.mxu1 %vm308_vm0, %v14005_v60  ;;  %12039 = vmatprep.mubr.msk.bf16.mxu0 %vm308_vm0, %v2069_v61  ;;  %v2399_v61 = vld [vmem:[%s13700_s26 + $0x10f] sm:$0xff] }
  0xe1   : > { %12057 = vmatprep.mubr.msk.bf16.mxu1 %vm308_vm0, %v14007_v62 }
  0xe7   : > { %12040 = vmatmul.mubr.msk.bf16.gmra.mxu0 %vm308_vm0, %v2070_v5  ;;  %v2569_v5 = vld [vmem:[%s13700_s26 + $0x118] sm:$0xff] }
  0xe8   : > { %12058 = vmatmul.mubr.msk.bf16.gmra.mxu1 %vm308_vm0, %v14021_v6  ;;  %12063 = vmatprep.mubr.msk.bf16.mxu0 %vm308_vm0, %v2233_v34  ;;  %v2577_v19 = vpack.c.bf16 %v2569_v5, %v2568_v1 }
  0xe9   : > { %12081 = vmatprep.mubr.msk.bf16.mxu1 %vm308_vm0, %v2570_v7 }
  0xef   : > { %v11849_v17 = vpop.f32.mrf.mxu0  ;;  %12064 = vmatmul.mubr.msk.bf16.vlgmr.msra.gmra.mxu0 %vm308_vm0, %v13967_v36 }
  0xf0   : > { %v432_v20 = vadd.f32 %v11849_v17, %v14035_v12  ;;  %v11867_v21 = vpop.f32.mrf.mxu1  ;;  %12082 = vmatmul.mubr.msk.bf16.vlgmr.msra.gmra.mxu1 %vm308_vm0, %v2571_v13  ;;  %12098 = vmatpush3.bf16.msra.mxu0 %v13971_v40 }
  0xf1   : > { %v367_v24 = vpop.f32.mrf.mxu0  ;;  %12116 = vmatpush3.bf16.msra.mxu1 %v13973_v41  ;;  %12067 = vmatprep.mubr.msk.bf16.mxu0 %vm308_vm0, %v2235_v48  ;;  %v2564_v41 = vld [vmem:[%s13700_s26 + $0xf0] sm:$0xff] }
  0xf2   : > { %v14051_v25 = vadd.f32 %v11867_v21, %v432_v20  ;;  %v430_v26 = vadd.f32 %v14035_v12, %v367_v24  ;;  %v536_v27 = vpop.f32.mrf.mxu1  ;;  %12085 = vmatprep.mubr.msk.bf16.mxu1 %vm308_vm0, %v2572_v16  ;;  %12133 = vmatprep.subr.bf16.mxu0 %v14037_v14  ;;  %v2575_v55 = vpack.c.bf16 %v2565_v44, %v2564_v41 }
  0xf3   : > { %v11850_v29 = vpop.f32.mrf.mxu0  ;;  %12151 = vmatprep.subr.bf16.mxu1 %v14039_v15  ;;  %v14104_v16 = vpack.c.bf16 %v2400_v63, %v2399_v61  ;;  %v2908_v21 = vpack.c.bf16 %v2893_v11, %v2892_v8  ;;  %v2900_v63 = vld [vmem:[%s13700_s26 + $0xf1] sm:$0xff] }
  0xf4   : > { %v14058_v30 = vadd.f32 %v536_v27, %v430_v26  ;;  %v433_v31 = vadd.f32 %v11850_v29, %v14035_v12  ;;  %v11868_v32 = vpop.f32.mrf.mxu1 }
  0xf5   : > { %v370_v34 = vpop.f32.mrf.mxu0 }
  0xf6   : > { %v14061_v36 = vadd.f32 %v11868_v32, %v433_v31  ;;  %v431_v38 = vadd.f32 %v14035_v12, %v370_v34  ;;  %v539_v39 = vpop.f32.mrf.mxu1  ;;  %v2894_v32 = vld [vmem:[%s13700_s26 + $0xc1] sm:$0xff]  ;;  %v2895_v34 = vld [vmem:[%s13700_s26 + $0xc9] sm:$0xff] }
  0xf7   : > { %v11853_v40 = vpop.f32.mrf.mxu0  ;;  %12068 = vmatmul.mubr.msk.bf16.gmra.mxu0 %vm308_vm0, %v13990_v50  ;;  %v2567_v50 = vld [vmem:[%s13700_s26 + $0x108] sm:$0xff] }
  0xf8   : > { %v14067_v42 = vadd.f32 %v539_v39, %v431_v38  ;;  %v436_v43 = vadd.f32 %v11853_v40, %v14035_v12  ;;  %v11871_v22 = vpop.f32.mrf.mxu1  ;;  %12086 = vmatmul.mubr.msk.bf16.gmra.mxu1 %vm308_vm0, %v2573_v33  ;;  %12071 = vmatprep.mubr.msk.bf16.mxu0 %vm308_vm0, %v14005_v60  ;;  %v2576_v57 = vpack.c.bf16 %v2567_v50, %v2566_v46  ;;  %v2896_v40 = vld [vmem:[%s13700_s26 + $0xd1] sm:$0xff] }
  0xf9   : > { %v383_v45 = vpop.f32.mrf.mxu0  ;;  %12089 = vmatprep.mubr.msk.bf16.mxu1 %vm308_vm0, %v2574_v35 }
  0xfa   : > { %v14076_v47 = vadd.f32 %v11871_v22, %v436_v43  ;;  %v434_v48 = vadd.f32 %v14035_v12, %v383_v45  ;;  %v552_v49 = vpop.f32.mrf.mxu1  ;;  %v2897_v43 = vld [vmem:[%s13700_s26 + $0xd9] sm:$0xff] }
  0xfb   : > { %v11854_v51 = vpop.f32.mrf.mxu0 }
  0xfc   : > { %v14080_v52 = vadd.f32 %v552_v49, %v434_v48  ;;  %v437_v53 = vadd.f32 %v11854_v51, %v14035_v12  ;;  %v11872_v54 = vpop.f32.mrf.mxu1  ;;  %v2910_v51 = vpack.c.bf16 %v2897_v43, %v2896_v40 }
  0xfd   : > { %v386_v56 = vpop.f32.mrf.mxu0 }
  0xfe   : > { %v14083_v58 = vadd.f32 %v11872_v54, %v437_v53  ;;  %v435_v59 = vadd.f32 %v14035_v12, %v386_v56  ;;  %v555_v60 = vpop.f32.mrf.mxu1  ;;  %v14134_v53 = vld [vmem:[#allocation3] sm:$0xff]   ;;  %v14138_v56 = vld [vmem:[#allocation3 + $0x8] sm:$0xff]  }
  0xff   : > { %v11857_v0 = vpop.f32.mrf.mxu0  ;;  %12072 = vmatmul.mubr.msk.bf16.gmra.mxu0 %vm308_vm0, %v14007_v62 }
 0x100   : > { %v14091_v2 = vadd.f32 %v555_v60, %v435_v59  ;;  %v440_v3 = vadd.f32 %v11857_v0, %v14035_v12  ;;  %v11875_v4 = vpop.f32.mrf.mxu1  ;;  %12090 = vmatmul.mubr.msk.bf16.gmra.mxu1 %vm308_vm0, %v2575_v55  ;;  %12075 = vmatprep.mubr.msk.bf16.mxu0 %vm308_vm0, %v14021_v6  ;;  %v2898_v55 = vld [vmem:[%s13700_s26 + $0xe1] sm:$0xff] }
 0x101   : > { %v399_v7 = vpop.f32.mrf.mxu0  ;;  %12093 = vmatprep.mubr.msk.bf16.mxu1 %vm308_vm0, %v2576_v57 }
 0x102   : > { %v14100_v9 = vadd.f32 %v11875_v4, %v440_v3  ;;  %v438_v62 = vadd.f32 %v14035_v12, %v399_v7  ;;  %v568_v10 = vpop.f32.mrf.mxu1 }
 0x103   : > { %v11858_v13 = vpop.f32.mrf.mxu0 }
 0x104   : > { %v14106_v17 = vadd.f32 %v568_v10, %v438_v62  ;;  %v441_v18 = vadd.f32 %v11858_v13, %v14035_v12  ;;  %v11876_v6 = vpop.f32.mrf.mxu1 }
 0x105   : > { %v402_v20 = vpop.f32.mrf.mxu0 }
 0x106   : > { %v14109_v23 = vadd.f32 %v11876_v6, %v441_v18  ;;  %v439_v24 = vadd.f32 %v14035_v12, %v402_v20  ;;  %v571_v26 = vpop.f32.mrf.mxu1  ;;  %v2902_v18 = vld [vmem:[%s13700_s26 + $0x101] sm:$0xff]  ;;  %v2903_v6 = vld [vmem:[%s13700_s26 + $0x109] sm:$0xff] }
 0x107   : > { %v11861_v27 = vpop.f32.mrf.mxu0  ;;  %12076 = vmatmul.mubr.msk.bf16.gmra.mxu0 %vm308_vm0, %v14104_v16 }
 0x108   : > { %v14114_v28 = vadd.f32 %v571_v26, %v439_v24  ;;  %v444_v29 = vadd.f32 %v11861_v27, %v14035_v12  ;;  %v11879_v31 = vpop.f32.mrf.mxu1  ;;  %12094 = vmatmul.mubr.msk.bf16.gmra.mxu1 %vm308_vm0, %v2577_v19  ;;  %12099 = vmatprep.mubr.msk.bf16.mxu0 %vm308_vm0, %v13897_v37  ;;  %v2909_v37 = vpack.c.bf16 %v2895_v34, %v2894_v32  ;;  %v2905_v24 = vld [vmem:[%s13700_s26 + $0x119] sm:$0xff] }
 0x109   : > { %v415_v33 = vpop.f32.mrf.mxu0  ;;  %12117 = vmatprep.mubr.msk.bf16.mxu1 %vm308_vm0, %v2908_v21  ;;  %v2913_v34 = vpack.c.bf16 %v2903_v6, %v2902_v18  ;;  %v3066_v6 = vld [vmem:[%s13700_s26 + $0xda] sm:$0xff] }
 0x10a   : > { %v14123_v35 = vadd.f32 %v11879_v31, %v444_v29  ;;  %v442_v38 = vadd.f32 %v14035_v12, %v415_v33  ;;  %v584_v39 = vpop.f32.mrf.mxu1 }
 0x10b   : > { %v11862_v41 = vpop.f32.mrf.mxu0 }
 0x10c   : > { %v14128_v22 = vadd.f32 %v584_v39, %v442_v38  ;;  %v445_v44 = vadd.f32 %v11862_v41, %v14035_v12  ;;  %v11880_v45 = vpop.f32.mrf.mxu1 }
 0x10d   : > { %v418_v46 = vpop.f32.mrf.mxu0 }
 0x10e   : > { %v14131_v48 = vadd.f32 %v11880_v45, %v445_v44  ;;  %v443_v49 = vadd.f32 %v14035_v12, %v418_v46  ;;  %v587_v50 = vpop.f32.mrf.mxu1  ;;  %v2899_v12 = vld [vmem:[%s13700_s26 + $0xe9] sm:$0xff]  ;;  %v2906_v44 = vld [vmem:[%s13700_s26 + $0x121] sm:$0xff] }
 0x10f   : > { %v11885_v54 = vpop.f32.mrf.mxu0  ;;  %12100 = vmatmul.mubr.msk.bf16.vlgmr.msra.gmra.mxu0 %vm308_vm0, %v2908_v21  ;;  %v2911_v7 = vpack.c.bf16 %v2899_v12, %v2898_v55  ;;  %v2904_v21 = vld [vmem:[%s13700_s26 + $0x111] sm:$0xff]  ;;  %v2907_v45 = vld [vmem:[%s13700_s26 + $0x129] sm:$0xff]  ;;  %v3062_v46 = vld [vmem:[%s13700_s26 + $0xba] sm:$0xff] }
 0x110   : > { %v14140_v57 = vadd.f32 %v587_v50, %v443_v49  ;;  %v770_v59 = vadd.f32 %v11885_v54, %v14051_v25  ;;  %v11903_v60 = vpop.f32.mrf.mxu1  ;;  %12118 = vmatmul.mubr.msk.bf16.vlgmr.msra.gmra.mxu1 %vm308_vm0, %v2909_v37  ;;  %12134 = vmatpush3.bf16.msra.mxu0 %v14037_v14  ;;  %v2901_v25 = vld [vmem:[%s13700_s26 + $0xf9] sm:$0xff]  ;;  %v2914_v39 = vpack.c.bf16 %v2905_v24, %v2904_v21 }
 0x111   : > { %v705_v61 = vpop.f32.mrf.mxu0  ;;  %12152 = vmatpush3.bf16.msra.mxu1 %v14039_v15  ;;  %12103 = vmatprep.mubr.msk.bf16.mxu0 %vm308_vm0, %v2909_v37  ;;  %v2912_v8 = vpack.c.bf16 %v2901_v25, %v2900_v63  ;;  %v3061_v37 = vld [vmem:[%s13700_s26 + $0xb2] sm:$0xff]  ;;  %v3231_v54 = vld [vmem:[%s13700_s26 + $0xbb] sm:$0xff] }
 0x112   : > { %v14149_v0 = vadd.f32 %v11903_v60, %v770_v59  ;;  %v768_v1 = vadd.f32 %v705_v61, %v14058_v30  ;;  %v874_v3 = vpop.f32.mrf.mxu1  ;;  %12121 = vmatprep.mubr.msk.bf16.mxu1 %vm308_vm0, %v2910_v51  ;;  %12169 = vmatprep.subr.bf16.mxu0 %v14134_v53  ;;  %v3235_v21 = vld [vmem:[%s13700_s26 + $0xdb] sm:$0xff] }
 0x113   : > { %v11886_v14 = vpop.f32.mrf.mxu0  ;;  %12187 = vmatprep.subr.bf16.mxu1 %v14138_v56 }
 0x114   : > { %v14156_v4 = vadd.f32 %v874_v3, %v768_v1  ;;  %v771_v15 = vadd.f32 %v11886_v14, %v14061_v36  ;;  %v11904_v5 = vpop.f32.mrf.mxu1  ;;  %v2915_v1 = vpack.c.bf16 %v2907_v45, %v2906_v44  ;;  %v3077_v3 = vpack.c.bf16 %v3062_v46, %v3061_v37  ;;  %v3067_v45 = vld [vmem:[%s13700_s26 + $0xe2] sm:$0xff]  ;;  %v3068_v37 = vld [vmem:[%s13700_s26 + $0xea] sm:$0xff]  ;;  %v14232_v46 = vld [vmem:[#allocation3 + $0x18] sm:$0xff]  }
 0x115   : > { %v708_v30 = vpop.f32.mrf.mxu0 }
 0x116   : > { %v14159_v62 = vadd.f32 %v11904_v5, %v771_v15  ;;  %v769_v10 = vadd.f32 %v708_v30, %v14067_v42  ;;  %v877_v11 = vpop.f32.mrf.mxu1  ;;  %v3064_v30 = vld [vmem:[%s13700_s26 + $0xca] sm:$0xff] }
 0x117   : > { %v11889_v13 = vpop.f32.mrf.mxu0  ;;  %12104 = vmatmul.mubr.msk.bf16.gmra.mxu0 %vm308_vm0, %v2910_v51  ;;  %v3230_v51 = vld [vmem:[%s13700_s26 + $0xb3] sm:$0xff] }
 0x118   : > { %v14165_v19 = vadd.f32 %v877_v11, %v769_v10  ;;  %v774_v36 = vadd.f32 %v11889_v13, %v14076_v47  ;;  %v11907_v20 = vpop.f32.mrf.mxu1  ;;  %12122 = vmatmul.mubr.msk.bf16.gmra.mxu1 %vm308_vm0, %v2911_v7  ;;  %12107 = vmatprep.mubr.msk.bf16.mxu0 %vm308_vm0, %v2911_v7  ;;  %v3246_v14 = vpack.c.bf16 %v3231_v54, %v3230_v51  ;;  %v3063_v7 = vld [vmem:[%s13700_s26 + $0xc2] sm:$0xff]  ;;  %v3233_v10 = vld [vmem:[%s13700_s26 + $0xcb] sm:$0xff]  ;;  %v3070_v54 = vld [vmem:[%s13700_s26 + $0xfa] sm:$0xff] }
 0x119   : > { %v721_v26 = vpop.f32.mrf.mxu0  ;;  %12125 = vmatprep.mubr.msk.bf16.mxu1 %vm308_vm0, %v2912_v8  ;;  %v3069_v51 = vld [vmem:[%s13700_s26 + $0xf2] sm:$0xff] }
 0x11a   : > { %v14173_v42 = vadd.f32 %v11907_v20, %v774_v36  ;;  %v772_v27 = vadd.f32 %v721_v26, %v14080_v52  ;;  %v890_v29 = vpop.f32.mrf.mxu1  ;;  %v3234_v20 = vld [vmem:[%s13700_s26 + $0xd3] sm:$0xff] }
 0x11b   : > { %v11890_v47 = vpop.f32.mrf.mxu0  ;;  %v3248_v44 = vpack.c.bf16 %v3235_v21, %v3234_v20  ;;  %v3243_v20 = vld [vmem:[%s13700_s26 + $0x11b] sm:$0xff] }
 0x11c   : > { %v14176_v31 = vadd.f32 %v890_v29, %v772_v27  ;;  %v775_v32 = vadd.f32 %v11890_v47, %v14083_v58  ;;  %v11908_v33 = vpop.f32.mrf.mxu1  ;;  %v3078_v29 = vpack.c.bf16 %v3064_v30, %v3063_v7  ;;  %v3072_v7 = vld [vmem:[%s13700_s26 + $0x10a] sm:$0xff] }
 0x11d   : > { %v724_v38 = vpop.f32.mrf.mxu0 }
 0x11e   : > { %v14179_v40 = vadd.f32 %v11908_v33, %v775_v32  ;;  %v773_v41 = vadd.f32 %v724_v38, %v14091_v2  ;;  %v893_v43 = vpop.f32.mrf.mxu1 }
 0x11f   : > { %v11893_v52 = vpop.f32.mrf.mxu0  ;;  %12108 = vmatmul.mubr.msk.bf16.gmra.mxu0 %vm308_vm0, %v2912_v8 }
 0x120   : > { %v14187_v49 = vadd.f32 %v893_v43, %v773_v41  ;;  %v778_v58 = vadd.f32 %v11893_v52, %v14100_v9  ;;  %v11911_v50 = vpop.f32.mrf.mxu1  ;;  %12126 = vmatmul.mubr.msk.bf16.gmra.mxu1 %vm308_vm0, %v2913_v34  ;;  %12111 = vmatprep.mubr.msk.bf16.mxu0 %vm308_vm0, %v2913_v34  ;;  %v14225_v41 = vld [vmem:[#allocation3 + $0x10] sm:$0xff]  }
 0x121   : > { %v737_v2 = vpop.f32.mrf.mxu0  ;;  %12129 = vmatprep.mubr.msk.bf16.mxu1 %vm308_vm0, %v2914_v39 }
 0x122   : > { %v14195_v55 = vadd.f32 %v11911_v50, %v778_v58  ;;  %v776_v59 = vadd.f32 %v737_v2, %v14106_v17  ;;  %v906_v60 = vpop.f32.mrf.mxu1  ;;  %v3236_v58 = vld [vmem:[%s13700_s26 + $0xe3] sm:$0xff]  ;;  %v3237_v50 = vld [vmem:[%s13700_s26 + $0xeb] sm:$0xff] }
 0x123   : > { %v11894_v12 = vpop.f32.mrf.mxu0 }
 0x124   : > { %v14198_v9 = vadd.f32 %v906_v60, %v776_v59  ;;  %v779_v61 = vadd.f32 %v11894_v12, %v14109_v23  ;;  %v11912_v63 = vpop.f32.mrf.mxu1  ;;  %v3232_v23 = vld [vmem:[%s13700_s26 + $0xc3] sm:$0xff]  ;;  %v3238_v12 = vld [vmem:[%s13700_s26 + $0xf3] sm:$0xff] }
 0x125   : > { %v740_v25 = vpop.f32.mrf.mxu0  ;;  %v3247_v34 = vpack.c.bf16 %v3233_v10, %v3232_v23  ;;  %v3241_v23 = vld [vmem:[%s13700_s26 + $0x10b] sm:$0xff] }
 0x126   : > { %v14201_v15 = vadd.f32 %v11912_v63, %v779_v61  ;;  %v777_v5 = vadd.f32 %v740_v25, %v14114_v28  ;;  %v909_v17 = vpop.f32.mrf.mxu1  ;;  %v3065_v28 = vld [vmem:[%s13700_s26 + $0xd2] sm:$0xff]  ;;  %v3239_v61 = vld [vmem:[%s13700_s26 + $0xfb] sm:$0xff]  ;;  %v3080_v63 = vpack.c.bf16 %v3068_v37, %v3067_v45 }
 0x127   : > { %v11897_v8 = vpop.f32.mrf.mxu0  ;;  %12112 = vmatmul.mubr.msk.bf16.gmra.mxu0 %vm308_vm0, %v2914_v39  ;;  %v3079_v39 = vpack.c.bf16 %v3066_v6, %v3065_v28  ;;  %v3073_v10 = vld [vmem:[%s13700_s26 + $0x112] sm:$0xff] }
 0x128   : > { %v14209_v11 = vadd.f32 %v909_v17, %v777_v5  ;;  %v782_v13 = vadd.f32 %v11897_v8, %v14123_v35  ;;  %v11915_v18 = vpop.f32.mrf.mxu1  ;;  %12130 = vmatmul.mubr.msk.bf16.gmra.mxu1 %vm308_vm0, %v2915_v1  ;;  %12135 = vmatprep.mubr.msk.bf16.mxu0 %vm308_vm0, %v3077_v3  ;;  %v3249_v1 = vpack.c.bf16 %v3237_v50, %v3236_v58  ;;  %v3071_v17 = vld [vmem:[%s13700_s26 + $0x102] sm:$0xff]  ;;  %v3242_v28 = vld [vmem:[%s13700_s26 + $0x113] sm:$0xff] }
 0x129   : > { %v753_v36 = vpop.f32.mrf.mxu0  ;;  %12153 = vmatprep.mubr.msk.bf16.mxu1 %vm308_vm0, %v3246_v14  ;;  %v3081_v3 = vpack.c.bf16 %v3070_v54, %v3069_v51  ;;  %v3250_v14 = vpack.c.bf16 %v3239_v61, %v3238_v12  ;;  %v3240_v8 = vld [vmem:[%s13700_s26 + $0x103] sm:$0xff]  ;;  %v3479_v45 = vld [vmem:[%s13700_s26 + $0x10d] sm:$0xff]  ;;  %v3480_v37 = vld [vmem:[%s13700_s26 + $0x115] sm:$0xff] }
 0x12a   : > { %17428 = vst [vmem:[#allocation9_spill] sm:$0xff] %v14209_v11  ;;  %v14219_v24 = vadd.f32 %v11915_v18, %v782_v13  ;;  %v780_v26 = vadd.f32 %v753_v36, %v14128_v22  ;;  %v922_v27 = vpop.f32.mrf.mxu1  ;;  %v3074_v13 = vld [vmem:[%s13700_s26 + $0x11a] sm:$0xff]  ;;  %v3648_v50 = vld [vmem:[%s13700_s26 + $0x10e] sm:$0xff] }
 0x12b   : > { %v11898_v35 = vpop.f32.mrf.mxu0  ;;  %v3649_v12 = vld [vmem:[%s13700_s26 + $0x116] sm:$0xff] }
 0x12c   : > { %17429 = vst [vmem:[#allocation10_spill] sm:$0xff] %v14219_v24  ;;  %v14222_v47 = vadd.f32 %v922_v27, %v780_v26  ;;  %v783_v32 = vadd.f32 %v11898_v35, %v14131_v48  ;;  %v11916_v33 = vpop.f32.mrf.mxu1  ;;  %v3082_v26 = vpack.c.bf16 %v3072_v7, %v3071_v17  ;;  %v3251_v35 = vpack.c.bf16 %v3241_v23, %v3240_v8  ;;  %v3481_v23 = vld [vmem:[%s13700_s26 + $0x11d] sm:$0xff] }
 0x12d   : > { %v756_v38 = vpop.f32.mrf.mxu0  ;;  %v3664_v7 = vpack.c.bf16 %v3649_v12, %v3648_v50 }
 0x12e   : > { %17430 = vst [vmem:[#allocation11_spill] sm:$0xff] %v14222_v47  ;;  %v14227_v43 = vadd.f32 %v11916_v33, %v783_v32  ;;  %v781_v22 = vadd.f32 %v756_v38, %v14140_v57  ;;  %v925_v52 = vpop.f32.mrf.mxu1  ;;  %v3252_v33 = vpack.c.bf16 %v3243_v20, %v3242_v28  ;;  %v3075_v38 = vld [vmem:[%s13700_s26 + $0x122] sm:$0xff]  ;;  %v3661_v47 = vld [vmem:[%s13700_s26 + $0x176] sm:$0xff] }
 0x12f   : > { %v14234_v48 = vpop.f32.mrf.mxu0  ;;  %12136 = vmatmul.mubr.msk.bf16.vlgmr.msra.gmra.mxu0 %vm308_vm0, %v3078_v29  ;;  %v3083_v29 = vpack.c.bf16 %v3074_v13, %v3073_v10  ;;  %v3482_v10 = vld [vmem:[%s13700_s26 + $0x125] sm:$0xff] }
 0x130   : > { %17431 = vst [vmem:[#allocation12_spill] sm:$0xff] %v14227_v43  ;;  %v14241_v2 = vadd.f32 %v925_v52, %v781_v22  ;;  %v14243_v59 = vpop.f32.mrf.mxu1  ;;  %12154 = vmatmul.mubr.msk.bf16.vlgmr.msra.gmra.mxu1 %vm308_vm0, %v3247_v34  ;;  %12170 = vmatpush3.bf16.msra.mxu0 %v14134_v53  ;;  %v3244_v52 = vld [vmem:[%s13700_s26 + $0x123] sm:$0xff] }
 0x131   : > { %v14247_v57 = vpop.f32.mrf.mxu0  ;;  %12188 = vmatpush3.bf16.msra.mxu1 %v14138_v56  ;;  %12139 = vmatprep.mubr.msk.bf16.mxu0 %vm308_vm0, %v3079_v39  ;;  %v3076_v39 = vld [vmem:[%s13700_s26 + $0x12a] sm:$0xff]  ;;  %v3650_v28 = vld [vmem:[%s13700_s26 + $0x11e] sm:$0xff] }
 0x132   : > { %17432 = vst [vmem:[#allocation13_spill] sm:$0xff] %v14241_v2  ;;  %v14251_v60 = vpop.f32.mrf.mxu1  ;;  %12157 = vmatprep.mubr.msk.bf16.mxu1 %vm308_vm0, %v3248_v44  ;;  %12205 = vmatprep.subr.bf16.mxu0 %v14225_v41  ;;  %v3245_v44 = vld [vmem:[%s13700_s26 + $0x12b] sm:$0xff] }
 0x133   : > { %v14257_v53 = vpop.f32.mrf.mxu0  ;;  %12223 = vmatprep.subr.bf16.mxu1 %v14232_v46  ;;  %v3651_v20 = vld [vmem:[%s13700_s26 + $0x126] sm:$0xff] }
 0x134   : > { %v14260_v56 = vpop.f32.mrf.mxu1  ;;  %v3665_v50 = vpack.c.bf16 %v3651_v20, %v3650_v28  ;;  %v3485_v28 = vld [vmem:[%s13700_s26 + $0x13d] sm:$0xff]  ;;  %v3486_v20 = vld [vmem:[%s13700_s26 + $0x145] sm:$0xff] }
 0x135   : > { %v14262_v25 = vpop.f32.mrf.mxu0 }
 0x136   : > { %v14264_v5 = vpop.f32.mrf.mxu1 }
 0x137   : > { %v14268_v30 = vpop.f32.mrf.mxu0  ;;  %12140 = vmatmul.mubr.msk.bf16.gmra.mxu0 %vm308_vm0, %v3080_v63  ;;  %v3084_v63 = vpack.c.bf16 %v3076_v39, %v3075_v38  ;;  %v3652_v38 = vld [vmem:[%s13700_s26 + $0x12e] sm:$0xff] }
 0x138   : > { %v14275_v18 = vpop.f32.mrf.mxu1  ;;  %12158 = vmatmul.mubr.msk.bf16.gmra.mxu1 %vm308_vm0, %v3249_v1  ;;  %12143 = vmatprep.mubr.msk.bf16.mxu0 %vm308_vm0, %v3081_v3  ;;  %v3253_v3 = vpack.c.bf16 %v3245_v44, %v3244_v52  ;;  %v3653_v52 = vld [vmem:[%s13700_s26 + $0x136] sm:$0xff] }
 0x139   : > { %v14280_v6 = vpop.f32.mrf.mxu0  ;;  %12161 = vmatprep.mubr.msk.bf16.mxu1 %vm308_vm0, %v3250_v14  ;;  %v3495_v14 = vpack.c.bf16 %v3480_v37, %v3479_v45  ;;  %v3496_v45 = vpack.c.bf16 %v3482_v10, %v3481_v23  ;;  %v14355_v23 = vld [vmem:[#allocation3 + $0x28] sm:$0xff]  }
 0x13a   : > { %v14283_v36 = vpop.f32.mrf.mxu1 }
 0x13b   : > { %v14286_v21 = vpop.f32.mrf.mxu0 }
 0x13c   : > { %v14288_v27 = vpop.f32.mrf.mxu1 }
 0x13d   : > { %v14290_v32 = vpop.f32.mrf.mxu0 }
 0x13e   : > { %v14292_v34 = vpop.f32.mrf.mxu1 }
 0x13f   : > { %v14296_v22 = vpop.f32.mrf.mxu0  ;;  %12144 = vmatmul.mubr.msk.bf16.gmra.mxu0 %vm308_vm0, %v3082_v26 }
 0x140   : > { %v14303_v58 = vpop.f32.mrf.mxu1  ;;  %12162 = vmatmul.mubr.msk.bf16.gmra.mxu1 %vm308_vm0, %v3251_v35  ;;  %12147 = vmatprep.mubr.msk.bf16.mxu0 %vm308_vm0, %v3083_v29  ;;  %v3483_v35 = vld [vmem:[%s13700_s26 + $0x12d] sm:$0xff]  ;;  %v3484_v29 = vld [vmem:[%s13700_s26 + $0x135] sm:$0xff] }
 0x141   : > { %v14308_v51 = vpop.f32.mrf.mxu0  ;;  %12165 = vmatprep.mubr.msk.bf16.mxu1 %vm308_vm0, %v3252_v33 }
 0x142   : > { %v14311_v54 = vpop.f32.mrf.mxu1 }
 0x143   : > { %17433 = vst [vmem:[#allocation14_spill] sm:$0xff] %v14311_v54  ;;  %v14314_v61 = vpop.f32.mrf.mxu0 }
 0x144   : > { %v14316_v1 = vpop.f32.mrf.mxu1 }
 0x145   : > { %17434 = vst [vmem:[#allocation15_spill] sm:$0xff] %v14316_v1  ;;  %v14318_v17 = vpop.f32.mrf.mxu0 }
 0x146   : > { %17435 = vst [vmem:[#allocation16_spill] sm:$0xff] %v14318_v17  ;;  %v14320_v8 = vpop.f32.mrf.mxu1 }
 0x147   : > { %17436 = vst [vmem:[#allocation17_spill] sm:$0xff] %v14320_v8  ;;  %v14324_v13 = vpop.f32.mrf.mxu0  ;;  %12148 = vmatmul.mubr.msk.bf16.gmra.mxu0 %vm308_vm0, %v3084_v63  ;;  %v3497_v63 = vpack.c.bf16 %v3484_v29, %v3483_v35  ;;  %v3654_v35 = vld [vmem:[%s13700_s26 + $0x13e] sm:$0xff] }
 0x148   : > { %17437 = vst [vmem:[#allocation18_spill] sm:$0xff] %v14324_v13  ;;  %v14329_v26 = vpop.f32.mrf.mxu1  ;;  %12166 = vmatmul.mubr.msk.bf16.gmra.mxu1 %vm308_vm0, %v3253_v3  ;;  %12171 = vmatprep.mubr.msk.bf16.mxu0 %vm308_vm0, %v3495_v14  ;;  %v3666_v14 = vpack.c.bf16 %v3653_v52, %v3652_v38  ;;  %v3655_v38 = vld [vmem:[%s13700_s26 + $0x146] sm:$0xff] }
 0x149   : > { %17438 = vst [vmem:[#allocation19_spill] sm:$0xff] %v14329_v26  ;;  %v14335_v33 = vpop.f32.mrf.mxu0  ;;  %12189 = vmatprep.mubr.msk.bf16.mxu1 %vm308_vm0, %v3664_v7  ;;  %v14350_v7 = vld [vmem:[#allocation3 + $0x20] sm:$0xff]   ;;  %v3487_v52 = vld [vmem:[%s13700_s26 + $0x14d] sm:$0xff] }
 0x14a   : > { %17439 = vst [vmem:[#allocation20_spill] sm:$0xff] %v14335_v33  ;;  %v14339_v39 = vpop.f32.mrf.mxu1 }
 0x14b   : > { %17440 = vst [vmem:[#allocation21_spill] sm:$0xff] %v14339_v39  ;;  %v14342_v44 = vpop.f32.mrf.mxu0 }
 0x14c   : > { %17441 = vst [vmem:[#allocation22_spill] sm:$0xff] %v14342_v44  ;;  %v14344_v37 = vpop.f32.mrf.mxu1 }
 0x14d   : > { %17442 = vst [vmem:[#allocation23_spill] sm:$0xff] %v14344_v37  ;;  %v14346_v12 = vpop.f32.mrf.mxu0  ;;  %v3656_v37 = vld [vmem:[%s13700_s26 + $0x14e] sm:$0xff] }
 0x14e   : > { %17443 = vst [vmem:[#allocation24_spill] sm:$0xff] %v14346_v12  ;;  %v14348_v3 = vpop.f32.mrf.mxu1  ;;  %v3498_v12 = vpack.c.bf16 %v3486_v20, %v3485_v28  ;;  %v3489_v20 = vld [vmem:[%s13700_s26 + $0x15d] sm:$0xff] }
 0x14f   : > { %17444 = vst [vmem:[#allocation25_spill] sm:$0xff] %v14348_v3  ;;  %v14352_v2 = vpop.f32.mrf.mxu0  ;;  %12172 = vmatmul.mubr.msk.bf16.vlgmr.msra.gmra.mxu0 %vm308_vm0, %v3496_v45  ;;  %v3488_v45 = vld [vmem:[%s13700_s26 + $0x155] sm:$0xff] }
 0x150   : > { %v14357_v10 = vpop.f32.mrf.mxu1  ;;  %12190 = vmatmul.mubr.msk.bf16.vlgmr.msra.gmra.mxu1 %vm308_vm0, %v3665_v50  ;;  %12206 = vmatpush3.bf16.msra.mxu0 %v14225_v41  ;;  %v3657_v50 = vld [vmem:[%s13700_s26 + $0x156] sm:$0xff]  ;;  %v3499_v39 = vpack.c.bf16 %v3488_v45, %v3487_v52  ;;  %v3491_v45 = vld [vmem:[%s13700_s26 + $0x16d] sm:$0xff] }
 0x151   : > { %v14364_v29 = vpop.f32.mrf.mxu0  ;;  %12224 = vmatpush3.bf16.msra.mxu1 %v14232_v46  ;;  %12175 = vmatprep.mubr.msk.bf16.mxu0 %vm308_vm0, %v3497_v63  ;;  %v3667_v63 = vpack.c.bf16 %v3655_v38, %v3654_v35  ;;  %v3668_v44 = vpack.c.bf16 %v3657_v50, %v3656_v37  ;;  %v3490_v35 = vld [vmem:[%s13700_s26 + $0x165] sm:$0xff]  ;;  %v3492_v50 = vld [vmem:[%s13700_s26 + $0x175] sm:$0xff] }
 0x152   : > { %v14371_v3 = vpop.f32.mrf.mxu1  ;;  %12193 = vmatprep.mubr.msk.bf16.mxu1 %vm308_vm0, %v3666_v14  ;;  %12241 = vmatprep.subr.bf16.mxu0 %v14350_v7  ;;  %v3658_v38 = vld [vmem:[%s13700_s26 + $0x15e] sm:$0xff]  ;;  %v3659_v37 = vld [vmem:[%s13700_s26 + $0x166] sm:$0xff]  ;;  %v3501_v24 = vpack.c.bf16 %v3492_v50, %v3491_v45 }
 0x153   : > { %v14377_v41 = vpop.f32.mrf.mxu0  ;;  %12259 = vmatprep.subr.bf16.mxu1 %v14355_v23  ;;  %v3669_v13 = vpack.c.bf16 %v3659_v37, %v3658_v38  ;;  %v3662_v37 = vld [vmem:[%s13700_s26 + $0x17e] sm:$0xff] }
 0x154   : > { %v14380_v46 = vpop.f32.mrf.mxu1  ;;  %v3986_v50 = vld [vmem:[%s13700_s26 + $0x11f] sm:$0xff] }
 0x155   : > { %v14382_v14 = vpop.f32.mrf.mxu0 }
 0x156   : > { %v14384_v43 = vpop.f32.mrf.mxu1 }
 0x157   : > { %v14386_v26 = vpop.f32.mrf.mxu0  ;;  %12176 = vmatmul.mubr.msk.bf16.gmra.mxu0 %vm308_vm0, %v3498_v12  ;;  %v3660_v12 = vld [vmem:[%s13700_s26 + $0x16e] sm:$0xff] }
 0x158   : > { %v14389_v28 = vpop.f32.mrf.mxu1  ;;  %12194 = vmatmul.mubr.msk.bf16.gmra.mxu1 %vm308_vm0, %v3667_v63  ;;  %12179 = vmatprep.mubr.msk.bf16.mxu0 %vm308_vm0, %v3499_v39  ;;  %v3500_v63 = vpack.c.bf16 %v3490_v35, %v3489_v20  ;;  %v3670_v1 = vpack.c.bf16 %v3661_v47, %v3660_v12  ;;  %v3493_v20 = vld [vmem:[%s13700_s26 + $0x17d] sm:$0xff]  ;;  %v3494_v35 = vld [vmem:[%s13700_s26 + $0x185] sm:$0xff] }
 0x159   : > { %v14396_v52 = vpop.f32.mrf.mxu0  ;;  %12197 = vmatprep.mubr.msk.bf16.mxu1 %vm308_vm0, %v3668_v44  ;;  %v3663_v47 = vld [vmem:[%s13700_s26 + $0x186] sm:$0xff] }
 0x15a   : > { %v14402_v33 = vpop.f32.mrf.mxu1  ;;  %v3987_v12 = vld [vmem:[%s13700_s26 + $0x127] sm:$0xff] }
 0x15b   : > { %v14406_v8 = vpop.f32.mrf.mxu0 }
 0x15c   : > { %v14408_v39 = vpop.f32.mrf.mxu1 }
 0x15d   : > { %17445 = vst [vmem:[#allocation26_spill] sm:$0xff] %v14408_v39  ;;  %v14410_v44 = vpop.f32.mrf.mxu0  ;;  %v1106_v39 = vadd.f32 %v14247_v57, %v14156_v4  ;;  %v3988_v57 = vld [vmem:[%s13700_s26 + $0x12f] sm:$0xff] }
 0x15e   : > { %v14412_v17 = vpop.f32.mrf.mxu1 }
 0x15f   : > { %17446 = vst [vmem:[#allocation27_spill] sm:$0xff] %v14412_v17  ;;  %v14414_v11 = vpop.f32.mrf.mxu0  ;;  %12180 = vmatmul.mubr.msk.bf16.gmra.mxu0 %vm308_vm0, %v3500_v63  ;;  %v3502_v63 = vpack.c.bf16 %v3494_v35, %v3493_v20  ;;  %v3989_v35 = vld [vmem:[%s13700_s26 + $0x137] sm:$0xff] }
 0x160   : > { %17447 = vst [vmem:[#allocation28_spill] sm:$0xff] %v14414_v11  ;;  %v14417_v54 = vpop.f32.mrf.mxu1  ;;  %12198 = vmatmul.mubr.msk.bf16.gmra.mxu1 %vm308_vm0, %v3669_v13  ;;  %12183 = vmatprep.mubr.msk.bf16.mxu0 %vm308_vm0, %v3501_v24  ;;  %v1108_v13 = vadd.f32 %v14234_v48, %v14149_v0  ;;  %v1109_v0 = vadd.f32 %v14257_v53, %v14159_v62 }
 0x161   : > { %17448 = vst [vmem:[#allocation29_spill] sm:$0xff] %v14417_v54  ;;  %v14423_v38 = vpop.f32.mrf.mxu0  ;;  %12201 = vmatprep.mubr.msk.bf16.mxu1 %vm308_vm0, %v3670_v1  ;;  %v3671_v54 = vpack.c.bf16 %v3663_v47, %v3662_v37  ;;  %v4002_v1 = vpack.c.bf16 %v3987_v12, %v3986_v50  ;;  %v1107_v62 = vadd.f32 %v14262_v25, %v14165_v19  ;;  %v3990_v50 = vld [vmem:[%s13700_s26 + $0x13f] sm:$0xff]  ;;  %v3991_v12 = vld [vmem:[%s13700_s26 + $0x147] sm:$0xff] }
 0x162   : > { %17449 = vst [vmem:[#allocation30_spill] sm:$0xff] %v14423_v38  ;;  %v14428_v45 = vpop.f32.mrf.mxu1  ;;  %v1277_v20 = vadd.f32 %v14243_v59, %v1108_v13  ;;  %v1275_v59 = vadd.f32 %v14251_v60, %v1106_v39  ;;  %v1278_v60 = vadd.f32 %v14260_v56, %v1109_v0  ;;  %v14484_v39 = vld [vmem:[%s17417_s0] sm:$0xff]  ;;  %v3993_v13 = vld [vmem:[%s13700_s26 + $0x157] sm:$0xff] }
 0x163   : > { %17450 = vst [vmem:[#allocation31_spill] sm:$0xff] %v14428_v45  ;;  %v14432_v17 = vpop.f32.mrf.mxu0  ;;  %v14496_v56 = vld [vmem:[%s17417_s0 + $0x18] sm:$0xff]  ;;  %vm1830_vm2 = vcmp.ne.f32.partialorder %v14484_v39, 0.0 }
 0x164   : > { %v14436_v24 = vpop.f32.mrf.mxu1  ;;  %v1446_v53 = vadd.f32 %v14352_v2, %v1277_v20  ;;  %v1444_v19 = vadd.f32 %v14364_v29, %v1275_v59  ;;  %v4003_v2 = vpack.c.bf16 %v3989_v35, %v3988_v57  ;;  %v1276_v29 = vadd.f32 %v14264_v5, %v1107_v62  ;;  %v14510_v35 = vld [vmem:[#allocation3 + $0x30] sm:$0xff]  }
 0x165   : > { %v14438_v38 = vpop.f32.mrf.mxu0  ;;  %v1447_v0 = vadd.f32 %v14377_v41, %v1278_v60  ;;  %v1113_v5 = vadd.f32 %v14286_v21, %v14179_v40  ;;  %v14520_v41 = vld [vmem:[%s17417_s0 + $0x30] sm:$0xff]  ;;  %vm1833_vm3 = vcmp.ne.f32.partialorder %v14496_v56, 0.0  ;;  %v3994_v21 = vld [vmem:[%s13700_s26 + $0x15f] sm:$0xff]  ;;  %v1111_v60 = vadd.f32 %v14290_v32, %v14187_v49 }
 0x166   : > { %v14442_v45 = vpop.f32.mrf.mxu1  ;;  %v1615_v20 = vadd.f32 %v14357_v10, %v1446_v53  ;;  %v14524_v53 = vld [vmem:[#allocation3 + $0x38] sm:$0xff]   ;;  %vm1836_vm5 = vcmp.ne.f32.partialorder %v14520_v41, 0.0  ;;  %v14551_v49 = vld [vmem:[%s17417_s0 + $0x20] sm:$0xff]  ;;  %v1116_v32 = vadd.f32 %v14296_v22, %v14195_v55  ;;  %v1114_v22 = vadd.f32 %v14308_v51, %v14198_v9 }
 0x167   : > { %v14444_v11 = vpop.f32.mrf.mxu0  ;;  %12184 = vmatmul.mubr.msk.bf16.gmra.mxu0 %vm308_vm0, %v3502_v63  ;;  %v3992_v63 = vld [vmem:[%s13700_s26 + $0x14f] sm:$0xff]  ;;  %v1280_v55 = vadd.f32 %v14292_v34, %v1111_v60  ;;  %vm1834_vm6 = vcmp.ne.f32.partialorder %v14551_v49, 0.0  ;;  %v14581_v34 = vld [vmem:[%s17417_s0 + $0x38] sm:$0xff]  ;;  %v1117_v51 = vadd.f32 %v14314_v61, %v14201_v15 }
 0x168   : > { %v14450_v48 = vpop.f32.mrf.mxu1  ;;  %12202 = vmatmul.mubr.msk.bf16.gmra.mxu1 %vm308_vm0, %v3671_v54  ;;  %12207 = vmatprep.mubr.msk.bf16.mxu0 %vm308_vm0, %v14104_v16  ;;  %v14469_v16 = vld [vmem:[%s17417_s0 + $0x10] sm:$0xff]  ;;  %v1112_v54 = vadd.f32 %v14268_v30, %v14173_v42  ;;  %v1110_v42 = vadd.f32 %v14280_v6, %v14176_v31  ;;  %v14506_v31 = vld [vmem:[%s17417_s0 + $0x8] sm:$0xff]  ;;  %v14508_v6 = vpack.c.bf16 %v3991_v12, %v3990_v50  ;;  %vm1837_vm7 = vcmp.ne.f32.partialorder %v14581_v34, 0.0 }
 0x169   : > { %v14455_v4 = vpop.f32.mrf.mxu0  ;;  %12225 = vmatprep.mubr.msk.bf16.mxu1 %vm308_vm0, %v4002_v1  ;;  %vm1832_vm1 = vcmp.ne.f32.partialorder %v14469_v16, 0.0  ;;  %v14522_v62 = vpack.c.bf16 %v3993_v13, %v3992_v63  ;;  %vm1831_vm4 = vcmp.ne.f32.partialorder %v14506_v31, 0.0  ;;  %v1285_v9 = vadd.f32 %v14303_v58, %v1116_v32  ;;  %v14599_v15 = vld [vmem:[%s17417_s0 + $0x28] sm:$0xff]  ;;  %v17451_v58 = vld [vmem:[#allocation14_spill] sm:$0xff] }
 0x16a   : > { %v14464_v37 = vpop.f32.mrf.mxu1  ;;  %v1281_v59 = vadd.f32 %v14275_v18, %v1112_v54  ;;  %v1613_v18 = vadd.f32 %v14371_v3, %v1444_v19  ;;  %v1445_v54 = vadd.f32 %v14382_v14, %v1276_v29  ;;  %v1279_v12 = vadd.f32 %v14283_v36, %v1110_v42 }
 0x16b   : > { %v14473_v47 = vpop.f32.mrf.mxu0  ;;  %v1282_v36 = vadd.f32 %v14288_v27, %v1113_v5  ;;  %v3996_v27 = vld [vmem:[%s13700_s26 + $0x16f] sm:$0xff]  ;;  %v1283_v61 = vadd.f32 %v17451_v58, %v1114_v22  ;;  %vm1835_vm8 = vcmp.ne.f32.partialorder %v14599_v15, 0.0 }
 0x16c   : > { %v14479_v25 = vpop.f32.mrf.mxu1  ;;  %v1450_v3 = vadd.f32 %v14386_v26, %v1281_v59  ;;  %v1448_v26 = vadd.f32 %v14396_v52, %v1279_v12  ;;  %v3997_v59 = vld [vmem:[%s13700_s26 + $0x177] sm:$0xff] }
 0x16d   : > { %v14490_v30 = vpop.f32.mrf.mxu0  ;;  %v4007_v39 = vpack.c.bf16 %v3997_v59, %v3996_v27  ;;  %v17459_v59 = vld [vmem:[#allocation30_spill] sm:$0xff] }
 0x16e   : > { %v14501_v57 = vpop.f32.mrf.mxu1  ;;  %v1619_v52 = vadd.f32 %v14389_v28, %v1450_v3  ;;  %v1617_v28 = vadd.f32 %v14402_v33, %v1448_v26  ;;  %v17452_v33 = vld [vmem:[#allocation9_spill] sm:$0xff]  ;;  %v3998_v26 = vld [vmem:[%s13700_s26 + $0x17f] sm:$0xff] }
 0x16f   : > { %v11993_v10 = vpop.f32.mrf.mxu0  ;;  %12208 = vmatmul.mubr.msk.bf16.vlgmr.msra.gmra.mxu0 %vm308_vm0, %v4002_v1  ;;  %v3995_v1 = vld [vmem:[%s13700_s26 + $0x167] sm:$0xff] }
 0x170   : > { %v1784_v50 = vadd.f32 %v11993_v10, %v1615_v20  ;;  %v14528_v40 = vpop.f32.mrf.mxu1  ;;  %12226 = vmatmul.mubr.msk.bf16.vlgmr.msra.gmra.mxu1 %vm308_vm0, %v4003_v2  ;;  %12242 = vmatpush3.bf16.msra.mxu0 %v14350_v7  ;;  %v1616_v7 = vadd.f32 %v14380_v46, %v1447_v0  ;;  %v14558_v46 = vpack.c.bf16 %v3995_v1, %v3994_v21 }
 0x171   : > { %v1719_v19 = vpop.f32.mrf.mxu0  ;;  %12260 = vmatpush3.bf16.msra.mxu1 %v14355_v23  ;;  %12211 = vmatprep.mubr.msk.bf16.mxu0 %vm308_vm0, %v4003_v2  ;;  %v1614_v2 = vadd.f32 %v14384_v43, %v1445_v54  ;;  %v1451_v43 = vadd.f32 %v14406_v8, %v1282_v36 }
 0x172   : > { %v1800_v14 = vmax.f32 %v1784_v50, 0.0  ;;  %v1782_v63 = vadd.f32 %v1719_v19, %v1613_v18  ;;  %v14543_v13 = vpop.f32.mrf.mxu1  ;;  %12229 = vmatprep.mubr.msk.bf16.mxu1 %vm308_vm0, %v14508_v6  ;;  %12277 = vmatprep.subr.bf16.mxu0 %v14510_v35  ;;  %v1449_v50 = vadd.f32 %v14410_v44, %v1280_v55  ;;  %v17453_v44 = vld [vmem:[#allocation16_spill] sm:$0xff]  ;;  %v1452_v55 = vadd.f32 %v17459_v59, %v1283_v61  ;;  %v17469_v59 = vld [vmem:[#allocation21_spill] sm:$0xff] }
 0x173   : > { %v11994_v23 = vpop.f32.mrf.mxu0  ;;  %12295 = vmatprep.subr.bf16.mxu1 %v14524_v53  ;;  %v1115_v56 = vadd.f32 %v17453_v44, %v17452_v33 }
 0x174   : > { %v1848_v42 = vsel %vm1832_vm1, %v1800_v14, 0.0  ;;  %v1798_v29 = vmax.f32 %v1782_v63, 0.0  ;;  %v1785_v20 = vadd.f32 %v11994_v23, %v1616_v7  ;;  %v14564_v0 = vpop.f32.mrf.mxu1  ;;  %v17455_v7 = vld [vmem:[#allocation26_spill] sm:$0xff]  ;;  %v3999_v23 = vld [vmem:[%s13700_s26 + $0x187] sm:$0xff] }
 0x175   : > { %1864 = vst [vmem:[#allocation2 + $0x30] sm:$0xff] %v1848_v42  ;;  %v1722_v5 = vpop.f32.mrf.mxu0  ;;  %v1620_v14 = vadd.f32 %v17455_v7, %v1451_v43  ;;  %v14634_v41 = vpack.c.bf16 %v3999_v23, %v3998_v26  ;;  %v17466_v7 = vld [vmem:[#allocation12_spill] sm:$0xff] }
 0x176   : > { %v1846_v16 = vsel %vm1830_vm2, %v1798_v29, 0.0  ;;  %v1801_v10 = vmax.f32 %v1785_v20, 0.0  ;;  %v1783_v18 = vadd.f32 %v1722_v5, %v1614_v2  ;;  %v14576_v54 = vpop.f32.mrf.mxu1  ;;  %v17456_v2 = vld [vmem:[#allocation15_spill] sm:$0xff]  ;;  %v17457_v29 = vld [vmem:[#allocation10_spill] sm:$0xff] }
 0x177   : > { %1862 = vst [vmem:[#allocation2 + $0x20] sm:$0xff] %v1846_v16  ;;  %v11997_v8 = vpop.f32.mrf.mxu0  ;;  %12212 = vmatmul.mubr.msk.bf16.gmra.mxu0 %vm308_vm0, %v14508_v6  ;;  %v17454_v6 = vld [vmem:[#allocation28_spill] sm:$0xff]  ;;  %v1286_v42 = vadd.f32 %v17456_v2, %v1117_v51  ;;  %v17458_v20 = vld [vmem:[#allocation18_spill] sm:$0xff] }
 0x178   : > { %v1849_v21 = vsel %vm1833_vm3, %v1801_v10, 0.0  ;;  %v1799_v1 = vmax.f32 %v1783_v18, 0.0  ;;  %v1788_v12 = vadd.f32 %v11997_v8, %v1619_v52  ;;  %v14592_v60 = vpop.f32.mrf.mxu1  ;;  %12230 = vmatmul.mubr.msk.bf16.gmra.mxu1 %vm308_vm0, %v14522_v62  ;;  %12215 = vmatprep.mubr.msk.bf16.mxu0 %vm308_vm0, %v14522_v62  ;;  %v1454_v3 = vadd.f32 %v17454_v6, %v1285_v9  ;;  %v17460_v52 = vld [vmem:[#allocation27_spill] sm:$0xff]  ;;  %v1824_v18 = vld [vmem:[%s17417_s0 + $0x50] sm:$0xff]  ;;  %v17461_v9 = vld [vmem:[#allocation17_spill] sm:$0xff] }
 0x179   : > { %1865 = vst [vmem:[#allocation2 + $0x38] sm:$0xff] %v1849_v21  ;;  %v1735_v19 = vpop.f32.mrf.mxu0  ;;  %12233 = vmatprep.mubr.msk.bf16.mxu1 %vm308_vm0, %v14558_v46  ;;  %v1120_v27 = vadd.f32 %v17458_v20, %v17457_v29  ;;  %v1618_v31 = vadd.f32 %v17460_v52, %v1449_v50  ;;  %v1284_v51 = vadd.f32 %v17461_v9, %v1115_v56  ;;  %v17463_v8 = vld [vmem:[#allocation20_spill] sm:$0xff]  ;;  %vm1840_vm9 = vcmp.ne.f32.partialorder %v1824_v18, 0.0  ;;  %v4001_v20 = vld [vmem:[%s13700_s26 + $0x197] sm:$0xff] }
 0x17a   : > { %v1847_v63 = vsel %vm1831_vm4, %v1799_v1, 0.0  ;;  %v1804_v62 = vmax.f32 %v1788_v12, 0.0  ;;  %v1786_v36 = vadd.f32 %v1735_v19, %v1617_v28  ;;  %v14613_v32 = vpop.f32.mrf.mxu1  ;;  %v17462_v28 = vld [vmem:[#allocation11_spill] sm:$0xff]  ;;  %v17464_v1 = vld [vmem:[#allocation29_spill] sm:$0xff]  ;;  %v1455_v58 = vadd.f32 %v14432_v17, %v1286_v42  ;;  %v1822_v56 = vld [vmem:[%s17417_s0 + $0x40] sm:$0xff] }
 0x17b   : > { %1863 = vst [vmem:[#allocation2 + $0x28] sm:$0xff] %v1847_v63  ;;  %v11998_v22 = vpop.f32.mrf.mxu0  ;;  %v1118_v21 = vadd.f32 %v17463_v8, %v17462_v28  ;;  %v1623_v12 = vadd.f32 %v17464_v1, %v1454_v3  ;;  %v17465_v19 = vld [vmem:[#allocation19_spill] sm:$0xff]  ;;  %v1453_v26 = vadd.f32 %v14438_v38, %v1284_v51  ;;  %v17471_v38 = vld [vmem:[#allocation24_spill] sm:$0xff]  ;;  %vm1838_vm10 = vcmp.ne.f32.partialorder %v1822_v56, 0.0  ;;  %v4325_v28 = vld [vmem:[%s13700_s26 + $0x129] sm:$0xff] }
 0x17c   : > { %v1852_v5 = vsel %vm1836_vm5, %v1804_v62, 0.0  ;;  %v1802_v43 = vmax.f32 %v1786_v36, 0.0  ;;  %v1789_v16 = vadd.f32 %v11998_v22, %v1620_v14  ;;  %v14625_v10 = vpop.f32.mrf.mxu1  ;;  %v1289_v3 = vadd.f32 %v17465_v19, %v1120_v27  ;;  %v17467_v14 = vld [vmem:[#allocation22_spill] sm:$0xff]  ;;  %v17468_v62 = vld [vmem:[#allocation31_spill] sm:$0xff]  ;;  %v4155_v27 = vld [vmem:[%s13700_s26 + $0x120] sm:$0xff] }
 0x17d   : > { %1868 = vst [vmem:[#allocation2 + $0x50] sm:$0xff] %v1852_v5  ;;  %v1738_v50 = vpop.f32.mrf.mxu0  ;;  %v1121_v63 = vadd.f32 %v17467_v14, %v17466_v7  ;;  %v1621_v17 = vadd.f32 %v17468_v62, %v1452_v55  ;;  %v14651_v36 = vld [vmem:[%s13700_s26 + $0x18f] sm:$0xff]  ;;  %v1287_v55 = vadd.f32 %v17469_v59, %v1118_v21  ;;  %v1825_v51 = vld [vmem:[%s17417_s0 + $0x58] sm:$0xff] }
 0x17e   : > { %v1850_v61 = vsel %vm1834_vm6, %v1802_v43, 0.0  ;;  %v1805_v33 = vmax.f32 %v1789_v16, 0.0  ;;  %v1787_v44 = vadd.f32 %v1738_v50, %v1618_v31  ;;  %v14639_v6 = vpop.f32.mrf.mxu1  ;;  %v17470_v22 = vld [vmem:[#allocation13_spill] sm:$0xff]  ;;  %v1458_v34 = vadd.f32 %v14444_v11, %v1289_v3  ;;  %v17472_v8 = vld [vmem:[#allocation23_spill] sm:$0xff]  ;;  %v4157_v56 = vld [vmem:[%s13700_s26 + $0x130] sm:$0xff] }
 0x17f   : > { %1866 = vst [vmem:[#allocation2 + $0x40] sm:$0xff] %v1850_v61  ;;  %v12001_v49 = vpop.f32.mrf.mxu0  ;;  %12216 = vmatmul.mubr.msk.bf16.gmra.mxu0 %vm308_vm0, %v14558_v46  ;;  %v4156_v46 = vld [vmem:[%s13700_s26 + $0x128] sm:$0xff]  ;;  %v1119_v52 = vadd.f32 %v17471_v38, %v17470_v22  ;;  %v1290_v21 = vadd.f32 %v17472_v8, %v1121_v63  ;;  %v1456_v1 = vadd.f32 %v14455_v4, %v1287_v55  ;;  %vm1841_vm11 = vcmp.ne.f32.partialorder %v1825_v51, 0.0  ;;  %v4159_v55 = vld [vmem:[%s13700_s26 + $0x140] sm:$0xff] }
 0x180   : > { %v1853_v23 = vsel %vm1837_vm7, %v1805_v33, 0.0  ;;  %v1803_v2 = vmax.f32 %v1787_v44, 0.0  ;;  %v1792_v42 = vadd.f32 %v12001_v49, %v1623_v12  ;;  %v14656_v29 = vpop.f32.mrf.mxu1  ;;  %12234 = vmatmul.mubr.msk.bf16.gmra.mxu1 %vm308_vm0, %v4007_v39  ;;  %12219 = vmatprep.mubr.msk.bf16.mxu0 %vm308_vm0, %v4007_v39  ;;  %v1624_v39 = vadd.f32 %v14436_v24, %v1455_v58  ;;  %v4324_v11 = vld [vmem:[%s13700_s26 + $0x121] sm:$0xff] }
 0x181   : > { %1869 = vst [vmem:[#allocation2 + $0x58] sm:$0xff] %v1853_v23  ;;  %v1751_v31 = vpop.f32.mrf.mxu0  ;;  %12237 = vmatprep.mubr.msk.bf16.mxu1 %vm308_vm0, %v14634_v41  ;;  %v4009_v24 = vpack.c.bf16 %v4001_v20, %v14651_v36  ;;  %v4171_v15 = vpack.c.bf16 %v4156_v46, %v4155_v27  ;;  %v1622_v50 = vadd.f32 %v14442_v45, %v1453_v26  ;;  %v1823_v19 = vld [vmem:[%s17417_s0 + $0x48] sm:$0xff]  ;;  %v1828_v36 = vld [vmem:[%s17417_s0 + $0x70] sm:$0xff]  ;;  %v4327_v46 = vld [vmem:[%s13700_s26 + $0x139] sm:$0xff] }
 0x182   : > { %v1851_v5 = vsel %vm1835_vm8, %v1803_v2, 0.0  ;;  %v1808_v43 = vmax.f32 %v1792_v42, 0.0  ;;  %v1790_v16 = vadd.f32 %v1751_v31, %v1621_v17  ;;  %v14672_v9 = vpop.f32.mrf.mxu1  ;;  %v17473_v3 = vld [vmem:[#allocation25_spill] sm:$0xff]  ;;  %v1627_v4 = vadd.f32 %v14450_v48, %v1458_v34  ;;  %v4326_v27 = vld [vmem:[%s13700_s26 + $0x131] sm:$0xff] }
 0x183   : > { %1867 = vst [vmem:[#allocation2 + $0x48] sm:$0xff] %v1851_v5  ;;  %v12002_v12 = vpop.f32.mrf.mxu0  ;;  %v1288_v7 = vadd.f32 %v17473_v3, %v1119_v52  ;;  %v4340_v63 = vpack.c.bf16 %v4325_v28, %v4324_v11  ;;  %v1459_v45 = vadd.f32 %v14473_v47, %v1290_v21  ;;  %v1625_v48 = vadd.f32 %v14464_v37, %v1456_v1  ;;  %v1826_v47 = vld [vmem:[%s17417_s0 + $0x60] sm:$0xff] }
 0x184   : > { %v1856_v58 = vsel %vm1840_vm9, %v1808_v43, 0.0  ;;  %v1806_v61 = vmax.f32 %v1790_v16, 0.0  ;;  %v1793_v33 = vadd.f32 %v12002_v12, %v1624_v39  ;;  %v14684_v44 = vpop.f32.mrf.mxu1  ;;  %vm1839_vm12 = vcmp.ne.f32.partialorder %v1823_v19, 0.0  ;;  %v4160_v39 = vld [vmem:[%s13700_s26 + $0x148] sm:$0xff] }
 0x185   : > { %1872 = vst [vmem:[#allocation2 + $0x70] sm:$0xff] %v1856_v58  ;;  %v1754_v14 = vpop.f32.mrf.mxu0  ;;  %v1457_v23 = vadd.f32 %v14490_v30, %v1288_v7  ;;  %vm1844_vm13 = vcmp.ne.f32.partialorder %v1828_v36, 0.0  ;;  %v1829_v30 = vld [vmem:[%s17417_s0 + $0x78] sm:$0xff]  ;;  %v1628_v22 = vadd.f32 %v14479_v25, %v1459_v45  ;;  %v4328_v5 = vld [vmem:[%s13700_s26 + $0x141] sm:$0xff]  ;;  %v4329_v43 = vld [vmem:[%s13700_s26 + $0x149] sm:$0xff]  ;;  %vm1842_vm14 = vcmp.ne.f32.partialorder %v1826_v47, 0.0 }
 0x186   : > { %v1854_v18 = vsel %vm1838_vm10, %v1806_v61, 0.0  ;;  %v1809_v62 = vmax.f32 %v1793_v33, 0.0  ;;  %v1791_v17 = vadd.f32 %v1754_v14, %v1622_v50  ;;  %v14693_v49 = vpop.f32.mrf.mxu1  ;;  %v14726_v11 = vpack.c.bf16 %v4327_v46, %v4326_v27  ;;  %v1827_v12 = vld [vmem:[%s17417_s0 + $0x68] sm:$0xff]  ;;  %v14747_v7 = vld [vmem:[#allocation3 + $0x40] sm:$0xff]   ;;  %v4161_v14 = vld [vmem:[%s13700_s26 + $0x150] sm:$0xff] }
 0x187   : > { %1870 = vst [vmem:[#allocation2 + $0x60] sm:$0xff] %v1854_v18  ;;  %v12005_v26 = vpop.f32.mrf.mxu0  ;;  %12220 = vmatmul.mubr.msk.bf16.gmra.mxu0 %vm308_vm0, %v14634_v41  ;;  %v4158_v41 = vld [vmem:[%s13700_s26 + $0x138] sm:$0xff]  ;;  %v1626_v28 = vadd.f32 %v14501_v57, %v1457_v23  ;;  %vm1845_vm15 = vcmp.ne.f32.partialorder %v1829_v30, 0.0  ;;  %v14735_v50 = vpack.c.bf16 %v4329_v43, %v4328_v5  ;;  %v14740_v57 = vld [vmem:[%s17420_s3] ss:$0 sm:$0xff]  ;;  %vm1843_vm1 = vcmp.ne.f32.partialorder %v1827_v12, 0.0 }
 0x188   : > { %v1857_v2 = vsel %vm1841_vm11, %v1809_v62, 0.0  ;;  %v1807_v42 = vmax.f32 %v1791_v17, 0.0  ;;  %v1796_v20 = vadd.f32 %v12005_v26, %v1627_v4  ;;  %v14707_v37 = vpop.f32.mrf.mxu1  ;;  %12238 = vmatmul.mubr.msk.bf16.gmra.mxu1 %vm308_vm0, %v4009_v24  ;;  %12243 = vmatprep.mubr.msk.bf16.mxu0 %vm308_vm0, %v4171_v15  ;;  %v4172_v51 = vpack.c.bf16 %v4158_v41, %v4157_v56  ;;  %v4162_v36 = vld [vmem:[%s13700_s26 + $0x158] sm:$0xff]  ;;  %v4164_v56 = vld [vmem:[%s13700_s26 + $0x168] sm:$0xff] }
 0x189   : > { %1873 = vst [vmem:[#allocation2 + $0x78] sm:$0xff] %v1857_v2  ;;  %v1767_v59 = vpop.f32.mrf.mxu0  ;;  %12261 = vmatprep.mubr.msk.bf16.mxu1 %vm308_vm0, %v4340_v63  ;;  %v4173_v15 = vpack.c.bf16 %v4160_v39, %v4159_v55  ;;  %v2033_v58 = vadd.f32 %v14740_v57, %v14528_v40  ;;  %v14754_v40 = vld [vmem:[%s17421_s4 + $0x38] sm:$0xff]   ;;  %v2031_v63 = vadd.f32 %v14740_v57, %v14543_v13  ;;  %v4163_v13 = vld [vmem:[%s13700_s26 + $0x160] sm:$0xff]  ;;  %v4333_v27 = vld [vmem:[%s13700_s26 + $0x169] sm:$0xff] }
 0x18a   : > { %v1855_v38 = vsel %vm1839_vm12, %v1807_v42, 0.0  ;;  %v1812_v52 = vmax.f32 %v1796_v20, 0.0  ;;  %v1794_v34 = vadd.f32 %v1767_v59, %v1625_v48  ;;  %v14721_v31 = vpop.f32.mrf.mxu1  ;;  %v4330_v48 = vld [vmem:[%s13700_s26 + $0x151] sm:$0xff]  ;;  %v4331_v26 = vld [vmem:[%s13700_s26 + $0x159] sm:$0xff]  ;;  %v2034_v23 = vadd.f32 %v14740_v57, %v14564_v0  ;;  %v4332_v41 = vld [vmem:[%s13700_s26 + $0x161] sm:$0xff] }
 0x18b   : > { %1871 = vst [vmem:[#allocation2 + $0x68] sm:$0xff] %v1855_v38  ;;  %v12006_v16 = vpop.f32.mrf.mxu0  ;;  %v4174_v46 = vpack.c.bf16 %v4162_v36, %v4161_v14  ;;  %v14779_v59 = vpack.c.bf16 %v4331_v26, %v4330_v48  ;;  %v2032_v0 = vadd.f32 %v14740_v57, %v14576_v54  ;;  %v4175_v38 = vpack.c.bf16 %v4164_v56, %v4163_v13  ;;  %v4334_v12 = vld [vmem:[%s13700_s26 + $0x171] sm:$0xff]  ;;  %v4336_v14 = vld [vmem:[%s13700_s26 + $0x181] sm:$0xff] }
 0x18c   : > { %v1860_v8 = vsel %vm1844_vm13, %v1812_v52, 0.0  ;;  %v1810_v25 = vmax.f32 %v1794_v34, 0.0  ;;  %v1797_v21 = vadd.f32 %v12006_v16, %v1628_v22  ;;  %v14730_v1 = vpop.f32.mrf.mxu1  ;;  %v14786_v34 = vpack.c.bf16 %v4333_v27, %v4332_v41 }
 0x18d   : > { %1876 = vst [vmem:[#allocation2 + $0x90] sm:$0xff] %v1860_v8  ;;  %v1770_v24 = vpop.f32.mrf.mxu0  ;;  %v2037_v39 = vadd.f32 %v14740_v57, %v14592_v60  ;;  %v4166_v60 = vld [vmem:[%s13700_s26 + $0x178] sm:$0xff]  ;;  %v2041_v56 = vadd.f32 %v14740_v57, %v14656_v29  ;;  %v4169_v29 = vld [vmem:[%s13700_s26 + $0x190] sm:$0xff] }
 0x18e   : > { %v1858_v61 = vsel %vm1842_vm14, %v1810_v25, 0.0  ;;  %v1813_v33 = vmax.f32 %v1797_v21, 0.0  ;;  %v1795_v19 = vadd.f32 %v1770_v24, %v1626_v28  ;;  %v14745_v3 = vpop.f32.mrf.mxu1  ;;  %v2035_v28 = vadd.f32 %v14740_v57, %v14613_v32  ;;  %v4335_v24 = vld [vmem:[%s13700_s26 + $0x179] sm:$0xff]  ;;  %v4168_v32 = vld [vmem:[%s13700_s26 + $0x188] sm:$0xff] }
 0x18f   : > { %1874 = vst [vmem:[#allocation2 + $0x80] sm:$0xff] %v1858_v61  ;;  %v12029_v4 = vpop.f32.mrf.mxu0  ;;  %12244 = vmatmul.mubr.msk.bf16.vlgmr.msra.gmra.mxu0 %vm308_vm0, %v4172_v51  ;;  %v4165_v51 = vld [vmem:[%s13700_s26 + $0x170] sm:$0xff]  ;;  %v2038_v61 = vadd.f32 %v14740_v57, %v14625_v10 }
 0x190   : > { %v1861_v45 = vsel %vm1845_vm15, %v1813_v33, 0.0  ;;  %v1811_v18 = vmax.f32 %v1795_v19, 0.0  ;;  %v2202_v62 = vadd.f32 %v12029_v4, %v2033_v58  ;;  %v12047_v17 = vpop.f32.mrf.mxu1  ;;  %12262 = vmatmul.mubr.msk.bf16.vlgmr.msra.gmra.mxu1 %vm308_vm0, %v14726_v11  ;;  %12278 = vmatpush3.bf16.msra.mxu0 %v14510_v35  ;;  %v4167_v58 = vld [vmem:[%s13700_s26 + $0x180] sm:$0xff] }
 0x191   : > { %1877 = vst [vmem:[#allocation2 + $0x98] sm:$0xff] %v1861_v45  ;;  %v2137_v47 = vpop.f32.mrf.mxu0  ;;  %12296 = vmatpush3.bf16.msra.mxu1 %v14524_v53  ;;  %12247 = vmatprep.mubr.msk.bf16.mxu0 %vm308_vm0, %v4173_v15 }
 0x192   : > { %v1859_v2 = vsel %vm1843_vm1, %v1811_v18, 0.0  ;;  %v14772_v42 = vadd.f32 %v12047_v17, %v2202_v62  ;;  %v2200_v35 = vadd.f32 %v2137_v47, %v2031_v63  ;;  %v2306_v20 = vpop.f32.mrf.mxu1  ;;  %12265 = vmatprep.mubr.msk.bf16.mxu1 %vm308_vm0, %v14735_v50  ;;  %12313 = vmatprep.subr.bf16.mxu0 %v14747_v7  ;;  %v4337_v63 = vld [vmem:[%s13700_s26 + $0x189] sm:$0xff]  ;;  %v4176_v18 = vpack.c.bf16 %v4166_v60, %v4165_v51 }
 0x193   : > { %1875 = vst [vmem:[#allocation2 + $0x88] sm:$0xff] %v1859_v2  ;;  %v12030_v53 = vpop.f32.mrf.mxu0  ;;  %12331 = vmatprep.subr.bf16.mxu1 %v14754_v40  ;;  %v14814_v62 = vpack.c.bf16 %v4335_v24, %v4334_v12  ;;  %v2036_v17 = vadd.f32 %v14740_v57, %v14639_v6  ;;  %v4177_v47 = vpack.c.bf16 %v4168_v32, %v4167_v58 }
 0x194   : > { %v14784_v30 = vadd.f32 %v2306_v20, %v2200_v35  ;;  %v2203_v55 = vadd.f32 %v12030_v53, %v2034_v23  ;;  %v12048_v22 = vpop.f32.mrf.mxu1  ;;  %v14820_v13 = vpack.c.bf16 %v4337_v63, %v4336_v14  ;;  %v2039_v20 = vadd.f32 %v14740_v57, %v14672_v9 }
 0x195   : > { %v2140_v52 = vpop.f32.mrf.mxu0  ;;  %v2042_v9 = vadd.f32 %v14740_v57, %v14684_v44 }
 0x196   : > { %v14790_v5 = vadd.f32 %v12048_v22, %v2203_v55  ;;  %v2201_v43 = vadd.f32 %v2140_v52, %v2032_v0  ;;  %v2309_v16 = vpop.f32.mrf.mxu1  ;;  %v4338_v55 = vld [vmem:[%s13700_s26 + $0x191] sm:$0xff]  ;;  %v4339_v22 = vld [vmem:[%s13700_s26 + $0x199] sm:$0xff] }
 0x197   : > { %v12033_v54 = vpop.f32.mrf.mxu0  ;;  %12248 = vmatmul.mubr.msk.bf16.gmra.mxu0 %vm308_vm0, %v4174_v46  ;;  %v4170_v46 = vld [vmem:[%s13700_s26 + $0x198] sm:$0xff]  ;;  %v14850_v12 = vpack.c.bf16 %v4339_v22, %v4338_v55 }
 0x198   : > { %v14796_v8 = vadd.f32 %v2309_v16, %v2201_v43  ;;  %v2206_v25 = vadd.f32 %v12033_v54, %v2037_v39  ;;  %v12051_v21 = vpop.f32.mrf.mxu1  ;;  %12266 = vmatmul.mubr.msk.bf16.gmra.mxu1 %vm308_vm0, %v14779_v59  ;;  %12251 = vmatprep.mubr.msk.bf16.mxu0 %vm308_vm0, %v4175_v38  ;;  %v4662_v43 = vld [vmem:[%s13700_s26 + $0x132] sm:$0xff]  ;;  %v4663_v16 = vld [vmem:[%s13700_s26 + $0x13a] sm:$0xff]  ;;  %v4178_v51 = vpack.c.bf16 %v4170_v46, %v4169_v29 }
 0x199   : > { %v2153_v15 = vpop.f32.mrf.mxu0  ;;  %12269 = vmatprep.mubr.msk.bf16.mxu1 %vm308_vm0, %v14786_v34  ;;  %v4678_v44 = vpack.c.bf16 %v4663_v16, %v4662_v43  ;;  %v13278_v46 = vld [vmem:[%s17421_s4 + $0x30] sm:$0xff]   ;;  %v13279_v43 = vld [vmem:[%s17421_s4 + $0x28] sm:$0xff]  }
 0x19a   : > { %v14810_v33 = vadd.f32 %v12051_v21, %v2206_v25  ;;  %v2204_v19 = vadd.f32 %v2153_v15, %v2035_v28  ;;  %v2322_v4 = vpop.f32.mrf.mxu1  ;;  %v2040_v28 = vadd.f32 %v14740_v57, %v14693_v49  ;;  %v2045_v15 = vadd.f32 %v14740_v57, %v14707_v37  ;;  %v4670_v16 = vld [vmem:[%s13700_s26 + $0x172] sm:$0xff] }
 0x19b   : > { %v12034_v45 = vpop.f32.mrf.mxu0  ;;  %v2043_v49 = vadd.f32 %v14740_v57, %v14721_v31 }
 0x19c   : > { %v14818_v36 = vadd.f32 %v2322_v4, %v2204_v19  ;;  %v2207_v48 = vadd.f32 %v12034_v45, %v2038_v61  ;;  %v12052_v26 = vpop.f32.mrf.mxu1  ;;  %v4664_v45 = vld [vmem:[%s13700_s26 + $0x142] sm:$0xff] }
 0x19d   : > { %v2156_v10 = vpop.f32.mrf.mxu0 }
 0x19e   : > { %v14824_v23 = vadd.f32 %v12052_v26, %v2207_v48  ;;  %v2205_v2 = vadd.f32 %v2156_v10, %v2036_v17  ;;  %v2325_v35 = vpop.f32.mrf.mxu1  ;;  %v2046_v17 = vadd.f32 %v14740_v57, %v14730_v1  ;;  %v4666_v10 = vld [vmem:[%s13700_s26 + $0x152] sm:$0xff] }
 0x19f   : > { %v12037_v6 = vpop.f32.mrf.mxu0  ;;  %12252 = vmatmul.mubr.msk.bf16.gmra.mxu0 %vm308_vm0, %v4176_v18  ;;  %v4665_v18 = vld [vmem:[%s13700_s26 + $0x14a] sm:$0xff] }
 0x1a0   : > { %v14829_v41 = vadd.f32 %v2325_v35, %v2205_v2  ;;  %v2210_v27 = vadd.f32 %v12037_v6, %v2041_v56  ;;  %v12055_v53 = vpop.f32.mrf.mxu1  ;;  %12270 = vmatmul.mubr.msk.bf16.gmra.mxu1 %vm308_vm0, %v14814_v62  ;;  %12255 = vmatprep.mubr.msk.bf16.mxu0 %vm308_vm0, %v4177_v47  ;;  %v4667_v56 = vld [vmem:[%s13700_s26 + $0x15a] sm:$0xff]  ;;  %v2044_v2 = vadd.f32 %v14740_v57, %v14745_v3 }
 0x1a1   : > { %v2169_v0 = vpop.f32.mrf.mxu0  ;;  %12273 = vmatprep.mubr.msk.bf16.mxu1 %vm308_vm0, %v14820_v13  ;;  %v14890_v57 = vld [vmem:[%s17421_s4 + $0x78] sm:$0xff]  }
 0x1a2   : > { %v14842_v38 = vadd.f32 %v12055_v53, %v2210_v27  ;;  %v2208_v52 = vadd.f32 %v2169_v0, %v2039_v20  ;;  %v2338_v39 = vpop.f32.mrf.mxu1  ;;  %v4679_v20 = vpack.c.bf16 %v4665_v18, %v4664_v45  ;;  %v4680_v0 = vpack.c.bf16 %v4667_v56, %v4666_v10  ;;  %v4507_v10 = vld [vmem:[%s13700_s26 + $0x1a1] sm:$0xff]  ;;  %v4508_v56 = vld [vmem:[%s13700_s26 + $0x1a9] sm:$0xff] }
 0x1a3   : > { %v12038_v54 = vpop.f32.mrf.mxu0 }
 0x1a4   : > { %v14848_v25 = vadd.f32 %v2338_v39, %v2208_v52  ;;  %v2211_v21 = vadd.f32 %v12038_v54, %v2042_v9  ;;  %v12056_v60 = vpop.f32.mrf.mxu1  ;;  %v4669_v52 = vld [vmem:[%s13700_s26 + $0x16a] sm:$0xff] }
 0x1a5   : > { %v2172_v24 = vpop.f32.mrf.mxu0 }
 0x1a6   : > { %v14854_v58 = vadd.f32 %v12056_v60, %v2211_v21  ;;  %v2209_v32 = vadd.f32 %v2172_v24, %v2040_v28  ;;  %v2341_v61 = vpop.f32.mrf.mxu1  ;;  %v13280_v60 = vld [vmem:[%s17421_s4 + $0x20] sm:$0xff]  }
 0x1a7   : > { %v12041_v19 = vpop.f32.mrf.mxu0  ;;  %12256 = vmatmul.mubr.msk.bf16.gmra.mxu0 %vm308_vm0, %v4178_v51 }
 0x1a8   : > { %17474 = vst [vmem:[#allocation14_spill] sm:$0xff] %v14854_v58  ;;  %v14859_v4 = vadd.f32 %v2341_v61, %v2209_v32  ;;  %v2214_v14 = vadd.f32 %v12041_v19, %v2045_v15  ;;  %v12059_v63 = vpop.f32.mrf.mxu1  ;;  %12274 = vmatmul.mubr.msk.bf16.gmra.mxu1 %vm308_vm0, %v14850_v12  ;;  %12279 = vmatprep.mubr.msk.bf16.mxu0 %vm308_vm0, %v14726_v11  ;;  %v4672_v32 = vld [vmem:[%s13700_s26 + $0x182] sm:$0xff]  ;;  %v4673_v61 = vld [vmem:[%s13700_s26 + $0x18a] sm:$0xff]  ;;  %v15169_v58 = vld [vmem:[%s17421_s4 + $0x138] sm:$0xff]  }
 0x1a9   : > { %v2185_v37 = vpop.f32.mrf.mxu0  ;;  %12297 = vmatprep.mubr.msk.bf16.mxu1 %vm308_vm0, %v4678_v44 }
 0x1aa   : > { %17475 = vst [vmem:[#allocation9_spill] sm:$0xff] %v14859_v4  ;;  %v14870_v31 = vadd.f32 %v12059_v63, %v2214_v14  ;;  %v2212_v48 = vadd.f32 %v2185_v37, %v2043_v49  ;;  %v2354_v26 = vpop.f32.mrf.mxu1  ;;  %v4674_v49 = vld [vmem:[%s13700_s26 + $0x192] sm:$0xff]  ;;  %v4675_v14 = vld [vmem:[%s13700_s26 + $0x19a] sm:$0xff]  ;;  %v4683_v37 = vpack.c.bf16 %v4673_v61, %v4672_v32  ;;  %v4833_v61 = vld [vmem:[%s13700_s26 + $0x143] sm:$0xff] }
 0x1ab   : > { %v12042_v47 = vpop.f32.mrf.mxu0  ;;  %v4684_v18 = vpack.c.bf16 %v4675_v14, %v4674_v49  ;;  %v5493_v4 = vld [vmem:[#allocation2 + $0x2f] sm:$0xff] }
 0x1ac   : > { %17476 = vst [vmem:[#allocation16_spill] sm:$0xff] %v14870_v31  ;;  %v14876_v35 = vadd.f32 %v2354_v26, %v2212_v48  ;;  %v2215_v11 = vadd.f32 %v12042_v47, %v2046_v17  ;;  %v12060_v6 = vpop.f32.mrf.mxu1  ;;  %v13282_v48 = vld [vmem:[%s17421_s4 + $0x10] sm:$0xff]   ;;  %v13297_v31 = vld [vmem:[%s17421_s4 + $0x48] sm:$0xff]  }
 0x1ad   : > { %v2188_v27 = vpop.f32.mrf.mxu0 }
 0x1ae   : > { %17477 = vst [vmem:[#allocation28_spill] sm:$0xff] %v14876_v35  ;;  %v14878_v53 = vadd.f32 %v12060_v6, %v2215_v11  ;;  %v2213_v1 = vadd.f32 %v2188_v27, %v2044_v2  ;;  %v2357_v29 = vpop.f32.mrf.mxu1  ;;  %v4676_v2 = vld [vmem:[%s13700_s26 + $0x1a2] sm:$0xff]  ;;  %v4677_v6 = vld [vmem:[%s13700_s26 + $0x1aa] sm:$0xff] }
 0x1af   : > { %v14883_v55 = vpop.f32.mrf.mxu0  ;;  %12280 = vmatmul.mubr.msk.bf16.vlgmr.msra.gmra.mxu0 %vm308_vm0, %v14735_v50  ;;  %v4668_v50 = vld [vmem:[%s13700_s26 + $0x162] sm:$0xff] }
 0x1b0   : > { %17478 = vst [vmem:[#allocation26_spill] sm:$0xff] %v14878_v53  ;;  %v14892_v3 = vadd.f32 %v2357_v29, %v2213_v1  ;;  %v14894_v22 = vpop.f32.mrf.mxu1  ;;  %12298 = vmatmul.mubr.msk.bf16.vlgmr.msra.gmra.mxu1 %vm308_vm0, %v4679_v20  ;;  %12314 = vmatpush3.bf16.msra.mxu0 %v14747_v7  ;;  %v4671_v7 = vld [vmem:[%s13700_s26 + $0x17a] sm:$0xff]  ;;  %v5087_v29 = vld [vmem:[#allocation2 + $0xd] sm:$0xff] }
 0x1b1   : > { %12332 = vmatpush3.bf16.msra.mxu1 %v14754_v40  ;;  %v14899_v9 = vpop.f32.mrf.mxu0  ;;  %12283 = vmatprep.mubr.msk.bf16.mxu0 %vm308_vm0, %v14779_v59  ;;  %v4681_v59 = vpack.c.bf16 %v4669_v52, %v4668_v50  ;;  %v4682_v28 = vpack.c.bf16 %v4671_v7, %v4670_v16  ;;  %v4831_v20 = vld [vmem:[%s13700_s26 + $0x133] sm:$0xff]  ;;  %v4832_v27 = vld [vmem:[%s13700_s26 + $0x13b] sm:$0xff]  ;;  %v4685_v52 = vpack.c.bf16 %v4677_v6, %v4676_v2 }
 0x1b2   : > { %17479 = vst [vmem:[#allocation15_spill] sm:$0xff] %v14892_v3  ;;  %v14905_v39 = vpop.f32.mrf.mxu1  ;;  %12333 = vmatprep.subr.bf16.mxu1 %v13278_v46  ;;  %12301 = vmatprep.mubr.msk.bf16.mxu1 %vm308_vm0, %v4680_v0  ;;  %v4516_v0 = vpack.c.bf16 %v4508_v56, %v4507_v10  ;;  %v5090_v10 = vld [vmem:[#allocation2 + $0x25] sm:$0xff]  ;;  %v5091_v2 = vld [vmem:[#allocation2 + $0x2d] sm:$0xff]  ;;  %v5093_v3 = vld [vmem:[#allocation2 + $0x3d] sm:$0xff] }
 0x1b3   : > { %v14913_v54 = vpop.f32.mrf.mxu0  ;;  %12363 = vmatprep.subr.bf16.mxu0 %v14890_v57  ;;  %v4835_v6 = vld [vmem:[%s13700_s26 + $0x153] sm:$0xff]  ;;  %v5097_v35 = vld [vmem:[#allocation2 + $0x5d] sm:$0xff] }
 0x1b4   : > { %v14916_v40 = vpop.f32.mrf.mxu1 }
 0x1b5   : > { %12334 = vmatpush3.bf16.msra.mxu1 %v13278_v46  ;;  %v14918_v51 = vpop.f32.mrf.mxu0 }
 0x1b6   : > { %v14920_v21 = vpop.f32.mrf.mxu1  ;;  %12335 = vmatprep.subr.bf16.mxu1 %v13279_v43 }
 0x1b7   : > { %v14925_v24 = vpop.f32.mrf.mxu0  ;;  %12284 = vmatmul.mubr.msk.bf16.gmra.mxu0 %vm308_vm0, %v14786_v34  ;;  %v13281_v34 = vld [vmem:[%s17421_s4 + $0x18] sm:$0xff]  }
 0x1b8   : > { %v14929_v44 = vpop.f32.mrf.mxu1  ;;  %12302 = vmatmul.mubr.msk.bf16.gmra.mxu1 %vm308_vm0, %v4681_v59  ;;  %12287 = vmatprep.mubr.msk.bf16.mxu0 %vm308_vm0, %v14814_v62 }
 0x1b9   : > { %12336 = vmatpush3.bf16.msra.mxu1 %v13279_v43  ;;  %v14934_v15 = vpop.f32.mrf.mxu0  ;;  %12305 = vmatprep.mubr.msk.bf16.mxu1 %vm308_vm0, %v4682_v28  ;;  %v4847_v43 = vpack.c.bf16 %v4832_v27, %v4831_v20  ;;  %v13284_v28 = vld [vmem:[%s17421_s4] sm:$0xff]  }
 0x1ba   : > { %v14939_v19 = vpop.f32.mrf.mxu1  ;;  %12337 = vmatprep.subr.bf16.mxu1 %v13280_v60  ;;  %v4836_v20 = vld [vmem:[%s13700_s26 + $0x15b] sm:$0xff] }
 0x1bb   : > { %v14946_v63 = vpop.f32.mrf.mxu0 }
 0x1bc   : > { %v14948_v62 = vpop.f32.mrf.mxu1 }
 0x1bd   : > { %12338 = vmatpush3.bf16.msra.mxu1 %v13280_v60  ;;  %v14950_v45 = vpop.f32.mrf.mxu0 }
 0x1be   : > { %v14952_v17 = vpop.f32.mrf.mxu1  ;;  %12339 = vmatprep.subr.bf16.mxu1 %v13281_v34 }
 0x1bf   : > { %v14957_v26 = vpop.f32.mrf.mxu0  ;;  %12288 = vmatmul.mubr.msk.bf16.gmra.mxu0 %vm308_vm0, %v14820_v13  ;;  %v13283_v13 = vld [vmem:[%s17421_s4 + $0x8] sm:$0xff]  }
 0x1c0   : > { %v14961_v47 = vpop.f32.mrf.mxu1  ;;  %12306 = vmatmul.mubr.msk.bf16.gmra.mxu1 %vm308_vm0, %v4683_v37  ;;  %12291 = vmatprep.mubr.msk.bf16.mxu0 %vm308_vm0, %v14850_v12  ;;  %v5088_v12 = vld [vmem:[#allocation2 + $0x15] sm:$0xff] }
 0x1c1   : > { %12340 = vmatpush3.bf16.msra.mxu1 %v13281_v34  ;;  %v14969_v11 = vpop.f32.mrf.mxu0  ;;  %12309 = vmatprep.mubr.msk.bf16.mxu1 %vm308_vm0, %v4684_v18  ;;  %v5103_v7 = vpack.c.bf16 %v5088_v12, %v5087_v29  ;;  %v4834_v34 = vld [vmem:[%s13700_s26 + $0x14b] sm:$0xff]  ;;  %v13286_v37 = vld [vmem:[%s17421_s4 + $0xb8] sm:$0xff]  }
 0x1c2   : > { %v14975_v1 = vpop.f32.mrf.mxu1  ;;  %12341 = vmatprep.subr.bf16.mxu1 %v13282_v48 }
 0x1c3   : > { %v14980_v46 = vpop.f32.mrf.mxu0 }
 0x1c4   : > { %17480 = vst [vmem:[#allocation10_spill] sm:$0xff] %v14980_v46  ;;  %v14982_v50 = vpop.f32.mrf.mxu1  ;;  %v15138_v46 = vld [vmem:[#allocation2 + $0x46] sm:$0xff] }
 0x1c5   : > { %17481 = vst [vmem:[#allocation18_spill] sm:$0xff] %v14982_v50  ;;  %12342 = vmatpush3.bf16.msra.mxu1 %v13282_v48  ;;  %v14984_v16 = vpop.f32.mrf.mxu0  ;;  %v4848_v48 = vpack.c.bf16 %v4834_v34, %v4833_v61  ;;  %v4849_v61 = vpack.c.bf16 %v4836_v20, %v4835_v6  ;;  %v13293_v50 = vld [vmem:[%s17421_s4 + $0x58] sm:$0xff]  }
 0x1c6   : > { %17482 = vst [vmem:[#allocation30_spill] sm:$0xff] %v14984_v16  ;;  %v14986_v59 = vpop.f32.mrf.mxu1  ;;  %12343 = vmatprep.subr.bf16.mxu1 %v13283_v13  ;;  %v15136_v16 = vld [vmem:[#allocation2 + $0x2e] sm:$0xff] }
 0x1c7   : > { %17483 = vst [vmem:[#allocation27_spill] sm:$0xff] %v14986_v59  ;;  %v14991_v60 = vpop.f32.mrf.mxu0  ;;  %12292 = vmatmul.mubr.msk.bf16.gmra.mxu0 %vm308_vm0, %v4516_v0  ;;  %v5092_v0 = vld [vmem:[#allocation2 + $0x35] sm:$0xff] }
 0x1c8   : > { %17484 = vst [vmem:[#allocation17_spill] sm:$0xff] %v14991_v60  ;;  %v14994_v32 = vpop.f32.mrf.mxu1  ;;  %12310 = vmatmul.mubr.msk.bf16.gmra.mxu1 %vm308_vm0, %v4685_v52  ;;  %12315 = vmatprep.mubr.msk.bf16.mxu0 %vm308_vm0, %v4847_v43  ;;  %v13287_v52 = vld [vmem:[%s17421_s4 + $0x70] sm:$0xff]  }
 0x1c9   : > { %17485 = vst [vmem:[#allocation11_spill] sm:$0xff] %v14994_v32  ;;  %12344 = vmatpush3.bf16.msra.mxu1 %v13283_v13  ;;  %v15000_v49 = vpop.f32.mrf.mxu0  ;;  %12347 = vmatprep.mubr.bf16.mxu1 %v5103_v7  ;;  %v5089_v13 = vld [vmem:[#allocation2 + $0x1d] sm:$0xff]  ;;  %v13288_v43 = vld [vmem:[%s17421_s4 + $0xb0] sm:$0xff]  }
 0x1ca   : > { %17486 = vst [vmem:[#allocation20_spill] sm:$0xff] %v15000_v49  ;;  %v15002_v14 = vpop.f32.mrf.mxu1  ;;  %12345 = vmatprep.subr.bf16.mxu1 %v13284_v28  ;;  %v5104_v12 = vpack.c.bf16 %v5090_v10, %v5089_v13  ;;  %v4837_v10 = vld [vmem:[%s13700_s26 + $0x163] sm:$0xff]  ;;  %v4838_v13 = vld [vmem:[%s13700_s26 + $0x16b] sm:$0xff] }
 0x1cb   : > { %17487 = vst [vmem:[#allocation29_spill] sm:$0xff] %v15002_v14  ;;  %v15007_v18 = vpop.f32.mrf.mxu0  ;;  %v4850_v6 = vpack.c.bf16 %v4838_v13, %v4837_v10  ;;  %v13291_v10 = vld [vmem:[%s17421_s4 + $0x60] sm:$0xff]  }
 0x1cc   : > { %17488 = vst [vmem:[#allocation19_spill] sm:$0xff] %v15007_v18  ;;  %v15009_v56 = vpop.f32.mrf.mxu1 }
 0x1cd   : > { %17489 = vst [vmem:[#allocation12_spill] sm:$0xff] %v15009_v56  ;;  %12346 = vmatpush3.bf16.msra.mxu1 %v13284_v28  ;;  %v15013_v27 = vpop.f32.mrf.mxu0  ;;  %v5105_v28 = vpack.c.bf16 %v5092_v0, %v5091_v2  ;;  %v13289_v56 = vld [vmem:[%s17421_s4 + $0x68] sm:$0xff]   ;;  %v4839_v0 = vld [vmem:[%s13700_s26 + $0x173] sm:$0xff] }
 0x1ce   : > { %17490 = vst [vmem:[#allocation22_spill] sm:$0xff] %v15013_v27  ;;  %v15015_v29 = vpop.f32.mrf.mxu1  ;;  %12395 = vmatprep.subr.bf16.mxu1 %v13286_v37 }
 0x1cf   : > { %17491 = vst [vmem:[#allocation31_spill] sm:$0xff] %v15015_v29  ;;  %v15023_v7 = vpop.f32.mrf.mxu0  ;;  %12316 = vmatmul.mubr.msk.bf16.vlgmr.msra.gmra.mxu0 %vm308_vm0, %v4848_v48 }
 0x1d0   : > { %v15026_v34 = vpop.f32.mrf.mxu1  ;;  %12348 = vmatmul.mubr.bf16.vlgmr.msra.gmra.mxu1 %v5104_v12  ;;  %12364 = vmatpush3.bf16.msra.mxu0 %v14890_v57  ;;  %v13290_v57 = vld [vmem:[%s17421_s4 + $0xa8] sm:$0xff]  }
 0x1d1   : > { %12351 = vmatprep.mubr.bf16.mxu1 %v5105_v28  ;;  %12396 = vmatpush3.bf16.msra.mxu1 %v13286_v37  ;;  %v15031_v29 = vpop.f32.mrf.mxu0  ;;  %v5094_v37 = vld [vmem:[#allocation2 + $0x45] sm:$0xff]  ;;  %v5095_v12 = vld [vmem:[#allocation2 + $0x4d] sm:$0xff]  ;;  %v4840_v28 = vld [vmem:[%s13700_s26 + $0x17b] sm:$0xff] }
 0x1d2   : > { %v15036_v48 = vpop.f32.mrf.mxu1  ;;  %12365 = vmatprep.subr.bf16.mxu0 %v13287_v52  ;;  %12397 = vmatprep.subr.bf16.mxu1 %v13288_v43  ;;  %v5106_v53 = vpack.c.bf16 %v5094_v37, %v5093_v3  ;;  %v4851_v14 = vpack.c.bf16 %v4840_v28, %v4839_v0  ;;  %v4841_v3 = vld [vmem:[%s13700_s26 + $0x183] sm:$0xff]  ;;  %v4842_v37 = vld [vmem:[%s13700_s26 + $0x18b] sm:$0xff]  ;;  %v4843_v28 = vld [vmem:[%s13700_s26 + $0x193] sm:$0xff] }
 0x1d3   : > { %v15041_v2 = vpop.f32.mrf.mxu0  ;;  %12319 = vmatprep.mubr.msk.bf16.mxu0 %vm308_vm0, %v4849_v61  ;;  %v5096_v61 = vld [vmem:[#allocation2 + $0x55] sm:$0xff]  ;;  %v5099_v0 = vld [vmem:[#allocation2 + $0x6d] sm:$0xff] }
 0x1d4   : > { %v15044_v20 = vpop.f32.mrf.mxu1  ;;  %12366 = vmatpush3.bf16.msra.mxu0 %v13287_v52  ;;  %v13292_v52 = vld [vmem:[%s17421_s4 + $0xa0] sm:$0xff]   ;;  %v5107_v13 = vpack.c.bf16 %v5096_v61, %v5095_v12 }
 0x1d5   : > { %12398 = vmatpush3.bf16.msra.mxu1 %v13288_v43  ;;  %v15048_v27 = vpop.f32.mrf.mxu0  ;;  %12367 = vmatprep.subr.bf16.mxu0 %v13289_v56  ;;  %v4844_v61 = vld [vmem:[%s13700_s26 + $0x19b] sm:$0xff] }
 0x1d6   : > { %v15050_v18 = vpop.f32.mrf.mxu1  ;;  %12399 = vmatprep.subr.bf16.mxu1 %v13290_v57 }
 0x1d7   : > { %17492 = vst [vmem:[#allocation21_spill] sm:$0xff] %v15050_v18  ;;  %v15058_v43 = vpop.f32.mrf.mxu0  ;;  %12320 = vmatmul.mubr.msk.bf16.gmra.mxu0 %vm308_vm0, %v4850_v6  ;;  %v4852_v6 = vpack.c.bf16 %v4842_v37, %v4841_v3  ;;  %v13295_v3 = vld [vmem:[%s17421_s4 + $0x50] sm:$0xff]  }
 0x1d8   : > { %v15061_v32 = vpop.f32.mrf.mxu1  ;;  %12352 = vmatmul.mubr.bf16.gmra.mxu1 %v5106_v53  ;;  %12368 = vmatpush3.bf16.msra.mxu0 %v13289_v56  ;;  %v13294_v53 = vld [vmem:[%s17421_s4 + $0x98] sm:$0xff]  }
 0x1d9   : > { %17493 = vst [vmem:[#allocation13_spill] sm:$0xff] %v15061_v32  ;;  %12355 = vmatprep.mubr.bf16.mxu1 %v5107_v13  ;;  %12400 = vmatpush3.bf16.msra.mxu1 %v13290_v57  ;;  %v15065_v59 = vpop.f32.mrf.mxu0  ;;  %v5098_v57 = vld [vmem:[#allocation2 + $0x65] sm:$0xff] }
 0x1da   : > { %v15070_v49 = vpop.f32.mrf.mxu1  ;;  %12369 = vmatprep.subr.bf16.mxu0 %v13291_v10  ;;  %12401 = vmatprep.subr.bf16.mxu1 %v13292_v52  ;;  %v5108_v60 = vpack.c.bf16 %v5098_v57, %v5097_v35  ;;  %v4845_v35 = vld [vmem:[%s13700_s26 + $0x1a3] sm:$0xff]  ;;  %v4846_v57 = vld [vmem:[%s13700_s26 + $0x1ab] sm:$0xff]  ;;  %s258_s26 = sand.u32 1, %s13579_s22  }
 0x1db   : > { %17494 = vst [vmem:[#allocation24_spill] sm:$0xff] %v15070_v49  ;;  %v15075_v56 = vpop.f32.mrf.mxu0  ;;  %12323 = vmatprep.mubr.msk.bf16.mxu0 %vm308_vm0, %v4851_v14  ;;  %v5100_v14 = vld [vmem:[#allocation2 + $0x75] sm:$0xff]  ;;  %s16543_s17 = smul.u32 384, %s258_s26  ;;  %s17377_s25 = scalar_lea.sflag [#allocation5], %s258_s26 }
 0x1dc   : > { %17495 = vst [vmem:[#allocation23_spill] sm:$0xff] %v15075_v56  ;;  %v15078_v12 = vpop.f32.mrf.mxu1  ;;  %12370 = vmatpush3.bf16.msra.mxu0 %v13291_v10  ;;  %v13296_v10 = vld [vmem:[%s17421_s4 + $0x90] sm:$0xff]   ;;  %v5109_v37 = vpack.c.bf16 %v5100_v14, %v5099_v0  ;;  %v5102_v0 = vld [vmem:[#allocation2 + $0x85] sm:$0xff] }
 0x1dd   : > { %17496 = vst [vmem:[#allocation25_spill] sm:$0xff] %v15078_v12  ;;  %12402 = vmatpush3.bf16.msra.mxu1 %v13292_v52  ;;  %v15082_v13 = vpop.f32.mrf.mxu0  ;;  %12371 = vmatprep.subr.bf16.mxu0 %v13293_v50  ;;  %v4853_v12 = vpack.c.bf16 %v4844_v61, %v4843_v28  ;;  %v15115_v28 = vld [vmem:[%s17421_s4 + $0x40] sm:$0xff]   ;;  %v5289_v61 = vld [vmem:[#allocation2 + $0x16] sm:$0xff]  ;;  %s16588_s12 = scalar_lea.vmem [#allocation6], %s16543_s17 }
 0x1de   : > { %17497 = vst [vmem:[#allocation32_spill] sm:$0xff] %v15082_v13  ;;  %v15084_v49 = vpop.f32.mrf.mxu1  ;;  %12403 = vmatprep.subr.bf16.mxu1 %v13294_v53  ;;  %v5489_v14 = vld [vmem:[#allocation2 + $0xf] sm:$0xff]  ;;  %s10624_s15 = sshll.u32 %s16588_s12, 4  ;;  %s17372_s15 = int_to_ptr.vmem [resolvable:$true] %s10624_s15 }
 0x1df   : > { %17498 = vst [vmem:[#allocation33_spill] sm:$0xff] %v15084_v49  ;;  %v15092_v52 = vpop.f32.mrf.mxu0  ;;  %12324 = vmatmul.mubr.msk.bf16.gmra.mxu0 %vm308_vm0, %v4852_v6  ;;  %v13298_v6 = vld [vmem:[%s17421_s4 + $0x88] sm:$0xff]   ;;  %s13523_s19 = scalar_lea.vmem %s17372_s15, 6144  ;;  %p13530_p11 = scmp.lt.s32.totalorder %s17372_s15, %s13528_s28 }
 0x1e0   : > { %17499 = vst [vmem:[#allocation34_spill] sm:$0xff] %v15092_v52  ;;  %v15095_v13 = vpop.f32.mrf.mxu1  ;;  %12356 = vmatmul.mubr.bf16.gmra.mxu1 %v5108_v60  ;;  %12372 = vmatpush3.bf16.msra.mxu0 %v13293_v50  ;;  %v5288_v60 = vld [vmem:[#allocation2 + $0xe] sm:$0xff]  ;;  %v5491_v52 = vld [vmem:[#allocation2 + $0x1f] sm:$0xff]  ;;  %p13524_p6 = scmp.ne.s32.totalorder %s17372_s15, %s13523_s19  ;;  %p13531_p12 = scmp.lt.s32.totalorder %s13529_s29, %s13523_s19 }
 0x1e1   : > { %17500 = vst [vmem:[#allocation35_spill] sm:$0xff] %v15095_v13  ;;  %12359 = vmatprep.mubr.bf16.mxu1 %v5109_v37  ;;  %12404 = vmatpush3.bf16.msra.mxu1 %v13294_v53  ;;  %v15099_v49 = vpop.f32.mrf.mxu0  ;;  %v4854_v53 = vpack.c.bf16 %v4846_v57, %v4845_v35  ;;  %v2540_v37 = vadd.f32 %v14883_v55, %v14772_v42  ;;  %v15126_v35 = vld [vmem:[#allocation2 + $0x1e] sm:$0xff]  ;;  %v15128_v57 = vld [vmem:[#allocation2 + $0x26] sm:$0xff] }
 0x1e2   : > { %17501 = vst [vmem:[#allocation36_spill] sm:$0xff] %v15099_v49  ;;  %v15104_v56 = vpop.f32.mrf.mxu1  ;;  %12373 = vmatprep.subr.bf16.mxu0 %v13295_v3  ;;  %12405 = vmatprep.subr.bf16.mxu1 %v13296_v10  ;;  %v5101_v49 = vld [vmem:[#allocation2 + $0x7d] sm:$0xff]  ;;  %v5492_v42 = vld [vmem:[#allocation2 + $0x27] sm:$0xff]  ;;  %v2538_v55 = vadd.f32 %v14899_v9, %v14784_v30  ;;  %v5304_v32 = vpack.c.bf16 %v5289_v61, %v5288_v60  ;;  %p13525_p9 = pnand %p13524_p6, %p13668_p5  ;;  %p13532_p13 = por %p13531_p12, %p13530_p11 }
 0x1e3   : > { %17502 = vst [vmem:[#allocation37_spill] sm:$0xff] %v15104_v56  ;;  %v15109_v50 = vpop.f32.mrf.mxu0  ;;  %12327 = vmatprep.mubr.msk.bf16.mxu0 %vm308_vm0, %v4853_v12  ;;  %v5490_v12 = vld [vmem:[#allocation2 + $0x17] sm:$0xff]  ;;  %v2541_v61 = vadd.f32 %v14913_v54, %v14790_v5  ;;  %v5497_v5 = vld [vmem:[#allocation2 + $0x4f] sm:$0xff] }
 0x1e4   : > { %17503 = vst [vmem:[#allocation38_spill] sm:$0xff] %v15109_v50  ;;  %v15119_v56 = vpop.f32.mrf.mxu1  ;;  %12374 = vmatpush3.bf16.msra.mxu0 %v13295_v3  ;;  %v15124_v50 = vld [vmem:[%s17421_s4 + $0x80] sm:$0xff]   ;;  %v15148_v30 = vld [vmem:[%s17421_s4 + $0xf8] sm:$0xff]   ;;  %p13526_p10 = pneg %p13525_p9 }
 0x1e5   : > { %17504 = vst [vmem:[#allocation39_spill] sm:$0xff] %v15119_v56  ;;  %12406 = vmatpush3.bf16.msra.mxu1 %v13296_v10  ;;  %v15130_v13 = vpop.f32.mrf.mxu0  ;;  %12375 = vmatprep.subr.bf16.mxu0 %v13297_v31  ;;  %v5110_v56 = vpack.c.bf16 %v5102_v0, %v5101_v49  ;;  %v15150_v9 = vld [vmem:[#allocation2 + $0x36] sm:$0xff]  ;;  %v15152_v60 = vld [vmem:[#allocation2 + $0x3e] sm:$0xff]  ;;  %v2709_v0 = vadd.f32 %v14894_v22, %v2540_v37  ;;  %v5496_v22 = vld [vmem:[#allocation2 + $0x47] sm:$0xff] }
 0x1e6   : > { %17505 = vst [vmem:[#allocation40_spill] sm:$0xff] %v15130_v13  ;;  %v15134_v3 = vpop.f32.mrf.mxu1  ;;  %12407 = vmatprep.subr.bf16.mxu1 %v13298_v6  ;;  %v5505_v13 = vpack.c.bf16 %v5490_v12, %v5489_v14  ;;  %v5494_v49 = vld [vmem:[#allocation2 + $0x37] sm:$0xff]  ;;  %17508 = vst [vmem:[#allocation43_spill] sm:$0xff] %v15152_v60  ;;  %v15164_v12 = vpack.c.bf16 %v5492_v42, %v5491_v52  ;;  %v15171_v37 = vld [vmem:[#allocation2 + $0x4e] sm:$0xff]  ;;  %p13533_p0 = pnand %p13532_p13, %p13526_p10 }
 0x1e7   : > { %17506 = vst [vmem:[#allocation41_spill] sm:$0xff] %v15134_v3  ;;  %v15140_v10 = vpop.f32.mrf.mxu0  ;;  %12328 = vmatmul.mubr.msk.bf16.gmra.mxu0 %vm308_vm0, %v4854_v53  ;;  %v15162_v14 = vld [vmem:[%s17417_s0 + $0x90] sm:$0xff]  ;;  %v5495_v42 = vld [vmem:[#allocation2 + $0x3f] sm:$0xff]  ;;  %v5500_v3 = vld [vmem:[#allocation2 + $0x67] sm:$0xff] }
 0x1e8   : > { %17507 = vst [vmem:[#allocation42_spill] sm:$0xff] %v15140_v10  ;;  %v15157_v53 = vpop.f32.mrf.mxu1  ;;  %12360 = vmatmul.mubr.bf16.gmra.mxu1 %v5110_v56  ;;  %12376 = vmatpush3.bf16.msra.mxu0 %v13297_v31  ;;  %v5306_v31 = vpack.c.bf16 %v15150_v9, %v15136_v16  ;;  %v15178_v56 = vpack.c.bf16 %v5494_v49, %v5493_v4  ;;  %v15191_v4 = vld [vmem:[#allocation2 + $0x56] sm:$0xff]  ;;  %v15193_v9 = vld [vmem:[#allocation2 + $0x6e] sm:$0xff]  ;;  %vm3433_vm0 = vcmp.ne.f32.partialorder %v15162_v14, 0.0  ;;  %v17522_v14 = vld [vmem:[#allocation24_spill] sm:$0xff] }
 0x1e9   : > { %17509 = vst [vmem:[#allocation44_spill] sm:$0xff] %v15157_v53  ;;  %12408 = vmatpush3.bf16.msra.mxu1 %v13298_v6  ;;  %v15173_v54 = vpop.f32.mrf.mxu0  ;;  %12377 = vmatprep.subr.bf16.mxu0 %v15115_v28  ;;  %v15182_v53 = vld [vmem:[#allocation2 + $0x66] sm:$0xff]  ;;  %v2707_v10 = vadd.f32 %v14905_v39, %v2538_v55  ;;  %v2539_v6 = vadd.f32 %v14918_v51, %v14796_v8  ;;  %v5498_v16 = vld [vmem:[#allocation2 + $0x57] sm:$0xff]  ;;  %v5501_v55 = vld [vmem:[#allocation2 + $0x6f] sm:$0xff] }
 0x1ea   : > { %17510 = vst [vmem:[#allocation45_spill] sm:$0xff] %v15173_v54  ;;  %v2878_v54 = vadd.f32 %v15023_v7, %v2709_v0  ;;  %v15188_v18 = vpop.f32.mrf.mxu1  ;;  %12409 = vmatprep.subr.bf16.mxu1 %v15124_v50  ;;  %12379 = vmatprep.mubr.bf16.mxu0 %v5304_v32  ;;  %v2544_v49 = vadd.f32 %v14925_v24, %v14810_v33  ;;  %v15205_v7 = vld [vmem:[#allocation2 + $0x5e] sm:$0xff] }
 0x1eb   : > { %17511 = vst [vmem:[#allocation46_spill] sm:$0xff] %v15188_v18  ;;  %v15197_v52 = vpop.f32.mrf.mxu0  ;;  %12411 = vmatprep.mubr.bf16.mxu1 %v5505_v13  ;;  %v15199_v39 = vpack.c.bf16 %v5496_v22, %v5495_v42  ;;  %v5308_v8 = vpack.c.bf16 %v15191_v4, %v15171_v37  ;;  %v15203_v51 = vpack.c.bf16 %v5498_v16, %v5497_v5  ;;  %v5499_v32 = vld [vmem:[#allocation2 + $0x5f] sm:$0xff]  ;;  %v15216_v13 = vld [vmem:[#allocation2 + $0x76] sm:$0xff] }
 0x1ec   : > { %v2710_v0 = vadd.f32 %v14916_v40, %v2541_v61  ;;  %v2876_v18 = vadd.f32 %v15031_v29, %v2707_v10  ;;  %v15209_v60 = vpop.f32.mrf.mxu1  ;;  %12378 = vmatpush3.bf16.msra.mxu0 %v15115_v28  ;;  %v5309_v33 = vpack.c.bf16 %v15182_v53, %v15205_v7  ;;  %v15214_v24 = vpack.c.bf16 %v5500_v3, %v5499_v32  ;;  %v15230_v29 = vld [vmem:[%s17417_s0 + $0x80] sm:$0xff]  ;;  %v15243_v3 = vld [vmem:[%s17417_s0 + $0x98] sm:$0xff]  ;;  %v13303_v10 = vld [vmem:[%s17421_s4 + $0xf0] sm:$0xff]  }
 0x1ed   : > { %v2542_v22 = vadd.f32 %v14934_v15, %v14818_v36  ;;  %v2545_v5 = vadd.f32 %v14946_v63, %v14824_v23  ;;  %12410 = vmatpush3.bf16.msra.mxu1 %v15124_v50  ;;  %v15223_v40 = vpop.f32.mrf.mxu0  ;;  %12427 = vmatprep.subr.bf16.mxu0 %v15148_v30  ;;  %v5310_v28 = vpack.c.bf16 %v15216_v13, %v15193_v9  ;;  %v5502_v36 = vld [vmem:[#allocation2 + $0x77] sm:$0xff]  ;;  %vm3431_vm2 = vcmp.ne.f32.partialorder %v15230_v29, 0.0  ;;  %v5303_v53 = vld [vmem:[#allocation2 + $0x86] sm:$0xff] }
 0x1ee   : > { %v2708_v15 = vadd.f32 %v14920_v21, %v2539_v6  ;;  %v3047_v23 = vadd.f32 %v15026_v34, %v2878_v54  ;;  %v2879_v63 = vadd.f32 %v15041_v2, %v2710_v0  ;;  %v15237_v50 = vpop.f32.mrf.mxu1  ;;  %12459 = vmatprep.subr.bf16.mxu1 %v15169_v58  ;;  %v15248_v61 = vpack.c.bf16 %v5502_v36, %v5501_v55  ;;  %v13304_v16 = vld [vmem:[%s17421_s4 + $0x130] sm:$0xff]   ;;  %v13306_v55 = vld [vmem:[%s17421_s4 + $0x128] sm:$0xff]   ;;  %v17542_v7 = vld [vmem:[#allocation15_spill] sm:$0xff] }
 0x1ef   : > { %v2713_v21 = vadd.f32 %v14929_v44, %v2544_v49  ;;  %v2543_v34 = vadd.f32 %v14950_v45, %v14829_v41  ;;  %v2548_v2 = vadd.f32 %v14957_v26, %v14842_v38  ;;  %v2546_v54 = vadd.f32 %v14969_v11, %v14848_v25  ;;  %v12137_v42 = vpop.f32.mrf.mxu0  ;;  %v15266_v44 = vld [vmem:[%s17417_s0 + $0x88] sm:$0xff]  ;;  %v15275_v26 = vld [vmem:[%s17417_s0 + $0xb0] sm:$0xff] }
 0x1f0   : > { %v17512_v6 = vpack.c.bf16 %v15128_v57, %v15126_v35  ;;  %v3045_v41 = vadd.f32 %v15036_v48, %v2876_v18  ;;  %v2877_v38 = vadd.f32 %v15048_v27, %v2708_v15  ;;  %v3216_v45 = vadd.f32 %v12137_v42, %v3047_v23  ;;  %v12155_v25 = vpop.f32.mrf.mxu1  ;;  %12412 = vmatmul.mubr.bf16.vlgmr.msra.gmra.mxu1 %v15164_v12  ;;  %v17513_v0 = vld [vmem:[#allocation21_spill] sm:$0xff]  ;;  %v17519_v42 = vld [vmem:[#allocation23_spill] sm:$0xff] }
 0x1f1   : > { %v2711_v11 = vadd.f32 %v14939_v19, %v2542_v22  ;;  %v2714_v35 = vadd.f32 %v14948_v62, %v2545_v5  ;;  %v2882_v18 = vadd.f32 %v15058_v43, %v2713_v21  ;;  %12415 = vmatprep.mubr.bf16.mxu1 %v15178_v56  ;;  %v3151_v27 = vpop.f32.mrf.mxu0  ;;  %vm3434_vm3 = vcmp.ne.f32.partialorder %v15243_v3, 0.0  ;;  %12460 = vmatpush3.bf16.msra.mxu1 %v15169_v58  ;;  %v13305_v19 = vld [vmem:[%s17421_s4 + $0xe8] sm:$0xff]   ;;  %v15292_v62 = vld [vmem:[%s17417_s0 + $0xa0] sm:$0xff]  ;;  %v17517_v21 = vld [vmem:[#allocation30_spill] sm:$0xff] }
 0x1f2   : > { %12380 = vmatmul.mubr.bf16.vlgmr.msra.gmra.mxu0 %v17512_v6  ;;  %v3048_v48 = vadd.f32 %v15044_v20, %v2879_v63  ;;  %v3385_v57 = vadd.f32 %v12155_v25, %v3216_v45  ;;  %v3320_v49 = vpop.f32.mrf.mxu1  ;;  %vm3432_vm4 = vcmp.ne.f32.partialorder %v15266_v44, 0.0  ;;  %v2712_v43 = vadd.f32 %v14952_v17, %v2543_v34  ;;  %12461 = vmatprep.subr.bf16.mxu1 %v13304_v16  ;;  %v17516_v63 = vld [vmem:[#allocation9_spill] sm:$0xff] }
 0x1f3   : > { %12383 = vmatprep.mubr.bf16.mxu0 %v5306_v31  ;;  %12428 = vmatpush3.bf16.msra.mxu0 %v15148_v30  ;;  %v3214_v31 = vadd.f32 %v3151_v27, %v3045_v41  ;;  %v2717_v20 = vadd.f32 %v14961_v47, %v2548_v2  ;;  %v15297_v58 = vadd.f32 %v14975_v1, %v2546_v54  ;;  %v12138_v32 = vpop.f32.mrf.mxu0  ;;  %vm3437_vm5 = vcmp.ne.f32.partialorder %v15275_v26, 0.0  ;;  %v15308_v47 = vld [vmem:[%s17417_s0 + $0xb8] sm:$0xff]  ;;  %v17514_v1 = vld [vmem:[#allocation14_spill] sm:$0xff]  ;;  %v17518_v2 = vld [vmem:[#allocation13_spill] sm:$0xff] }
 0x1f4   : > { %12429 = vmatprep.subr.bf16.mxu0 %v13303_v10  ;;  %v2880_v30 = vadd.f32 %v15065_v59, %v2711_v11  ;;  %v3046_v22 = vadd.f32 %v17513_v0, %v2877_v38  ;;  %v3401_v5 = vmax.f32 %v3385_v57, 0.0  ;;  %v3217_v17 = vadd.f32 %v12138_v32, %v3048_v48  ;;  %v12156_v15 = vpop.f32.mrf.mxu1  ;;  %v17515_v59 = vld [vmem:[#allocation10_spill] sm:$0xff]  ;;  %v13307_v48 = vld [vmem:[%s17421_s4 + $0xe0] sm:$0xff]   ;;  %v17524_v0 = vld [vmem:[#allocation43_spill] sm:$0xff] }
 0x1f5   : > { %v3383_v36 = vadd.f32 %v3320_v49, %v3214_v31  ;;  %v2549_v23 = vadd.f32 %v17515_v59, %v17514_v1  ;;  %v2547_v34 = vadd.f32 %v17517_v21, %v17516_v63  ;;  %v3051_v54 = vadd.f32 %v17518_v2, %v2882_v18  ;;  %v3154_v41 = vpop.f32.mrf.mxu0  ;;  %12462 = vmatpush3.bf16.msra.mxu1 %v13304_v16  ;;  %v17521_v18 = vld [vmem:[#allocation17_spill] sm:$0xff]  ;;  %v17523_v49 = vld [vmem:[#allocation32_spill] sm:$0xff]  ;;  %v17529_v2 = vld [vmem:[#allocation34_spill] sm:$0xff] }
 0x1f6   : > { %v2883_v6 = vadd.f32 %v17519_v42, %v2714_v35  ;;  %vm3435_vm6 = vcmp.ne.f32.partialorder %v15292_v62, 0.0  ;;  %v3449_v38 = vsel %vm3433_vm0, %v3401_v5, 0.0  ;;  %v3386_v25 = vadd.f32 %v12156_v15, %v3217_v17  ;;  %v3323_v27 = vpop.f32.mrf.mxu1  ;;  %v17520_v35 = vld [vmem:[#allocation16_spill] sm:$0xff]  ;;  %12463 = vmatprep.subr.bf16.mxu1 %v13306_v55  ;;  %v17528_v63 = vld [vmem:[#allocation25_spill] sm:$0xff] }
 0x1f7   : > { %12430 = vmatpush3.bf16.msra.mxu0 %v13303_v10  ;;  %v3399_v45 = vmax.f32 %v3383_v36, 0.0  ;;  %v3215_v11 = vadd.f32 %v3154_v41, %v3046_v22  ;;  %v15325_v10 = vld [vmem:[%s17417_s0 + $0xa8] sm:$0xff]  ;;  %v2552_v57 = vadd.f32 %v17521_v18, %v17520_v35  ;;  %v3049_v31 = vadd.f32 %v17522_v14, %v2880_v30  ;;  %3465 = vst [vmem:[#allocation2 + $0xb0] sm:$0xff] %v3449_v38  ;;  %v12141_v16 = vpop.f32.mrf.mxu0  ;;  %v13308_v5 = vld [vmem:[%s17421_s4 + $0x120] sm:$0xff]  }
 0x1f8   : > { %12431 = vmatprep.subr.bf16.mxu0 %v13305_v19  ;;  %v2881_v32 = vadd.f32 %v17523_v49, %v2712_v43  ;;  %v17525_v22 = vpack.c.bf16 %v15138_v46, %v17524_v0  ;;  %vm3438_vm7 = vcmp.ne.f32.partialorder %v15308_v47, 0.0  ;;  %v3402_v17 = vmax.f32 %v3386_v25, 0.0  ;;  %v12159_v43 = vpop.f32.mrf.mxu1  ;;  %12416 = vmatmul.mubr.bf16.gmra.mxu1 %v15199_v39  ;;  %v17526_v46 = vld [vmem:[#allocation28_spill] sm:$0xff]  ;;  %v17532_v25 = vld [vmem:[#allocation33_spill] sm:$0xff] }
 0x1f9   : > { %v3447_v36 = vsel %vm3431_vm2, %v3399_v45, 0.0  ;;  %v3384_v30 = vadd.f32 %v3323_v27, %v3215_v11  ;;  %v3220_v15 = vadd.f32 %v12141_v16, %v3051_v54  ;;  %v17527_v1 = vld [vmem:[#allocation20_spill] sm:$0xff]  ;;  %v3052_v21 = vadd.f32 %v17528_v63, %v2883_v6  ;;  %12419 = vmatprep.mubr.bf16.mxu1 %v15203_v51  ;;  %v3167_v29 = vpop.f32.mrf.mxu0  ;;  %12464 = vmatpush3.bf16.msra.mxu1 %v13306_v55  ;;  %v17530_v6 = vld [vmem:[#allocation18_spill] sm:$0xff]  ;;  %v17531_v45 = vld [vmem:[#allocation27_spill] sm:$0xff] }
 0x1fa   : > { %12384 = vmatmul.mubr.bf16.gmra.mxu0 %v17525_v22  ;;  %v2550_v59 = vadd.f32 %v17527_v1, %v17526_v46  ;;  %v2886_v42 = vadd.f32 %v17529_v2, %v2717_v20  ;;  %3463 = vst [vmem:[#allocation2 + $0xa0] sm:$0xff] %v3447_v36  ;;  %vm3436_vm8 = vcmp.ne.f32.partialorder %v15325_v10, 0.0  ;;  %v3450_v54 = vsel %vm3434_vm3, %v3402_v17, 0.0  ;;  %v13309_v20 = vld [vmem:[%s17421_s4 + $0xd8] sm:$0xff]   ;;  %v17533_v27 = vld [vmem:[#allocation36_spill] sm:$0xff]  ;;  %12465 = vmatprep.subr.bf16.mxu1 %v13308_v5  ;;  %v17535_v16 = vld [vmem:[#allocation29_spill] sm:$0xff] }
 0x1fb   : > { %12387 = vmatprep.mubr.bf16.mxu0 %v5308_v8  ;;  %12432 = vmatpush3.bf16.msra.mxu0 %v13305_v19  ;;  %v3400_v41 = vmax.f32 %v3384_v30, 0.0  ;;  %v3389_v37 = vadd.f32 %v12159_v43, %v3220_v15  ;;  %v3218_v4 = vadd.f32 %v3167_v29, %v3049_v31  ;;  %v3336_v8 = vpop.f32.mrf.mxu1  ;;  %v2718_v38 = vadd.f32 %v17530_v6, %v2549_v23  ;;  %v12142_v35 = vpop.f32.mrf.mxu0  ;;  %v13310_v55 = vld [vmem:[%s17421_s4 + $0x118] sm:$0xff]   ;;  %v17537_v17 = vld [vmem:[#allocation38_spill] sm:$0xff]  ;;  %v17540_v26 = vld [vmem:[#allocation37_spill] sm:$0xff] }
 0x1fc   : > { %12433 = vmatprep.subr.bf16.mxu0 %v13307_v48  ;;  %v2716_v19 = vadd.f32 %v17531_v45, %v2547_v34  ;;  %v3050_v11 = vadd.f32 %v17532_v25, %v2881_v32  ;;  %v2884_v3 = vadd.f32 %v17533_v27, %v15297_v58  ;;  %3466 = vst [vmem:[#allocation2 + $0xb8] sm:$0xff] %v3450_v54  ;;  %v15368_v34 = vld [vmem:[%s17417_s0 + $0xd0] sm:$0xff]  ;;  %v17534_v58 = vld [vmem:[#allocation11_spill] sm:$0xff]  ;;  %v17541_v29 = vld [vmem:[#allocation40_spill] sm:$0xff] }
 0x1fd   : > { %v3448_v18 = vsel %vm3432_vm4, %v3400_v41, 0.0  ;;  %v3405_v14 = vmax.f32 %v3389_v37, 0.0  ;;  %v3387_v31 = vadd.f32 %v3336_v8, %v3218_v4  ;;  %v3221_v23 = vadd.f32 %v12142_v35, %v3052_v21  ;;  %v12160_v49 = vpop.f32.mrf.mxu1  ;;  %v17536_v22 = vld [vmem:[#allocation35_spill] sm:$0xff]  ;;  %v3170_v44 = vpop.f32.mrf.mxu0  ;;  %12466 = vmatpush3.bf16.msra.mxu1 %v13308_v5  ;;  %v13312_v41 = vld [vmem:[%s17421_s4 + $0x110] sm:$0xff]  }
 0x1fe   : > { %v2721_v32 = vadd.f32 %v17534_v58, %v2552_v57  ;;  %v2719_v0 = vadd.f32 %v17535_v16, %v2550_v59  ;;  %v3055_v36 = vadd.f32 %v17536_v22, %v2886_v42  ;;  %v2887_v30 = vadd.f32 %v17537_v17, %v2718_v38  ;;  %3464 = vst [vmem:[#allocation2 + $0xa8] sm:$0xff] %v3448_v18  ;;  %v15379_v57 = vld [vmem:[%s17417_s0 + $0xc0] sm:$0xff]  ;;  %v13311_v59 = vld [vmem:[%s17421_s4 + $0xd0] sm:$0xff]   ;;  %v17539_v21 = vld [vmem:[#allocation19_spill] sm:$0xff] }
 0x1ff   : > { %12434 = vmatpush3.bf16.msra.mxu0 %v13307_v48  ;;  %v3453_v15 = vsel %vm3437_vm5, %v3405_v14, 0.0  ;;  %v3403_v43 = vmax.f32 %v3387_v31, 0.0  ;;  %v3390_v46 = vadd.f32 %v12160_v49, %v3221_v23  ;;  %v3219_v1 = vadd.f32 %v3170_v44, %v3050_v11  ;;  %v3339_v63 = vpop.f32.mrf.mxu1  ;;  %v17538_v48 = vld [vmem:[#allocation26_spill] sm:$0xff]  ;;  %v12145_v5 = vpop.f32.mrf.mxu0  ;;  %12467 = vmatprep.subr.bf16.mxu1 %v13310_v55  ;;  %v5302_v18 = vld [vmem:[#allocation2 + $0x7e] sm:$0xff]  ;;  %v5504_v14 = vld [vmem:[#allocation2 + $0x87] sm:$0xff] }
 0x200   : > { %12435 = vmatprep.subr.bf16.mxu0 %v13309_v20  ;;  %v2553_v2 = vadd.f32 %v17539_v21, %v17538_v48  ;;  %v3053_v42 = vadd.f32 %v17540_v26, %v2884_v3  ;;  %v2885_v54 = vadd.f32 %v17541_v29, %v2716_v19  ;;  %3469 = vst [vmem:[#allocation2 + $0xd0] sm:$0xff] %v3453_v15  ;;  %vm3441_vm9 = vcmp.ne.f32.partialorder %v15368_v34, 0.0  ;;  %v17544_v19 = vld [vmem:[#allocation39_spill] sm:$0xff]  ;;  %v17545_v11 = vld [vmem:[#allocation42_spill] sm:$0xff]  ;;  %v13313_v31 = vld [vmem:[%s17421_s4 + $0xc8] sm:$0xff]  }
 0x201   : > { %v3451_v37 = vsel %vm3435_vm6, %v3403_v43, 0.0  ;;  %v3406_v4 = vmax.f32 %v3390_v46, 0.0  ;;  %v3388_v8 = vadd.f32 %v3339_v63, %v3219_v1  ;;  %v3224_v6 = vadd.f32 %v12145_v5, %v3055_v36  ;;  %v12163_v38 = vpop.f32.mrf.mxu1  ;;  %12420 = vmatmul.mubr.bf16.gmra.mxu1 %v15214_v24  ;;  %v3183_v62 = vpop.f32.mrf.mxu0  ;;  %v17546_v23 = vld [vmem:[#allocation12_spill] sm:$0xff]  ;;  %v17547_v49 = vld [vmem:[#allocation41_spill] sm:$0xff]  ;;  %v3426_v43 = vld [vmem:[%s17417_s0 + $0xd8] sm:$0xff] }
 0x202   : > { %12388 = vmatmul.mubr.bf16.gmra.mxu0 %v5309_v33  ;;  %v17543_v33 = vld [vmem:[#allocation22_spill] sm:$0xff]  ;;  %v3056_v25 = vadd.f32 %v17544_v19, %v2887_v30  ;;  %v2890_v27 = vadd.f32 %v17545_v11, %v2721_v32  ;;  %3467 = vst [vmem:[#allocation2 + $0xc0] sm:$0xff] %v3451_v37  ;;  %12423 = vmatprep.mubr.bf16.mxu1 %v15248_v61  ;;  %vm3439_vm10 = vcmp.ne.f32.partialorder %v15379_v57, 0.0  ;;  %v17548_v32 = vld [vmem:[#allocation45_spill] sm:$0xff]  ;;  %v17549_v1 = vld [vmem:[#allocation31_spill] sm:$0xff]  ;;  %vm3442_vm11 = vcmp.ne.f32.partialorder %v3426_v43, 0.0 }
 0x203   : > { %12391 = vmatprep.mubr.bf16.mxu0 %v5310_v28  ;;  %v2551_v45 = vadd.f32 %v17543_v33, %v17542_v7  ;;  %12436 = vmatpush3.bf16.msra.mxu0 %v13309_v20  ;;  %v3454_v3 = vsel %vm3438_vm7, %v3406_v4, 0.0  ;;  %v3404_v9 = vmax.f32 %v3388_v8, 0.0  ;;  %v3393_v13 = vadd.f32 %v12163_v38, %v3224_v6  ;;  %v3352_v35 = vpop.f32.mrf.mxu1  ;;  %v12146_v47 = vpop.f32.mrf.mxu0  ;;  %v5892_v46 = vld [vmem:[#allocation2 + $0x28] sm:$0xff]  ;;  %v17550_v48 = vld [vmem:[#allocation44_spill] sm:$0xff] }
 0x204   : > { %12468 = vmatpush3.bf16.msra.mxu1 %v13310_v55  ;;  %v3222_v28 = vadd.f32 %v3183_v62, %v3053_v42  ;;  %12437 = vmatprep.subr.bf16.mxu0 %v13311_v59  ;;  %v2722_v20 = vadd.f32 %v17546_v23, %v2553_v2  ;;  %v3054_v58 = vadd.f32 %v17547_v49, %v2885_v54  ;;  %v13314_v55 = vld [vmem:[%s17421_s4 + $0x108] sm:$0xff]   ;;  %v5891_v8 = vld [vmem:[#allocation2 + $0x20] sm:$0xff] }
 0x205   : > { %v2888_v16 = vadd.f32 %v17548_v32, %v2719_v0  ;;  %3470 = vst [vmem:[#allocation2 + $0xd8] sm:$0xff] %v3454_v3  ;;  %12469 = vmatprep.subr.bf16.mxu1 %v13312_v41  ;;  %v5311_v22 = vpack.c.bf16 %v5303_v53, %v5302_v18  ;;  %v3452_v36 = vsel %vm3436_vm8, %v3404_v9, 0.0  ;;  %v3409_v17 = vmax.f32 %v3393_v13, 0.0  ;;  %v12164_v15 = vpop.f32.mrf.mxu1  ;;  %v5503_v0 = vld [vmem:[#allocation2 + $0x7f] sm:$0xff]  ;;  %v3186_v10 = vpop.f32.mrf.mxu0  ;;  %v3424_v4 = vld [vmem:[%s17417_s0 + $0xc8] sm:$0xff] }
 0x206   : > { %v3391_v30 = vadd.f32 %v3352_v35, %v3222_v28  ;;  %v3225_v44 = vadd.f32 %v12146_v47, %v3056_v25  ;;  %v2720_v63 = vadd.f32 %v17549_v1, %v2551_v45  ;;  %v3059_v21 = vadd.f32 %v17550_v48, %v2890_v27  ;;  %3468 = vst [vmem:[#allocation2 + $0xc8] sm:$0xff] %v3452_v36  ;;  %v13316_v53 = vld [vmem:[%s17421_s4 + $0x100] sm:$0xff]   ;;  %v13318_v18 = vld [vmem:[%s17421_s4 + $0x1b8] sm:$0xff]   ;;  %v13319_v1 = vld [vmem:[%s17421_s4 + $0x170] sm:$0xff]  }
 0x207   : > { %v2891_v2 = vadd.f32 %v15197_v52, %v2722_v20  ;;  %12438 = vmatpush3.bf16.msra.mxu0 %v13311_v59  ;;  %v15426_v26 = vpack.c.bf16 %v5504_v14, %v5503_v0  ;;  %v3457_v42 = vsel %vm3441_vm9, %v3409_v17, 0.0  ;;  %v3223_v5 = vadd.f32 %v3186_v10, %v3054_v58  ;;  %v3355_v37 = vpop.f32.mrf.mxu1  ;;  %v13315_v52 = vld [vmem:[%s17421_s4 + $0xc0] sm:$0xff]   ;;  %v17551_v59 = vld [vmem:[#allocation46_spill] sm:$0xff]  ;;  %v12149_v38 = vpop.f32.mrf.mxu0  ;;  %v3430_v58 = vld [vmem:[%s17417_s0 + $0xf8] sm:$0xff] }
 0x208   : > { %v3407_v29 = vmax.f32 %v3391_v30, 0.0  ;;  %v3394_v54 = vadd.f32 %v12164_v15, %v3225_v44  ;;  %12470 = vmatpush3.bf16.msra.mxu1 %v13312_v41  ;;  %12439 = vmatprep.subr.bf16.mxu0 %v13313_v31  ;;  %v3057_v6 = vadd.f32 %v17551_v59, %v2888_v16  ;;  %v2889_v34 = vadd.f32 %v15223_v40, %v2720_v63  ;;  %v3429_v40 = vld [vmem:[%s17417_s0 + $0xf0] sm:$0xff]  ;;  %v3427_v28 = vld [vmem:[%s17417_s0 + $0xe0] sm:$0xff]  ;;  %v5894_v32 = vld [vmem:[#allocation2 + $0x38] sm:$0xff] }
 0x209   : > { %3473 = vst [vmem:[#allocation2 + $0xf0] sm:$0xff] %v3457_v42  ;;  %12471 = vmatprep.subr.bf16.mxu1 %v13314_v55  ;;  %v5907_v41 = vpack.c.bf16 %v5892_v46, %v5891_v8  ;;  %v3392_v45 = vadd.f32 %v3355_v37, %v3223_v5  ;;  %v3228_v19 = vadd.f32 %v12149_v38, %v3059_v21  ;;  %v12167_v25 = vpop.f32.mrf.mxu1  ;;  %vm3440_vm12 = vcmp.ne.f32.partialorder %v3424_v4, 0.0  ;;  %v3199_v57 = vpop.f32.mrf.mxu0  ;;  %v3428_v30 = vld [vmem:[%s17417_s0 + $0xe8] sm:$0xff]  ;;  %v5893_v44 = vld [vmem:[#allocation2 + $0x30] sm:$0xff]  ;;  %v5895_v15 = vld [vmem:[#allocation2 + $0x40] sm:$0xff] }
 0x20a   : > { %12392 = vmatmul.mubr.bf16.gmra.mxu0 %v5311_v22  ;;  %v3455_v7 = vsel %vm3439_vm10, %v3407_v29, 0.0  ;;  %v3410_v33 = vmax.f32 %v3394_v54, 0.0  ;;  %12424 = vmatmul.mubr.bf16.gmra.mxu1 %v15426_v26  ;;  %v3060_v11 = vadd.f32 %v15209_v60, %v2891_v2  ;;  %v3226_v9 = vadd.f32 %v3199_v57, %v3057_v6  ;;  %v13317_v60 = vld [vmem:[%s17421_s4 + $0x178] sm:$0xff]   ;;  %v15475_v2 = vld [vmem:[%s17420_s3] ss:$0 sm:$0xff]  ;;  %v13320_v29 = vld [vmem:[%s17421_s4 + $0x1b0] sm:$0xff]  }
 0x20b   : > { %12443 = vmatprep.mubr.bf16.mxu0 %v15164_v12  ;;  %3471 = vst [vmem:[#allocation2 + $0xe0] sm:$0xff] %v3455_v7  ;;  %12440 = vmatpush3.bf16.msra.mxu0 %v13313_v31  ;;  %v3408_v62 = vmax.f32 %v3392_v45, 0.0  ;;  %v3397_v3 = vadd.f32 %v12167_v25, %v3228_v19  ;;  %v3368_v13 = vpop.f32.mrf.mxu1  ;;  %v3058_v12 = vadd.f32 %v15237_v50, %v2889_v34  ;;  %vm3445_vm13 = vcmp.ne.f32.partialorder %v3429_v40, 0.0  ;;  %v12150_v35 = vpop.f32.mrf.mxu0  ;;  %v5896_v50 = vld [vmem:[#allocation2 + $0x48] sm:$0xff]  ;;  %v5897_v40 = vld [vmem:[#allocation2 + $0x50] sm:$0xff] }
 0x20c   : > { %12475 = vmatprep.mubr.bf16.mxu1 %v5907_v41  ;;  %v3458_v27 = vsel %vm3442_vm11, %v3410_v33, 0.0  ;;  %12472 = vmatpush3.bf16.msra.mxu1 %v13314_v55  ;;  %v3395_v23 = vadd.f32 %v3368_v13, %v3226_v9  ;;  %v3229_v20 = vadd.f32 %v12150_v35, %v3060_v11  ;;  %vm3443_vm14 = vcmp.ne.f32.partialorder %v3427_v28, 0.0  ;;  %v13321_v59 = vld [vmem:[%s17421_s4 + $0x168] sm:$0xff]   ;;  %v5898_v41 = vld [vmem:[#allocation2 + $0x58] sm:$0xff] }
 0x20d   : > { %12441 = vmatprep.subr.bf16.mxu0 %v13315_v52  ;;  %3474 = vst [vmem:[#allocation2 + $0xf8] sm:$0xff] %v3458_v27  ;;  %12473 = vmatprep.subr.bf16.mxu1 %v13316_v53  ;;  %v3456_v14 = vsel %vm3440_vm12, %v3408_v62, 0.0  ;;  %v3413_v31 = vmax.f32 %v3397_v3, 0.0  ;;  %v12168_v49 = vpop.f32.mrf.mxu1  ;;  %v3202_v16 = vpop.f32.mrf.mxu0  ;;  %vm3446_vm15 = vcmp.ne.f32.partialorder %v3430_v58, 0.0  ;;  %v5908_v0 = vpack.c.bf16 %v5894_v32, %v5893_v44  ;;  %v5900_v33 = vld [vmem:[#allocation2 + $0x68] sm:$0xff]  ;;  %v5899_v27 = vld [vmem:[#allocation2 + $0x60] sm:$0xff] }
 0x20e   : > { %3472 = vst [vmem:[#allocation2 + $0xe8] sm:$0xff] %v3456_v14  ;;  %v3411_v22 = vmax.f32 %v3395_v23, 0.0  ;;  %v3398_v55 = vadd.f32 %v12168_v49, %v3229_v20  ;;  %v3227_v36 = vadd.f32 %v3202_v16, %v3058_v12  ;;  %v5909_v46 = vpack.c.bf16 %v5896_v50, %v5895_v15  ;;  %v13323_v62 = vld [vmem:[%s17421_s4 + $0x160] sm:$0xff]   ;;  %v5902_v49 = vld [vmem:[#allocation2 + $0x78] sm:$0xff]  ;;  %v5904_v50 = vld [vmem:[#allocation2 + $0x88] sm:$0xff] }
 0x20f   : > { %12442 = vmatpush3.bf16.msra.mxu0 %v13315_v52  ;;  %v3461_v47 = vsel %vm3445_vm13, %v3413_v31, 0.0  ;;  %v3371_v17 = vpop.f32.mrf.mxu1  ;;  %v12173_v43 = vpop.f32.mrf.mxu0  ;;  %vm3444_vm1 = vcmp.ne.f32.partialorder %v3428_v30, 0.0  ;;  %v5910_v57 = vpack.c.bf16 %v5898_v41, %v5897_v40  ;;  %v5911_v28 = vpack.c.bf16 %v5900_v33, %v5899_v27  ;;  %v13326_v58 = vld [vmem:[%s17421_s4 + $0x198] sm:$0xff]   ;;  %v5903_v30 = vld [vmem:[#allocation2 + $0x80] sm:$0xff]  ;;  %v13327_v44 = vld [vmem:[%s17421_s4 + $0x150] sm:$0xff]  }
 0x210   : > { %12474 = vmatpush3.bf16.msra.mxu1 %v13316_v53  ;;  %12491 = vmatprep.subr.bf16.mxu0 %v13317_v60  ;;  %3477 = vst [vmem:[#allocation2 + $0x110] sm:$0xff] %v3461_v47  ;;  %v3459_v63 = vsel %vm3443_vm14, %v3411_v22, 0.0  ;;  %v3414_v48 = vmax.f32 %v3398_v55, 0.0  ;;  %v3396_v21 = vadd.f32 %v3371_v17, %v3227_v36  ;;  %v3634_v10 = vadd.f32 %v15475_v2, %v12173_v43  ;;  %v13322_v53 = vld [vmem:[%s17421_s4 + $0x1a8] sm:$0xff]   ;;  %v5901_v55 = vld [vmem:[#allocation2 + $0x70] sm:$0xff] }
 0x211   : > { %12523 = vmatprep.subr.bf16.mxu1 %v13318_v18  ;;  %v12191_v42 = vpop.f32.mrf.mxu1  ;;  %3475 = vst [vmem:[#allocation2 + $0x100] sm:$0xff] %v3459_v63  ;;  %v3569_v54 = vpop.f32.mrf.mxu0  ;;  %v5912_v17 = vpack.c.bf16 %v5902_v49, %v5901_v55  ;;  %v5905_v33 = vld [vmem:[#allocation2 + $0x90] sm:$0xff] }
 0x212   : > { %12444 = vmatmul.mubr.bf16.vlgmr.msra.gmra.mxu0 %v15178_v56  ;;  %v3462_v5 = vsel %vm3446_vm15, %v3414_v48, 0.0  ;;  %v3412_v37 = vmax.f32 %v3396_v21, 0.0  ;;  %v15484_v4 = vadd.f32 %v12191_v42, %v3634_v10  ;;  %v3632_v8 = vadd.f32 %v15475_v2, %v3569_v54  ;;  %v6092_v54 = vld [vmem:[#allocation2 + $0x21] sm:$0xff] }
 0x213   : > { %12476 = vmatmul.mubr.bf16.vlgmr.msra.gmra.mxu1 %v5908_v0  ;;  %12447 = vmatprep.mubr.bf16.mxu0 %v15199_v39  ;;  %v3738_v56 = vpop.f32.mrf.mxu1  ;;  %3478 = vst [vmem:[#allocation2 + $0x118] sm:$0xff] %v3462_v5  ;;  %v12174_v52 = vpop.f32.mrf.mxu0 }
 0x214   : > { %12479 = vmatprep.mubr.bf16.mxu1 %v5909_v46  ;;  %12492 = vmatpush3.bf16.msra.mxu0 %v13317_v60  ;;  %v3460_v39 = vsel %vm3444_vm1, %v3412_v37, 0.0  ;;  %v15491_v6 = vadd.f32 %v3738_v56, %v3632_v8  ;;  %v3635_v34 = vadd.f32 %v15475_v2, %v12174_v52  ;;  %v13324_v60 = vld [vmem:[%s17421_s4 + $0x1a0] sm:$0xff]   ;;  %v5913_v46 = vpack.c.bf16 %v5904_v50, %v5903_v30  ;;  %v5906_v8 = vld [vmem:[#allocation2 + $0x98] sm:$0xff]  ;;  %v13330_v56 = vld [vmem:[%s17421_s4 + $0x188] sm:$0xff]  }
 0x215   : > { %12524 = vmatpush3.bf16.msra.mxu1 %v13318_v18  ;;  %12493 = vmatprep.subr.bf16.mxu0 %v13319_v1  ;;  %v12192_v38 = vpop.f32.mrf.mxu1  ;;  %3476 = vst [vmem:[#allocation2 + $0x108] sm:$0xff] %v3460_v39  ;;  %v3572_v7 = vpop.f32.mrf.mxu0  ;;  %v6093_v52 = vld [vmem:[#allocation2 + $0x29] sm:$0xff]  ;;  %v5705_v39 = vld [vmem:[#allocation2 + $0x97] sm:$0xff]  ;;  %v6295_v50 = vld [vmem:[#allocation2 + $0x41] sm:$0xff] }
 0x216   : > { %12525 = vmatprep.subr.bf16.mxu1 %v13320_v29  ;;  %v15497_v45 = vadd.f32 %v12192_v38, %v3635_v34  ;;  %v3633_v19 = vadd.f32 %v15475_v2, %v3572_v7  ;;  %v6294_v34 = vld [vmem:[#allocation2 + $0x39] sm:$0xff]  ;;  %v6108_v40 = vpack.c.bf16 %v6093_v52, %v6092_v54  ;;  %v6299_v52 = vld [vmem:[#allocation2 + $0x61] sm:$0xff] }
 0x217   : > { %v3741_v25 = vpop.f32.mrf.mxu1  ;;  %v12177_v11 = vpop.f32.mrf.mxu0 }
 0x218   : > { %12494 = vmatpush3.bf16.msra.mxu0 %v13319_v1  ;;  %v15503_v3 = vadd.f32 %v3741_v25, %v3633_v19  ;;  %v3638_v9 = vadd.f32 %v15475_v2, %v12177_v11  ;;  %v13328_v1 = vld [vmem:[%s17421_s4 + $0x190] sm:$0xff]   ;;  %v5914_v25 = vpack.c.bf16 %v5906_v8, %v5905_v33  ;;  %v13337_v8 = vld [vmem:[%s17421_s4 + $0x1e8] sm:$0xff]  }
 0x219   : > { %12526 = vmatpush3.bf16.msra.mxu1 %v13320_v29  ;;  %12495 = vmatprep.subr.bf16.mxu0 %v13321_v59  ;;  %v12195_v13 = vpop.f32.mrf.mxu1  ;;  %v3585_v12 = vpop.f32.mrf.mxu0  ;;  %v13329_v29 = vld [vmem:[%s17421_s4 + $0x148] sm:$0xff]   ;;  %v6293_v11 = vld [vmem:[#allocation2 + $0x31] sm:$0xff] }
 0x21a   : > { %12448 = vmatmul.mubr.bf16.gmra.mxu0 %v15203_v51  ;;  %12527 = vmatprep.subr.bf16.mxu1 %v13322_v53  ;;  %v15511_v35 = vadd.f32 %v12195_v13, %v3638_v9  ;;  %v3636_v18 = vadd.f32 %v15475_v2, %v3585_v12  ;;  %v13325_v51 = vld [vmem:[%s17421_s4 + $0x158] sm:$0xff]   ;;  %v6309_v13 = vpack.c.bf16 %v6294_v34, %v6293_v11  ;;  %v13339_v11 = vld [vmem:[%s17421_s4 + $0x1e0] sm:$0xff]  }
 0x21b   : > { %12480 = vmatmul.mubr.bf16.gmra.mxu1 %v5910_v57  ;;  %12451 = vmatprep.mubr.bf16.mxu0 %v15214_v24  ;;  %v3754_v14 = vpop.f32.mrf.mxu1  ;;  %v12178_v31 = vpop.f32.mrf.mxu0  ;;  %v13331_v57 = vld [vmem:[%s17421_s4 + $0x140] sm:$0xff]  }
 0x21c   : > { %12483 = vmatprep.mubr.bf16.mxu1 %v5911_v28  ;;  %12496 = vmatpush3.bf16.msra.mxu0 %v13321_v59  ;;  %v15517_v23 = vadd.f32 %v3754_v14, %v3636_v18  ;;  %v3639_v20 = vadd.f32 %v15475_v2, %v12178_v31  ;;  %v13332_v28 = vld [vmem:[%s17421_s4 + $0x180] sm:$0xff]  }
 0x21d   : > { %12528 = vmatpush3.bf16.msra.mxu1 %v13322_v53  ;;  %12497 = vmatprep.subr.bf16.mxu0 %v13323_v62  ;;  %v12196_v24 = vpop.f32.mrf.mxu1  ;;  %v3588_v32 = vpop.f32.mrf.mxu0 }
 0x21e   : > { %12529 = vmatprep.subr.bf16.mxu1 %v13324_v60  ;;  %v15523_v16 = vadd.f32 %v12196_v24, %v3639_v20  ;;  %v3637_v47 = vadd.f32 %v15475_v2, %v3588_v32 }
 0x21f   : > { %v3757_v22 = vpop.f32.mrf.mxu1  ;;  %v12181_v36 = vpop.f32.mrf.mxu0 }
 0x220   : > { %12498 = vmatpush3.bf16.msra.mxu0 %v13323_v62  ;;  %v15529_v15 = vadd.f32 %v3757_v22, %v3637_v47  ;;  %v3642_v43 = vadd.f32 %v15475_v2, %v12181_v36  ;;  %v6296_v47 = vld [vmem:[#allocation2 + $0x49] sm:$0xff] }
 0x221   : > { %12530 = vmatpush3.bf16.msra.mxu1 %v13324_v60  ;;  %12499 = vmatprep.subr.bf16.mxu0 %v13325_v51  ;;  %v12199_v0 = vpop.f32.mrf.mxu1  ;;  %v3601_v63 = vpop.f32.mrf.mxu0 }
 0x222   : > { %12452 = vmatmul.mubr.bf16.gmra.mxu0 %v15248_v61  ;;  %12531 = vmatprep.subr.bf16.mxu1 %v13326_v58  ;;  %v15537_v48 = vadd.f32 %v12199_v0, %v3642_v43  ;;  %v3640_v21 = vadd.f32 %v15475_v2, %v3601_v63  ;;  %v5704_v61 = vld [vmem:[#allocation2 + $0x8f] sm:$0xff] }
 0x223   : > { %12484 = vmatmul.mubr.bf16.gmra.mxu1 %v5912_v17  ;;  %12455 = vmatprep.mubr.bf16.mxu0 %v15426_v26  ;;  %v3770_v10 = vpop.f32.mrf.mxu1  ;;  %v12182_v42 = vpop.f32.mrf.mxu0  ;;  %v5713_v7 = vpack.c.bf16 %v5705_v39, %v5704_v61  ;;  %v6298_v17 = vld [vmem:[#allocation2 + $0x59] sm:$0xff]  ;;  %v13335_v63 = vld [vmem:[%s17421_s4 + $0x1f0] sm:$0xff]  }
 0x224   : > { %12487 = vmatprep.mubr.bf16.mxu1 %v5913_v46  ;;  %12500 = vmatpush3.bf16.msra.mxu0 %v13325_v51  ;;  %v15543_v5 = vadd.f32 %v3770_v10, %v3640_v21  ;;  %v3643_v26 = vadd.f32 %v15475_v2, %v12182_v42  ;;  %v13333_v51 = vld [vmem:[%s17421_s4 + $0x1f8] sm:$0xff]   ;;  %v6310_v46 = vpack.c.bf16 %v6296_v47, %v6295_v50  ;;  %v13336_v10 = vld [vmem:[%s17421_s4 + $0x230] sm:$0xff]  }
 0x225   : > { %12532 = vmatpush3.bf16.msra.mxu1 %v13326_v58  ;;  %12501 = vmatprep.subr.bf16.mxu0 %v13327_v44  ;;  %v12200_v37 = vpop.f32.mrf.mxu1  ;;  %v3604_v59 = vpop.f32.mrf.mxu0  ;;  %v13334_v58 = vld [vmem:[%s17421_s4 + $0x238] sm:$0xff]  }
 0x226   : > { %12533 = vmatprep.subr.bf16.mxu1 %v13328_v1  ;;  %v15549_v38 = vadd.f32 %v12200_v37, %v3643_v26  ;;  %v3641_v41 = vadd.f32 %v15475_v2, %v3604_v59  ;;  %v6300_v59 = vld [vmem:[#allocation2 + $0x69] sm:$0xff] }
 0x227   : > { %v3773_v53 = vpop.f32.mrf.mxu1  ;;  %v12185_v19 = vpop.f32.mrf.mxu0 }
 0x228   : > { %12502 = vmatpush3.bf16.msra.mxu0 %v13327_v44  ;;  %v15555_v27 = vadd.f32 %v3773_v53, %v3641_v41  ;;  %v3646_v62 = vadd.f32 %v15475_v2, %v12185_v19 }
 0x229   : > { %12534 = vmatpush3.bf16.msra.mxu1 %v13328_v1  ;;  %12503 = vmatprep.subr.bf16.mxu0 %v13329_v29  ;;  %v12203_v9 = vpop.f32.mrf.mxu1  ;;  %v3617_v60 = vpop.f32.mrf.mxu0  ;;  %v6297_v1 = vld [vmem:[#allocation2 + $0x51] sm:$0xff] }
 0x22a   : > { %12456 = vmatmul.mubr.bf16.gmra.mxu0 %v5713_v7  ;;  %12535 = vmatprep.subr.bf16.mxu1 %v13330_v56  ;;  %v15561_v12 = vadd.f32 %v12203_v9, %v3646_v62  ;;  %v3644_v18 = vadd.f32 %v15475_v2, %v3617_v60  ;;  %v6311_v21 = vpack.c.bf16 %v6298_v17, %v6297_v1  ;;  %v13340_v62 = vld [vmem:[%s17421_s4 + $0x220] sm:$0xff]   ;;  %v13344_v1 = vld [vmem:[%s17421_s4 + $0x210] sm:$0xff]  }
 0x22b   : > { %12488 = vmatmul.mubr.bf16.gmra.mxu1 %v5914_v25  ;;  %12507 = vmatprep.mubr.bf16.mxu0 %v6108_v40  ;;  %v3786_v14 = vpop.f32.mrf.mxu1  ;;  %v12186_v31 = vpop.f32.mrf.mxu0  ;;  %v6312_v25 = vpack.c.bf16 %v6300_v59, %v6299_v52  ;;  %v6301_v40 = vld [vmem:[#allocation2 + $0x71] sm:$0xff] }
 0x22c   : > { %12504 = vmatpush3.bf16.msra.mxu0 %v13329_v29  ;;  %12539 = vmatprep.mubr.bf16.mxu1 %v6309_v13  ;;  %v15567_v20 = vadd.f32 %v3786_v14, %v3644_v18  ;;  %v3647_v24 = vadd.f32 %v15475_v2, %v12186_v31  ;;  %v13341_v31 = vld [vmem:[%s17421_s4 + $0x1d8] sm:$0xff]  }
 0x22d   : > { %12536 = vmatpush3.bf16.msra.mxu1 %v13330_v56  ;;  %12505 = vmatprep.subr.bf16.mxu0 %v13331_v57  ;;  %v12204_v49 = vpop.f32.mrf.mxu1  ;;  %v3620_v32 = vpop.f32.mrf.mxu0 }
 0x22e   : > { %12537 = vmatprep.subr.bf16.mxu1 %v13332_v28  ;;  %v15573_v22 = vadd.f32 %v12204_v49, %v3647_v24  ;;  %v3645_v55 = vadd.f32 %v15475_v2, %v3620_v32  ;;  %v6303_v24 = vld [vmem:[#allocation2 + $0x81] sm:$0xff]  ;;  %v6304_v49 = vld [vmem:[#allocation2 + $0x89] sm:$0xff] }
 0x22f   : > { %v3789_v36 = vpop.f32.mrf.mxu1  ;;  %v12209_v30 = vpop.f32.mrf.mxu0 }
 0x230   : > { %12506 = vmatpush3.bf16.msra.mxu0 %v13331_v57  ;;  %v15576_v44 = vadd.f32 %v3789_v36, %v3645_v55  ;;  %v3972_v43 = vadd.f32 %v12209_v30, %v15484_v4  ;;  %v6314_v30 = vpack.c.bf16 %v6304_v49, %v6303_v24  ;;  %v6496_v24 = vld [vmem:[#allocation2 + $0x42] sm:$0xff]  ;;  %v6497_v49 = vld [vmem:[#allocation2 + $0x4a] sm:$0xff] }
 0x231   : > { %12538 = vmatpush3.bf16.msra.mxu1 %v13332_v28  ;;  %12555 = vmatprep.subr.bf16.mxu0 %v13333_v51  ;;  %v12227_v0 = vpop.f32.mrf.mxu1  ;;  %v3907_v2 = vpop.f32.mrf.mxu0 }
 0x232   : > { %12587 = vmatprep.subr.bf16.mxu1 %v13334_v58  ;;  %v15585_v42 = vadd.f32 %v12227_v0, %v3972_v43  ;;  %v3970_v4 = vadd.f32 %v3907_v2, %v15491_v6  ;;  %v13338_v6 = vld [vmem:[%s17421_s4 + $0x228] sm:$0xff]   ;;  %v6305_v43 = vld [vmem:[#allocation2 + $0x91] sm:$0xff] }
 0x233   : > { %12508 = vmatmul.mubr.bf16.vlgmr.msra.gmra.mxu0 %v6309_v13  ;;  %v4076_v61 = vpop.f32.mrf.mxu1  ;;  %v12210_v29 = vpop.f32.mrf.mxu0  ;;  %v13343_v0 = vld [vmem:[%s17421_s4 + $0x1d0] sm:$0xff]  }
 0x234   : > { %12540 = vmatmul.mubr.bf16.vlgmr.msra.gmra.mxu1 %v6310_v46  ;;  %12511 = vmatprep.mubr.bf16.mxu0 %v6310_v46  ;;  %v15588_v54 = vadd.f32 %v4076_v61, %v3970_v4  ;;  %v3973_v26 = vadd.f32 %v12210_v29, %v15497_v45  ;;  %v6302_v45 = vld [vmem:[#allocation2 + $0x79] sm:$0xff]  ;;  %v13345_v29 = vld [vmem:[%s17421_s4 + $0x1c8] sm:$0xff]  }
 0x235   : > { %12543 = vmatprep.mubr.bf16.mxu1 %v6311_v21  ;;  %12556 = vmatpush3.bf16.msra.mxu0 %v13333_v51  ;;  %v12228_v37 = vpop.f32.mrf.mxu1  ;;  %v3910_v56 = vpop.f32.mrf.mxu0 }
 0x236   : > { %12588 = vmatpush3.bf16.msra.mxu1 %v13334_v58  ;;  %12557 = vmatprep.subr.bf16.mxu0 %v13335_v63  ;;  %v15597_v39 = vadd.f32 %v12228_v37, %v3973_v26  ;;  %v3971_v34 = vadd.f32 %v3910_v56, %v15503_v3  ;;  %v6313_v3 = vpack.c.bf16 %v6302_v45, %v6301_v40  ;;  %v6495_v26 = vld [vmem:[#allocation2 + $0x3a] sm:$0xff]  ;;  %v13346_v56 = vld [vmem:[%s17421_s4 + $0x208] sm:$0xff]  }
 0x237   : > { %12589 = vmatprep.subr.bf16.mxu1 %v13336_v10  ;;  %v4079_v41 = vpop.f32.mrf.mxu1  ;;  %v12213_v53 = vpop.f32.mrf.mxu0  ;;  %v6695_v40 = vld [vmem:[#allocation2 + $0x33] sm:$0xff] }
 0x238   : > { %v15600_v7 = vadd.f32 %v4079_v41, %v3971_v34  ;;  %v3976_v33 = vadd.f32 %v12213_v53, %v15511_v35  ;;  %v6696_v34 = vld [vmem:[#allocation2 + $0x3b] sm:$0xff] }
 0x239   : > { %12558 = vmatpush3.bf16.msra.mxu0 %v13335_v63  ;;  %v12231_v19 = vpop.f32.mrf.mxu1  ;;  %v3923_v57 = vpop.f32.mrf.mxu0 }
 0x23a   : > { %12590 = vmatpush3.bf16.msra.mxu1 %v13336_v10  ;;  %12559 = vmatprep.subr.bf16.mxu0 %v13337_v8  ;;  %v15609_v9 = vadd.f32 %v12231_v19, %v3976_v33  ;;  %v3974_v35 = vadd.f32 %v3923_v57, %v15517_v23  ;;  %v13342_v23 = vld [vmem:[%s17421_s4 + $0x218] sm:$0xff]   ;;  %v13348_v57 = vld [vmem:[%s17421_s4 + $0x200] sm:$0xff]  }
 0x23b   : > { %12512 = vmatmul.mubr.bf16.gmra.mxu0 %v6311_v21  ;;  %12591 = vmatprep.subr.bf16.mxu1 %v13338_v6  ;;  %v4092_v13 = vpop.f32.mrf.mxu1  ;;  %v12214_v28 = vpop.f32.mrf.mxu0 }
 0x23c   : > { %12544 = vmatmul.mubr.bf16.gmra.mxu1 %v6312_v25  ;;  %12515 = vmatprep.mubr.bf16.mxu0 %v6312_v25  ;;  %v15612_v60 = vadd.f32 %v4092_v13, %v3974_v35  ;;  %v3977_v18 = vadd.f32 %v12214_v28, %v15523_v16  ;;  %v6306_v16 = vld [vmem:[#allocation2 + $0x99] sm:$0xff] }
 0x23d   : > { %12547 = vmatprep.mubr.bf16.mxu1 %v6313_v3  ;;  %12560 = vmatpush3.bf16.msra.mxu0 %v13337_v8  ;;  %v12232_v14 = vpop.f32.mrf.mxu1  ;;  %v3926_v51 = vpop.f32.mrf.mxu0  ;;  %v6307_v8 = vld [vmem:[#allocation2 + $0xa1] sm:$0xff] }
 0x23e   : > { %12592 = vmatpush3.bf16.msra.mxu1 %v13338_v6  ;;  %12561 = vmatprep.subr.bf16.mxu0 %v13339_v11  ;;  %v15621_v58 = vadd.f32 %v12232_v14, %v3977_v18  ;;  %v3975_v32 = vadd.f32 %v3926_v51, %v15529_v15  ;;  %v6315_v15 = vpack.c.bf16 %v6306_v16, %v6305_v43  ;;  %v6494_v6 = vld [vmem:[#allocation2 + $0x32] sm:$0xff] }
 0x23f   : > { %12593 = vmatprep.subr.bf16.mxu1 %v13340_v62  ;;  %v4095_v50 = vpop.f32.mrf.mxu1  ;;  %v12217_v47 = vpop.f32.mrf.mxu0  ;;  %v6510_v45 = vpack.c.bf16 %v6495_v26, %v6494_v6  ;;  %v6698_v16 = vld [vmem:[#allocation2 + $0x4b] sm:$0xff] }
 0x240   : > { %v15624_v55 = vadd.f32 %v4095_v50, %v3975_v32  ;;  %v3980_v36 = vadd.f32 %v12217_v47, %v15537_v48  ;;  %v6499_v47 = vld [vmem:[#allocation2 + $0x5a] sm:$0xff]  ;;  %v6702_v6 = vld [vmem:[#allocation2 + $0x6b] sm:$0xff] }
 0x241   : > { %12562 = vmatpush3.bf16.msra.mxu0 %v13339_v11  ;;  %v12235_v17 = vpop.f32.mrf.mxu1  ;;  %v3939_v46 = vpop.f32.mrf.mxu0  ;;  %v13347_v11 = vld [vmem:[%s17421_s4 + $0x1c0] sm:$0xff]  }
 0x242   : > { %12594 = vmatpush3.bf16.msra.mxu1 %v13340_v62  ;;  %12563 = vmatprep.subr.bf16.mxu0 %v13341_v31  ;;  %v15633_v63 = vadd.f32 %v12235_v17, %v3980_v36  ;;  %v3978_v48 = vadd.f32 %v3939_v46, %v15543_v5  ;;  %v6308_v5 = vld [vmem:[#allocation2 + $0xa9] sm:$0xff]  ;;  %v6700_v17 = vld [vmem:[#allocation2 + $0x5b] sm:$0xff] }
 0x243   : > { %12516 = vmatmul.mubr.bf16.gmra.mxu0 %v6313_v3  ;;  %12595 = vmatprep.subr.bf16.mxu1 %v13342_v23  ;;  %v4108_v21 = vpop.f32.mrf.mxu1  ;;  %v12218_v2 = vpop.f32.mrf.mxu0  ;;  %v6316_v25 = vpack.c.bf16 %v6308_v5, %v6307_v8  ;;  %v6501_v5 = vld [vmem:[#allocation2 + $0x6a] sm:$0xff] }
 0x244   : > { %12548 = vmatmul.mubr.bf16.gmra.mxu1 %v6314_v30  ;;  %12519 = vmatprep.mubr.bf16.mxu0 %v6314_v30  ;;  %v15636_v10 = vadd.f32 %v4108_v21, %v3978_v48  ;;  %v3981_v4 = vadd.f32 %v12218_v2, %v15549_v38  ;;  %v13351_v21 = vld [vmem:[%s17421_s4 + $0x30] sm:$0xff]  }
 0x245   : > { %12551 = vmatprep.mubr.bf16.mxu1 %v6315_v15  ;;  %12564 = vmatpush3.bf16.msra.mxu0 %v13341_v31  ;;  %v12236_v61 = vpop.f32.mrf.mxu1  ;;  %v3942_v37 = vpop.f32.mrf.mxu0  ;;  %v13349_v31 = vld [vmem:[%s17421_s4 + $0x38] sm:$0xff]  }
 0x246   : > { %12596 = vmatpush3.bf16.msra.mxu1 %v13342_v23  ;;  %12565 = vmatprep.subr.bf16.mxu0 %v13343_v0  ;;  %v15645_v52 = vadd.f32 %v12236_v61, %v3981_v4  ;;  %v3979_v59 = vadd.f32 %v3942_v37, %v15555_v27  ;;  %v6711_v27 = vpack.c.bf16 %v6696_v34, %v6695_v40  ;;  %v13352_v61 = vld [vmem:[%s17421_s4 + $0x70] sm:$0xff]   ;;  %v6500_v37 = vld [vmem:[#allocation2 + $0x62] sm:$0xff] }
 0x247   : > { %12597 = vmatprep.subr.bf16.mxu1 %v13344_v1  ;;  %v4111_v38 = vpop.f32.mrf.mxu1  ;;  %v12221_v41 = vpop.f32.mrf.mxu0  ;;  %v13354_v34 = vld [vmem:[%s17421_s4 + $0x68] sm:$0xff]   ;;  %v6502_v40 = vld [vmem:[#allocation2 + $0x72] sm:$0xff] }
 0x248   : > { %v15648_v53 = vadd.f32 %v4111_v38, %v3979_v59  ;;  %v3984_v33 = vadd.f32 %v12221_v41, %v15561_v12  ;;  %v13353_v59 = vld [vmem:[%s17421_s4 + $0x28] sm:$0xff]   ;;  %v6503_v41 = vld [vmem:[#allocation2 + $0x7a] sm:$0xff] }
 0x249   : > { %12566 = vmatpush3.bf16.msra.mxu0 %v13343_v0  ;;  %v12239_v19 = vpop.f32.mrf.mxu1  ;;  %v3955_v3 = vpop.f32.mrf.mxu0  ;;  %v6511_v0 = vpack.c.bf16 %v6497_v49, %v6496_v24  ;;  %v6505_v49 = vld [vmem:[#allocation2 + $0x8a] sm:$0xff] }
 0x24a   : > { %12598 = vmatpush3.bf16.msra.mxu1 %v13344_v1  ;;  %17552 = vst [vmem:[#allocation21_spill] sm:$0xff] %v15648_v53  ;;  %12567 = vmatprep.subr.bf16.mxu0 %v13345_v29  ;;  %v15657_v62 = vadd.f32 %v12239_v19, %v3984_v33  ;;  %v3982_v12 = vadd.f32 %v3955_v3, %v15567_v20  ;;  %v13350_v20 = vld [vmem:[%s17421_s4 + $0x78] sm:$0xff]  }
 0x24b   : > { %12520 = vmatmul.mubr.bf16.gmra.mxu0 %v6315_v15  ;;  %12599 = vmatprep.subr.bf16.mxu1 %v13346_v56  ;;  %v4124_v35 = vpop.f32.mrf.mxu1  ;;  %v12222_v13 = vpop.f32.mrf.mxu0  ;;  %v6498_v15 = vld [vmem:[#allocation2 + $0x52] sm:$0xff]  ;;  %v6704_v33 = vld [vmem:[#allocation2 + $0x7b] sm:$0xff] }
 0x24c   : > { %17553 = vst [vmem:[#allocation14_spill] sm:$0xff] %v15657_v62  ;;  %12552 = vmatmul.mubr.bf16.gmra.mxu1 %v6316_v25  ;;  %12571 = vmatprep.mubr.bf16.mxu0 %v6510_v45  ;;  %v15660_v28 = vadd.f32 %v4124_v35, %v3982_v12  ;;  %v3985_v18 = vadd.f32 %v12222_v13, %v15573_v22  ;;  %v6697_v22 = vld [vmem:[#allocation2 + $0x43] sm:$0xff]  ;;  %v6703_v3 = vld [vmem:[#allocation2 + $0x73] sm:$0xff] }
 0x24d   : > { %12568 = vmatpush3.bf16.msra.mxu0 %v13345_v29  ;;  %12603 = vmatprep.mubr.bf16.mxu1 %v6711_v27  ;;  %v12240_v14 = vpop.f32.mrf.mxu1  ;;  %v3958_v51 = vpop.f32.mrf.mxu0  ;;  %v6712_v46 = vpack.c.bf16 %v6698_v16, %v6697_v22  ;;  %v6512_v1 = vpack.c.bf16 %v6499_v47, %v6498_v15  ;;  %v6513_v25 = vpack.c.bf16 %v6501_v5, %v6500_v37  ;;  %v13355_v12 = vld [vmem:[%s17421_s4 + $0x20] sm:$0xff]   ;;  %v6706_v22 = vld [vmem:[#allocation2 + $0x8b] sm:$0xff]  ;;  %v13358_v16 = vld [vmem:[%s17421_s4 + $0x58] sm:$0xff]  }
 0x24e   : > { %12600 = vmatpush3.bf16.msra.mxu1 %v13346_v56  ;;  %17554 = vst [vmem:[#allocation10_spill] sm:$0xff] %v15660_v28  ;;  %12569 = vmatprep.subr.bf16.mxu0 %v13347_v11  ;;  %v15669_v23 = vadd.f32 %v12240_v14, %v3985_v18  ;;  %v3983_v32 = vadd.f32 %v3958_v51, %v15576_v44  ;;  %v6699_v44 = vld [vmem:[#allocation2 + $0x53] sm:$0xff]  ;;  %v6701_v56 = vld [vmem:[#allocation2 + $0x63] sm:$0xff] }
 0x24f   : > { %12601 = vmatprep.subr.bf16.mxu1 %v13348_v57  ;;  %v4127_v50 = vpop.f32.mrf.mxu1  ;;  %v15672_v36 = vpop.f32.mrf.mxu0  ;;  %v6713_v2 = vpack.c.bf16 %v6700_v17, %v6699_v44  ;;  %v6514_v27 = vpack.c.bf16 %v6503_v41, %v6502_v40  ;;  %v6715_v35 = vpack.c.bf16 %v6704_v33, %v6703_v3  ;;  %v13356_v18 = vld [vmem:[%s17421_s4 + $0x60] sm:$0xff]   ;;  %v13359_v37 = vld [vmem:[%s17421_s4 + $0x10] sm:$0xff]  }
 0x250   : > { %17555 = vst [vmem:[#allocation9_spill] sm:$0xff] %v15669_v23  ;;  %v15674_v30 = vadd.f32 %v4127_v50, %v3983_v32  ;;  %v6504_v51 = vld [vmem:[#allocation2 + $0x82] sm:$0xff]  ;;  %v13357_v32 = vld [vmem:[%s17421_s4 + $0x18] sm:$0xff]   ;;  %v6928_v41 = vld [vmem:[#allocation2 + $0x8d] sm:$0xff] }
 0x251   : > { %12570 = vmatpush3.bf16.msra.mxu0 %v13347_v11  ;;  %v15676_v43 = vpop.f32.mrf.mxu1  ;;  %v15678_v48 = vpop.f32.mrf.mxu0  ;;  %v6714_v11 = vpack.c.bf16 %v6702_v6, %v6701_v56  ;;  %v6507_v47 = vld [vmem:[#allocation2 + $0x9a] sm:$0xff]  ;;  %v6509_v40 = vld [vmem:[#allocation2 + $0xaa] sm:$0xff] }
 0x252   : > { %12602 = vmatpush3.bf16.msra.mxu1 %v13348_v57  ;;  %17556 = vst [vmem:[#allocation30_spill] sm:$0xff] %v15674_v30  ;;  %12619 = vmatprep.subr.bf16.mxu0 %v13349_v31  ;;  %v6709_v3 = vld [vmem:[#allocation2 + $0xa3] sm:$0xff]  ;;  %v7138_v28 = vld [vmem:[#allocation2 + $0xd6] sm:$0xff] }
 0x253   : > { %12651 = vmatprep.subr.bf16.mxu1 %v13350_v20  ;;  %v15683_v4 = vpop.f32.mrf.mxu1  ;;  %v15688_v29 = vpop.f32.mrf.mxu0 }
 0x254   : > { %12572 = vmatmul.mubr.bf16.vlgmr.msra.gmra.mxu0 %v6511_v0  ;;  %v6708_v0 = vld [vmem:[#allocation2 + $0x9b] sm:$0xff] }
 0x255   : > { %12604 = vmatmul.mubr.bf16.vlgmr.msra.gmra.mxu1 %v6712_v46  ;;  %12575 = vmatprep.mubr.bf16.mxu0 %v6512_v1  ;;  %v15690_v26 = vpop.f32.mrf.mxu1  ;;  %v15692_v8 = vpop.f32.mrf.mxu0  ;;  %v6515_v46 = vpack.c.bf16 %v6505_v49, %v6504_v51  ;;  %v6506_v1 = vld [vmem:[#allocation2 + $0x92] sm:$0xff] }
 0x256   : > { %12607 = vmatprep.mubr.bf16.mxu1 %v6713_v2  ;;  %12620 = vmatpush3.bf16.msra.mxu0 %v13349_v31  ;;  %v6707_v2 = vld [vmem:[#allocation2 + $0x93] sm:$0xff] }
 0x257   : > { %12652 = vmatpush3.bf16.msra.mxu1 %v13350_v20  ;;  %12621 = vmatprep.subr.bf16.mxu0 %v13351_v21  ;;  %v15697_v38 = vpop.f32.mrf.mxu1  ;;  %v15702_v45 = vpop.f32.mrf.mxu0  ;;  %v6705_v20 = vld [vmem:[#allocation2 + $0x83] sm:$0xff]  ;;  %v6717_v5 = vpack.c.bf16 %v6708_v0, %v6707_v2  ;;  %v7129_v51 = vld [vmem:[#allocation2 + $0x8e] sm:$0xff] }
 0x258   : > { %12653 = vmatprep.subr.bf16.mxu1 %v13352_v61  ;;  %v6716_v44 = vpack.c.bf16 %v6706_v22, %v6705_v20 }
 0x259   : > { %v15704_v19 = vpop.f32.mrf.mxu1  ;;  %v15706_v57 = vpop.f32.mrf.mxu0 }
 0x25a   : > { %12622 = vmatpush3.bf16.msra.mxu0 %v13351_v21  ;;  %v6516_v21 = vpack.c.bf16 %v6507_v47, %v6506_v1  ;;  %v7130_v47 = vld [vmem:[#allocation2 + $0x96] sm:$0xff] }
 0x25b   : > { %12654 = vmatpush3.bf16.msra.mxu1 %v13352_v61  ;;  %12623 = vmatprep.subr.bf16.mxu0 %v13353_v59  ;;  %v15711_v13 = vpop.f32.mrf.mxu1  ;;  %v15716_v14 = vpop.f32.mrf.mxu0  ;;  %v7145_v1 = vpack.c.bf16 %v7130_v47, %v7129_v51  ;;  %v6930_v51 = vld [vmem:[#allocation2 + $0x9d] sm:$0xff] }
 0x25c   : > { %12576 = vmatmul.mubr.bf16.gmra.mxu0 %v6513_v25  ;;  %12655 = vmatprep.subr.bf16.mxu1 %v13354_v34  ;;  %v6508_v25 = vld [vmem:[#allocation2 + $0xa2] sm:$0xff] }
 0x25d   : > { %12608 = vmatmul.mubr.bf16.gmra.mxu1 %v6714_v11  ;;  %12579 = vmatprep.mubr.bf16.mxu0 %v6514_v27  ;;  %v15718_v31 = vpop.f32.mrf.mxu1  ;;  %v15720_v24 = vpop.f32.mrf.mxu0  ;;  %v13361_v11 = vld [vmem:[%s17421_s4 + $0x8] sm:$0xff]   ;;  %v6517_v20 = vpack.c.bf16 %v6509_v40, %v6508_v25  ;;  %v13366_v40 = vld [vmem:[%s17421_s4 + $0xf8] sm:$0xff]  }
 0x25e   : > { %12611 = vmatprep.mubr.bf16.mxu1 %v6715_v35  ;;  %12624 = vmatpush3.bf16.msra.mxu0 %v13353_v59  ;;  %v13360_v59 = vld [vmem:[%s17421_s4 + $0x50] sm:$0xff]   ;;  %v13362_v35 = vld [vmem:[%s17421_s4 + $0x48] sm:$0xff]  }
 0x25f   : > { %12656 = vmatpush3.bf16.msra.mxu1 %v13354_v34  ;;  %12625 = vmatprep.subr.bf16.mxu0 %v13355_v12  ;;  %v15725_v50 = vpop.f32.mrf.mxu1  ;;  %v15730_v17 = vpop.f32.mrf.mxu0  ;;  %v6931_v25 = vld [vmem:[#allocation2 + $0xa5] sm:$0xff] }
 0x260   : > { %12657 = vmatprep.subr.bf16.mxu1 %v13356_v18 }
 0x261   : > { %v15732_v15 = vpop.f32.mrf.mxu1  ;;  %v15734_v61 = vpop.f32.mrf.mxu0 }
 0x262   : > { %12626 = vmatpush3.bf16.msra.mxu0 %v13355_v12  ;;  %v6710_v12 = vld [vmem:[#allocation2 + $0xab] sm:$0xff] }
 0x263   : > { %12658 = vmatpush3.bf16.msra.mxu1 %v13356_v18  ;;  %12627 = vmatprep.subr.bf16.mxu0 %v13357_v32  ;;  %v15739_v56 = vpop.f32.mrf.mxu1  ;;  %v15744_v6 = vpop.f32.mrf.mxu0  ;;  %v6718_v22 = vpack.c.bf16 %v6710_v12, %v6709_v3  ;;  %v7132_v3 = vld [vmem:[#allocation2 + $0xa6] sm:$0xff] }
 0x264   : > { %12580 = vmatmul.mubr.bf16.gmra.mxu0 %v6515_v46  ;;  %12659 = vmatprep.subr.bf16.mxu1 %v13358_v16  ;;  %17557 = vst [vmem:[#allocation13_spill] sm:$0xff] %v15739_v56  ;;  %v13363_v46 = vld [vmem:[%s17421_s4] sm:$0xff]   ;;  %v6932_v12 = vld [vmem:[#allocation2 + $0xad] sm:$0xff] }
 0x265   : > { %12612 = vmatmul.mubr.bf16.gmra.mxu1 %v6716_v44  ;;  %12583 = vmatprep.mubr.bf16.mxu0 %v6516_v21  ;;  %v15746_v34 = vpop.f32.mrf.mxu1  ;;  %v15748_v33 = vpop.f32.mrf.mxu0  ;;  %v13364_v21 = vld [vmem:[%s17421_s4 + $0x40] sm:$0xff]   ;;  %v13375_v56 = vld [vmem:[%s17421_s4 + $0x90] sm:$0xff]  }
 0x266   : > { %12615 = vmatprep.mubr.bf16.mxu1 %v6717_v5  ;;  %12628 = vmatpush3.bf16.msra.mxu0 %v13357_v32  ;;  %17558 = vst [vmem:[#allocation23_spill] sm:$0xff] %v15746_v34  ;;  %17559 = vst [vmem:[#allocation16_spill] sm:$0xff] %v15748_v33  ;;  %v6929_v32 = vld [vmem:[#allocation2 + $0x95] sm:$0xff] }
 0x267   : > { %12660 = vmatpush3.bf16.msra.mxu1 %v13358_v16  ;;  %12629 = vmatprep.subr.bf16.mxu0 %v13359_v37  ;;  %v15753_v27 = vpop.f32.mrf.mxu1  ;;  %v15758_v18 = vpop.f32.mrf.mxu0  ;;  %v6944_v16 = vpack.c.bf16 %v6929_v32, %v6928_v41  ;;  %v6945_v32 = vpack.c.bf16 %v6931_v25, %v6930_v51  ;;  %v6935_v51 = vld [vmem:[#allocation2 + $0xc5] sm:$0xff]  ;;  %v7142_v33 = vld [vmem:[#allocation2 + $0xf6] sm:$0xff] }
 0x268   : > { %12661 = vmatprep.subr.bf16.mxu1 %v13360_v59  ;;  %17560 = vst [vmem:[#allocation17_spill] sm:$0xff] %v15753_v27  ;;  %17561 = vst [vmem:[#allocation24_spill] sm:$0xff] %v15758_v18  ;;  %v13371_v18 = vld [vmem:[%s17421_s4 + $0xa0] sm:$0xff]  }
 0x269   : > { %v15760_v49 = vpop.f32.mrf.mxu1  ;;  %v15762_v0 = vpop.f32.mrf.mxu0 }
 0x26a   : > { %12630 = vmatpush3.bf16.msra.mxu0 %v13359_v37  ;;  %17562 = vst [vmem:[#allocation32_spill] sm:$0xff] %v15760_v49  ;;  %17563 = vst [vmem:[#allocation43_spill] sm:$0xff] %v15762_v0 }
 0x26b   : > { %12662 = vmatpush3.bf16.msra.mxu1 %v13360_v59  ;;  %12631 = vmatprep.subr.bf16.mxu0 %v13361_v11  ;;  %v15767_v44 = vpop.f32.mrf.mxu1  ;;  %v15772_v2 = vpop.f32.mrf.mxu0  ;;  %v13365_v59 = vld [vmem:[%s17421_s4 + $0xb8] sm:$0xff]  }
 0x26c   : > { %12584 = vmatmul.mubr.bf16.gmra.mxu0 %v6517_v20  ;;  %12663 = vmatprep.subr.bf16.mxu1 %v13362_v35  ;;  %17564 = vst [vmem:[#allocation28_spill] sm:$0xff] %v15767_v44  ;;  %17565 = vst [vmem:[#allocation20_spill] sm:$0xff] %v15772_v2  ;;  %v7133_v20 = vld [vmem:[#allocation2 + $0xae] sm:$0xff] }
 0x26d   : > { %12616 = vmatmul.mubr.bf16.gmra.mxu1 %v6718_v22  ;;  %12635 = vmatprep.mubr.bf16.mxu0 %v6944_v16  ;;  %v15774_v37 = vpop.f32.mrf.mxu1  ;;  %v15776_v5 = vpop.f32.mrf.mxu0  ;;  %v7131_v22 = vld [vmem:[#allocation2 + $0x9e] sm:$0xff]  ;;  %v6933_v16 = vld [vmem:[#allocation2 + $0xb5] sm:$0xff] }
 0x26e   : > { %12632 = vmatpush3.bf16.msra.mxu0 %v13361_v11  ;;  %12667 = vmatprep.mubr.bf16.mxu1 %v7145_v1  ;;  %17566 = vst [vmem:[#allocation25_spill] sm:$0xff] %v15774_v37  ;;  %17567 = vst [vmem:[#allocation34_spill] sm:$0xff] %v15776_v5  ;;  %v7146_v1 = vpack.c.bf16 %v7132_v3, %v7131_v22  ;;  %v7134_v37 = vld [vmem:[#allocation2 + $0xb6] sm:$0xff]  ;;  %v7137_v22 = vld [vmem:[#allocation2 + $0xce] sm:$0xff] }
 0x26f   : > { %12664 = vmatpush3.bf16.msra.mxu1 %v13362_v35  ;;  %12633 = vmatprep.subr.bf16.mxu0 %v13363_v46  ;;  %v15781_v41 = vpop.f32.mrf.mxu1  ;;  %v15786_v11 = vpop.f32.mrf.mxu0  ;;  %v7147_v30 = vpack.c.bf16 %v7134_v37, %v7133_v20  ;;  %v13369_v37 = vld [vmem:[%s17421_s4 + $0xa8] sm:$0xff]   ;;  %v6937_v2 = vld [vmem:[#allocation2 + $0xd5] sm:$0xff]  ;;  %v7149_v62 = vpack.c.bf16 %v7138_v28, %v7137_v22 }
 0x270   : > { %12665 = vmatprep.subr.bf16.mxu1 %v13364_v21  ;;  %17568 = vst [vmem:[#allocation18_spill] sm:$0xff] %v15781_v41  ;;  %v6946_v41 = vpack.c.bf16 %v6933_v16, %v6932_v12  ;;  %v13373_v28 = vld [vmem:[%s17421_s4 + $0x98] sm:$0xff]   ;;  %v7141_v22 = vld [vmem:[#allocation2 + $0xee] sm:$0xff] }
 0x271   : > { %v15788_v35 = vpop.f32.mrf.mxu1  ;;  %v15790_v47 = vpop.f32.mrf.mxu0 }
 0x272   : > { %12634 = vmatpush3.bf16.msra.mxu0 %v13363_v46  ;;  %v13367_v46 = vld [vmem:[%s17421_s4 + $0xb0] sm:$0xff]  }
 0x273   : > { %12666 = vmatpush3.bf16.msra.mxu1 %v13364_v21  ;;  %12683 = vmatprep.subr.bf16.mxu0 %v13365_v59  ;;  %v15792_v5 = vpop.f32.mrf.mxu1  ;;  %v15797_v44 = vpop.f32.mrf.mxu0  ;;  %v13368_v21 = vld [vmem:[%s17421_s4 + $0xf0] sm:$0xff]  }
 0x274   : > { %12715 = vmatprep.subr.bf16.mxu1 %v13366_v40 }
 0x275   : > { %12636 = vmatmul.mubr.bf16.vlgmr.msra.gmra.mxu0 %v6945_v32  ;;  %v15802_v25 = vpop.f32.mrf.mxu1  ;;  %v15804_v3 = vpop.f32.mrf.mxu0  ;;  %v7136_v32 = vld [vmem:[#allocation2 + $0xc6] sm:$0xff] }
 0x276   : > { %12668 = vmatmul.mubr.bf16.vlgmr.msra.gmra.mxu1 %v7146_v1  ;;  %12639 = vmatprep.mubr.bf16.mxu0 %v6946_v41  ;;  %v7135_v1 = vld [vmem:[#allocation2 + $0xbe] sm:$0xff] }
 0x277   : > { %12671 = vmatprep.mubr.bf16.mxu1 %v7147_v30  ;;  %12684 = vmatpush3.bf16.msra.mxu0 %v13365_v59  ;;  %v15806_v12 = vpop.f32.mrf.mxu1  ;;  %v15811_v20 = vpop.f32.mrf.mxu0  ;;  %v13370_v30 = vld [vmem:[%s17421_s4 + $0xe8] sm:$0xff]   ;;  %v7148_v49 = vpack.c.bf16 %v7136_v32, %v7135_v1  ;;  %v7139_v1 = vld [vmem:[#allocation2 + $0xde] sm:$0xff] }
 0x278   : > { %12716 = vmatpush3.bf16.msra.mxu1 %v13366_v40  ;;  %12685 = vmatprep.subr.bf16.mxu0 %v13367_v46  ;;  %v6936_v59 = vld [vmem:[#allocation2 + $0xcd] sm:$0xff]  ;;  %v6934_v40 = vld [vmem:[#allocation2 + $0xbd] sm:$0xff] }
 0x279   : > { %12717 = vmatprep.subr.bf16.mxu1 %v13368_v21  ;;  %v15816_v41 = vpop.f32.mrf.mxu1  ;;  %v6947_v16 = vpack.c.bf16 %v6935_v51, %v6934_v40  ;;  %v15818_v23 = vpop.f32.mrf.mxu0  ;;  %v6948_v0 = vpack.c.bf16 %v6937_v2, %v6936_v59  ;;  %v13372_v51 = vld [vmem:[%s17421_s4 + $0xe0] sm:$0xff]  }
 0x27a   : > { %v6939_v59 = vld [vmem:[#allocation2 + $0xe5] sm:$0xff] }
 0x27b   : > { %12686 = vmatpush3.bf16.msra.mxu0 %v13367_v46  ;;  %v15820_v27 = vpop.f32.mrf.mxu1  ;;  %v15825_v46 = vpop.f32.mrf.mxu0 }
 0x27c   : > { %12718 = vmatpush3.bf16.msra.mxu1 %v13368_v21  ;;  %12687 = vmatprep.subr.bf16.mxu0 %v13369_v37 }
 0x27d   : > { %12640 = vmatmul.mubr.bf16.gmra.mxu0 %v6947_v16  ;;  %12719 = vmatprep.subr.bf16.mxu1 %v13370_v30  ;;  %v15830_v21 = vpop.f32.mrf.mxu1  ;;  %v15832_v2 = vpop.f32.mrf.mxu0 }
 0x27e   : > { %12672 = vmatmul.mubr.bf16.gmra.mxu1 %v7148_v49  ;;  %12643 = vmatprep.mubr.bf16.mxu0 %v6948_v0  ;;  %17569 = vst [vmem:[#allocation27_spill] sm:$0xff] %v15830_v21  ;;  %v7140_v49 = vld [vmem:[#allocation2 + $0xe6] sm:$0xff] }
 0x27f   : > { %12675 = vmatprep.mubr.bf16.mxu1 %v7149_v62  ;;  %12688 = vmatpush3.bf16.msra.mxu0 %v13369_v37  ;;  %v15834_v32 = vpop.f32.mrf.mxu1  ;;  %v15839_v40 = vpop.f32.mrf.mxu0  ;;  %v13374_v62 = vld [vmem:[%s17421_s4 + $0xd8] sm:$0xff]   ;;  %v6940_v0 = vld [vmem:[#allocation2 + $0xed] sm:$0xff]  ;;  %v7150_v21 = vpack.c.bf16 %v7140_v49, %v7139_v1 }
 0x280   : > { %12720 = vmatpush3.bf16.msra.mxu1 %v13370_v30  ;;  %12689 = vmatprep.subr.bf16.mxu0 %v13371_v18  ;;  %17570 = vst [vmem:[#allocation33_spill] sm:$0xff] %v15834_v32  ;;  %17571 = vst [vmem:[#allocation36_spill] sm:$0xff] %v15839_v40  ;;  %v6938_v30 = vld [vmem:[#allocation2 + $0xdd] sm:$0xff]  ;;  %v6941_v32 = vld [vmem:[#allocation2 + $0xf5] sm:$0xff] }
 0x281   : > { %12721 = vmatprep.subr.bf16.mxu1 %v13372_v51  ;;  %v15844_v37 = vpop.f32.mrf.mxu1  ;;  %v6949_v16 = vpack.c.bf16 %v6939_v59, %v6938_v30  ;;  %v15846_v34 = vpop.f32.mrf.mxu0  ;;  %v6950_v40 = vpack.c.bf16 %v6941_v32, %v6940_v0  ;;  %v13376_v59 = vld [vmem:[%s17421_s4 + $0xd0] sm:$0xff]   ;;  %v7532_v1 = vld [vmem:[#allocation2 + $0xa7] sm:$0xff] }
 0x282   : > { %17572 = vst [vmem:[#allocation11_spill] sm:$0xff] %v15844_v37  ;;  %v7151_v37 = vpack.c.bf16 %v7142_v33, %v7141_v22  ;;  %v7330_v0 = vld [vmem:[#allocation2 + $0x8f] sm:$0xff]  ;;  %v4308_v33 = vadd.f32 %v15678_v48, %v15588_v54  ;;  %v6943_v22 = vld [vmem:[#allocation2 + $0x105] sm:$0xff]  ;;  %v4311_v48 = vadd.f32 %v15688_v29, %v15597_v39 }
 0x283   : > { %12690 = vmatpush3.bf16.msra.mxu0 %v13371_v18  ;;  %v15848_v53 = vpop.f32.mrf.mxu1  ;;  %v15853_v18 = vpop.f32.mrf.mxu0  ;;  %v7531_v39 = vld [vmem:[#allocation2 + $0x9f] sm:$0xff] }
 0x284   : > { %12722 = vmatpush3.bf16.msra.mxu1 %v13372_v51  ;;  %12691 = vmatprep.subr.bf16.mxu0 %v13373_v28  ;;  %17573 = vst [vmem:[#allocation29_spill] sm:$0xff] %v15848_v53  ;;  %17574 = vst [vmem:[#allocation35_spill] sm:$0xff] %v15853_v18  ;;  %v4310_v51 = vadd.f32 %v15672_v36, %v15585_v42  ;;  %v13377_v42 = vld [vmem:[%s17421_s4 + $0x88] sm:$0xff]   ;;  %v4477_v53 = vadd.f32 %v15683_v4, %v4308_v33 }
 0x285   : > { %12644 = vmatmul.mubr.bf16.gmra.mxu0 %v6949_v16  ;;  %12723 = vmatprep.subr.bf16.mxu1 %v13374_v62  ;;  %v15860_v32 = vpop.f32.mrf.mxu1  ;;  %v15862_v49 = vpop.f32.mrf.mxu0  ;;  %v7144_v16 = vld [vmem:[#allocation2 + $0x106] sm:$0xff]  ;;  %v4309_v18 = vadd.f32 %v15692_v8, %v15600_v7  ;;  %v15894_v4 = vpack.c.bf16 %v7532_v1, %v7531_v39 }
 0x286   : > { %12676 = vmatmul.mubr.bf16.gmra.mxu1 %v7150_v21  ;;  %12647 = vmatprep.mubr.bf16.mxu0 %v6950_v40  ;;  %17575 = vst [vmem:[#allocation38_spill] sm:$0xff] %v15860_v32  ;;  %17576 = vst [vmem:[#allocation26_spill] sm:$0xff] %v15862_v49  ;;  %v13378_v21 = vld [vmem:[%s17421_s4 + $0xc8] sm:$0xff]   ;;  %v4479_v54 = vadd.f32 %v15676_v43, %v4310_v51  ;;  %v13380_v8 = vld [vmem:[%s17421_s4 + $0xc0] sm:$0xff]  }
 0x287   : > { %12679 = vmatprep.mubr.bf16.mxu1 %v7151_v37  ;;  %12692 = vmatpush3.bf16.msra.mxu0 %v13373_v28  ;;  %v15866_v30 = vpop.f32.mrf.mxu1  ;;  %v15871_v36 = vpop.f32.mrf.mxu0  ;;  %v7331_v28 = vld [vmem:[#allocation2 + $0x97] sm:$0xff]  ;;  %v7533_v51 = vld [vmem:[#allocation2 + $0xaf] sm:$0xff] }
 0x288   : > { %12724 = vmatpush3.bf16.msra.mxu1 %v13374_v62  ;;  %12693 = vmatprep.subr.bf16.mxu0 %v13375_v56  ;;  %17577 = vst [vmem:[#allocation19_spill] sm:$0xff] %v15866_v30  ;;  %17578 = vst [vmem:[#allocation37_spill] sm:$0xff] %v15871_v36  ;;  %v6942_v62 = vld [vmem:[#allocation2 + $0xfd] sm:$0xff]  ;;  %v7346_v49 = vpack.c.bf16 %v7331_v28, %v7330_v0  ;;  %v4648_v43 = vadd.f32 %v15786_v11, %v4479_v54  ;;  %v7540_v54 = vld [vmem:[#allocation2 + $0xe7] sm:$0xff] }
 0x289   : > { %12725 = vmatprep.subr.bf16.mxu1 %v13376_v59  ;;  %v15879_v40 = vpop.f32.mrf.mxu1  ;;  %v7143_v37 = vld [vmem:[#allocation2 + $0xfe] sm:$0xff]  ;;  %v6951_v30 = vpack.c.bf16 %v6943_v22, %v6942_v62  ;;  %v15881_v36 = vpop.f32.mrf.mxu0  ;;  %v4314_v0 = vadd.f32 %v15702_v45, %v15609_v9  ;;  %v4480_v11 = vadd.f32 %v15690_v26, %v4311_v48  ;;  %v7536_v9 = vld [vmem:[#allocation2 + $0xc7] sm:$0xff]  ;;  %v7537_v45 = vld [vmem:[#allocation2 + $0xcf] sm:$0xff]  ;;  %v4315_v62 = vadd.f32 %v15716_v14, %v15621_v58 }
 0x28a   : > { %v7152_v32 = vpack.c.bf16 %v7144_v16, %v7143_v37  ;;  %v7534_v22 = vld [vmem:[#allocation2 + $0xb7] sm:$0xff]  ;;  %v5016_v58 = vld [vmem:[%s17417_s0 + $0x100] sm:$0xff] }
 0x28b   : > { %12694 = vmatpush3.bf16.msra.mxu0 %v13375_v56  ;;  %v15887_v29 = vpop.f32.mrf.mxu1  ;;  %v13379_v56 = vld [vmem:[%s17421_s4 + $0x80] sm:$0xff]   ;;  %v15896_v7 = vpop.f32.mrf.mxu0  ;;  %v5018_v26 = vld [vmem:[%s17417_s0 + $0x110] sm:$0xff]  ;;  %v4649_v28 = vadd.f32 %v15797_v44, %v4480_v11  ;;  %v4483_v48 = vadd.f32 %v15704_v19, %v4314_v0  ;;  %v13382_v44 = vld [vmem:[%s17421_s4 + $0x178] sm:$0xff]   ;;  %vm5032_vm2 = vcmp.ne.f32.partialorder %v5016_v58, 0.0 }
 0x28c   : > { %12726 = vmatpush3.bf16.msra.mxu1 %v13376_v59  ;;  %12695 = vmatprep.subr.bf16.mxu0 %v13377_v42  ;;  %v4646_v59 = vadd.f32 %v15790_v47, %v4477_v53  ;;  %v7548_v53 = vpack.c.bf16 %v7534_v22, %v7533_v51  ;;  %v7535_v47 = vld [vmem:[#allocation2 + $0xbf] sm:$0xff]  ;;  %vm5034_vm0 = vcmp.ne.f32.partialorder %v5018_v26, 0.0  ;;  %v4313_v51 = vadd.f32 %v15720_v24, %v15624_v55 }
 0x28d   : > { %12648 = vmatmul.mubr.bf16.gmra.mxu0 %v6951_v30  ;;  %12727 = vmatprep.subr.bf16.mxu1 %v13378_v21  ;;  %v15903_v33 = vpop.f32.mrf.mxu1  ;;  %v4312_v30 = vadd.f32 %v15706_v57, %v15612_v60  ;;  %v15908_v16 = vpop.f32.mrf.mxu0  ;;  %v13381_v57 = vld [vmem:[%s17421_s4 + $0x138] sm:$0xff]   ;;  %v4652_v0 = vadd.f32 %v15811_v20, %v4483_v48  ;;  %v4484_v24 = vadd.f32 %v15718_v31, %v4315_v62  ;;  %v17582_v58 = vld [vmem:[#allocation36_spill] sm:$0xff] }
 0x28e   : > { %12680 = vmatmul.mubr.bf16.gmra.mxu1 %v7152_v32  ;;  %12699 = vmatprep.mubr.bf16.mxu0 %v7346_v49  ;;  %v4478_v32 = vadd.f32 %v15697_v38, %v4309_v18  ;;  %v4817_v49 = vadd.f32 %v15788_v35, %v4648_v43  ;;  %v15927_v35 = vpack.c.bf16 %v7536_v9, %v7535_v47  ;;  %v7539_v14 = vld [vmem:[#allocation2 + $0xdf] sm:$0xff] }
 0x28f   : > { %12696 = vmatpush3.bf16.msra.mxu0 %v13377_v42  ;;  %12731 = vmatprep.mubr.bf16.mxu1 %v15894_v4  ;;  %v15916_v60 = vpop.f32.mrf.mxu1  ;;  %v7538_v42 = vld [vmem:[#allocation2 + $0xd7] sm:$0xff]  ;;  %v12317_v38 = vpop.f32.mrf.mxu0  ;;  %v4815_v37 = vadd.f32 %v15792_v5, %v4646_v59  ;;  %v4481_v39 = vadd.f32 %v15711_v13, %v4312_v30  ;;  %v15942_v11 = vpack.c.bf16 %v7540_v54, %v7539_v14 }
 0x290   : > { %12728 = vmatpush3.bf16.msra.mxu1 %v13378_v21  ;;  %12697 = vmatprep.subr.bf16.mxu0 %v13379_v56  ;;  %v15929_v18 = vpack.c.bf16 %v7538_v42, %v7537_v45  ;;  %v7541_v21 = vld [vmem:[#allocation2 + $0xef] sm:$0xff]  ;;  %v4647_v1 = vadd.f32 %v15804_v3, %v4478_v32  ;;  %v4986_v43 = vadd.f32 %v12317_v38, %v4817_v49  ;;  %v7542_v3 = vld [vmem:[#allocation2 + $0xf7] sm:$0xff] }
 0x291   : > { %12729 = vmatprep.subr.bf16.mxu1 %v13380_v8  ;;  %v15933_v19 = vpop.f32.mrf.mxu1  ;;  %v4921_v5 = vpop.f32.mrf.mxu0  ;;  %v4818_v59 = vadd.f32 %v15802_v25, %v4649_v28  ;;  %v5019_v13 = vld [vmem:[%s17417_s0 + $0x118] sm:$0xff]  ;;  %v15950_v55 = vpack.c.bf16 %v7542_v3, %v7541_v21  ;;  %v4318_v20 = vadd.f32 %v15730_v17, %v15633_v63  ;;  %v13384_v63 = vld [vmem:[%s17421_s4 + $0x170] sm:$0xff]   ;;  %v4482_v17 = vadd.f32 %v15725_v50, %v4313_v51 }
 0x292   : > { %v5002_v22 = vmax.f32 %v4986_v43, 0.0  ;;  %v4984_v9 = vadd.f32 %v4921_v5, %v4815_v37  ;;  %v4816_v30 = vadd.f32 %v15806_v12, %v4647_v1  ;;  %v4316_v12 = vadd.f32 %v15734_v61, %v15636_v10  ;;  %v5022_v10 = vld [vmem:[%s17417_s0 + $0x130] sm:$0xff]  ;;  %v17580_v1 = vld [vmem:[#allocation21_spill] sm:$0xff]  ;;  %v17581_v43 = vld [vmem:[#allocation16_spill] sm:$0xff] }
 0x293   : > { %12698 = vmatpush3.bf16.msra.mxu0 %v13379_v56  ;;  %v15945_v45 = vpop.f32.mrf.mxu1  ;;  %v4650_v56 = vadd.f32 %v15818_v23, %v4481_v39  ;;  %v12318_v25 = vpop.f32.mrf.mxu0  ;;  %v5017_v23 = vld [vmem:[%s17417_s0 + $0x108] sm:$0xff]  ;;  %v4821_v26 = vadd.f32 %v15816_v41, %v4652_v0  ;;  %vm5035_vm3 = vcmp.ne.f32.partialorder %v5019_v13, 0.0  ;;  %v4653_v28 = vadd.f32 %v15825_v46, %v4484_v24  ;;  %v17583_v51 = vld [vmem:[#allocation27_spill] sm:$0xff] }
 0x294   : > { %12730 = vmatpush3.bf16.msra.mxu1 %v13380_v8  ;;  %12747 = vmatprep.subr.bf16.mxu0 %v13381_v57  ;;  %v13383_v8 = vld [vmem:[%s17421_s4 + $0x130] sm:$0xff]   ;;  %v5050_v47 = vsel %vm5034_vm0, %v5002_v22, 0.0  ;;  %v5000_v32 = vmax.f32 %v4984_v9, 0.0  ;;  %v4987_v31 = vadd.f32 %v12318_v25, %v4818_v59  ;;  %v4487_v61 = vadd.f32 %v15732_v15, %v4318_v20  ;;  %v5023_v9 = vld [vmem:[%s17417_s0 + $0x138] sm:$0xff] }
 0x295   : > { %12779 = vmatprep.subr.bf16.mxu1 %v13382_v44  ;;  %v15962_v49 = vpop.f32.mrf.mxu1  ;;  %5066 = vst [vmem:[#allocation2 + $0x130] sm:$0xff] %v5050_v47  ;;  %v4319_v41 = vadd.f32 %v15744_v6, %v15645_v52  ;;  %v4819_v46 = vadd.f32 %v15820_v27, %v4650_v56  ;;  %vm5033_vm4 = vcmp.ne.f32.partialorder %v5017_v23, 0.0  ;;  %v4651_v62 = vadd.f32 %v15832_v2, %v4482_v17  ;;  %v13386_v52 = vld [vmem:[%s17421_s4 + $0x168] sm:$0xff]   ;;  %v5020_v6 = vld [vmem:[%s17417_s0 + $0x120] sm:$0xff]  ;;  %v17584_v13 = vld [vmem:[#allocation23_spill] sm:$0xff] }
 0x296   : > { %12700 = vmatmul.mubr.bf16.vlgmr.msra.gmra.mxu0 %v15894_v4  ;;  %v4924_v4 = vpop.f32.mrf.mxu0  ;;  %v5048_v42 = vsel %vm5032_vm2, %v5000_v32, 0.0  ;;  %v5003_v54 = vmax.f32 %v4987_v31, 0.0  ;;  %v17579_v27 = vld [vmem:[#allocation13_spill] sm:$0xff]  ;;  %v4317_v2 = vadd.f32 %v17581_v43, %v17580_v1  ;;  %v4656_v14 = vadd.f32 %v17582_v58, %v4487_v61  ;;  %v17585_v20 = vld [vmem:[#allocation14_spill] sm:$0xff]  ;;  %v17586_v56 = vld [vmem:[#allocation24_spill] sm:$0xff] }
 0x297   : > { %12732 = vmatmul.mubr.bf16.vlgmr.msra.gmra.mxu1 %v7548_v53  ;;  %12703 = vmatprep.mubr.bf16.mxu0 %v7548_v53  ;;  %v4985_v48 = vadd.f32 %v4924_v4, %v4816_v30  ;;  %v15977_v50 = vpop.f32.mrf.mxu1  ;;  %5064 = vst [vmem:[#allocation2 + $0x120] sm:$0xff] %v5048_v42  ;;  %vm5038_vm5 = vcmp.ne.f32.partialorder %v5022_v10, 0.0  ;;  %v4822_v0 = vadd.f32 %v17583_v51, %v4653_v28  ;;  %vm5036_vm6 = vcmp.ne.f32.partialorder %v5020_v6, 0.0  ;;  %v13387_v47 = vld [vmem:[%s17421_s4 + $0x120] sm:$0xff]   ;;  %v17587_v32 = vld [vmem:[#allocation33_spill] sm:$0xff]  ;;  %v17589_v42 = vld [vmem:[#allocation10_spill] sm:$0xff] }
 0x298   : > { %12735 = vmatprep.mubr.bf16.mxu1 %v15927_v35  ;;  %12748 = vmatpush3.bf16.msra.mxu0 %v13381_v57  ;;  %v12321_v53 = vpop.f32.mrf.mxu0  ;;  %v13385_v57 = vld [vmem:[%s17421_s4 + $0x128] sm:$0xff]   ;;  %v5051_v38 = vsel %vm5035_vm3, %v5003_v54, 0.0  ;;  %v4488_v24 = vadd.f32 %v17584_v13, %v4319_v41  ;;  %v4322_v25 = vadd.f32 %v17586_v56, %v17585_v20  ;;  %v4820_v31 = vadd.f32 %v17587_v32, %v4651_v62  ;;  %v17590_v54 = vld [vmem:[#allocation43_spill] sm:$0xff]  ;;  %v17595_v1 = vld [vmem:[#allocation20_spill] sm:$0xff] }
 0x299   : > { %12780 = vmatpush3.bf16.msra.mxu1 %v13382_v44  ;;  %12749 = vmatprep.subr.bf16.mxu0 %v13383_v8  ;;  %v5001_v15 = vmax.f32 %v4985_v48, 0.0  ;;  %v4990_v21 = vadd.f32 %v12321_v53, %v4821_v26  ;;  %v15991_v37 = vpop.f32.mrf.mxu1  ;;  %v4485_v44 = vadd.f32 %v17579_v27, %v4316_v12  ;;  %5067 = vst [vmem:[#allocation2 + $0x138] sm:$0xff] %v5051_v38  ;;  %v17588_v4 = vld [vmem:[#allocation17_spill] sm:$0xff]  ;;  %v17591_v10 = vld [vmem:[#allocation11_spill] sm:$0xff]  ;;  %vm5039_vm7 = vcmp.ne.f32.partialorder %v5023_v9, 0.0  ;;  %v17593_v27 = vld [vmem:[#allocation32_spill] sm:$0xff] }
 0x29a   : > { %12781 = vmatprep.subr.bf16.mxu1 %v13384_v63  ;;  %v4937_v39 = vpop.f32.mrf.mxu0  ;;  %v4486_v28 = vadd.f32 %v17588_v4, %v4317_v2  ;;  %v4320_v48 = vadd.f32 %v17590_v54, %v17589_v42  ;;  %v17592_v41 = vld [vmem:[#allocation35_spill] sm:$0xff]  ;;  %v17596_v2 = vld [vmem:[#allocation29_spill] sm:$0xff]  ;;  %v5024_v13 = vld [vmem:[%s17417_s0 + $0x140] sm:$0xff] }
 0x29b   : > { %v5049_v5 = vsel %vm5033_vm4, %v5001_v15, 0.0  ;;  %v5006_v3 = vmax.f32 %v4990_v21, 0.0  ;;  %v4988_v59 = vadd.f32 %v4937_v39, %v4819_v46  ;;  %v16005_v22 = vpop.f32.mrf.mxu1  ;;  %v4654_v30 = vadd.f32 %v15846_v34, %v4485_v44  ;;  %v13388_v34 = vld [vmem:[%s17421_s4 + $0x160] sm:$0xff]   ;;  %v5026_v21 = vld [vmem:[%s17417_s0 + $0x150] sm:$0xff]  ;;  %v13389_v6 = vld [vmem:[%s17421_s4 + $0x118] sm:$0xff]  }
 0x29c   : > { %12750 = vmatpush3.bf16.msra.mxu0 %v13383_v8  ;;  %5065 = vst [vmem:[#allocation2 + $0x128] sm:$0xff] %v5049_v5  ;;  %v12322_v8 = vpop.f32.mrf.mxu0  ;;  %v4657_v46 = vadd.f32 %v17592_v41, %v4488_v24  ;;  %v4491_v44 = vadd.f32 %v17593_v27, %v4322_v25  ;;  %v17598_v24 = vld [vmem:[#allocation28_spill] sm:$0xff]  ;;  %v17599_v56 = vld [vmem:[#allocation30_spill] sm:$0xff]  ;;  %vm5042_vm9 = vcmp.ne.f32.partialorder %v5026_v21, 0.0  ;;  %v5027_v54 = vld [vmem:[%s17417_s0 + $0x158] sm:$0xff]  ;;  %vm5040_vm10 = vcmp.ne.f32.partialorder %v5024_v13, 0.0 }
 0x29d   : > { %12782 = vmatpush3.bf16.msra.mxu1 %v13384_v63  ;;  %12751 = vmatprep.subr.bf16.mxu0 %v13385_v57  ;;  %v5054_v23 = vsel %vm5038_vm5, %v5006_v3, 0.0  ;;  %v5004_v17 = vmax.f32 %v4988_v59, 0.0  ;;  %v4991_v12 = vadd.f32 %v12322_v8, %v4822_v0  ;;  %v16020_v26 = vpop.f32.mrf.mxu1  ;;  %v5021_v63 = vld [vmem:[%s17417_s0 + $0x128] sm:$0xff]  ;;  %v4823_v58 = vadd.f32 %v17596_v2, %v4654_v30  ;;  %v17600_v25 = vld [vmem:[#allocation34_spill] sm:$0xff]  ;;  %v7543_v4 = vld [vmem:[#allocation2 + $0xff] sm:$0xff] }
 0x29e   : > { %12704 = vmatmul.mubr.bf16.gmra.mxu0 %v15927_v35  ;;  %12783 = vmatprep.subr.bf16.mxu1 %v13386_v52  ;;  %v4825_v35 = vadd.f32 %v17591_v10, %v4656_v14  ;;  %5070 = vst [vmem:[#allocation2 + $0x150] sm:$0xff] %v5054_v23  ;;  %v4940_v61 = vpop.f32.mrf.mxu0  ;;  %vm5037_vm8 = vcmp.ne.f32.partialorder %v5021_v63, 0.0  ;;  %v17597_v14 = vld [vmem:[#allocation26_spill] sm:$0xff]  ;;  %v7544_v59 = vld [vmem:[#allocation2 + $0x107] sm:$0xff]  ;;  %v4489_v20 = vadd.f32 %v17598_v24, %v4320_v48  ;;  %v17604_v41 = vld [vmem:[#allocation19_spill] sm:$0xff]  ;;  %vm5043_vm11 = vcmp.ne.f32.partialorder %v5027_v54, 0.0 }
 0x29f   : > { %12736 = vmatmul.mubr.bf16.gmra.mxu1 %v15929_v18  ;;  %12707 = vmatprep.mubr.bf16.mxu0 %v15929_v18  ;;  %v5052_v53 = vsel %vm5036_vm6, %v5004_v17, 0.0  ;;  %v5007_v62 = vmax.f32 %v4991_v12, 0.0  ;;  %v4989_v38 = vadd.f32 %v4940_v61, %v4820_v31  ;;  %v16037_v15 = vpop.f32.mrf.mxu1  ;;  %v17594_v18 = vld [vmem:[#allocation9_spill] sm:$0xff]  ;;  %v4655_v39 = vadd.f32 %v17597_v14, %v4486_v28  ;;  %v17602_v31 = vld [vmem:[#allocation38_spill] sm:$0xff]  ;;  %v13395_v54 = vld [vmem:[%s17421_s4 + $0x100] sm:$0xff]  }
 0x2a0   : > { %12739 = vmatprep.mubr.bf16.mxu1 %v15942_v11  ;;  %12752 = vmatpush3.bf16.msra.mxu0 %v13385_v57  ;;  %v4323_v43 = vadd.f32 %v17595_v1, %v17594_v18  ;;  %5068 = vst [vmem:[#allocation2 + $0x140] sm:$0xff] %v5052_v53  ;;  %v12325_v57 = vpop.f32.mrf.mxu0  ;;  %v4321_v9 = vadd.f32 %v17600_v25, %v17599_v56  ;;  %v17601_v30 = vld [vmem:[#allocation37_spill] sm:$0xff]  ;;  %v13391_v63 = vld [vmem:[%s17421_s4 + $0x110] sm:$0xff]  }
 0x2a1   : > { %12784 = vmatpush3.bf16.msra.mxu1 %v13386_v52  ;;  %12753 = vmatprep.subr.bf16.mxu0 %v13387_v47  ;;  %v5055_v51 = vsel %vm5039_vm7, %v5007_v62, 0.0  ;;  %v5005_v0 = vmax.f32 %v4989_v38, 0.0  ;;  %v4994_v5 = vadd.f32 %v12325_v57, %v4825_v35  ;;  %v16051_v3 = vpop.f32.mrf.mxu1  ;;  %v13390_v52 = vld [vmem:[%s17421_s4 + $0x158] sm:$0xff]   ;;  %v4660_v8 = vadd.f32 %v17601_v30, %v4491_v44  ;;  %v17603_v48 = vld [vmem:[#allocation25_spill] sm:$0xff]  ;;  %v13392_v38 = vld [vmem:[%s17421_s4 + $0x150] sm:$0xff]  }
 0x2a2   : > { %12785 = vmatprep.subr.bf16.mxu1 %v13388_v34  ;;  %5071 = vst [vmem:[#allocation2 + $0x158] sm:$0xff] %v5055_v51  ;;  %v4953_v32 = vpop.f32.mrf.mxu0  ;;  %v4826_v23 = vadd.f32 %v17602_v31, %v4657_v46  ;;  %v4492_v10 = vadd.f32 %v17603_v48, %v4323_v43  ;;  %v4658_v35 = vadd.f32 %v15881_v36, %v4489_v20  ;;  %v5025_v27 = vld [vmem:[%s17417_s0 + $0x148] sm:$0xff]  ;;  %v17605_v44 = vld [vmem:[#allocation18_spill] sm:$0xff]  ;;  %v5028_v20 = vld [vmem:[%s17417_s0 + $0x160] sm:$0xff] }
 0x2a3   : > { %v5053_v17 = vsel %vm5037_vm8, %v5005_v0, 0.0  ;;  %v5010_v12 = vmax.f32 %v4994_v5, 0.0  ;;  %v4992_v28 = vadd.f32 %v4953_v32, %v4823_v58  ;;  %v16065_v42 = vpop.f32.mrf.mxu1  ;;  %v16072_v61 = vpack.c.bf16 %v7544_v59, %v7543_v4  ;;  %v7733_v14 = vld [vmem:[#allocation2 + $0xa8] sm:$0xff]  ;;  %v7546_v30 = vld [vmem:[#allocation2 + $0x117] sm:$0xff] }
 0x2a4   : > { %12754 = vmatpush3.bf16.msra.mxu0 %v13387_v47  ;;  %5069 = vst [vmem:[#allocation2 + $0x148] sm:$0xff] %v5053_v17  ;;  %v12326_v47 = vpop.f32.mrf.mxu0  ;;  %v4824_v46 = vadd.f32 %v17604_v41, %v4655_v39  ;;  %v4490_v18 = vadd.f32 %v17605_v44, %v4321_v9  ;;  %v4829_v21 = vadd.f32 %v15879_v40, %v4660_v8  ;;  %v5030_v40 = vld [vmem:[%s17417_s0 + $0x170] sm:$0xff]  ;;  %vm5041_vm12 = vcmp.ne.f32.partialorder %v5025_v27, 0.0  ;;  %v7933_v39 = vld [vmem:[#allocation2 + $0xa1] sm:$0xff]  ;;  %v16124_v17 = vld [vmem:[%s17422_s5] ss:$0 sm:$0xff] }
 0x2a5   : > { %12786 = vmatpush3.bf16.msra.mxu1 %v13388_v34  ;;  %12755 = vmatprep.subr.bf16.mxu0 %v13389_v6  ;;  %v5058_v53 = vsel %vm5042_vm9, %v5010_v12, 0.0  ;;  %v5008_v62 = vmax.f32 %v4992_v28, 0.0  ;;  %v4995_v36 = vadd.f32 %v12326_v47, %v4826_v23  ;;  %v16080_v34 = vpop.f32.mrf.mxu1  ;;  %v4661_v1 = vadd.f32 %v15896_v7, %v4492_v10  ;;  %v7934_v51 = vld [vmem:[#allocation2 + $0xa9] sm:$0xff]  ;;  %v7732_v8 = vld [vmem:[#allocation2 + $0xa0] sm:$0xff]  ;;  %v5031_v23 = vld [vmem:[%s17417_s0 + $0x178] sm:$0xff] }
 0x2a6   : > { %12708 = vmatmul.mubr.bf16.gmra.mxu0 %v15942_v11  ;;  %12787 = vmatprep.subr.bf16.mxu1 %v13390_v52  ;;  %5074 = vst [vmem:[#allocation2 + $0x170] sm:$0xff] %v5058_v53  ;;  %v4956_v11 = vpop.f32.mrf.mxu0  ;;  %v4659_v0 = vadd.f32 %v15908_v16, %v4490_v18  ;;  %vm5046_vm13 = vcmp.ne.f32.partialorder %v5030_v40, 0.0  ;;  %v7748_v12 = vpack.c.bf16 %v7733_v14, %v7732_v8  ;;  %vm5044_vm14 = vcmp.ne.f32.partialorder %v5028_v20, 0.0  ;;  %v13396_v41 = vld [vmem:[%s17421_s4 + $0x140] sm:$0xff]   ;;  %v13397_v44 = vld [vmem:[%s17421_s4 + $0x1b8] sm:$0xff]   ;;  %v7734_v40 = vld [vmem:[#allocation2 + $0xb0] sm:$0xff] }
 0x2a7   : > { %12740 = vmatmul.mubr.bf16.gmra.mxu1 %v15950_v55  ;;  %12711 = vmatprep.mubr.bf16.mxu0 %v15950_v55  ;;  %v5056_v43 = vsel %vm5040_vm10, %v5008_v62, 0.0  ;;  %v5011_v2 = vmax.f32 %v4995_v36, 0.0  ;;  %v4993_v58 = vadd.f32 %v4956_v11, %v4824_v46  ;;  %v16095_v57 = vpop.f32.mrf.mxu1  ;;  %v4827_v55 = vadd.f32 %v15887_v29, %v4658_v35  ;;  %v7545_v29 = vld [vmem:[#allocation2 + $0x10f] sm:$0xff] }
 0x2a8   : > { %12743 = vmatprep.mubr.bf16.mxu1 %v16072_v61  ;;  %12756 = vmatpush3.bf16.msra.mxu0 %v13389_v6  ;;  %5072 = vst [vmem:[#allocation2 + $0x160] sm:$0xff] %v5056_v43  ;;  %v12329_v7 = vpop.f32.mrf.mxu0  ;;  %v13393_v6 = vld [vmem:[%s17421_s4 + $0x108] sm:$0xff]   ;;  %v4830_v16 = vadd.f32 %v15903_v33, %v4661_v1  ;;  %v7554_v33 = vpack.c.bf16 %v7546_v30, %v7545_v29  ;;  %vm5047_vm15 = vcmp.ne.f32.partialorder %v5031_v23, 0.0  ;;  %v7735_v43 = vld [vmem:[#allocation2 + $0xb8] sm:$0xff]  ;;  %v13399_v30 = vld [vmem:[%s17421_s4 + $0x1b0] sm:$0xff]  }
 0x2a9   : > { %12788 = vmatpush3.bf16.msra.mxu1 %v13390_v52  ;;  %12757 = vmatprep.subr.bf16.mxu0 %v13391_v63  ;;  %v5059_v5 = vsel %vm5043_vm11, %v5011_v2, 0.0  ;;  %v5009_v59 = vmax.f32 %v4993_v58, 0.0  ;;  %v4998_v13 = vadd.f32 %v12329_v7, %v4829_v21  ;;  %v16106_v24 = vpop.f32.mrf.mxu1  ;;  %v13394_v52 = vld [vmem:[%s17421_s4 + $0x148] sm:$0xff]   ;;  %v7949_v4 = vpack.c.bf16 %v7934_v51, %v7933_v39  ;;  %v7936_v2 = vld [vmem:[#allocation2 + $0xb9] sm:$0xff]  ;;  %v7935_v39 = vld [vmem:[#allocation2 + $0xb1] sm:$0xff] }
 0x2aa   : > { %12789 = vmatprep.subr.bf16.mxu1 %v13392_v38  ;;  %5075 = vst [vmem:[#allocation2 + $0x178] sm:$0xff] %v5059_v5  ;;  %v4969_v56 = vpop.f32.mrf.mxu0  ;;  %v4828_v48 = vadd.f32 %v15916_v60, %v4659_v0  ;;  %v5029_v46 = vld [vmem:[%s17417_s0 + $0x168] sm:$0xff]  ;;  %v13398_v58 = vld [vmem:[%s17421_s4 + $0x1f8] sm:$0xff]   ;;  %v5275_v7 = vadd.f32 %v15962_v49, %v16124_v17  ;;  %v16159_v29 = vpack.c.bf16 %v7936_v2, %v7935_v39 }
 0x2ab   : > { %v5057_v25 = vsel %vm5041_vm12, %v5009_v59, 0.0  ;;  %v5014_v9 = vmax.f32 %v4998_v13, 0.0  ;;  %v4996_v32 = vadd.f32 %v4969_v56, %v4827_v55  ;;  %v16116_v31 = vpop.f32.mrf.mxu1  ;;  %vm5045_vm1 = vcmp.ne.f32.partialorder %v5029_v46, 0.0  ;;  %v7737_v14 = vld [vmem:[#allocation2 + $0xc8] sm:$0xff] }
 0x2ac   : > { %12758 = vmatpush3.bf16.msra.mxu0 %v13391_v63  ;;  %5073 = vst [vmem:[#allocation2 + $0x168] sm:$0xff] %v5057_v25  ;;  %v12330_v28 = vpop.f32.mrf.mxu0  ;;  %v7937_v51 = vld [vmem:[#allocation2 + $0xc1] sm:$0xff]  ;;  %v7938_v0 = vld [vmem:[#allocation2 + $0xc9] sm:$0xff]  ;;  %v7749_v13 = vpack.c.bf16 %v7735_v43, %v7734_v40  ;;  %v5273_v49 = vadd.f32 %v16124_v17, %v15977_v50  ;;  %v5278_v50 = vadd.f32 %v15991_v37, %v16124_v17 }
 0x2ad   : > { %12790 = vmatpush3.bf16.msra.mxu1 %v13392_v38  ;;  %12759 = vmatprep.subr.bf16.mxu0 %v13393_v6  ;;  %v5062_v10 = vsel %vm5046_vm13, %v5014_v9, 0.0  ;;  %v5012_v35 = vmax.f32 %v4996_v32, 0.0  ;;  %v4999_v47 = vadd.f32 %v12330_v28, %v4830_v16  ;;  %v16132_v63 = vpop.f32.mrf.mxu1  ;;  %v16168_v8 = vpack.c.bf16 %v7938_v0, %v7937_v51  ;;  %v13400_v32 = vld [vmem:[%s17421_s4 + $0x1f0] sm:$0xff]   ;;  %v7741_v46 = vld [vmem:[#allocation2 + $0xe8] sm:$0xff] }
 0x2ae   : > { %12712 = vmatmul.mubr.bf16.gmra.mxu0 %v16072_v61  ;;  %12791 = vmatprep.subr.bf16.mxu1 %v13394_v52  ;;  %5078 = vst [vmem:[#allocation2 + $0x190] sm:$0xff] %v5062_v10  ;;  %v4972_v60 = vpop.f32.mrf.mxu0  ;;  %v5274_v61 = vadd.f32 %v15933_v19, %v16124_v17  ;;  %v5272_v19 = vadd.f32 %v16124_v17, %v15945_v45 }
 0x2af   : > { %12744 = vmatmul.mubr.bf16.gmra.mxu1 %v7554_v33  ;;  %12763 = vmatprep.mubr.bf16.mxu0 %v7748_v12  ;;  %v5060_v53 = vsel %vm5044_vm14, %v5012_v35, 0.0  ;;  %v5015_v62 = vmax.f32 %v4999_v47, 0.0  ;;  %v4997_v36 = vadd.f32 %v4972_v60, %v4828_v48  ;;  %v16143_v38 = vpop.f32.mrf.mxu1  ;;  %v5276_v48 = vadd.f32 %v16124_v17, %v16005_v22  ;;  %v7940_v47 = vld [vmem:[#allocation2 + $0xd9] sm:$0xff]  ;;  %v7738_v60 = vld [vmem:[#allocation2 + $0xd0] sm:$0xff] }
 0x2b0   : > { %12760 = vmatpush3.bf16.msra.mxu0 %v13393_v6  ;;  %12795 = vmatprep.mubr.bf16.mxu1 %v7949_v4  ;;  %5076 = vst [vmem:[#allocation2 + $0x180] sm:$0xff] %v5060_v53  ;;  %v13402_v53 = vld [vmem:[%s17421_s4 + $0x1e8] sm:$0xff]  }
 0x2b1   : > { %12792 = vmatpush3.bf16.msra.mxu1 %v13394_v52  ;;  %12761 = vmatprep.subr.bf16.mxu0 %v13395_v54  ;;  %v5063_v18 = vsel %vm5047_vm15, %v5015_v62, 0.0  ;;  %v5013_v21 = vmax.f32 %v4997_v36, 0.0  ;;  %v12413_v1 = vpop.f32.mrf.mxu1  ;;  %v7736_v52 = vld [vmem:[#allocation2 + $0xc0] sm:$0xff]  ;;  %v5279_v62 = vadd.f32 %v16020_v26, %v16124_v17 }
 0x2b2   : > { %v12381_v27 = vpop.f32.mrf.mxu0  ;;  %12793 = vmatprep.subr.bf16.mxu1 %v13396_v41  ;;  %5079 = vst [vmem:[#allocation2 + $0x198] sm:$0xff] %v5063_v18  ;;  %v7750_v56 = vpack.c.bf16 %v7737_v14, %v7736_v52  ;;  %v5280_v52 = vadd.f32 %v16124_v17, %v16065_v42 }
 0x2b3   : > { %v5475_v11 = vadd.f32 %v12381_v27, %v5274_v61  ;;  %v5061_v45 = vsel %vm5045_vm1, %v5013_v21, 0.0  ;;  %v5611_v59 = vpop.f32.mrf.mxu1  ;;  %v7939_v61 = vld [vmem:[#allocation2 + $0xd1] sm:$0xff]  ;;  %v7740_v27 = vld [vmem:[#allocation2 + $0xe0] sm:$0xff] }
 0x2b4   : > { %v5410_v55 = vpop.f32.mrf.mxu0  ;;  %12762 = vmatpush3.bf16.msra.mxu0 %v13395_v54  ;;  %5077 = vst [vmem:[#allocation2 + $0x188] sm:$0xff] %v5061_v45  ;;  %v7739_v54 = vld [vmem:[#allocation2 + $0xd8] sm:$0xff]  ;;  %v7752_v43 = vpack.c.bf16 %v7741_v46, %v7740_v27  ;;  %v13404_v45 = vld [vmem:[%s17421_s4 + $0x1e0] sm:$0xff]   ;;  %v13408_v27 = vld [vmem:[%s17421_s4 + $0x1d0] sm:$0xff]  }
 0x2b5   : > { %v16157_v6 = vadd.f32 %v12413_v1, %v5475_v11  ;;  %v5473_v5 = vadd.f32 %v5410_v55, %v5272_v19  ;;  %12794 = vmatpush3.bf16.msra.mxu1 %v13396_v41  ;;  %12811 = vmatprep.subr.bf16.mxu0 %v13397_v44  ;;  %v12414_v9 = vpop.f32.mrf.mxu1  ;;  %v13401_v41 = vld [vmem:[%s17421_s4 + $0x1a8] sm:$0xff]   ;;  %v7751_v11 = vpack.c.bf16 %v7739_v54, %v7738_v60  ;;  %v13403_v55 = vld [vmem:[%s17421_s4 + $0x1a0] sm:$0xff]  }
 0x2b6   : > { %v12382_v20 = vpop.f32.mrf.mxu0  ;;  %12843 = vmatprep.subr.bf16.mxu1 %v13398_v58  ;;  %v7942_v19 = vld [vmem:[#allocation2 + $0xe9] sm:$0xff]  ;;  %v16193_v1 = vpack.c.bf16 %v7940_v47, %v7939_v61  ;;  %v5281_v60 = vadd.f32 %v16124_v17, %v16095_v57  ;;  %v5286_v57 = vadd.f32 %v16106_v24, %v16124_v17 }
 0x2b7   : > { %v16163_v16 = vadd.f32 %v5611_v59, %v5473_v5  ;;  %v5476_v25 = vadd.f32 %v12382_v20, %v5275_v7  ;;  %12764 = vmatmul.mubr.bf16.vlgmr.msra.gmra.mxu0 %v7749_v13  ;;  %v5614_v4 = vpop.f32.mrf.mxu1  ;;  %v7743_v13 = vld [vmem:[#allocation2 + $0xf8] sm:$0xff]  ;;  %v7946_v54 = vld [vmem:[#allocation2 + $0x109] sm:$0xff] }
 0x2b8   : > { %v5413_v23 = vpop.f32.mrf.mxu0  ;;  %12796 = vmatmul.mubr.bf16.vlgmr.msra.gmra.mxu1 %v16159_v29  ;;  %12767 = vmatprep.mubr.bf16.mxu0 %v7750_v56  ;;  %v7944_v56 = vld [vmem:[#allocation2 + $0xf9] sm:$0xff] }
 0x2b9   : > { %v16176_v33 = vadd.f32 %v12414_v9, %v5476_v25  ;;  %v5474_v12 = vadd.f32 %v5413_v23, %v5273_v49  ;;  %12799 = vmatprep.mubr.bf16.mxu1 %v16168_v8  ;;  %12812 = vmatpush3.bf16.msra.mxu0 %v13397_v44  ;;  %v12417_v35 = vpop.f32.mrf.mxu1  ;;  %v7941_v44 = vld [vmem:[#allocation2 + $0xe1] sm:$0xff]  ;;  %v13405_v25 = vld [vmem:[%s17421_s4 + $0x198] sm:$0xff]  }
 0x2ba   : > { %v12385_v28 = vpop.f32.mrf.mxu0  ;;  %12844 = vmatpush3.bf16.msra.mxu1 %v13398_v58  ;;  %12813 = vmatprep.subr.bf16.mxu0 %v13399_v30  ;;  %v5277_v58 = vadd.f32 %v16124_v17, %v16037_v15  ;;  %v16202_v7 = vpack.c.bf16 %v7942_v19, %v7941_v44  ;;  %v5282_v15 = vadd.f32 %v16051_v3, %v16124_v17  ;;  %v7745_v9 = vld [vmem:[#allocation2 + $0x108] sm:$0xff]  ;;  %v13406_v23 = vld [vmem:[%s17421_s4 + $0x1d8] sm:$0xff]  }
 0x2bb   : > { %v16181_v10 = vadd.f32 %v5614_v4, %v5474_v12  ;;  %v5479_v37 = vadd.f32 %v12385_v28, %v5278_v50  ;;  %12845 = vmatprep.subr.bf16.mxu1 %v13400_v32  ;;  %v5627_v21 = vpop.f32.mrf.mxu1  ;;  %v5283_v50 = vadd.f32 %v16080_v34, %v16124_v17  ;;  %v7744_v4 = vld [vmem:[#allocation2 + $0x100] sm:$0xff] }
 0x2bc   : > { %v5426_v22 = vpop.f32.mrf.mxu0  ;;  %v7945_v28 = vld [vmem:[#allocation2 + $0x101] sm:$0xff] }
 0x2bd   : > { %v16191_v36 = vadd.f32 %v12417_v35, %v5479_v37  ;;  %v5477_v18 = vadd.f32 %v5426_v22, %v5276_v48  ;;  %12814 = vmatpush3.bf16.msra.mxu0 %v13399_v30  ;;  %v12418_v14 = vpop.f32.mrf.mxu1  ;;  %v7742_v30 = vld [vmem:[#allocation2 + $0xf0] sm:$0xff] }
 0x2be   : > { %v12386_v2 = vpop.f32.mrf.mxu0  ;;  %12846 = vmatpush3.bf16.msra.mxu1 %v13400_v32  ;;  %12815 = vmatprep.subr.bf16.mxu0 %v13401_v41  ;;  %v7943_v32 = vld [vmem:[#allocation2 + $0xf1] sm:$0xff]  ;;  %v7753_v35 = vpack.c.bf16 %v7743_v13, %v7742_v30 }
 0x2bf   : > { %v16197_v40 = vadd.f32 %v5627_v21, %v5477_v18  ;;  %v5480_v26 = vadd.f32 %v12386_v2, %v5279_v62  ;;  %12768 = vmatmul.mubr.bf16.gmra.mxu0 %v7751_v11  ;;  %12847 = vmatprep.subr.bf16.mxu1 %v13402_v53  ;;  %v5630_v5 = vpop.f32.mrf.mxu1  ;;  %v16227_v47 = vpack.c.bf16 %v7944_v56, %v7943_v32  ;;  %v13407_v22 = vld [vmem:[%s17421_s4 + $0x190] sm:$0xff]  }
 0x2c0   : > { %v5429_v39 = vpop.f32.mrf.mxu0  ;;  %12800 = vmatmul.mubr.bf16.gmra.mxu1 %v16193_v1  ;;  %12771 = vmatprep.mubr.bf16.mxu0 %v7752_v43  ;;  %v16236_v62 = vpack.c.bf16 %v7946_v54, %v7945_v28  ;;  %v5284_v43 = vadd.f32 %v16124_v17, %v16116_v31  ;;  %v5287_v31 = vadd.f32 %v16132_v63, %v16124_v17 }
 0x2c1   : > { %v16210_v51 = vadd.f32 %v12418_v14, %v5480_v26  ;;  %v5478_v0 = vadd.f32 %v5429_v39, %v5277_v58  ;;  %12803 = vmatprep.mubr.bf16.mxu1 %v16202_v7  ;;  %12816 = vmatpush3.bf16.msra.mxu0 %v13401_v41  ;;  %v12421_v49 = vpop.f32.mrf.mxu1  ;;  %v7754_v41 = vpack.c.bf16 %v7745_v9, %v7744_v4  ;;  %v7747_v26 = vld [vmem:[#allocation2 + $0x118] sm:$0xff] }
 0x2c2   : > { %v12389_v59 = vpop.f32.mrf.mxu0  ;;  %12848 = vmatpush3.bf16.msra.mxu1 %v13402_v53  ;;  %12817 = vmatprep.subr.bf16.mxu0 %v13403_v55  ;;  %v7948_v14 = vld [vmem:[#allocation2 + $0x119] sm:$0xff] }
 0x2c3   : > { %v16215_v20 = vadd.f32 %v5630_v5, %v5478_v0  ;;  %v5483_v3 = vadd.f32 %v12389_v59, %v5282_v15  ;;  %12849 = vmatprep.subr.bf16.mxu1 %v13404_v45  ;;  %v5643_v37 = vpop.f32.mrf.mxu1  ;;  %v7746_v0 = vld [vmem:[#allocation2 + $0x110] sm:$0xff]  ;;  %v8336_v59 = vld [vmem:[#allocation2 + $0xba] sm:$0xff] }
 0x2c4   : > { %v5442_v42 = vpop.f32.mrf.mxu0  ;;  %v7947_v5 = vld [vmem:[#allocation2 + $0x111] sm:$0xff] }
 0x2c5   : > { %v16225_v12 = vadd.f32 %v12421_v49, %v5483_v3  ;;  %v5481_v48 = vadd.f32 %v5442_v42, %v5280_v52  ;;  %12818 = vmatpush3.bf16.msra.mxu0 %v13403_v55  ;;  %v12422_v53 = vpop.f32.mrf.mxu1  ;;  %v13409_v55 = vld [vmem:[%s17421_s4 + $0x188] sm:$0xff]   ;;  %v7755_v3 = vpack.c.bf16 %v7747_v26, %v7746_v0  ;;  %v16261_v49 = vpack.c.bf16 %v7948_v14, %v7947_v5  ;;  %v8335_v9 = vld [vmem:[#allocation2 + $0xb2] sm:$0xff] }
 0x2c6   : > { %v12390_v46 = vpop.f32.mrf.mxu0  ;;  %12850 = vmatpush3.bf16.msra.mxu1 %v13404_v45  ;;  %12819 = vmatprep.subr.bf16.mxu0 %v13405_v25  ;;  %v13410_v45 = vld [vmem:[%s17421_s4 + $0x1c8] sm:$0xff]   ;;  %v8351_v42 = vpack.c.bf16 %v8336_v59, %v8335_v9  ;;  %v8343_v59 = vld [vmem:[#allocation2 + $0xf2] sm:$0xff] }
 0x2c7   : > { %v16231_v61 = vadd.f32 %v5643_v37, %v5481_v48  ;;  %v5484_v34 = vadd.f32 %v12390_v46, %v5283_v50  ;;  %12772 = vmatmul.mubr.bf16.gmra.mxu0 %v7753_v35  ;;  %12851 = vmatprep.subr.bf16.mxu1 %v13406_v23  ;;  %v5646_v21 = vpop.f32.mrf.mxu1  ;;  %v13412_v50 = vld [vmem:[%s17421_s4 + $0x1c0] sm:$0xff]   ;;  %v13413_v37 = vld [vmem:[%s17421_s4 + $0x238] sm:$0xff]   ;;  %v8338_v46 = vld [vmem:[#allocation2 + $0xca] sm:$0xff] }
 0x2c8   : > { %v5445_v44 = vpop.f32.mrf.mxu0  ;;  %12804 = vmatmul.mubr.bf16.gmra.mxu1 %v16227_v47  ;;  %12775 = vmatprep.mubr.bf16.mxu0 %v7754_v41  ;;  %v8337_v41 = vld [vmem:[#allocation2 + $0xc2] sm:$0xff] }
 0x2c9   : > { %v16244_v19 = vadd.f32 %v12422_v53, %v5484_v34  ;;  %v5482_v18 = vadd.f32 %v5445_v44, %v5281_v60  ;;  %12807 = vmatprep.mubr.bf16.mxu1 %v16236_v62  ;;  %12820 = vmatpush3.bf16.msra.mxu0 %v13405_v25  ;;  %v5285_v25 = vadd.f32 %v16124_v17, %v16143_v38  ;;  %v8340_v34 = vld [vmem:[#allocation2 + $0xda] sm:$0xff]  ;;  %v8339_v44 = vld [vmem:[#allocation2 + $0xd2] sm:$0xff]  ;;  %v8341_v14 = vld [vmem:[#allocation2 + $0xe2] sm:$0xff] }
 0x2ca   : > { %v12393_v11 = vpop.f32.mrf.mxu0  ;;  %12852 = vmatpush3.bf16.msra.mxu1 %v13406_v23  ;;  %12821 = vmatprep.subr.bf16.mxu0 %v13407_v22  ;;  %v12425_v24 = vpop.f32.mrf.mxu1  ;;  %v13411_v23 = vld [vmem:[%s17421_s4 + $0x180] sm:$0xff]  }
 0x2cb   : > { %v16249_v2 = vadd.f32 %v5646_v21, %v5482_v18  ;;  %v5487_v58 = vadd.f32 %v12393_v11, %v5286_v57  ;;  %12853 = vmatprep.subr.bf16.mxu1 %v13408_v27  ;;  %v13415_v18 = vld [vmem:[%s17421_s4 + $0x230] sm:$0xff]   ;;  %v8353_v21 = vpack.c.bf16 %v8340_v34, %v8339_v44 }
 0x2cc   : > { %v5458_v39 = vpop.f32.mrf.mxu0  ;;  %v5659_v52 = vpop.f32.mrf.mxu1  ;;  %v13416_v11 = vld [vmem:[%s17421_s4 + $0x30] sm:$0xff]  }
 0x2cd   : > { %17606 = vst [vmem:[#allocation40_spill] sm:$0xff] %v16249_v2  ;;  %v16259_v15 = vadd.f32 %v12425_v24, %v5487_v58  ;;  %v5485_v13 = vadd.f32 %v5458_v39, %v5284_v43  ;;  %12822 = vmatpush3.bf16.msra.mxu0 %v13407_v22  ;;  %v8344_v39 = vld [vmem:[#allocation2 + $0xfa] sm:$0xff] }
 0x2ce   : > { %v12394_v56 = vpop.f32.mrf.mxu0  ;;  %12854 = vmatpush3.bf16.msra.mxu1 %v13408_v27  ;;  %12823 = vmatprep.subr.bf16.mxu0 %v13409_v55  ;;  %v12426_v32 = vpop.f32.mrf.mxu1  ;;  %v8352_v27 = vpack.c.bf16 %v8338_v46, %v8337_v41  ;;  %v13423_v46 = vld [vmem:[%s17421_s4 + $0x210] sm:$0xff]  }
 0x2cf   : > { %17607 = vst [vmem:[#allocation15_spill] sm:$0xff] %v16259_v15  ;;  %v16265_v30 = vadd.f32 %v5659_v52, %v5485_v13  ;;  %v5488_v63 = vadd.f32 %v12394_v56, %v5287_v31  ;;  %12776 = vmatmul.mubr.bf16.gmra.mxu0 %v7755_v3  ;;  %12855 = vmatprep.subr.bf16.mxu1 %v13410_v45  ;;  %v13419_v52 = vld [vmem:[%s17421_s4 + $0x220] sm:$0xff]   ;;  %v8782_v2 = vld [vmem:[#allocation2 + $0x175] sm:$0xff] }
 0x2d0   : > { %v5461_v4 = vpop.f32.mrf.mxu0  ;;  %12808 = vmatmul.mubr.bf16.gmra.mxu1 %v16261_v49  ;;  %12827 = vmatprep.mubr.bf16.mxu0 %v16159_v29  ;;  %v5662_v28 = vpop.f32.mrf.mxu1  ;;  %v13414_v29 = vld [vmem:[%s17421_s4 + $0x38] sm:$0xff]   ;;  %v8355_v3 = vpack.c.bf16 %v8344_v39, %v8343_v59  ;;  %v13420_v56 = vld [vmem:[%s17421_s4 + $0x20] sm:$0xff]   ;;  %v13426_v39 = vld [vmem:[%s17421_s4 + $0x8] sm:$0xff]  }
 0x2d1   : > { %17608 = vst [vmem:[#allocation22_spill] sm:$0xff] %v16265_v30  ;;  %v16275_v17 = vadd.f32 %v12426_v32, %v5488_v63  ;;  %v5486_v38 = vadd.f32 %v5461_v4, %v5285_v25  ;;  %12824 = vmatpush3.bf16.msra.mxu0 %v13409_v55  ;;  %12859 = vmatprep.mubr.bf16.mxu1 %v8351_v42  ;;  %v8342_v55 = vld [vmem:[#allocation2 + $0xea] sm:$0xff]  ;;  %v13421_v32 = vld [vmem:[%s17421_s4 + $0x218] sm:$0xff]  }
 0x2d2   : > { %12856 = vmatpush3.bf16.msra.mxu1 %v13410_v45  ;;  %12825 = vmatprep.subr.bf16.mxu0 %v13411_v23  ;;  %v16279_v48 = vpop.f32.mrf.mxu0  ;;  %v8354_v5 = vpack.c.bf16 %v8342_v55, %v8341_v14  ;;  %v8346_v42 = vld [vmem:[#allocation2 + $0x10a] sm:$0xff]  ;;  %v8348_v4 = vld [vmem:[#allocation2 + $0x11a] sm:$0xff] }
 0x2d3   : > { %17609 = vst [vmem:[#allocation39_spill] sm:$0xff] %v16275_v17  ;;  %v16277_v54 = vadd.f32 %v5662_v28, %v5486_v38  ;;  %12857 = vmatprep.subr.bf16.mxu1 %v13412_v50  ;;  %v16284_v35 = vpop.f32.mrf.mxu1  ;;  %v8149_v14 = vld [vmem:[#allocation2 + $0x129] sm:$0xff]  ;;  %v8775_v17 = vld [vmem:[#allocation2 + $0x13d] sm:$0xff] }
 0x2d4   : > { %v16289_v60 = vpop.f32.mrf.mxu0  ;;  %v13425_v55 = vld [vmem:[%s17421_s4 + $0x208] sm:$0xff]  }
 0x2d5   : > { %17610 = vst [vmem:[#allocation42_spill] sm:$0xff] %v16277_v54  ;;  %12826 = vmatpush3.bf16.msra.mxu0 %v13411_v23  ;;  %v16291_v53 = vpop.f32.mrf.mxu1  ;;  %v8345_v23 = vld [vmem:[#allocation2 + $0x102] sm:$0xff]  ;;  %v8769_v59 = vld [vmem:[#allocation2 + $0x10d] sm:$0xff]  ;;  %v8774_v54 = vld [vmem:[#allocation2 + $0x135] sm:$0xff] }
 0x2d6   : > { %12858 = vmatpush3.bf16.msra.mxu1 %v13412_v50  ;;  %12875 = vmatprep.subr.bf16.mxu0 %v13413_v37  ;;  %v16293_v22 = vpop.f32.mrf.mxu0 }
 0x2d7   : > { %12907 = vmatprep.subr.bf16.mxu1 %v13414_v29  ;;  %v16295_v57 = vpop.f32.mrf.mxu1 }
 0x2d8   : > { %12828 = vmatmul.mubr.bf16.vlgmr.msra.gmra.mxu0 %v16168_v8  ;;  %v16304_v43 = vpop.f32.mrf.mxu0  ;;  %v13417_v8 = vld [vmem:[%s17421_s4 + $0x228] sm:$0xff]  }
 0x2d9   : > { %12860 = vmatmul.mubr.bf16.vlgmr.msra.gmra.mxu1 %v8352_v27  ;;  %12831 = vmatprep.mubr.bf16.mxu0 %v16193_v1  ;;  %v16307_v58 = vpop.f32.mrf.mxu1  ;;  %v13418_v1 = vld [vmem:[%s17421_s4 + $0x28] sm:$0xff]   ;;  %v13424_v27 = vld [vmem:[%s17421_s4 + $0x10] sm:$0xff]  }
 0x2da   : > { %12863 = vmatprep.mubr.bf16.mxu1 %v8353_v21  ;;  %12876 = vmatpush3.bf16.msra.mxu0 %v13413_v37  ;;  %v16309_v24 = vpop.f32.mrf.mxu0  ;;  %v8356_v37 = vpack.c.bf16 %v8346_v42, %v8345_v23 }
 0x2db   : > { %12908 = vmatpush3.bf16.msra.mxu1 %v13414_v29  ;;  %12877 = vmatprep.subr.bf16.mxu0 %v13415_v18  ;;  %v16311_v26 = vpop.f32.mrf.mxu1  ;;  %v8347_v29 = vld [vmem:[#allocation2 + $0x112] sm:$0xff] }
 0x2dc   : > { %12909 = vmatprep.subr.bf16.mxu1 %v13416_v11  ;;  %v16319_v45 = vpop.f32.mrf.mxu0  ;;  %v8357_v34 = vpack.c.bf16 %v8348_v4, %v8347_v29 }
 0x2dd   : > { %v16321_v31 = vpop.f32.mrf.mxu1 }
 0x2de   : > { %12878 = vmatpush3.bf16.msra.mxu0 %v13415_v18  ;;  %v16323_v0 = vpop.f32.mrf.mxu0 }
 0x2df   : > { %12910 = vmatpush3.bf16.msra.mxu1 %v13416_v11  ;;  %12879 = vmatprep.subr.bf16.mxu0 %v13417_v8  ;;  %v16325_v13 = vpop.f32.mrf.mxu1  ;;  %v8537_v11 = vld [vmem:[#allocation2 + $0xbb] sm:$0xff] }
 0x2e0   : > { %12832 = vmatmul.mubr.bf16.gmra.mxu0 %v16202_v7  ;;  %12911 = vmatprep.subr.bf16.mxu1 %v13418_v1  ;;  %v16334_v25 = vpop.f32.mrf.mxu0 }
 0x2e1   : > { %12864 = vmatmul.mubr.bf16.gmra.mxu1 %v8354_v5  ;;  %12835 = vmatprep.mubr.bf16.mxu0 %v16227_v47  ;;  %v16337_v9 = vpop.f32.mrf.mxu1  ;;  %v13422_v47 = vld [vmem:[%s17421_s4 + $0x18] sm:$0xff]  }
 0x2e2   : > { %12867 = vmatprep.mubr.bf16.mxu1 %v8355_v3  ;;  %12880 = vmatpush3.bf16.msra.mxu0 %v13417_v8  ;;  %v16339_v63 = vpop.f32.mrf.mxu0  ;;  %v8148_v8 = vld [vmem:[#allocation2 + $0x121] sm:$0xff] }
 0x2e3   : > { %12912 = vmatpush3.bf16.msra.mxu1 %v13418_v1  ;;  %12881 = vmatprep.subr.bf16.mxu0 %v13419_v52  ;;  %v16341_v7 = vpop.f32.mrf.mxu1  ;;  %v8349_v1 = vld [vmem:[#allocation2 + $0x122] sm:$0xff]  ;;  %v8157_v3 = vpack.c.bf16 %v8149_v14, %v8148_v8  ;;  %v13429_v8 = vld [vmem:[%s17421_s4 + $0x78] sm:$0xff]  }
 0x2e4   : > { %12913 = vmatprep.subr.bf16.mxu1 %v13420_v56  ;;  %v16349_v50 = vpop.f32.mrf.mxu0 }
 0x2e5   : > { %v16351_v38 = vpop.f32.mrf.mxu1 }
 0x2e6   : > { %17611 = vst [vmem:[#allocation12_spill] sm:$0xff] %v16351_v38  ;;  %12882 = vmatpush3.bf16.msra.mxu0 %v13419_v52  ;;  %v16353_v28 = vpop.f32.mrf.mxu0 }
 0x2e7   : > { %12914 = vmatpush3.bf16.msra.mxu1 %v13420_v56  ;;  %12883 = vmatprep.subr.bf16.mxu0 %v13421_v32  ;;  %v16355_v41 = vpop.f32.mrf.mxu1  ;;  %v8536_v56 = vld [vmem:[#allocation2 + $0xb3] sm:$0xff] }
 0x2e8   : > { %17612 = vst [vmem:[#allocation41_spill] sm:$0xff] %v16355_v41  ;;  %12836 = vmatmul.mubr.bf16.gmra.mxu0 %v16236_v62  ;;  %12915 = vmatprep.subr.bf16.mxu1 %v13422_v47  ;;  %v16364_v44 = vpop.f32.mrf.mxu0  ;;  %v8552_v42 = vpack.c.bf16 %v8537_v11, %v8536_v56  ;;  %v13435_v41 = vld [vmem:[%s17421_s4 + $0x60] sm:$0xff]  }
 0x2e9   : > { %17613 = vst [vmem:[#allocation45_spill] sm:$0xff] %v16364_v44  ;;  %12868 = vmatmul.mubr.bf16.gmra.mxu1 %v8356_v37  ;;  %12839 = vmatprep.mubr.bf16.mxu0 %v16261_v49  ;;  %v16367_v18 = vpop.f32.mrf.mxu1  ;;  %v8350_v49 = vld [vmem:[#allocation2 + $0x12a] sm:$0xff]  ;;  %v13427_v37 = vld [vmem:[%s17421_s4 + $0x200] sm:$0xff]  }
 0x2ea   : > { %17614 = vst [vmem:[#allocation31_spill] sm:$0xff] %v16367_v18  ;;  %12871 = vmatprep.mubr.bf16.mxu1 %v8357_v34  ;;  %12884 = vmatpush3.bf16.msra.mxu0 %v13421_v32  ;;  %v16369_v21 = vpop.f32.mrf.mxu0  ;;  %v8358_v23 = vpack.c.bf16 %v8350_v49, %v8349_v1  ;;  %v8538_v1 = vld [vmem:[#allocation2 + $0xc3] sm:$0xff]  ;;  %v8539_v49 = vld [vmem:[#allocation2 + $0xcb] sm:$0xff] }
 0x2eb   : > { %17615 = vst [vmem:[#allocation44_spill] sm:$0xff] %v16369_v21  ;;  %12916 = vmatpush3.bf16.msra.mxu1 %v13422_v47  ;;  %12885 = vmatprep.subr.bf16.mxu0 %v13423_v46  ;;  %v16371_v62 = vpop.f32.mrf.mxu1  ;;  %v8770_v47 = vld [vmem:[#allocation2 + $0x115] sm:$0xff] }
 0x2ec   : > { %17616 = vst [vmem:[#allocation46_spill] sm:$0xff] %v16371_v62  ;;  %12917 = vmatprep.subr.bf16.mxu1 %v13424_v27  ;;  %v16379_v5 = vpop.f32.mrf.mxu0  ;;  %v8785_v29 = vpack.c.bf16 %v8770_v47, %v8769_v59  ;;  %v13430_v59 = vld [vmem:[%s17421_s4 + $0xb8] sm:$0xff]  }
 0x2ed   : > { %17617 = vst [vmem:[#allocation13_spill] sm:$0xff] %v16379_v5  ;;  %v16381_v52 = vpop.f32.mrf.mxu1  ;;  %v8771_v47 = vld [vmem:[#allocation2 + $0x11d] sm:$0xff]  ;;  %v8544_v62 = vld [vmem:[#allocation2 + $0xf3] sm:$0xff] }
 0x2ee   : > { %17618 = vst [vmem:[#allocation21_spill] sm:$0xff] %v16381_v52  ;;  %12886 = vmatpush3.bf16.msra.mxu0 %v13423_v46  ;;  %v16383_v32 = vpop.f32.mrf.mxu0  ;;  %v13428_v46 = vld [vmem:[%s17421_s4] sm:$0xff]   ;;  %v8778_v21 = vld [vmem:[#allocation2 + $0x155] sm:$0xff] }
 0x2ef   : > { %17619 = vst [vmem:[#allocation16_spill] sm:$0xff] %v16383_v32  ;;  %12918 = vmatpush3.bf16.msra.mxu1 %v13424_v27  ;;  %12887 = vmatprep.subr.bf16.mxu0 %v13425_v55  ;;  %v16385_v4 = vpop.f32.mrf.mxu1 }
 0x2f0   : > { %17620 = vst [vmem:[#allocation36_spill] sm:$0xff] %v16385_v4  ;;  %12840 = vmatmul.mubr.bf16.gmra.mxu0 %v8157_v3  ;;  %12919 = vmatprep.subr.bf16.mxu1 %v13426_v39  ;;  %v16393_v34 = vpop.f32.mrf.mxu0  ;;  %v8772_v3 = vld [vmem:[#allocation2 + $0x125] sm:$0xff] }
 0x2f1   : > { %17621 = vst [vmem:[#allocation27_spill] sm:$0xff] %v16393_v34  ;;  %12872 = vmatmul.mubr.bf16.gmra.mxu1 %v8358_v23  ;;  %12891 = vmatprep.mubr.bf16.mxu0 %v8552_v42  ;;  %v16395_v27 = vpop.f32.mrf.mxu1  ;;  %v8553_v42 = vpack.c.bf16 %v8539_v49, %v8538_v1  ;;  %v8786_v4 = vpack.c.bf16 %v8772_v3, %v8771_v47  ;;  %v8776_v47 = vld [vmem:[#allocation2 + $0x145] sm:$0xff] }
 0x2f2   : > { %17622 = vst [vmem:[#allocation23_spill] sm:$0xff] %v16395_v27  ;;  %12888 = vmatpush3.bf16.msra.mxu0 %v13425_v55  ;;  %12923 = vmatprep.mubr.bf16.mxu1 %v8785_v29  ;;  %v8541_v55 = vld [vmem:[#allocation2 + $0xdb] sm:$0xff]  ;;  %v8540_v29 = vld [vmem:[#allocation2 + $0xd3] sm:$0xff]  ;;  %v8788_v30 = vpack.c.bf16 %v8776_v47, %v8775_v17 }
 0x2f3   : > { %12920 = vmatpush3.bf16.msra.mxu1 %v13426_v39  ;;  %12889 = vmatprep.subr.bf16.mxu0 %v13427_v37  ;;  %v16397_v11 = vpop.f32.mrf.mxu0  ;;  %v8773_v39 = vld [vmem:[#allocation2 + $0x12d] sm:$0xff]  ;;  %v8554_v34 = vpack.c.bf16 %v8541_v55, %v8540_v29  ;;  %v13437_v47 = vld [vmem:[%s17421_s4 + $0x58] sm:$0xff]  }
 0x2f4   : > { %12921 = vmatprep.subr.bf16.mxu1 %v13428_v46  ;;  %v16402_v14 = vpop.f32.mrf.mxu1  ;;  %v8787_v32 = vpack.c.bf16 %v8774_v54, %v8773_v39  ;;  %v8543_v54 = vld [vmem:[#allocation2 + $0xeb] sm:$0xff] }
 0x2f5   : > { %v16407_v56 = vpop.f32.mrf.mxu0  ;;  %v13433_v39 = vld [vmem:[%s17421_s4 + $0x68] sm:$0xff]  }
 0x2f6   : > { %12890 = vmatpush3.bf16.msra.mxu0 %v13427_v37  ;;  %v16409_v23 = vpop.f32.mrf.mxu1  ;;  %v13431_v37 = vld [vmem:[%s17421_s4 + $0x70] sm:$0xff]  }
 0x2f7   : > { %12922 = vmatpush3.bf16.msra.mxu1 %v13428_v46  ;;  %12939 = vmatprep.subr.bf16.mxu0 %v13429_v8  ;;  %v16411_v27 = vpop.f32.mrf.mxu0  ;;  %v13432_v46 = vld [vmem:[%s17421_s4 + $0xb0] sm:$0xff]  }
 0x2f8   : > { %12971 = vmatprep.subr.bf16.mxu1 %v13430_v59  ;;  %v16413_v52 = vpop.f32.mrf.mxu1 }
 0x2f9   : > { %12892 = vmatmul.mubr.bf16.vlgmr.msra.gmra.mxu0 %v8553_v42  ;;  %v16421_v1 = vpop.f32.mrf.mxu0  ;;  %v8542_v42 = vld [vmem:[#allocation2 + $0xe3] sm:$0xff] }
 0x2fa   : > { %12924 = vmatmul.mubr.bf16.vlgmr.msra.gmra.mxu1 %v8786_v4  ;;  %12895 = vmatprep.mubr.bf16.mxu0 %v8554_v34  ;;  %v16423_v49 = vpop.f32.mrf.mxu1  ;;  %v13434_v4 = vld [vmem:[%s17421_s4 + $0xa8] sm:$0xff]   ;;  %v8555_v29 = vpack.c.bf16 %v8543_v54, %v8542_v42 }
 0x2fb   : > { %12927 = vmatprep.mubr.bf16.mxu1 %v8787_v32  ;;  %12940 = vmatpush3.bf16.msra.mxu0 %v13429_v8  ;;  %v16425_v3 = vpop.f32.mrf.mxu0  ;;  %v8545_v32 = vld [vmem:[#allocation2 + $0xfb] sm:$0xff]  ;;  %v8777_v8 = vld [vmem:[#allocation2 + $0x14d] sm:$0xff]  ;;  %v8546_v54 = vld [vmem:[#allocation2 + $0x103] sm:$0xff] }
 0x2fc   : > { %12972 = vmatpush3.bf16.msra.mxu1 %v13430_v59  ;;  %12941 = vmatprep.subr.bf16.mxu0 %v13431_v37  ;;  %v16427_v55 = vpop.f32.mrf.mxu1  ;;  %v8556_v18 = vpack.c.bf16 %v8545_v32, %v8544_v62  ;;  %v8789_v44 = vpack.c.bf16 %v8778_v21, %v8777_v8  ;;  %v8547_v21 = vld [vmem:[#allocation2 + $0x10b] sm:$0xff] }
 0x2fd   : > { %12973 = vmatprep.subr.bf16.mxu1 %v13432_v46  ;;  %v16435_v34 = vpop.f32.mrf.mxu0  ;;  %v8780_v32 = vld [vmem:[#allocation2 + $0x165] sm:$0xff]  ;;  %v8557_v8 = vpack.c.bf16 %v8547_v21, %v8546_v54  ;;  %v5875_v21 = vadd.f32 %v16289_v60, %v16163_v16 }
 0x2fe   : > { %v16437_v59 = vpop.f32.mrf.mxu1  ;;  %v8784_v16 = vld [vmem:[#allocation2 + $0x185] sm:$0xff] }
 0x2ff   : > { %12942 = vmatpush3.bf16.msra.mxu0 %v13431_v37  ;;  %v16439_v5 = vpop.f32.mrf.mxu0  ;;  %v13436_v37 = vld [vmem:[%s17421_s4 + $0xa0] sm:$0xff]   ;;  %v13442_v60 = vld [vmem:[%s17421_s4 + $0x88] sm:$0xff]  }
 0x300   : > { %12974 = vmatpush3.bf16.msra.mxu1 %v13432_v46  ;;  %12943 = vmatprep.subr.bf16.mxu0 %v13433_v39  ;;  %v16441_v15 = vpop.f32.mrf.mxu1 }
 0x301   : > { %17623 = vst [vmem:[#allocation14_spill] sm:$0xff] %v16441_v15  ;;  %12896 = vmatmul.mubr.bf16.gmra.mxu0 %v8555_v29  ;;  %12975 = vmatprep.subr.bf16.mxu1 %v13434_v4  ;;  %v16449_v42 = vpop.f32.mrf.mxu0  ;;  %v8779_v29 = vld [vmem:[#allocation2 + $0x15d] sm:$0xff] }
 0x302   : > { %12928 = vmatmul.mubr.bf16.gmra.mxu1 %v8788_v30  ;;  %12899 = vmatprep.mubr.bf16.mxu0 %v8556_v18  ;;  %v16451_v17 = vpop.f32.mrf.mxu1  ;;  %v13438_v30 = vld [vmem:[%s17421_s4 + $0x98] sm:$0xff]   ;;  %v8790_v15 = vpack.c.bf16 %v8780_v32, %v8779_v29  ;;  %v6076_v29 = vadd.f32 %v16291_v53, %v5875_v21 }
 0x303   : > { %17624 = vst [vmem:[#allocation24_spill] sm:$0xff] %v16451_v17  ;;  %12931 = vmatprep.mubr.bf16.mxu1 %v8789_v44  ;;  %12944 = vmatpush3.bf16.msra.mxu0 %v13433_v39  ;;  %v16453_v62 = vpop.f32.mrf.mxu0  ;;  %v8549_v44 = vld [vmem:[#allocation2 + $0x11b] sm:$0xff]  ;;  %v8781_v39 = vld [vmem:[#allocation2 + $0x16d] sm:$0xff] }
 0x304   : > { %17625 = vst [vmem:[#allocation33_spill] sm:$0xff] %v16453_v62  ;;  %12976 = vmatpush3.bf16.msra.mxu1 %v13434_v4  ;;  %12945 = vmatprep.subr.bf16.mxu0 %v13435_v41  ;;  %v16455_v46 = vpop.f32.mrf.mxu1  ;;  %v9172_v21 = vld [vmem:[#allocation2 + $0x117] sm:$0xff] }
 0x305   : > { %17626 = vst [vmem:[#allocation17_spill] sm:$0xff] %v16455_v46  ;;  %12977 = vmatprep.subr.bf16.mxu1 %v13436_v37  ;;  %v16463_v18 = vpop.f32.mrf.mxu0  ;;  %v8548_v46 = vld [vmem:[#allocation2 + $0x113] sm:$0xff] }
 0x306   : > { %17627 = vst [vmem:[#allocation10_spill] sm:$0xff] %v16463_v18  ;;  %v16465_v4 = vpop.f32.mrf.mxu1  ;;  %v8558_v62 = vpack.c.bf16 %v8549_v44, %v8548_v46  ;;  %v13439_v18 = vld [vmem:[%s17421_s4 + $0x50] sm:$0xff]   ;;  %v5878_v44 = vadd.f32 %v16293_v22, %v16176_v33  ;;  %v8783_v22 = vld [vmem:[#allocation2 + $0x17d] sm:$0xff] }
 0x307   : > { %17628 = vst [vmem:[#allocation43_spill] sm:$0xff] %v16465_v4  ;;  %12946 = vmatpush3.bf16.msra.mxu0 %v13435_v41  ;;  %v16467_v17 = vpop.f32.mrf.mxu0  ;;  %v5877_v4 = vadd.f32 %v16279_v48, %v16157_v6  ;;  %v8791_v41 = vpack.c.bf16 %v8782_v2, %v8781_v39  ;;  %v8550_v2 = vld [vmem:[#allocation2 + $0x123] sm:$0xff]  ;;  %v8551_v48 = vld [vmem:[#allocation2 + $0x12b] sm:$0xff] }
 0x308   : > { %12978 = vmatpush3.bf16.msra.mxu1 %v13436_v37  ;;  %12947 = vmatprep.subr.bf16.mxu0 %v13437_v47  ;;  %v16469_v38 = vpop.f32.mrf.mxu1  ;;  %v13440_v37 = vld [vmem:[%s17421_s4 + $0x90] sm:$0xff]   ;;  %v8559_v33 = vpack.c.bf16 %v8551_v48, %v8550_v2  ;;  %v9174_v48 = vld [vmem:[#allocation2 + $0x127] sm:$0xff] }
 0x309   : > { %12900 = vmatmul.mubr.bf16.gmra.mxu0 %v8557_v8  ;;  %12979 = vmatprep.subr.bf16.mxu1 %v13438_v30  ;;  %v16479_v54 = vpop.f32.mrf.mxu0  ;;  %v9171_v39 = vld [vmem:[#allocation2 + $0x10f] sm:$0xff] }
 0x30a   : > { %12932 = vmatmul.mubr.bf16.gmra.mxu1 %v8790_v15  ;;  %12903 = vmatprep.mubr.bf16.mxu0 %v8558_v62  ;;  %v16481_v46 = vpop.f32.mrf.mxu1  ;;  %v13441_v15 = vld [vmem:[%s17421_s4 + $0x48] sm:$0xff]   ;;  %v6078_v62 = vadd.f32 %v16284_v35, %v5877_v4  ;;  %v5876_v35 = vadd.f32 %v16304_v43, %v16181_v10  ;;  %v13443_v43 = vld [vmem:[%s17421_s4 + $0x40] sm:$0xff]   ;;  %v9187_v2 = vpack.c.bf16 %v9172_v21, %v9171_v39 }
 0x30b   : > { %17629 = vst [vmem:[#allocation11_spill] sm:$0xff] %v16481_v46  ;;  %12935 = vmatprep.mubr.bf16.mxu1 %v8791_v41  ;;  %12948 = vmatpush3.bf16.msra.mxu0 %v13437_v47  ;;  %v16485_v32 = vpop.f32.mrf.mxu0  ;;  %v8970_v47 = vld [vmem:[#allocation2 + $0x10e] sm:$0xff]  ;;  %v8971_v41 = vld [vmem:[#allocation2 + $0x116] sm:$0xff]  ;;  %v16508_v46 = vld [vmem:[#allocation2 + $0x126] sm:$0xff] }
 0x30c   : > { %12980 = vmatpush3.bf16.msra.mxu1 %v13438_v30  ;;  %12949 = vmatprep.subr.bf16.mxu0 %v13439_v18  ;;  %v16487_v6 = vpop.f32.mrf.mxu1  ;;  %v6279_v4 = vadd.f32 %v16397_v11, %v6078_v62  ;;  %v8986_v53 = vpack.c.bf16 %v8971_v41, %v8970_v47  ;;  %v6079_v11 = vadd.f32 %v16295_v57, %v5878_v44  ;;  %v16533_v44 = vld [vmem:[#allocation2 + $0x12e] sm:$0xff] }
 0x30d   : > { %17630 = vst [vmem:[#allocation35_spill] sm:$0xff] %v16487_v6  ;;  %12981 = vmatprep.subr.bf16.mxu1 %v13440_v37  ;;  %v16498_v30 = vpop.f32.mrf.mxu0  ;;  %v5879_v62 = vadd.f32 %v16319_v45, %v16197_v40  ;;  %v9175_v40 = vld [vmem:[#allocation2 + $0x12f] sm:$0xff] }
 0x30e   : > { %17631 = vst [vmem:[#allocation32_spill] sm:$0xff] %v16498_v30  ;;  %v16500_v8 = vpop.f32.mrf.mxu1  ;;  %v5881_v30 = vadd.f32 %v16309_v24, %v16191_v36  ;;  %v13444_v36 = vld [vmem:[%s17421_s4 + $0x80] sm:$0xff]   ;;  %v6480_v47 = vadd.f32 %v16402_v14, %v6279_v4  ;;  %v6280_v39 = vadd.f32 %v16411_v27, %v6079_v11  ;;  %v13445_v27 = vld [vmem:[%s17421_s4 + $0xf8] sm:$0xff]  }
 0x30f   : > { %17632 = vst [vmem:[#allocation9_spill] sm:$0xff] %v16500_v8  ;;  %12950 = vmatpush3.bf16.msra.mxu0 %v13439_v18  ;;  %v16506_v6 = vpop.f32.mrf.mxu0  ;;  %v8792_v8 = vpack.c.bf16 %v8784_v16, %v8783_v22  ;;  %v6277_v18 = vadd.f32 %v16407_v56, %v6076_v29  ;;  %v6077_v16 = vadd.f32 %v16307_v58, %v5876_v35  ;;  %v9173_v29 = vld [vmem:[#allocation2 + $0x11f] sm:$0xff]  ;;  %v8975_v14 = vld [vmem:[#allocation2 + $0x136] sm:$0xff] }
 0x310   : > { %12982 = vmatpush3.bf16.msra.mxu1 %v13440_v37  ;;  %12951 = vmatprep.subr.bf16.mxu0 %v13441_v15  ;;  %v16512_v10 = vpop.f32.mrf.mxu1  ;;  %v16525_v37 = vld [vmem:[#allocation2 + $0x11e] sm:$0xff]  ;;  %v6082_v45 = vadd.f32 %v16311_v26, %v5881_v30  ;;  %v16545_v58 = vpack.c.bf16 %v9174_v48, %v9173_v29  ;;  %v8988_v35 = vpack.c.bf16 %v8975_v14, %v16533_v44 }
 0x311   : > { %12904 = vmatmul.mubr.bf16.gmra.mxu0 %v8559_v33  ;;  %12983 = vmatprep.subr.bf16.mxu1 %v13442_v60  ;;  %v16522_v24 = vpop.f32.mrf.mxu0  ;;  %v8987_v56 = vpack.c.bf16 %v16508_v46, %v16525_v37  ;;  %v6478_v26 = vadd.f32 %v16409_v23, %v6277_v18  ;;  %v6278_v30 = vadd.f32 %v16421_v1, %v6077_v16  ;;  %v9176_v4 = vld [vmem:[#allocation2 + $0x137] sm:$0xff] }
 0x312   : > { %12936 = vmatmul.mubr.bf16.gmra.mxu1 %v8792_v8  ;;  %12955 = vmatprep.mubr.bf16.mxu0 %v8986_v53  ;;  %v16529_v57 = vpop.f32.mrf.mxu1  ;;  %v5882_v8 = vadd.f32 %v16323_v0, %v16210_v51  ;;  %v6080_v33 = vadd.f32 %v16321_v31, %v5879_v62  ;;  %v5880_v22 = vadd.f32 %v16334_v25, %v16215_v20  ;;  %v16564_v53 = vld [vmem:[#allocation2 + $0x13e] sm:$0xff]  ;;  %v9178_v31 = vld [vmem:[#allocation2 + $0x147] sm:$0xff] }
 0x313   : > { %12952 = vmatpush3.bf16.msra.mxu0 %v13441_v15  ;;  %12987 = vmatprep.mubr.bf16.mxu1 %v9187_v2  ;;  %v16550_v15 = vld [vmem:[#allocation2 + $0x146] sm:$0xff]  ;;  %v6283_v41 = vadd.f32 %v16425_v3, %v6082_v45  ;;  %v16562_v23 = vpack.c.bf16 %v9176_v4, %v9175_v40  ;;  %v6481_v21 = vadd.f32 %v16413_v52, %v6280_v39 }
 0x314   : > { %12984 = vmatpush3.bf16.msra.mxu1 %v13442_v60  ;;  %12953 = vmatprep.subr.bf16.mxu0 %v13443_v43  ;;  %v12573_v46 = vpop.f32.mrf.mxu0  ;;  %v13446_v60 = vld [vmem:[%s17421_s4 + $0x138] sm:$0xff]   ;;  %v8989_v37 = vpack.c.bf16 %v16550_v15, %v16564_v53  ;;  %v6083_v48 = vadd.f32 %v16325_v13, %v5882_v8  ;;  %v5885_v20 = vadd.f32 %v16339_v63, %v16225_v12  ;;  %v13447_v13 = vld [vmem:[%s17421_s4 + $0xf0] sm:$0xff]  }
 0x315   : > { %12985 = vmatprep.subr.bf16.mxu1 %v13444_v36  ;;  %v6681_v51 = vadd.f32 %v12573_v46, %v6480_v47  ;;  %v12605_v0 = vpop.f32.mrf.mxu1  ;;  %v6281_v25 = vadd.f32 %v16435_v34, %v6080_v33  ;;  %v6479_v52 = vadd.f32 %v16423_v49, %v6278_v30  ;;  %v9177_v47 = vld [vmem:[#allocation2 + $0x13f] sm:$0xff]  ;;  %v6081_v12 = vadd.f32 %v16337_v9, %v5880_v22  ;;  %v13448_v49 = vld [vmem:[%s17421_s4 + $0x130] sm:$0xff]   ;;  %v13450_v33 = vld [vmem:[%s17421_s4 + $0x128] sm:$0xff]  }
 0x316   : > { %v6616_v1 = vpop.f32.mrf.mxu0  ;;  %v5883_v63 = vadd.f32 %v16349_v50, %v16231_v61  ;;  %v6484_v34 = vadd.f32 %v16427_v55, %v6283_v41  ;;  %v16584_v39 = vpack.c.bf16 %v9178_v31, %v9177_v47  ;;  %v6284_v29 = vadd.f32 %v16439_v5, %v6083_v48  ;;  %v17647_v15 = vld [vmem:[#allocation46_spill] sm:$0xff] }
 0x317   : > { %12954 = vmatpush3.bf16.msra.mxu0 %v13443_v43  ;;  %v6882_v11 = vadd.f32 %v12605_v0, %v6681_v51  ;;  %v6679_v18 = vadd.f32 %v6616_v1, %v6478_v26  ;;  %v6817_v2 = vpop.f32.mrf.mxu1  ;;  %v6086_v40 = vadd.f32 %v16341_v7, %v5885_v20  ;;  %v5886_v45 = vadd.f32 %v16353_v28, %v16244_v19  ;;  %v13449_v19 = vld [vmem:[%s17421_s4 + $0xe8] sm:$0xff]   ;;  %v8979_v7 = vld [vmem:[#allocation2 + $0x156] sm:$0xff] }
 0x318   : > { %12986 = vmatpush3.bf16.msra.mxu1 %v13444_v36  ;;  %13003 = vmatprep.subr.bf16.mxu0 %v13445_v27  ;;  %v12574_v3 = vpop.f32.mrf.mxu0  ;;  %v6482_v5 = vadd.f32 %v16437_v59, %v6281_v25  ;;  %v6282_v46 = vadd.f32 %v16449_v42, %v6081_v12  ;;  %v9179_v28 = vld [vmem:[#allocation2 + $0x14f] sm:$0xff]  ;;  %v17633_v59 = vld [vmem:[#allocation12_spill] sm:$0xff] }
 0x319   : > { %v6898_v43 = vmax.f32 %v6882_v11, 0.0  ;;  %13035 = vmatprep.subr.bf16.mxu1 %v13446_v60  ;;  %v6880_v62 = vadd.f32 %v6817_v2, %v6679_v18  ;;  %v6682_v44 = vadd.f32 %v12574_v3, %v6481_v21  ;;  %v12606_v16 = vpop.f32.mrf.mxu1  ;;  %v6084_v0 = vadd.f32 %v17633_v59, %v5883_v63  ;;  %v17636_v42 = vld [vmem:[#allocation33_spill] sm:$0xff]  ;;  %v17637_v1 = vld [vmem:[#allocation14_spill] sm:$0xff]  ;;  %v17639_v3 = vld [vmem:[#allocation15_spill] sm:$0xff] }
 0x31a   : > { %12956 = vmatmul.mubr.bf16.vlgmr.msra.gmra.mxu0 %v8987_v56  ;;  %v6619_v36 = vpop.f32.mrf.mxu0  ;;  %v8978_v56 = vld [vmem:[#allocation2 + $0x14e] sm:$0xff]  ;;  %v6485_v21 = vadd.f32 %v17637_v1, %v6284_v29  ;;  %v9180_v2 = vld [vmem:[#allocation2 + $0x157] sm:$0xff]  ;;  %v17642_v12 = vld [vmem:[#allocation24_spill] sm:$0xff] }
 0x31b   : > { %6914 = vst [vmem:[%s16588_s12 + $0x10] sm:$0xff] %v6898_v43  ;;  %12988 = vmatmul.mubr.bf16.vlgmr.msra.gmra.mxu1 %v16545_v58  ;;  %12959 = vmatprep.mubr.bf16.mxu0 %v8988_v35  ;;  %v6896_v61 = vmax.f32 %v6880_v62, 0.0  ;;  %v6883_v9 = vadd.f32 %v12606_v16, %v6682_v44  ;;  %v6680_v50 = vadd.f32 %v6619_v36, %v6479_v52  ;;  %v6820_v55 = vpop.f32.mrf.mxu1  ;;  %v17635_v35 = vld [vmem:[#allocation45_spill] sm:$0xff]  ;;  %v17640_v52 = vld [vmem:[#allocation44_spill] sm:$0xff]  ;;  %v17641_v62 = vld [vmem:[#allocation10_spill] sm:$0xff] }
 0x31c   : > { %12991 = vmatprep.mubr.bf16.mxu1 %v16562_v23  ;;  %13004 = vmatpush3.bf16.msra.mxu0 %v13445_v27  ;;  %v12577_v8 = vpop.f32.mrf.mxu0  ;;  %v17634_v27 = vld [vmem:[#allocation40_spill] sm:$0xff]  ;;  %v8990_v22 = vpack.c.bf16 %v8979_v7, %v8978_v56  ;;  %v17638_v20 = vld [vmem:[#allocation41_spill] sm:$0xff]  ;;  %v5889_v43 = vadd.f32 %v17640_v52, %v17639_v3  ;;  %v6285_v44 = vadd.f32 %v17641_v62, %v6084_v0  ;;  %v17650_v0 = vld [vmem:[#allocation43_spill] sm:$0xff] }
 0x31d   : > { %13036 = vmatpush3.bf16.msra.mxu1 %v13446_v60  ;;  %6912 = vst [vmem:[%s16588_s12] sm:$0xff] %v6896_v61  ;;  %v6899_v14 = vmax.f32 %v6883_v9, 0.0  ;;  %13005 = vmatprep.subr.bf16.mxu0 %v13447_v13  ;;  %v6881_v26 = vadd.f32 %v6820_v55, %v6680_v50  ;;  %v6685_v30 = vadd.f32 %v12577_v8, %v6484_v34  ;;  %v12609_v51 = vpop.f32.mrf.mxu1  ;;  %v13451_v9 = vld [vmem:[%s17421_s4 + $0xe0] sm:$0xff]   ;;  %v17643_v50 = vld [vmem:[#allocation31_spill] sm:$0xff]  ;;  %v17645_v56 = vld [vmem:[#allocation13_spill] sm:$0xff] }
 0x31e   : > { %v5884_v4 = vadd.f32 %v17635_v35, %v17634_v27  ;;  %v6287_v60 = vadd.f32 %v17636_v42, %v6086_v40  ;;  %13037 = vmatprep.subr.bf16.mxu1 %v13448_v49  ;;  %v6632_v41 = vpop.f32.mrf.mxu0  ;;  %v6087_v25 = vadd.f32 %v17638_v20, %v5886_v45  ;;  %v16615_v16 = vpack.c.bf16 %v9180_v2, %v9179_v28  ;;  %v17646_v45 = vld [vmem:[#allocation17_spill] sm:$0xff]  ;;  %v17649_v28 = vld [vmem:[#allocation16_spill] sm:$0xff]  ;;  %v13453_v35 = vld [vmem:[%s17421_s4 + $0xd8] sm:$0xff]  }
 0x31f   : > { %6915 = vst [vmem:[%s16588_s12 + $0x18] sm:$0xff] %v6899_v14  ;;  %v6897_v11 = vmax.f32 %v6881_v26, 0.0  ;;  %v6886_v18 = vadd.f32 %v12609_v51, %v6685_v30  ;;  %v6683_v31 = vadd.f32 %v6632_v41, %v6482_v5  ;;  %v6833_v48 = vpop.f32.mrf.mxu1  ;;  %v6483_v63 = vadd.f32 %v17642_v12, %v6282_v46  ;;  %v8981_v7 = vld [vmem:[#allocation2 + $0x166] sm:$0xff]  ;;  %v8980_v1 = vld [vmem:[#allocation2 + $0x15e] sm:$0xff]  ;;  %v17652_v2 = vld [vmem:[#allocation42_spill] sm:$0xff] }
 0x320   : > { %13006 = vmatpush3.bf16.msra.mxu0 %v13447_v13  ;;  %v12578_v47 = vpop.f32.mrf.mxu0  ;;  %v6085_v55 = vadd.f32 %v17643_v50, %v5884_v4  ;;  %v17644_v13 = vld [vmem:[#allocation22_spill] sm:$0xff]  ;;  %v6488_v5 = vadd.f32 %v17646_v45, %v6287_v60  ;;  %v6288_v46 = vadd.f32 %v16467_v17, %v6087_v25  ;;  %v6090_v53 = vadd.f32 %v17647_v15, %v5889_v43  ;;  %v9181_v62 = vld [vmem:[#allocation2 + $0x15f] sm:$0xff] }
 0x321   : > { %13038 = vmatpush3.bf16.msra.mxu1 %v13448_v49  ;;  %6913 = vst [vmem:[%s16588_s12 + $0x8] sm:$0xff] %v6897_v11  ;;  %v6902_v34 = vmax.f32 %v6886_v18, 0.0  ;;  %13007 = vmatprep.subr.bf16.mxu0 %v13449_v19  ;;  %v6884_v36 = vadd.f32 %v6833_v48, %v6683_v31  ;;  %v6686_v29 = vadd.f32 %v12578_v47, %v6485_v21  ;;  %v12610_v61 = vpop.f32.mrf.mxu1  ;;  %v13452_v49 = vld [vmem:[%s17421_s4 + $0x120] sm:$0xff]   ;;  %v8982_v11 = vld [vmem:[#allocation2 + $0x16e] sm:$0xff]  ;;  %v17653_v31 = vld [vmem:[#allocation27_spill] sm:$0xff] }
 0x322   : > { %v5887_v40 = vadd.f32 %v17645_v56, %v17644_v13  ;;  %12960 = vmatmul.mubr.bf16.gmra.mxu0 %v8989_v37  ;;  %13039 = vmatprep.subr.bf16.mxu1 %v13450_v33  ;;  %v6635_v8 = vpop.f32.mrf.mxu0  ;;  %v17648_v37 = vld [vmem:[#allocation39_spill] sm:$0xff]  ;;  %v6486_v27 = vadd.f32 %v17650_v0, %v6285_v44  ;;  %v6286_v4 = vadd.f32 %v16479_v54, %v6085_v55  ;;  %v9182_v21 = vld [vmem:[#allocation2 + $0x167] sm:$0xff]  ;;  %v9183_v47 = vld [vmem:[#allocation2 + $0x16f] sm:$0xff] }
 0x323   : > { %6918 = vst [vmem:[%s16588_s12 + $0x30] sm:$0xff] %v6902_v34  ;;  %12992 = vmatmul.mubr.bf16.gmra.mxu1 %v16584_v39  ;;  %12963 = vmatprep.mubr.bf16.mxu0 %v8990_v22  ;;  %v6900_v14 = vmax.f32 %v6884_v36, 0.0  ;;  %v6887_v26 = vadd.f32 %v12610_v61, %v6686_v29  ;;  %v6684_v30 = vadd.f32 %v6635_v8, %v6483_v63  ;;  %v6836_v51 = vpop.f32.mrf.mxu1  ;;  %v17651_v18 = vld [vmem:[#allocation21_spill] sm:$0xff]  ;;  %v8983_v44 = vld [vmem:[#allocation2 + $0x176] sm:$0xff]  ;;  %v17654_v34 = vld [vmem:[#allocation36_spill] sm:$0xff] }
 0x324   : > { %v5890_v59 = vadd.f32 %v17649_v28, %v17648_v37  ;;  %12995 = vmatprep.mubr.bf16.mxu1 %v16615_v16  ;;  %13008 = vmatpush3.bf16.msra.mxu0 %v13449_v19  ;;  %v12581_v17 = vpop.f32.mrf.mxu0  ;;  %v6088_v19 = vadd.f32 %v17651_v18, %v5887_v40  ;;  %v5888_v48 = vadd.f32 %v17653_v31, %v17652_v2  ;;  %v17655_v36 = vld [vmem:[#allocation32_spill] sm:$0xff]  ;;  %v17656_v13 = vld [vmem:[#allocation11_spill] sm:$0xff]  ;;  %v17659_v0 = vld [vmem:[#allocation9_spill] sm:$0xff] }
 0x325   : > { %13040 = vmatpush3.bf16.msra.mxu1 %v13450_v33  ;;  %6916 = vst [vmem:[%s16588_s12 + $0x20] sm:$0xff] %v6900_v14  ;;  %v6903_v42 = vmax.f32 %v6887_v26, 0.0  ;;  %13009 = vmatprep.subr.bf16.mxu0 %v13451_v9  ;;  %v6885_v60 = vadd.f32 %v6836_v51, %v6684_v30  ;;  %v6689_v22 = vadd.f32 %v12581_v17, %v6488_v5  ;;  %v12613_v41 = vpop.f32.mrf.mxu1  ;;  %v13454_v33 = vld [vmem:[%s17421_s4 + $0x118] sm:$0xff]  }
 0x326   : > { %v6291_v20 = vadd.f32 %v16485_v32, %v6090_v53  ;;  %13041 = vmatprep.subr.bf16.mxu1 %v13452_v49  ;;  %v8991_v54 = vpack.c.bf16 %v8981_v7, %v8980_v1  ;;  %v6648_v25 = vpop.f32.mrf.mxu0  ;;  %v6489_v3 = vadd.f32 %v16469_v38, %v6288_v46  ;;  %v6091_v32 = vadd.f32 %v17654_v34, %v5890_v59  ;;  %v9184_v40 = vld [vmem:[#allocation2 + $0x177] sm:$0xff]  ;;  %v9186_v1 = vld [vmem:[#allocation2 + $0x187] sm:$0xff]  ;;  %v9185_v31 = vld [vmem:[#allocation2 + $0x17f] sm:$0xff] }
 0x327   : > { %6919 = vst [vmem:[%s16588_s12 + $0x38] sm:$0xff] %v6903_v42  ;;  %v6901_v52 = vmax.f32 %v6885_v60, 0.0  ;;  %v6890_v43 = vadd.f32 %v12613_v41, %v6689_v22  ;;  %v6687_v12 = vadd.f32 %v6648_v25, %v6486_v27  ;;  %v6849_v63 = vpop.f32.mrf.mxu1  ;;  %v6289_v29 = vadd.f32 %v17655_v36, %v6088_v19  ;;  %v13455_v46 = vld [vmem:[%s17421_s4 + $0xd0] sm:$0xff]   ;;  %v17658_v26 = vld [vmem:[#allocation35_spill] sm:$0xff]  ;;  %v8985_v41 = vld [vmem:[#allocation2 + $0x186] sm:$0xff] }
 0x328   : > { %13010 = vmatpush3.bf16.msra.mxu0 %v13451_v9  ;;  %v16656_v61 = vpack.c.bf16 %v9182_v21, %v9181_v62  ;;  %v8992_v50 = vpack.c.bf16 %v8983_v44, %v8982_v11  ;;  %v12582_v55 = vpop.f32.mrf.mxu0  ;;  %v6487_v38 = vadd.f32 %v17656_v13, %v6286_v4  ;;  %v17657_v9 = vld [vmem:[#allocation23_spill] sm:$0xff]  ;;  %v6492_v30 = vadd.f32 %v17658_v26, %v6291_v20  ;;  %v13457_v21 = vld [vmem:[%s17421_s4 + $0xc8] sm:$0xff]  }
 0x329   : > { %13042 = vmatpush3.bf16.msra.mxu1 %v13452_v49  ;;  %6917 = vst [vmem:[%s16588_s12 + $0x28] sm:$0xff] %v6901_v52  ;;  %v6906_v56 = vmax.f32 %v6890_v43, 0.0  ;;  %13011 = vmatprep.subr.bf16.mxu0 %v13453_v35  ;;  %v6888_v45 = vadd.f32 %v6849_v63, %v6687_v12  ;;  %v6690_v5 = vadd.f32 %v12582_v55, %v6489_v3  ;;  %v12614_v8 = vpop.f32.mrf.mxu1  ;;  %v13456_v49 = vld [vmem:[%s17421_s4 + $0x110] sm:$0xff]   ;;  %v8984_v2 = vld [vmem:[#allocation2 + $0x17e] sm:$0xff]  ;;  %v9578_v26 = vld [vmem:[#allocation2 + $0x148] sm:$0xff] }
 0x32a   : > { %v6089_v14 = vadd.f32 %v17657_v9, %v5888_v48  ;;  %12964 = vmatmul.mubr.bf16.gmra.mxu0 %v8991_v54  ;;  %13043 = vmatprep.subr.bf16.mxu1 %v13454_v33  ;;  %v16665_v51 = vpack.c.bf16 %v9184_v40, %v9183_v47  ;;  %v6651_v7 = vpop.f32.mrf.mxu0  ;;  %v6292_v15 = vadd.f32 %v16506_v6, %v6091_v32  ;;  %v9574_v48 = vld [vmem:[#allocation2 + $0x128] sm:$0xff]  ;;  %v13459_v12 = vld [vmem:[%s17421_s4 + $0xc0] sm:$0xff]  }
 0x32b   : > { %6922 = vst [vmem:[%s16588_s12 + $0x50] sm:$0xff] %v6906_v56  ;;  %12996 = vmatmul.mubr.bf16.gmra.mxu1 %v16656_v61  ;;  %12967 = vmatprep.mubr.bf16.mxu0 %v8992_v50  ;;  %v6904_v53 = vmax.f32 %v6888_v45, 0.0  ;;  %v6891_v37 = vadd.f32 %v12614_v8, %v6690_v5  ;;  %v6688_v28 = vadd.f32 %v6651_v7, %v6487_v38  ;;  %v6852_v59 = vpop.f32.mrf.mxu1  ;;  %v13461_v56 = vld [vmem:[%s17421_s4 + $0x178] sm:$0xff]   ;;  %v9575_v7 = vld [vmem:[#allocation2 + $0x130] sm:$0xff] }
 0x32c   : > { %v6490_v27 = vadd.f32 %v17659_v0, %v6289_v29  ;;  %12999 = vmatprep.mubr.bf16.mxu1 %v16665_v51  ;;  %13012 = vmatpush3.bf16.msra.mxu0 %v13453_v35  ;;  %v12585_v17 = vpop.f32.mrf.mxu0  ;;  %v6290_v4 = vadd.f32 %v16522_v24, %v6089_v14  ;;  %v13458_v35 = vld [vmem:[%s17421_s4 + $0x108] sm:$0xff]   ;;  %v6493_v24 = vadd.f32 %v16512_v10, %v6292_v15  ;;  %v9573_v10 = vld [vmem:[#allocation2 + $0x120] sm:$0xff]  ;;  %v13462_v5 = vld [vmem:[%s17421_s4 + $0x1b8] sm:$0xff]  }
 0x32d   : > { %13044 = vmatpush3.bf16.msra.mxu1 %v13454_v33  ;;  %6920 = vst [vmem:[%s16588_s12 + $0x40] sm:$0xff] %v6904_v53  ;;  %v6907_v6 = vmax.f32 %v6891_v37, 0.0  ;;  %13013 = vmatprep.subr.bf16.mxu0 %v13455_v46  ;;  %v6889_v42 = vadd.f32 %v6852_v59, %v6688_v28  ;;  %v6693_v60 = vadd.f32 %v12585_v17, %v6492_v30  ;;  %v12617_v22 = vpop.f32.mrf.mxu1  ;;  %v9577_v37 = vld [vmem:[#allocation2 + $0x140] sm:$0xff] }
 0x32e   : > { %13045 = vmatprep.subr.bf16.mxu1 %v13456_v49  ;;  %v6664_v11 = vpop.f32.mrf.mxu0  ;;  %v8993_v33 = vpack.c.bf16 %v8985_v41, %v8984_v2  ;;  %v16685_v25 = vpack.c.bf16 %v9186_v1, %v9185_v31  ;;  %v6491_v52 = vadd.f32 %v16529_v57, %v6290_v4  ;;  %v9589_v63 = vpack.c.bf16 %v9574_v48, %v9573_v10  ;;  %v13460_v57 = vld [vmem:[%s17421_s4 + $0x100] sm:$0xff]   ;;  %v13464_v4 = vld [vmem:[%s17421_s4 + $0x1b0] sm:$0xff]  }
 0x32f   : > { %6923 = vst [vmem:[%s16588_s12 + $0x58] sm:$0xff] %v6907_v6  ;;  %v6905_v18 = vmax.f32 %v6889_v42, 0.0  ;;  %v6894_v19 = vadd.f32 %v12617_v22, %v6693_v60  ;;  %v6691_v20 = vadd.f32 %v6664_v11, %v6490_v27  ;;  %v6865_v54 = vpop.f32.mrf.mxu1  ;;  %v13463_v27 = vld [vmem:[%s17421_s4 + $0x170] sm:$0xff]   ;;  %v9591_v17 = vpack.c.bf16 %v9578_v26, %v9577_v37  ;;  %v13466_v11 = vld [vmem:[%s17421_s4 + $0x1a8] sm:$0xff]   ;;  %v13467_v10 = vld [vmem:[%s17421_s4 + $0x160] sm:$0xff]  }
 0x330   : > { %13014 = vmatpush3.bf16.msra.mxu0 %v13455_v46  ;;  %v12586_v3 = vpop.f32.mrf.mxu0  ;;  %v9576_v46 = vld [vmem:[#allocation2 + $0x138] sm:$0xff]  ;;  %v9579_v48 = vld [vmem:[#allocation2 + $0x150] sm:$0xff] }
 0x331   : > { %13046 = vmatpush3.bf16.msra.mxu1 %v13456_v49  ;;  %6921 = vst [vmem:[%s16588_s12 + $0x48] sm:$0xff] %v6905_v18  ;;  %v6910_v43 = vmax.f32 %v6894_v19, 0.0  ;;  %13015 = vmatprep.subr.bf16.mxu0 %v13457_v21  ;;  %v6892_v62 = vadd.f32 %v6865_v54, %v6691_v20  ;;  %v6694_v44 = vadd.f32 %v12586_v3, %v6493_v24  ;;  %v12618_v47 = vpop.f32.mrf.mxu1  ;;  %v9582_v19 = vld [vmem:[#allocation2 + $0x168] sm:$0xff] }
 0x332   : > { %12968 = vmatmul.mubr.bf16.gmra.mxu0 %v8993_v33  ;;  %13047 = vmatprep.subr.bf16.mxu1 %v13458_v35  ;;  %v6667_v34 = vpop.f32.mrf.mxu0  ;;  %v9590_v53 = vpack.c.bf16 %v9576_v46, %v9575_v7  ;;  %v9581_v33 = vld [vmem:[#allocation2 + $0x160] sm:$0xff] }
 0x333   : > { %6926 = vst [vmem:[%s16588_s12 + $0x70] sm:$0xff] %v6910_v43  ;;  %13000 = vmatmul.mubr.bf16.gmra.mxu1 %v16685_v25  ;;  %13019 = vmatprep.mubr.bf16.mxu0 %v16545_v58  ;;  %v6908_v32 = vmax.f32 %v6892_v62, 0.0  ;;  %v6895_v36 = vadd.f32 %v12618_v47, %v6694_v44  ;;  %v6692_v29 = vadd.f32 %v6667_v34, %v6491_v52  ;;  %v6868_v50 = vpop.f32.mrf.mxu1  ;;  %v16705_v58 = vld [vmem:[%s17422_s5] ss:$0 sm:$0xff] }
 0x334   : > { %13016 = vmatpush3.bf16.msra.mxu0 %v13457_v21  ;;  %13051 = vmatprep.mubr.bf16.mxu1 %v9589_v63  ;;  %v9593_v62 = vpack.c.bf16 %v9582_v19, %v9581_v33  ;;  %v13468_v44 = vld [vmem:[%s17421_s4 + $0x1a0] sm:$0xff]   ;;  %v9975_v33 = vld [vmem:[#allocation2 + $0x131] sm:$0xff] }
 0x335   : > { %13048 = vmatpush3.bf16.msra.mxu1 %v13458_v35  ;;  %6924 = vst [vmem:[%s16588_s12 + $0x60] sm:$0xff] %v6908_v32  ;;  %v6911_v55 = vmax.f32 %v6895_v36, 0.0  ;;  %13017 = vmatprep.subr.bf16.mxu0 %v13459_v12  ;;  %v6893_v13 = vadd.f32 %v6868_v50, %v6692_v29  ;;  %v12637_v38 = vpop.f32.mrf.mxu0  ;;  %v13465_v35 = vld [vmem:[%s17421_s4 + $0x168] sm:$0xff]   ;;  %v13469_v29 = vld [vmem:[%s17421_s4 + $0x158] sm:$0xff]   ;;  %v9585_v46 = vld [vmem:[#allocation2 + $0x180] sm:$0xff] }
 0x336   : > { %13049 = vmatprep.subr.bf16.mxu1 %v13460_v57  ;;  %v7115_v40 = vadd.f32 %v16705_v58, %v12637_v38  ;;  %v12669_v45 = vpop.f32.mrf.mxu1  ;;  %v13470_v50 = vld [vmem:[%s17421_s4 + $0x198] sm:$0xff]   ;;  %v9586_v38 = vld [vmem:[#allocation2 + $0x188] sm:$0xff] }
 0x337   : > { %6927 = vst [vmem:[%s16588_s12 + $0x78] sm:$0xff] %v6911_v55  ;;  %v6909_v8 = vmax.f32 %v6893_v13, 0.0  ;;  %v7050_v9 = vpop.f32.mrf.mxu0  ;;  %v9595_v7 = vpack.c.bf16 %v9586_v38, %v9585_v46  ;;  %v9977_v38 = vld [vmem:[#allocation2 + $0x141] sm:$0xff] }
 0x338   : > { %13018 = vmatpush3.bf16.msra.mxu0 %v13459_v12  ;;  %v16712_v14 = vadd.f32 %v12669_v45, %v7115_v40  ;;  %v7113_v30 = vadd.f32 %v16705_v58, %v7050_v9  ;;  %v7251_v49 = vpop.f32.mrf.mxu1  ;;  %v9583_v45 = vld [vmem:[#allocation2 + $0x170] sm:$0xff] }
 0x339   : > { %13050 = vmatpush3.bf16.msra.mxu1 %v13460_v57  ;;  %6925 = vst [vmem:[%s16588_s12 + $0x68] sm:$0xff] %v6909_v8  ;;  %13067 = vmatprep.subr.bf16.mxu0 %v13461_v56  ;;  %v12638_v15 = vpop.f32.mrf.mxu0 }
 0x33a   : > { %13099 = vmatprep.subr.bf16.mxu1 %v13462_v5  ;;  %v16716_v28 = vadd.f32 %v7251_v49, %v7113_v30  ;;  %v7116_v59 = vadd.f32 %v16705_v58, %v12638_v15  ;;  %v12670_v0 = vpop.f32.mrf.mxu1  ;;  %v13471_v49 = vld [vmem:[%s17421_s4 + $0x150] sm:$0xff]  }
 0x33b   : > { %13020 = vmatmul.mubr.bf16.vlgmr.msra.gmra.mxu0 %v16562_v23  ;;  %v7053_v6 = vpop.f32.mrf.mxu0  ;;  %v13472_v15 = vld [vmem:[%s17421_s4 + $0x190] sm:$0xff]  }
 0x33c   : > { %13052 = vmatmul.mubr.bf16.vlgmr.msra.gmra.mxu1 %v9590_v53  ;;  %13023 = vmatprep.mubr.bf16.mxu0 %v16584_v39  ;;  %v16727_v42 = vadd.f32 %v12670_v0, %v7116_v59  ;;  %v7114_v60 = vadd.f32 %v16705_v58, %v7053_v6  ;;  %v7254_v22 = vpop.f32.mrf.mxu1  ;;  %v9580_v39 = vld [vmem:[#allocation2 + $0x158] sm:$0xff] }
 0x33d   : > { %13055 = vmatprep.mubr.bf16.mxu1 %v9591_v17  ;;  %13068 = vmatpush3.bf16.msra.mxu0 %v13461_v56  ;;  %v12641_v41 = vpop.f32.mrf.mxu0  ;;  %v9592_v54 = vpack.c.bf16 %v9580_v39, %v9579_v48  ;;  %v9774_v17 = vld [vmem:[#allocation2 + $0x121] sm:$0xff]  ;;  %v9387_v39 = vld [vmem:[#allocation2 + $0x197] sm:$0xff] }
 0x33e   : > { %13100 = vmatpush3.bf16.msra.mxu1 %v13462_v5  ;;  %13069 = vmatprep.subr.bf16.mxu0 %v13463_v27  ;;  %v16730_v23 = vadd.f32 %v7254_v22, %v7114_v60  ;;  %v7119_v1 = vadd.f32 %v16705_v58, %v12641_v41  ;;  %v12673_v21 = vpop.f32.mrf.mxu1  ;;  %v9386_v60 = vld [vmem:[#allocation2 + $0x18f] sm:$0xff]  ;;  %v9588_v41 = vld [vmem:[#allocation2 + $0x198] sm:$0xff] }
 0x33f   : > { %13101 = vmatprep.subr.bf16.mxu1 %v13464_v4  ;;  %v7066_v24 = vpop.f32.mrf.mxu0  ;;  %v9775_v22 = vld [vmem:[#allocation2 + $0x129] sm:$0xff] }
 0x340   : > { %v16739_v18 = vadd.f32 %v12673_v21, %v7119_v1  ;;  %v7117_v2 = vadd.f32 %v16705_v58, %v7066_v24  ;;  %v7267_v31 = vpop.f32.mrf.mxu1  ;;  %v13474_v1 = vld [vmem:[%s17421_s4 + $0x188] sm:$0xff]   ;;  %v9790_v48 = vpack.c.bf16 %v9775_v22, %v9774_v17 }
 0x341   : > { %13070 = vmatpush3.bf16.msra.mxu0 %v13463_v27  ;;  %v12642_v20 = vpop.f32.mrf.mxu0  ;;  %v13481_v22 = vld [vmem:[%s17421_s4 + $0x1e8] sm:$0xff]  }
 0x342   : > { %13102 = vmatpush3.bf16.msra.mxu1 %v13464_v4  ;;  %13071 = vmatprep.subr.bf16.mxu0 %v13465_v35  ;;  %v16742_v3 = vadd.f32 %v7267_v31, %v7117_v2  ;;  %v7120_v52 = vadd.f32 %v16705_v58, %v12642_v20  ;;  %v12674_v43 = vpop.f32.mrf.mxu1  ;;  %v9395_v2 = vpack.c.bf16 %v9387_v39, %v9386_v60  ;;  %v9587_v31 = vld [vmem:[#allocation2 + $0x190] sm:$0xff] }
 0x343   : > { %13024 = vmatmul.mubr.bf16.gmra.mxu0 %v16615_v16  ;;  %13103 = vmatprep.subr.bf16.mxu1 %v13466_v11  ;;  %v7069_v47 = vpop.f32.mrf.mxu0 }
 0x344   : > { %13056 = vmatmul.mubr.bf16.gmra.mxu1 %v9592_v54  ;;  %13027 = vmatprep.mubr.bf16.mxu0 %v16656_v61  ;;  %v16753_v12 = vadd.f32 %v12674_v43, %v7120_v52  ;;  %v7118_v63 = vadd.f32 %v16705_v58, %v7069_v47  ;;  %v7270_v57 = vpop.f32.mrf.mxu1  ;;  %v9584_v61 = vld [vmem:[#allocation2 + $0x178] sm:$0xff]  ;;  %v9596_v54 = vpack.c.bf16 %v9588_v41, %v9587_v31  ;;  %v13476_v47 = vld [vmem:[%s17421_s4 + $0x180] sm:$0xff]  }
 0x345   : > { %13059 = vmatprep.mubr.bf16.mxu1 %v9593_v62  ;;  %13072 = vmatpush3.bf16.msra.mxu0 %v13465_v35  ;;  %v12645_v34 = vpop.f32.mrf.mxu0  ;;  %v9594_v8 = vpack.c.bf16 %v9584_v61, %v9583_v45  ;;  %v13475_v62 = vld [vmem:[%s17421_s4 + $0x140] sm:$0xff]   ;;  %v13477_v61 = vld [vmem:[%s17421_s4 + $0x1f8] sm:$0xff]  }
 0x346   : > { %13104 = vmatpush3.bf16.msra.mxu1 %v13466_v11  ;;  %13073 = vmatprep.subr.bf16.mxu0 %v13467_v10  ;;  %v16756_v16 = vadd.f32 %v7270_v57, %v7118_v63  ;;  %v7123_v32 = vadd.f32 %v16705_v58, %v12645_v34  ;;  %v12677_v36 = vpop.f32.mrf.mxu1  ;;  %v9976_v11 = vld [vmem:[#allocation2 + $0x139] sm:$0xff]  ;;  %v9981_v41 = vld [vmem:[#allocation2 + $0x161] sm:$0xff]  ;;  %v9983_v31 = vld [vmem:[#allocation2 + $0x171] sm:$0xff] }
 0x347   : > { %13105 = vmatprep.subr.bf16.mxu1 %v13468_v44  ;;  %v7082_v55 = vpop.f32.mrf.mxu0 }
 0x348   : > { %v16765_v13 = vadd.f32 %v12677_v36, %v7123_v32  ;;  %v7121_v56 = vadd.f32 %v16705_v58, %v7082_v55  ;;  %v7283_v40 = vpop.f32.mrf.mxu1 }
 0x349   : > { %13074 = vmatpush3.bf16.msra.mxu0 %v13467_v10  ;;  %v12646_v5 = vpop.f32.mrf.mxu0 }
 0x34a   : > { %13106 = vmatpush3.bf16.msra.mxu1 %v13468_v44  ;;  %13075 = vmatprep.subr.bf16.mxu0 %v13469_v29  ;;  %v16768_v9 = vadd.f32 %v7283_v40, %v7121_v56  ;;  %v7124_v26 = vadd.f32 %v16705_v58, %v12646_v5  ;;  %v12678_v30 = vpop.f32.mrf.mxu1  ;;  %v9991_v44 = vpack.c.bf16 %v9976_v11, %v9975_v33  ;;  %v9978_v56 = vld [vmem:[#allocation2 + $0x149] sm:$0xff]  ;;  %v9980_v5 = vld [vmem:[#allocation2 + $0x159] sm:$0xff] }
 0x34b   : > { %13028 = vmatmul.mubr.bf16.gmra.mxu0 %v16665_v51  ;;  %13107 = vmatprep.subr.bf16.mxu1 %v13470_v50  ;;  %v7085_v53 = vpop.f32.mrf.mxu0  ;;  %v9984_v11 = vld [vmem:[#allocation2 + $0x179] sm:$0xff] }
 0x34c   : > { %13060 = vmatmul.mubr.bf16.gmra.mxu1 %v9594_v8  ;;  %13031 = vmatprep.mubr.bf16.mxu0 %v16685_v25  ;;  %v16779_v37 = vadd.f32 %v12678_v30, %v7124_v26  ;;  %v7122_v59 = vadd.f32 %v16705_v58, %v7085_v53  ;;  %v7286_v0 = vpop.f32.mrf.mxu1  ;;  %v13473_v25 = vld [vmem:[%s17421_s4 + $0x148] sm:$0xff]   ;;  %v9992_v30 = vpack.c.bf16 %v9978_v56, %v9977_v38  ;;  %v13479_v53 = vld [vmem:[%s17421_s4 + $0x1f0] sm:$0xff]   ;;  %v13483_v33 = vld [vmem:[%s17421_s4 + $0x1e0] sm:$0xff]  }
 0x34d   : > { %13063 = vmatprep.mubr.bf16.mxu1 %v9595_v7  ;;  %13076 = vmatpush3.bf16.msra.mxu0 %v13469_v29  ;;  %v12649_v27 = vpop.f32.mrf.mxu0  ;;  %v9987_v38 = vld [vmem:[#allocation2 + $0x191] sm:$0xff]  ;;  %v9988_v56 = vld [vmem:[#allocation2 + $0x199] sm:$0xff] }
 0x34e   : > { %13108 = vmatpush3.bf16.msra.mxu1 %v13470_v50  ;;  %13077 = vmatprep.subr.bf16.mxu0 %v13471_v49  ;;  %v16782_v51 = vadd.f32 %v7286_v0, %v7122_v59  ;;  %v7127_v4 = vadd.f32 %v16705_v58, %v12649_v27  ;;  %v12681_v6 = vpop.f32.mrf.mxu1 }
 0x34f   : > { %13109 = vmatprep.subr.bf16.mxu1 %v13472_v15  ;;  %v7098_v21 = vpop.f32.mrf.mxu0 }
 0x350   : > { %v16791_v35 = vadd.f32 %v12681_v6, %v7127_v4  ;;  %v7125_v24 = vadd.f32 %v16705_v58, %v7098_v21  ;;  %v7299_v19 = vpop.f32.mrf.mxu1 }
 0x351   : > { %13078 = vmatpush3.bf16.msra.mxu0 %v13471_v49  ;;  %v12650_v20 = vpop.f32.mrf.mxu0 }
 0x352   : > { %13110 = vmatpush3.bf16.msra.mxu1 %v13472_v15  ;;  %13079 = vmatprep.subr.bf16.mxu0 %v13473_v25  ;;  %v16794_v52 = vadd.f32 %v7299_v19, %v7125_v24  ;;  %v7128_v43 = vadd.f32 %v16705_v58, %v12650_v20  ;;  %v12682_v10 = vpop.f32.mrf.mxu1 }
 0x353   : > { %13032 = vmatmul.mubr.bf16.gmra.mxu0 %v9395_v2  ;;  %13111 = vmatprep.subr.bf16.mxu1 %v13474_v1  ;;  %v7101_v63 = vpop.f32.mrf.mxu0 }
 0x354   : > { %13064 = vmatmul.mubr.bf16.gmra.mxu1 %v9596_v54  ;;  %13083 = vmatprep.mubr.bf16.mxu0 %v9790_v48  ;;  %v16803_v57 = vadd.f32 %v12682_v10, %v7128_v43  ;;  %v7126_v34 = vadd.f32 %v16705_v58, %v7101_v63  ;;  %v7302_v32 = vpop.f32.mrf.mxu1  ;;  %v13478_v58 = vld [vmem:[%s17421_s4 + $0x238] sm:$0xff]   ;;  %v9995_v43 = vpack.c.bf16 %v9984_v11, %v9983_v31 }
 0x355   : > { %13080 = vmatpush3.bf16.msra.mxu0 %v13473_v25  ;;  %13115 = vmatprep.mubr.bf16.mxu1 %v9991_v44 }
 0x356   : > { %13112 = vmatpush3.bf16.msra.mxu1 %v13474_v1  ;;  %13081 = vmatprep.subr.bf16.mxu0 %v13475_v62  ;;  %v16806_v36 = vadd.f32 %v7302_v32, %v7126_v34  ;;  %v12701_v29 = vpop.f32.mrf.mxu0  ;;  %v9982_v1 = vld [vmem:[#allocation2 + $0x169] sm:$0xff] }
 0x357   : > { %13113 = vmatprep.subr.bf16.mxu1 %v13476_v47  ;;  %v7517_v50 = vadd.f32 %v12701_v29, %v16712_v14  ;;  %v12733_v55 = vpop.f32.mrf.mxu1  ;;  %v9979_v14 = vld [vmem:[#allocation2 + $0x151] sm:$0xff]  ;;  %v9994_v2 = vpack.c.bf16 %v9982_v1, %v9981_v41 }
 0x358   : > { %v7452_v40 = vpop.f32.mrf.mxu0  ;;  %v9993_v59 = vpack.c.bf16 %v9980_v5, %v9979_v14  ;;  %v13485_v29 = vld [vmem:[%s17421_s4 + $0x1d8] sm:$0xff]   ;;  %v13487_v14 = vld [vmem:[%s17421_s4 + $0x1d0] sm:$0xff]  }
 0x359   : > { %13082 = vmatpush3.bf16.msra.mxu0 %v13475_v62  ;;  %v16815_v45 = vadd.f32 %v12733_v55, %v7517_v50  ;;  %v7515_v8 = vadd.f32 %v7452_v40, %v16716_v28  ;;  %v7653_v46 = vpop.f32.mrf.mxu1  ;;  %v13480_v28 = vld [vmem:[%s17421_s4 + $0x230] sm:$0xff]  }
 0x35a   : > { %13114 = vmatpush3.bf16.msra.mxu1 %v13476_v47  ;;  %13131 = vmatprep.subr.bf16.mxu0 %v13477_v61  ;;  %v12702_v26 = vpop.f32.mrf.mxu0  ;;  %v9986_v50 = vld [vmem:[#allocation2 + $0x189] sm:$0xff] }
 0x35b   : > { %13163 = vmatprep.subr.bf16.mxu1 %v13478_v58  ;;  %v16818_v49 = vadd.f32 %v7653_v46, %v7515_v8  ;;  %v7518_v7 = vadd.f32 %v12702_v26, %v16727_v42  ;;  %v12734_v15 = vpop.f32.mrf.mxu1 }
 0x35c   : > { %13084 = vmatmul.mubr.bf16.vlgmr.msra.gmra.mxu0 %v9991_v44  ;;  %v7455_v0 = vpop.f32.mrf.mxu0 }
 0x35d   : > { %13116 = vmatmul.mubr.bf16.vlgmr.msra.gmra.mxu1 %v9992_v30  ;;  %13087 = vmatprep.mubr.bf16.mxu0 %v9992_v30  ;;  %v16827_v27 = vadd.f32 %v12734_v15, %v7518_v7  ;;  %v7516_v17 = vadd.f32 %v7455_v0, %v16730_v23  ;;  %v7656_v4 = vpop.f32.mrf.mxu1  ;;  %v13482_v23 = vld [vmem:[%s17421_s4 + $0x228] sm:$0xff]   ;;  %v9997_v7 = vpack.c.bf16 %v9988_v56, %v9987_v38 }
 0x35e   : > { %13119 = vmatprep.mubr.bf16.mxu1 %v9993_v59  ;;  %13132 = vmatpush3.bf16.msra.mxu0 %v13477_v61  ;;  %v12705_v42 = vpop.f32.mrf.mxu0  ;;  %v9985_v61 = vld [vmem:[#allocation2 + $0x181] sm:$0xff] }
 0x35f   : > { %13164 = vmatpush3.bf16.msra.mxu1 %v13478_v58  ;;  %13133 = vmatprep.subr.bf16.mxu0 %v13479_v53  ;;  %v16830_v6 = vadd.f32 %v7656_v4, %v7516_v17  ;;  %v7521_v60 = vadd.f32 %v12705_v42, %v16739_v18  ;;  %v12737_v25 = vpop.f32.mrf.mxu1  ;;  %v9996_v8 = vpack.c.bf16 %v9986_v50, %v9985_v61  ;;  %v9989_v0 = vld [vmem:[#allocation2 + $0x1a1] sm:$0xff]  ;;  %v9990_v17 = vld [vmem:[#allocation2 + $0x1a9] sm:$0xff] }
 0x360   : > { %13165 = vmatprep.subr.bf16.mxu1 %v13480_v28  ;;  %v7468_v21 = vpop.f32.mrf.mxu0  ;;  %v10379_v61 = vld [vmem:[#allocation2 + $0x143] sm:$0xff]  ;;  %v10380_v50 = vld [vmem:[#allocation2 + $0x14b] sm:$0xff] }
 0x361   : > { %v16839_v39 = vadd.f32 %v12737_v25, %v7521_v60  ;;  %v7519_v24 = vadd.f32 %v7468_v21, %v16742_v3  ;;  %v7669_v19 = vpop.f32.mrf.mxu1  ;;  %v13484_v3 = vld [vmem:[%s17421_s4 + $0x220] sm:$0xff]   ;;  %v13489_v25 = vld [vmem:[%s17421_s4 + $0x1c8] sm:$0xff]  }
 0x362   : > { %13134 = vmatpush3.bf16.msra.mxu0 %v13479_v53  ;;  %v12706_v18 = vpop.f32.mrf.mxu0  ;;  %v10378_v21 = vld [vmem:[#allocation2 + $0x13b] sm:$0xff] }
 0x363   : > { %13166 = vmatpush3.bf16.msra.mxu1 %v13480_v28  ;;  %13135 = vmatprep.subr.bf16.mxu0 %v13481_v22  ;;  %v16842_v48 = vadd.f32 %v7669_v19, %v7519_v24  ;;  %v7522_v20 = vadd.f32 %v12706_v18, %v16753_v12  ;;  %v12738_v54 = vpop.f32.mrf.mxu1 }
 0x364   : > { %13088 = vmatmul.mubr.bf16.gmra.mxu0 %v9993_v59  ;;  %13167 = vmatprep.subr.bf16.mxu1 %v13482_v23  ;;  %v7471_v10 = vpop.f32.mrf.mxu0 }
 0x365   : > { %13120 = vmatmul.mubr.bf16.gmra.mxu1 %v9994_v2  ;;  %13091 = vmatprep.mubr.bf16.mxu0 %v9994_v2  ;;  %v16851_v62 = vadd.f32 %v12738_v54, %v7522_v20  ;;  %v7520_v44 = vadd.f32 %v7471_v10, %v16756_v16  ;;  %v7672_v12 = vpop.f32.mrf.mxu1  ;;  %v13486_v16 = vld [vmem:[%s17421_s4 + $0x218] sm:$0xff]  }
 0x366   : > { %13123 = vmatprep.mubr.bf16.mxu1 %v9995_v43  ;;  %13136 = vmatpush3.bf16.msra.mxu0 %v13481_v22  ;;  %v12709_v47 = vpop.f32.mrf.mxu0  ;;  %v10177_v22 = vld [vmem:[#allocation2 + $0x13a] sm:$0xff] }
 0x367   : > { %13168 = vmatpush3.bf16.msra.mxu1 %v13482_v23  ;;  %13137 = vmatprep.subr.bf16.mxu0 %v13483_v33  ;;  %v16854_v63 = vadd.f32 %v7672_v12, %v7520_v44  ;;  %v7525_v34 = vadd.f32 %v12709_v47, %v16765_v13  ;;  %v12741_v32 = vpop.f32.mrf.mxu1  ;;  %v9998_v23 = vpack.c.bf16 %v9990_v17, %v9989_v0  ;;  %v10377_v2 = vld [vmem:[#allocation2 + $0x133] sm:$0xff]  ;;  %v10383_v0 = vld [vmem:[#allocation2 + $0x163] sm:$0xff]  ;;  %v10384_v17 = vld [vmem:[#allocation2 + $0x16b] sm:$0xff] }
 0x368   : > { %13169 = vmatprep.subr.bf16.mxu1 %v13484_v3  ;;  %v7484_v55 = vpop.f32.mrf.mxu0 }
 0x369   : > { %v16863_v58 = vadd.f32 %v12741_v32, %v7525_v34  ;;  %v7523_v40 = vadd.f32 %v7484_v55, %v16768_v9  ;;  %v7685_v13 = vpop.f32.mrf.mxu1  ;;  %v13488_v9 = vld [vmem:[%s17421_s4 + $0x210] sm:$0xff]   ;;  %v10178_v32 = vld [vmem:[#allocation2 + $0x142] sm:$0xff] }
 0x36a   : > { %13138 = vmatpush3.bf16.msra.mxu0 %v13483_v33  ;;  %v12710_v5 = vpop.f32.mrf.mxu0  ;;  %v13491_v33 = vld [vmem:[%s17421_s4 + $0x1c0] sm:$0xff]  }
 0x36b   : > { %13170 = vmatpush3.bf16.msra.mxu1 %v13484_v3  ;;  %13139 = vmatprep.subr.bf16.mxu0 %v13485_v29  ;;  %v16866_v46 = vadd.f32 %v7685_v13, %v7523_v40  ;;  %v7526_v26 = vadd.f32 %v12710_v5, %v16779_v37  ;;  %v12742_v30 = vpop.f32.mrf.mxu1  ;;  %v10180_v40 = vld [vmem:[#allocation2 + $0x152] sm:$0xff]  ;;  %v10394_v5 = vpack.c.bf16 %v10380_v50, %v10379_v61  ;;  %v10390_v61 = vld [vmem:[#allocation2 + $0x19b] sm:$0xff] }
 0x36c   : > { %13092 = vmatmul.mubr.bf16.gmra.mxu0 %v9995_v43  ;;  %13171 = vmatprep.subr.bf16.mxu1 %v13486_v16  ;;  %v7487_v15 = vpop.f32.mrf.mxu0  ;;  %v13492_v43 = vld [vmem:[%s17421_s4 + $0x200] sm:$0xff]  }
 0x36d   : > { %13124 = vmatmul.mubr.bf16.gmra.mxu1 %v9996_v8  ;;  %13095 = vmatprep.mubr.bf16.mxu0 %v9996_v8  ;;  %v16875_v53 = vadd.f32 %v12742_v30, %v7526_v26  ;;  %v7524_v59 = vadd.f32 %v7487_v15, %v16782_v51  ;;  %v7688_v37 = vpop.f32.mrf.mxu1  ;;  %v13490_v51 = vld [vmem:[%s17421_s4 + $0x208] sm:$0xff]   ;;  %v10381_v26 = vld [vmem:[#allocation2 + $0x153] sm:$0xff] }
 0x36e   : > { %13127 = vmatprep.mubr.bf16.mxu1 %v9997_v7  ;;  %13140 = vmatpush3.bf16.msra.mxu0 %v13485_v29  ;;  %v12713_v28 = vpop.f32.mrf.mxu0  ;;  %v10179_v29 = vld [vmem:[#allocation2 + $0x14a] sm:$0xff] }
 0x36f   : > { %13172 = vmatpush3.bf16.msra.mxu1 %v13486_v16  ;;  %13141 = vmatprep.subr.bf16.mxu0 %v13487_v14  ;;  %v16878_v4 = vadd.f32 %v7688_v37, %v7524_v59  ;;  %v7529_v42 = vadd.f32 %v12713_v28, %v16791_v35  ;;  %v12745_v60 = vpop.f32.mrf.mxu1  ;;  %v10176_v35 = vld [vmem:[#allocation2 + $0x132] sm:$0xff]  ;;  %v10181_v16 = vld [vmem:[#allocation2 + $0x15a] sm:$0xff]  ;;  %v10193_v56 = vpack.c.bf16 %v10179_v29, %v10178_v32  ;;  %v10182_v37 = vld [vmem:[#allocation2 + $0x162] sm:$0xff] }
 0x370   : > { %13173 = vmatprep.subr.bf16.mxu1 %v13488_v9  ;;  %v7500_v41 = vpop.f32.mrf.mxu0  ;;  %v10192_v18 = vpack.c.bf16 %v10177_v22, %v10176_v35  ;;  %v10194_v8 = vpack.c.bf16 %v10181_v16, %v10180_v40  ;;  %v10183_v28 = vld [vmem:[#allocation2 + $0x16a] sm:$0xff]  ;;  %v10389_v29 = vld [vmem:[#allocation2 + $0x193] sm:$0xff] }
 0x371   : > { %v16887_v1 = vadd.f32 %v12745_v60, %v7529_v42  ;;  %v7527_v11 = vadd.f32 %v7500_v41, %v16794_v52  ;;  %v7701_v24 = vpop.f32.mrf.mxu1  ;;  %v10393_v52 = vpack.c.bf16 %v10378_v21, %v10377_v2  ;;  %v10185_v42 = vld [vmem:[#allocation2 + $0x17a] sm:$0xff]  ;;  %v10195_v22 = vpack.c.bf16 %v10183_v28, %v10182_v37  ;;  %v10184_v41 = vld [vmem:[#allocation2 + $0x172] sm:$0xff]  ;;  %v10190_v37 = vld [vmem:[#allocation2 + $0x1a2] sm:$0xff] }
 0x372   : > { %13142 = vmatpush3.bf16.msra.mxu0 %v13487_v14  ;;  %v12714_v19 = vpop.f32.mrf.mxu0  ;;  %v10396_v21 = vpack.c.bf16 %v10384_v17, %v10383_v0  ;;  %v10191_v28 = vld [vmem:[#allocation2 + $0x1aa] sm:$0xff] }
 0x373   : > { %13174 = vmatpush3.bf16.msra.mxu1 %v13488_v9  ;;  %13143 = vmatprep.subr.bf16.mxu0 %v13489_v25  ;;  %v16890_v31 = vadd.f32 %v7701_v24, %v7527_v11  ;;  %v7530_v20 = vadd.f32 %v12714_v19, %v16803_v57  ;;  %v12746_v54 = vpop.f32.mrf.mxu1  ;;  %v10196_v11 = vpack.c.bf16 %v10185_v42, %v10184_v41  ;;  %v10385_v24 = vld [vmem:[#allocation2 + $0x173] sm:$0xff]  ;;  %v10391_v17 = vld [vmem:[#allocation2 + $0x1a3] sm:$0xff]  ;;  %v10392_v42 = vld [vmem:[#allocation2 + $0x1ab] sm:$0xff] }
 0x374   : > { %13096 = vmatmul.mubr.bf16.gmra.mxu0 %v9997_v7  ;;  %13175 = vmatprep.subr.bf16.mxu1 %v13490_v51  ;;  %v7503_v3 = vpop.f32.mrf.mxu0 }
 0x375   : > { %17660 = vst [vmem:[#allocation20_spill] sm:$0xff] %v16890_v31  ;;  %13128 = vmatmul.mubr.bf16.gmra.mxu1 %v9998_v23  ;;  %13147 = vmatprep.mubr.bf16.mxu0 %v10192_v18  ;;  %v16899_v10 = vadd.f32 %v12746_v54, %v7530_v20  ;;  %v7528_v44 = vadd.f32 %v7503_v3, %v16806_v36  ;;  %v7704_v57 = vpop.f32.mrf.mxu1  ;;  %v10382_v36 = vld [vmem:[#allocation2 + $0x15b] sm:$0xff]  ;;  %v10388_v3 = vld [vmem:[#allocation2 + $0x18b] sm:$0xff] }
 0x376   : > { %13144 = vmatpush3.bf16.msra.mxu0 %v13489_v25  ;;  %13179 = vmatprep.mubr.bf16.mxu1 %v10393_v52  ;;  %v10395_v14 = vpack.c.bf16 %v10382_v36, %v10381_v26  ;;  %v10386_v25 = vld [vmem:[#allocation2 + $0x17b] sm:$0xff]  ;;  %v10187_v52 = vld [vmem:[#allocation2 + $0x18a] sm:$0xff] }
 0x377   : > { %17661 = vst [vmem:[#allocation29_spill] sm:$0xff] %v16899_v10  ;;  %13176 = vmatpush3.bf16.msra.mxu1 %v13490_v51  ;;  %13145 = vmatprep.subr.bf16.mxu0 %v13491_v33  ;;  %v16902_v12 = vadd.f32 %v7704_v57, %v7528_v44  ;;  %v16904_v47 = vpop.f32.mrf.mxu0  ;;  %v10397_v19 = vpack.c.bf16 %v10386_v25, %v10385_v24  ;;  %v10188_v44 = vld [vmem:[#allocation2 + $0x192] sm:$0xff]  ;;  %v10189_v57 = vld [vmem:[#allocation2 + $0x19a] sm:$0xff] }
 0x378   : > { %13177 = vmatprep.subr.bf16.mxu1 %v13492_v43  ;;  %v16906_v34 = vpop.f32.mrf.mxu1  ;;  %v10198_v40 = vpack.c.bf16 %v10189_v57, %v10188_v44  ;;  %v7919_v10 = vadd.f32 %v16904_v47, %v16815_v45 }
 0x379   : > { %17662 = vst [vmem:[#allocation26_spill] sm:$0xff] %v16902_v12  ;;  %v16908_v55 = vpop.f32.mrf.mxu0 }
 0x37a   : > { %13146 = vmatpush3.bf16.msra.mxu0 %v13491_v33  ;;  %v16910_v38 = vpop.f32.mrf.mxu1  ;;  %v10186_v33 = vld [vmem:[#allocation2 + $0x182] sm:$0xff]  ;;  %v7917_v31 = vadd.f32 %v16908_v55, %v16818_v49 }
 0x37b   : > { %13178 = vmatpush3.bf16.msra.mxu1 %v13492_v43  ;;  %v16912_v13 = vpop.f32.mrf.mxu0  ;;  %v10387_v43 = vld [vmem:[#allocation2 + $0x183] sm:$0xff]  ;;  %v10197_v16 = vpack.c.bf16 %v10187_v52, %v10186_v33 }
 0x37c   : > { %v16914_v30 = vpop.f32.mrf.mxu1  ;;  %v8118_v45 = vadd.f32 %v16910_v38, %v7917_v31 }
 0x37d   : > { %13148 = vmatmul.mubr.bf16.vlgmr.msra.gmra.mxu0 %v10193_v56  ;;  %v16916_v7 = vpop.f32.mrf.mxu0  ;;  %v10398_v56 = vpack.c.bf16 %v10388_v3, %v10387_v43 }
 0x37e   : > { %13180 = vmatmul.mubr.bf16.vlgmr.msra.gmra.mxu1 %v10394_v5  ;;  %13151 = vmatprep.mubr.bf16.mxu0 %v10194_v8  ;;  %v16918_v9 = vpop.f32.mrf.mxu1  ;;  %v10399_v8 = vpack.c.bf16 %v10390_v61, %v10389_v29  ;;  %v7918_v47 = vadd.f32 %v16916_v7, %v16830_v6 }
 0x37f   : > { %13183 = vmatprep.mubr.bf16.mxu1 %v10395_v14  ;;  %v16920_v15 = vpop.f32.mrf.mxu0 }
 0x380   : > { %v16922_v59 = vpop.f32.mrf.mxu1  ;;  %v8119_v6 = vadd.f32 %v16918_v9, %v7918_v47 }
 0x381   : > { %v16924_v60 = vpop.f32.mrf.mxu0 }
 0x382   : > { %v16926_v51 = vpop.f32.mrf.mxu1 }
 0x383   : > { %v16928_v23 = vpop.f32.mrf.mxu0 }
 0x384   : > { %v16930_v35 = vpop.f32.mrf.mxu1  ;;  %v7924_v7 = vadd.f32 %v16928_v23, %v16851_v62 }
 0x385   : > { %13152 = vmatmul.mubr.bf16.gmra.mxu0 %v10195_v22  ;;  %v16932_v18 = vpop.f32.mrf.mxu0  ;;  %v10199_v22 = vpack.c.bf16 %v10191_v28, %v10190_v37 }
 0x386   : > { %13184 = vmatmul.mubr.bf16.gmra.mxu1 %v10396_v21  ;;  %13155 = vmatprep.mubr.bf16.mxu0 %v10196_v11  ;;  %v16934_v2 = vpop.f32.mrf.mxu1  ;;  %v10400_v21 = vpack.c.bf16 %v10392_v42, %v10391_v17 }
 0x387   : > { %13187 = vmatprep.mubr.bf16.mxu1 %v10397_v19  ;;  %v16936_v20 = vpop.f32.mrf.mxu0 }
 0x388   : > { %v16938_v54 = vpop.f32.mrf.mxu1  ;;  %v7927_v23 = vadd.f32 %v16936_v20, %v16863_v58 }
 0x389   : > { %v16940_v32 = vpop.f32.mrf.mxu0 }
 0x38a   : > { %v16942_v50 = vpop.f32.mrf.mxu1 }
 0x38b   : > { %v16944_v36 = vpop.f32.mrf.mxu0 }
 0x38c   : > { %v16946_v5 = vpop.f32.mrf.mxu1 }
 0x38d   : > { %13156 = vmatmul.mubr.bf16.gmra.mxu0 %v10197_v16  ;;  %v16948_v26 = vpop.f32.mrf.mxu0 }
 0x38e   : > { %13188 = vmatmul.mubr.bf16.gmra.mxu1 %v10398_v56  ;;  %13159 = vmatprep.mubr.bf16.mxu0 %v10198_v40  ;;  %v16950_v14 = vpop.f32.mrf.mxu1 }
 0x38f   : > { %17663 = vst [vmem:[#allocation28_spill] sm:$0xff] %v16950_v14  ;;  %13191 = vmatprep.mubr.bf16.mxu1 %v10399_v8  ;;  %v16952_v0 = vpop.f32.mrf.mxu0 }
 0x390   : > { %v16954_v25 = vpop.f32.mrf.mxu1 }
 0x391   : > { %17664 = vst [vmem:[#allocation30_spill] sm:$0xff] %v16954_v25  ;;  %v16956_v41 = vpop.f32.mrf.mxu0 }
 0x392   : > { %17665 = vst [vmem:[#allocation34_spill] sm:$0xff] %v16956_v41  ;;  %v16958_v11 = vpop.f32.mrf.mxu1 }
 0x393   : > { %17666 = vst [vmem:[#allocation37_spill] sm:$0xff] %v16958_v11  ;;  %v16960_v24 = vpop.f32.mrf.mxu0 }
 0x394   : > { %17667 = vst [vmem:[#allocation38_spill] sm:$0xff] %v16960_v24  ;;  %v16962_v19 = vpop.f32.mrf.mxu1 }
 0x395   : > { %17668 = vst [vmem:[#allocation25_spill] sm:$0xff] %v16962_v19  ;;  %13160 = vmatmul.mubr.bf16.gmra.mxu0 %v10199_v22  ;;  %v16964_v33 = vpop.f32.mrf.mxu0 }
 0x396   : > { %17669 = vst [vmem:[#allocation19_spill] sm:$0xff] %v16964_v33  ;;  %13192 = vmatmul.mubr.bf16.gmra.mxu1 %v10400_v21  ;;  %v16966_v52 = vpop.f32.mrf.mxu1 }
 0x397   : > { %17670 = vst [vmem:[#allocation18_spill] sm:$0xff] %v16966_v52 }
 0x398   : > { %v12829_v43 = vpop.f32.mrf.mxu0 }
 0x399   : > { %v12861_v3 = vpop.f32.mrf.mxu1 }
 0x39a   : > { %v8256_v44 = vpop.f32.mrf.mxu0 }
 0x39b   : > { %v8457_v57 = vpop.f32.mrf.mxu1 }
 0x39c   : > { %v12830_v29 = vpop.f32.mrf.mxu0 }
 0x39d   : > { %v12862_v61 = vpop.f32.mrf.mxu1 }
 0x39e   : > { %v8259_v16 = vpop.f32.mrf.mxu0 }
 0x39f   : > { %v8460_v56 = vpop.f32.mrf.mxu1 }
 0x3a0   : > { %v12833_v40 = vpop.f32.mrf.mxu0 }
 0x3a1   : > { %v16968_v8 = vpop.f32.mrf.mxu1 }
 0x3a2   : > { %v8272_v37 = vpop.f32.mrf.mxu0 }
 0x3a3   : > { %v16970_v28 = vpop.f32.mrf.mxu1 }
 0x3a4   : > { %v12834_v17 = vpop.f32.mrf.mxu0 }
 0x3a5   : > { %v16972_v42 = vpop.f32.mrf.mxu1 }
 0x3a6   : > { %v16974_v22 = vpop.f32.mrf.mxu0 }
 0x3a7   : > { %v16976_v21 = vpop.f32.mrf.mxu1 }
 0x3a8   : > { %v16978_v52 = vpop.f32.mrf.mxu0 }
 0x3a9   : > { %v16980_v19 = vpop.f32.mrf.mxu1 }
 0x3aa   : > { %17671 = vst [vmem:[#allocation12_spill] sm:$0xff] %v16980_v19  ;;  %v16982_v33 = vpop.f32.mrf.mxu0 }
 0x3ab   : > { %17672 = vst [vmem:[#allocation40_spill] sm:$0xff] %v16982_v33  ;;  %v16984_v12 = vpop.f32.mrf.mxu1 }
 0x3ac   : > { %17673 = vst [vmem:[#allocation45_spill] sm:$0xff] %v16984_v12  ;;  %v16986_v11 = vpop.f32.mrf.mxu0  ;;  %v8120_v12 = vadd.f32 %v16906_v34, %v7919_v10  ;;  %v7923_v10 = vadd.f32 %v16920_v15, %v16839_v39  ;;  %v8320_v39 = vadd.f32 %v8259_v16, %v8119_v6 }
 0x3ad   : > { %17674 = vst [vmem:[#allocation33_spill] sm:$0xff] %v16986_v11  ;;  %v16988_v24 = vpop.f32.mrf.mxu1  ;;  %v7920_v11 = vadd.f32 %v16912_v13, %v16827_v27  ;;  %v8319_v27 = vadd.f32 %v8256_v44, %v8118_v45  ;;  %v7921_v13 = vadd.f32 %v16924_v60, %v16842_v48  ;;  %v7922_v60 = vadd.f32 %v16932_v18, %v16854_v63 }
 0x3ae   : > { %17675 = vst [vmem:[#allocation14_spill] sm:$0xff] %v16988_v24  ;;  %v16992_v25 = vpop.f32.mrf.mxu0  ;;  %v8521_v16 = vadd.f32 %v8460_v56, %v8320_v39  ;;  %v17679_v39 = vld [vmem:[#allocation28_spill] sm:$0xff] }
 0x3af   : > { %v16994_v41 = vpop.f32.mrf.mxu1  ;;  %v8122_v48 = vadd.f32 %v16926_v51, %v7921_v13  ;;  %v8123_v18 = vadd.f32 %v16934_v2, %v7922_v60  ;;  %v17681_v60 = vld [vmem:[#allocation34_spill] sm:$0xff] }
 0x3b0   : > { %17676 = vst [vmem:[#allocation41_spill] sm:$0xff] %v16994_v41  ;;  %v16998_v14 = vpop.f32.mrf.mxu0  ;;  %v8321_v41 = vadd.f32 %v12829_v43, %v8120_v12 }
 0x3b1   : > { %v17000_v19 = vpop.f32.mrf.mxu1  ;;  %v8323_v45 = vadd.f32 %v8272_v37, %v8122_v48  ;;  %v8128_v37 = vadd.f32 %v16938_v54, %v7927_v23  ;;  %v17680_v48 = vld [vmem:[#allocation20_spill] sm:$0xff] }
 0x3b2   : > { %17677 = vst [vmem:[#allocation15_spill] sm:$0xff] %v17000_v19  ;;  %v17005_v24 = vpop.f32.mrf.mxu0  ;;  %v8121_v19 = vadd.f32 %v16914_v30, %v7920_v11  ;;  %v8522_v12 = vadd.f32 %v12861_v3, %v8321_v41  ;;  %v8124_v30 = vadd.f32 %v16922_v59, %v7923_v10  ;;  %v8520_v11 = vadd.f32 %v8457_v57, %v8319_v27 }
 0x3b3   : > { %v17007_v33 = vpop.f32.mrf.mxu1  ;;  %v8125_v59 = vadd.f32 %v16930_v35, %v7924_v7  ;;  %v7928_v27 = vadd.f32 %v16944_v36, %v16875_v53  ;;  %v8524_v2 = vadd.f32 %v16970_v28, %v8323_v45  ;;  %v8329_v53 = vadd.f32 %v16978_v52, %v8128_v37  ;;  %v17689_v37 = vld [vmem:[#allocation26_spill] sm:$0xff] }
 0x3b4   : > { %v17012_v49 = vpop.f32.mrf.mxu0  ;;  %v8322_v38 = vadd.f32 %v12830_v29, %v8121_v19  ;;  %v8325_v19 = vadd.f32 %v12833_v40, %v8124_v30 }
 0x3b5   : > { %v17014_v55 = vpop.f32.mrf.mxu1  ;;  %v8326_v10 = vadd.f32 %v12834_v17, %v8125_v59  ;;  %v8129_v7 = vadd.f32 %v16946_v5, %v7928_v27  ;;  %v17684_v59 = vld [vmem:[#allocation30_spill] sm:$0xff]  ;;  %v17690_v27 = vld [vmem:[#allocation19_spill] sm:$0xff] }
 0x3b6   : > { %v17019_v34 = vpop.f32.mrf.mxu0  ;;  %v8523_v41 = vadd.f32 %v12862_v61, %v8322_v38  ;;  %v7925_v61 = vadd.f32 %v16940_v32, %v16866_v46  ;;  %v8526_v35 = vadd.f32 %v16968_v8, %v8325_v19  ;;  %v8324_v46 = vadd.f32 %v16974_v22, %v8123_v18 }
 0x3b7   : > { %v17023_v31 = vpop.f32.mrf.mxu1  ;;  %v8527_v38 = vadd.f32 %v16972_v42, %v8326_v10 }
 0x3b8   : > { %v8126_v6 = vadd.f32 %v16942_v50, %v7925_v61  ;;  %v8525_v30 = vadd.f32 %v16976_v21, %v8324_v46  ;;  %v17691_v46 = vld [vmem:[#allocation14_spill] sm:$0xff] }
 0x3b9   : > { %v12893_v43 = vpop.f32.mrf.mxu0 }
 0x3ba   : > { %v8723_v15 = vadd.f32 %v12893_v43, %v8522_v12  ;;  %v17029_v44 = vpop.f32.mrf.mxu1  ;;  %v7926_v12 = vadd.f32 %v16948_v26, %v16878_v4  ;;  %v7931_v43 = vadd.f32 %v16952_v0, %v16887_v1  ;;  %v17678_v4 = vld [vmem:[#allocation40_spill] sm:$0xff]  ;;  %v17683_v1 = vld [vmem:[#allocation33_spill] sm:$0xff] }
 0x3bb   : > { %v8658_v9 = vpop.f32.mrf.mxu0  ;;  %v8327_v26 = vadd.f32 %v17678_v4, %v8126_v6  ;;  %v8330_v0 = vadd.f32 %v17683_v1, %v8129_v7 }
 0x3bc   : > { %v8739_v3 = vmax.f32 %v8723_v15, 0.0  ;;  %v8721_v29 = vadd.f32 %v8658_v9, %v8520_v11  ;;  %v17034_v62 = vpop.f32.mrf.mxu1  ;;  %v8127_v15 = vadd.f32 %v17679_v39, %v7926_v12  ;;  %v7929_v9 = vadd.f32 %v17681_v60, %v17680_v48 }
 0x3bd   : > { %v12894_v57 = vpop.f32.mrf.mxu0  ;;  %v8132_v23 = vadd.f32 %v17684_v59, %v7931_v43 }
 0x3be   : > { %8755 = vst [vmem:[%s16588_s12 + $0x90] sm:$0xff] %v8739_v3  ;;  %v8737_v51 = vmax.f32 %v8721_v29, 0.0  ;;  %v8724_v47 = vadd.f32 %v12894_v57, %v8523_v41  ;;  %v17040_v63 = vpop.f32.mrf.mxu1  ;;  %v17682_v41 = vld [vmem:[#allocation12_spill] sm:$0xff]  ;;  %v17685_v57 = vld [vmem:[#allocation29_spill] sm:$0xff]  ;;  %v8328_v61 = vadd.f32 %v16992_v25, %v8127_v15 }
 0x3bf   : > { %v8661_v40 = vpop.f32.mrf.mxu0  ;;  %v8530_v19 = vadd.f32 %v17682_v41, %v8329_v53 }
 0x3c0   : > { %8753 = vst [vmem:[%s16588_s12 + $0x80] sm:$0xff] %v8737_v51  ;;  %v8740_v58 = vmax.f32 %v8724_v47, 0.0  ;;  %v8722_v20 = vadd.f32 %v8661_v40, %v8521_v16  ;;  %v17047_v56 = vpop.f32.mrf.mxu1  ;;  %v17686_v16 = vld [vmem:[#allocation38_spill] sm:$0xff]  ;;  %v17687_v47 = vld [vmem:[#allocation45_spill] sm:$0xff] }
 0x3c1   : > { %v12897_v13 = vpop.f32.mrf.mxu0  ;;  %v7932_v45 = vadd.f32 %v17686_v16, %v17685_v57  ;;  %v8528_v18 = vadd.f32 %v17687_v47, %v8327_v26 }
 0x3c2   : > { %8756 = vst [vmem:[%s16588_s12 + $0x98] sm:$0xff] %v8740_v58  ;;  %v8738_v32 = vmax.f32 %v8722_v20, 0.0  ;;  %v8727_v8 = vadd.f32 %v12897_v13, %v8526_v35  ;;  %v17055_v17 = vpop.f32.mrf.mxu1  ;;  %v17688_v58 = vld [vmem:[#allocation37_spill] sm:$0xff]  ;;  %v7930_v13 = vadd.f32 %v17690_v27, %v17689_v37 }
 0x3c3   : > { %v8674_v54 = vpop.f32.mrf.mxu0  ;;  %v8130_v20 = vadd.f32 %v17688_v58, %v7929_v9 }
 0x3c4   : > { %8754 = vst [vmem:[%s16588_s12 + $0x88] sm:$0xff] %v8738_v32  ;;  %v8743_v36 = vmax.f32 %v8727_v8, 0.0  ;;  %v8725_v28 = vadd.f32 %v8674_v54, %v8524_v2  ;;  %v17063_v22 = vpop.f32.mrf.mxu1  ;;  %v8531_v32 = vadd.f32 %v17691_v46, %v8330_v0  ;;  %v8333_v8 = vadd.f32 %v16998_v14, %v8132_v23  ;;  %v17692_v54 = vld [vmem:[#allocation25_spill] sm:$0xff]  ;;  %v17694_v14 = vld [vmem:[#allocation18_spill] sm:$0xff] }
 0x3c5   : > { %v12898_v50 = vpop.f32.mrf.mxu0  ;;  %v8331_v7 = vadd.f32 %v17005_v24, %v8130_v20  ;;  %v8131_v4 = vadd.f32 %v17694_v14, %v7930_v13 }
 0x3c6   : > { %8759 = vst [vmem:[%s16588_s12 + $0xb0] sm:$0xff] %v8743_v36  ;;  %v8741_v42 = vmax.f32 %v8725_v28, 0.0  ;;  %v8728_v11 = vadd.f32 %v12898_v50, %v8527_v38  ;;  %v17071_v52 = vpop.f32.mrf.mxu1  ;;  %v8133_v38 = vadd.f32 %v17692_v54, %v7932_v45  ;;  %v17693_v36 = vld [vmem:[#allocation41_spill] sm:$0xff] }
 0x3c7   : > { %v8677_v5 = vpop.f32.mrf.mxu0  ;;  %v8529_v28 = vadd.f32 %v17693_v36, %v8328_v61  ;;  %v8532_v9 = vadd.f32 %v17007_v33, %v8331_v7 }
 0x3c8   : > { %8757 = vst [vmem:[%s16588_s12 + $0xa0] sm:$0xff] %v8741_v42  ;;  %v8744_v21 = vmax.f32 %v8728_v11, 0.0  ;;  %v8726_v3 = vadd.f32 %v8677_v5, %v8525_v30  ;;  %v17079_v29 = vpop.f32.mrf.mxu1  ;;  %v17695_v42 = vld [vmem:[#allocation15_spill] sm:$0xff]  ;;  %v8334_v39 = vadd.f32 %v17012_v49, %v8133_v38  ;;  %v8332_v5 = vadd.f32 %v17019_v34, %v8131_v4 }
 0x3c9   : > { %v12901_v51 = vpop.f32.mrf.mxu0  ;;  %v8534_v11 = vadd.f32 %v17695_v42, %v8333_v8 }
 0x3ca   : > { %8760 = vst [vmem:[%s16588_s12 + $0xb8] sm:$0xff] %v8744_v21  ;;  %v8742_v40 = vmax.f32 %v8726_v3, 0.0  ;;  %v8731_v35 = vadd.f32 %v12901_v51, %v8530_v19  ;;  %v17087_v10 = vpop.f32.mrf.mxu1  ;;  %v8535_v49 = vadd.f32 %v17014_v55, %v8334_v39  ;;  %v8533_v33 = vadd.f32 %v17023_v31, %v8332_v5 }
 0x3cb   : > { %v8690_v2 = vpop.f32.mrf.mxu0 }
 0x3cc   : > { %8758 = vst [vmem:[%s16588_s12 + $0xa8] sm:$0xff] %v8742_v40  ;;  %v8747_v6 = vmax.f32 %v8731_v35, 0.0  ;;  %v8729_v25 = vadd.f32 %v8690_v2, %v8528_v18  ;;  %v17095_v12 = vpop.f32.mrf.mxu1  ;;  %v17128_v18 = vld [vmem:[%s17422_s5] ss:$0 sm:$0xff] }
 0x3cd   : > { %v12902_v53 = vpop.f32.mrf.mxu0  ;;  %v8956_v31 = vadd.f32 %v17128_v18, %v17029_v44  ;;  %v8954_v35 = vadd.f32 %v17128_v18, %v17034_v62  ;;  %v8957_v27 = vadd.f32 %v17128_v18, %v17040_v63  ;;  %v8955_v44 = vadd.f32 %v17128_v18, %v17047_v56 }
 0x3ce   : > { %8763 = vst [vmem:[%s16588_s12 + $0xd0] sm:$0xff] %v8747_v6  ;;  %v8745_v43 = vmax.f32 %v8729_v25, 0.0  ;;  %v8732_v50 = vadd.f32 %v12902_v53, %v8531_v32  ;;  %v17101_v30 = vpop.f32.mrf.mxu1  ;;  %v8960_v54 = vadd.f32 %v17128_v18, %v17055_v17  ;;  %v8961_v14 = vadd.f32 %v17128_v18, %v17071_v52 }
 0x3cf   : > { %v8693_v26 = vpop.f32.mrf.mxu0 }
 0x3d0   : > { %8761 = vst [vmem:[%s16588_s12 + $0xc0] sm:$0xff] %v8745_v43  ;;  %v8748_v15 = vmax.f32 %v8732_v50, 0.0  ;;  %v8730_v48 = vadd.f32 %v8693_v26, %v8529_v28  ;;  %v17107_v60 = vpop.f32.mrf.mxu1  ;;  %v8958_v28 = vadd.f32 %v17128_v18, %v17063_v22 }
 0x3d1   : > { %v12905_v24 = vpop.f32.mrf.mxu0 }
 0x3d2   : > { %8764 = vst [vmem:[%s16588_s12 + $0xd8] sm:$0xff] %v8748_v15  ;;  %v8746_v41 = vmax.f32 %v8730_v48, 0.0  ;;  %v8735_v19 = vadd.f32 %v12905_v24, %v8534_v11  ;;  %v17112_v1 = vpop.f32.mrf.mxu1  ;;  %v8959_v11 = vadd.f32 %v17128_v18, %v17079_v29  ;;  %v8964_v24 = vadd.f32 %v17128_v18, %v17087_v10 }
 0x3d3   : > { %v8706_v0 = vpop.f32.mrf.mxu0 }
 0x3d4   : > { %8762 = vst [vmem:[%s16588_s12 + $0xc8] sm:$0xff] %v8746_v41  ;;  %v8751_v21 = vmax.f32 %v8735_v19, 0.0  ;;  %v8733_v3 = vadd.f32 %v8706_v0, %v8532_v9  ;;  %v17116_v59 = vpop.f32.mrf.mxu1  ;;  %v8962_v19 = vadd.f32 %v17128_v18, %v17095_v12 }
 0x3d5   : > { %v12906_v23 = vpop.f32.mrf.mxu0 }
 0x3d6   : > { %8767 = vst [vmem:[%s16588_s12 + $0xf0] sm:$0xff] %v8751_v21  ;;  %v8749_v34 = vmax.f32 %v8733_v3, 0.0  ;;  %v8736_v57 = vadd.f32 %v12906_v23, %v8535_v49  ;;  %v17120_v16 = vpop.f32.mrf.mxu1  ;;  %v8965_v3 = vadd.f32 %v17128_v18, %v17101_v30 }
 0x3d7   : > { %v8709_v45 = vpop.f32.mrf.mxu0 }
 0x3d8   : > { %8765 = vst [vmem:[%s16588_s12 + $0xe0] sm:$0xff] %v8749_v34  ;;  %v8752_v51 = vmax.f32 %v8736_v57, 0.0  ;;  %v8734_v47 = vadd.f32 %v8709_v45, %v8533_v33  ;;  %v17123_v55 = vpop.f32.mrf.mxu1  ;;  %v8963_v57 = vadd.f32 %v17128_v18, %v17107_v60 }
 0x3da   : > { %8768 = vst [vmem:[%s16588_s12 + $0xf8] sm:$0xff] %v8752_v51  ;;  %v8750_v61 = vmax.f32 %v8734_v47, 0.0  ;;  %v12957_v40 = vpop.f32.mrf.mxu0 }
 0x3db   : > { %v9157_v58 = vadd.f32 %v12957_v40, %v8956_v31  ;;  %v12989_v20 = vpop.f32.mrf.mxu1  ;;  %v8968_v31 = vadd.f32 %v17128_v18, %v17112_v1 }
 0x3dc   : > { %8766 = vst [vmem:[%s16588_s12 + $0xe8] sm:$0xff] %v8750_v61  ;;  %v9092_v37 = vpop.f32.mrf.mxu0 }
 0x3dd   : > { %v17138_v13 = vadd.f32 %v12989_v20, %v9157_v58  ;;  %v9155_v2 = vadd.f32 %v9092_v37, %v8954_v35  ;;  %v9293_v46 = vpop.f32.mrf.mxu1  ;;  %v8966_v58 = vadd.f32 %v17128_v18, %v17116_v59 }
 0x3de   : > { %v12958_v32 = vpop.f32.mrf.mxu0 }
 0x3df   : > { %v17142_v8 = vadd.f32 %v9293_v46, %v9155_v2  ;;  %v9158_v6 = vadd.f32 %v12958_v32, %v8957_v27  ;;  %v12990_v25 = vpop.f32.mrf.mxu1  ;;  %v8969_v2 = vadd.f32 %v17128_v18, %v17120_v16 }
 0x3e0   : > { %v9095_v62 = vpop.f32.mrf.mxu0 }
 0x3e1   : > { %v17146_v38 = vadd.f32 %v12990_v25, %v9158_v6  ;;  %v9156_v53 = vadd.f32 %v9095_v62, %v8955_v44  ;;  %v9296_v63 = vpop.f32.mrf.mxu1  ;;  %v8967_v6 = vadd.f32 %v17128_v18, %v17123_v55 }
 0x3e2   : > { %v12961_v36 = vpop.f32.mrf.mxu0 }
 0x3e3   : > { %v17150_v7 = vadd.f32 %v9296_v63, %v9156_v53  ;;  %v9161_v43 = vadd.f32 %v12961_v36, %v8960_v54  ;;  %v12993_v56 = vpop.f32.mrf.mxu1 }
 0x3e4   : > { %v9108_v50 = vpop.f32.mrf.mxu0 }
 0x3e5   : > { %v17154_v4 = vadd.f32 %v12993_v56, %v9161_v43  ;;  %v9159_v26 = vadd.f32 %v9108_v50, %v8958_v28  ;;  %v9309_v17 = vpop.f32.mrf.mxu1 }
 0x3e6   : > { %v12962_v42 = vpop.f32.mrf.mxu0 }
 0x3e7   : > { %v17158_v39 = vadd.f32 %v9309_v17, %v9159_v26  ;;  %v9162_v15 = vadd.f32 %v12962_v42, %v8961_v14  ;;  %v12994_v22 = vpop.f32.mrf.mxu1 }
 0x3e8   : > { %v9111_v48 = vpop.f32.mrf.mxu0 }
 0x3e9   : > { %v17162_v9 = vadd.f32 %v12994_v22, %v9162_v15  ;;  %v9160_v5 = vadd.f32 %v9111_v48, %v8959_v11  ;;  %v9312_v52 = vpop.f32.mrf.mxu1 }
 0x3ea   : > { %v12965_v41 = vpop.f32.mrf.mxu0 }
 0x3eb   : > { %v17166_v0 = vadd.f32 %v9312_v52, %v9160_v5  ;;  %v9165_v49 = vadd.f32 %v12965_v41, %v8964_v24  ;;  %v12997_v29 = vpop.f32.mrf.mxu1 }
 0x3ec   : > { %v9124_v21 = vpop.f32.mrf.mxu0 }
 0x3ed   : > { %v17170_v23 = vadd.f32 %v12997_v29, %v9165_v49  ;;  %v9163_v33 = vadd.f32 %v9124_v21, %v8962_v19  ;;  %v9325_v10 = vpop.f32.mrf.mxu1 }
 0x3ee   : > { %v12966_v34 = vpop.f32.mrf.mxu0 }
 0x3ef   : > { %v17174_v45 = vadd.f32 %v9325_v10, %v9163_v33  ;;  %v9166_v51 = vadd.f32 %v12966_v34, %v8965_v3  ;;  %v12998_v12 = vpop.f32.mrf.mxu1 }
 0x3f0   : > { %v9127_v47 = vpop.f32.mrf.mxu0 }
 0x3f1   : > { %v17178_v61 = vadd.f32 %v12998_v12, %v9166_v51  ;;  %v9164_v40 = vadd.f32 %v9127_v47, %v8963_v57  ;;  %v9328_v30 = vpop.f32.mrf.mxu1 }
 0x3f2   : > { %v12969_v35 = vpop.f32.mrf.mxu0 }
 0x3f3   : > { %v17182_v20 = vadd.f32 %v9328_v30, %v9164_v40  ;;  %v9169_v37 = vadd.f32 %v12969_v35, %v8968_v31  ;;  %v13001_v60 = vpop.f32.mrf.mxu1 }
 0x3f4   : > { %v9140_v27 = vpop.f32.mrf.mxu0 }
 0x3f5   : > { %v17186_v46 = vadd.f32 %v13001_v60, %v9169_v37  ;;  %v9167_v32 = vadd.f32 %v9140_v27, %v8966_v58  ;;  %v9341_v1 = vpop.f32.mrf.mxu1 }
 0x3f6   : > { %v12970_v44 = vpop.f32.mrf.mxu0 }
 0x3f7   : > { %v17190_v25 = vadd.f32 %v9341_v1, %v9167_v32  ;;  %v9170_v62 = vadd.f32 %v12970_v44, %v8969_v2  ;;  %v13002_v59 = vpop.f32.mrf.mxu1 }
 0x3f8   : > { %v9143_v54 = vpop.f32.mrf.mxu0 }
 0x3f9   : > { %17696 = vst [vmem:[#allocation44_spill] sm:$0xff] %v17190_v25  ;;  %v17192_v53 = vadd.f32 %v13002_v59, %v9170_v62  ;;  %v9168_v63 = vadd.f32 %v9143_v54, %v8967_v6  ;;  %v9344_v36 = vpop.f32.mrf.mxu1 }
 0x3fb   : > { %17697 = vst [vmem:[#allocation10_spill] sm:$0xff] %v17192_v53  ;;  %v17194_v28 = vadd.f32 %v9344_v36, %v9168_v63  ;;  %v13021_v16 = vpop.f32.mrf.mxu0 }
 0x3fc   : > { %v13053_v43 = vpop.f32.mrf.mxu1  ;;  %v9559_v53 = vadd.f32 %v13021_v16, %v17138_v13 }
 0x3fd   : > { %17698 = vst [vmem:[#allocation24_spill] sm:$0xff] %v17194_v28  ;;  %v9494_v56 = vpop.f32.mrf.mxu0 }
 0x3fe   : > { %v9695_v50 = vpop.f32.mrf.mxu1  ;;  %v9557_v25 = vadd.f32 %v9494_v56, %v17142_v8 }
 0x3ff   : > { %v13022_v14 = vpop.f32.mrf.mxu0 }
 0x400   : > { %v17196_v26 = vpop.f32.mrf.mxu1 }
 0x401   : > { %v9497_v17 = vpop.f32.mrf.mxu0 }
 0x402   : > { %v17198_v55 = vpop.f32.mrf.mxu1  ;;  %v9558_v13 = vadd.f32 %v9497_v17, %v17150_v7 }
 0x403   : > { %v13025_v18 = vpop.f32.mrf.mxu0 }
 0x404   : > { %v17200_v42 = vpop.f32.mrf.mxu1 }
 0x405   : > { %v17202_v11 = vpop.f32.mrf.mxu0 }
 0x406   : > { %v17204_v15 = vpop.f32.mrf.mxu1 }
 0x407   : > { %v17206_v22 = vpop.f32.mrf.mxu0 }
 0x408   : > { %v17208_v48 = vpop.f32.mrf.mxu1 }
 0x409   : > { %v17210_v24 = vpop.f32.mrf.mxu0 }
 0x40a   : > { %v17212_v5 = vpop.f32.mrf.mxu1 }
 0x40b   : > { %v17214_v52 = vpop.f32.mrf.mxu0 }
 0x40c   : > { %v17216_v41 = vpop.f32.mrf.mxu1 }
 0x40d   : > { %v17218_v19 = vpop.f32.mrf.mxu0 }
 0x40e   : > { %v17220_v49 = vpop.f32.mrf.mxu1 }
 0x40f   : > { %v17222_v29 = vpop.f32.mrf.mxu0 }
 0x410   : > { %v17224_v21 = vpop.f32.mrf.mxu1 }
 0x411   : > { %v17226_v3 = vpop.f32.mrf.mxu0 }
 0x412   : > { %v17228_v33 = vpop.f32.mrf.mxu1 }
 0x413   : > { %17699 = vst [vmem:[#allocation31_spill] sm:$0xff] %v17228_v33  ;;  %v17230_v10 = vpop.f32.mrf.mxu0 }
 0x414   : > { %v17232_v34 = vpop.f32.mrf.mxu1 }
 0x415   : > { %17700 = vst [vmem:[#allocation22_spill] sm:$0xff] %v17232_v34  ;;  %v17234_v57 = vpop.f32.mrf.mxu0 }
 0x416   : > { %17701 = vst [vmem:[#allocation13_spill] sm:$0xff] %v17234_v57  ;;  %v17236_v51 = vpop.f32.mrf.mxu1 }
 0x417   : > { %17702 = vst [vmem:[#allocation17_spill] sm:$0xff] %v17236_v51  ;;  %v17238_v12 = vpop.f32.mrf.mxu0 }
 0x418   : > { %17703 = vst [vmem:[#allocation46_spill] sm:$0xff] %v17238_v12  ;;  %v17240_v47 = vpop.f32.mrf.mxu1 }
 0x419   : > { %17704 = vst [vmem:[#allocation39_spill] sm:$0xff] %v17240_v47  ;;  %v17242_v31 = vpop.f32.mrf.mxu0 }
 0x41a   : > { %17705 = vst [vmem:[#allocation16_spill] sm:$0xff] %v17242_v31  ;;  %v17244_v40 = vpop.f32.mrf.mxu1 }
 0x41b   : > { %17706 = vst [vmem:[#allocation43_spill] sm:$0xff] %v17244_v40 }
 0x41c   : > { %v13085_v30 = vpop.f32.mrf.mxu0 }
 0x41d   : > { %v13117_v35 = vpop.f32.mrf.mxu1 }
 0x41e   : > { %v9896_v58 = vpop.f32.mrf.mxu0 }
 0x41f   : > { %v10097_v37 = vpop.f32.mrf.mxu1 }
 0x420   : > { %v13086_v60 = vpop.f32.mrf.mxu0 }
 0x421   : > { %v13118_v27 = vpop.f32.mrf.mxu1 }
 0x422   : > { %v9899_v2 = vpop.f32.mrf.mxu0 }
 0x423   : > { %v10100_v32 = vpop.f32.mrf.mxu1 }
 0x424   : > { %v13089_v1 = vpop.f32.mrf.mxu0 }
 0x425   : > { %v17246_v44 = vpop.f32.mrf.mxu1 }
 0x426   : > { %v9912_v6 = vpop.f32.mrf.mxu0 }
 0x427   : > { %v17248_v62 = vpop.f32.mrf.mxu1 }
 0x428   : > { %v13090_v59 = vpop.f32.mrf.mxu0 }
 0x429   : > { %v17250_v54 = vpop.f32.mrf.mxu1 }
 0x42a   : > { %v17252_v63 = vpop.f32.mrf.mxu0 }
 0x42b   : > { %v17254_v36 = vpop.f32.mrf.mxu1 }
 0x42c   : > { %17707 = vst [vmem:[#allocation21_spill] sm:$0xff] %v17254_v36  ;;  %v17256_v40 = vpop.f32.mrf.mxu0 }
 0x42d   : > { %v17258_v47 = vpop.f32.mrf.mxu1 }
 0x42e   : > { %17708 = vst [vmem:[#allocation42_spill] sm:$0xff] %v17258_v47  ;;  %v17260_v31 = vpop.f32.mrf.mxu0  ;;  %v9760_v47 = vadd.f32 %v13053_v43, %v9559_v53 }
 0x42f   : > { %17709 = vst [vmem:[#allocation27_spill] sm:$0xff] %v17260_v31  ;;  %v17262_v28 = vpop.f32.mrf.mxu1  ;;  %v9560_v31 = vadd.f32 %v13022_v14, %v17146_v38  ;;  %v9561_v38 = vadd.f32 %v17202_v11, %v17158_v39  ;;  %v9562_v39 = vadd.f32 %v17210_v24, %v17166_v0  ;;  %v9565_v24 = vadd.f32 %v17218_v19, %v17174_v45 }
 0x430   : > { %17710 = vst [vmem:[#allocation36_spill] sm:$0xff] %v17262_v28  ;;  %v17264_v51 = vpop.f32.mrf.mxu0  ;;  %v9961_v16 = vadd.f32 %v13085_v30, %v9760_v47 }
 0x431   : > { %17711 = vst [vmem:[#allocation32_spill] sm:$0xff] %v17264_v51  ;;  %v17266_v12 = vpop.f32.mrf.mxu1  ;;  %v9761_v56 = vadd.f32 %v17196_v26, %v9560_v31  ;;  %v9762_v31 = vadd.f32 %v17204_v15, %v9561_v38  ;;  %v9763_v0 = vadd.f32 %v17212_v5, %v9562_v39  ;;  %v17718_v39 = vld [vmem:[#allocation31_spill] sm:$0xff] }
 0x432   : > { %17712 = vst [vmem:[#allocation11_spill] sm:$0xff] %v17266_v12  ;;  %v17269_v34 = vpop.f32.mrf.mxu0  ;;  %v9758_v12 = vadd.f32 %v9695_v50, %v9557_v25  ;;  %v9759_v25 = vadd.f32 %v17198_v55, %v9558_v13  ;;  %v10162_v7 = vadd.f32 %v13117_v35, %v9961_v16 }
 0x433   : > { %17713 = vst [vmem:[#allocation23_spill] sm:$0xff] %v17269_v34  ;;  %v17271_v57 = vpop.f32.mrf.mxu1  ;;  %v9962_v50 = vadd.f32 %v13086_v60, %v9761_v56  ;;  %v9568_v56 = vadd.f32 %v17222_v29, %v17178_v61  ;;  %v9964_v45 = vadd.f32 %v17252_v63, %v9763_v0 }
 0x434   : > { %17714 = vst [vmem:[#allocation35_spill] sm:$0xff] %v17271_v57  ;;  %v17274_v33 = vpop.f32.mrf.mxu0  ;;  %v9563_v57 = vadd.f32 %v13025_v18, %v17154_v4  ;;  %v9564_v4 = vadd.f32 %v17206_v22, %v17162_v9  ;;  %v9960_v26 = vadd.f32 %v9899_v2, %v9759_v25  ;;  %v9567_v9 = vadd.f32 %v17214_v52, %v17170_v23 }
 0x435   : > { %v17276_v36 = vpop.f32.mrf.mxu1  ;;  %v10163_v55 = vadd.f32 %v13118_v27, %v9962_v50  ;;  %v9963_v22 = vadd.f32 %v9912_v6, %v9762_v31  ;;  %v9566_v50 = vadd.f32 %v17226_v3, %v17182_v20  ;;  %v17717_v20 = vld [vmem:[#allocation21_spill] sm:$0xff] }
 0x436   : > { %17715 = vst [vmem:[#allocation9_spill] sm:$0xff] %v17276_v36  ;;  %v17279_v28 = vpop.f32.mrf.mxu0  ;;  %v9959_v36 = vadd.f32 %v9896_v58, %v9758_v12  ;;  %v9764_v14 = vadd.f32 %v17200_v42, %v9563_v57  ;;  %v9765_v57 = vadd.f32 %v17208_v48, %v9564_v4  ;;  %v10161_v60 = vadd.f32 %v10100_v32, %v9960_v26 }
 0x437   : > { %v17281_v51 = vpop.f32.mrf.mxu1  ;;  %v9768_v32 = vadd.f32 %v17216_v41, %v9567_v9  ;;  %v10164_v5 = vadd.f32 %v17248_v62, %v9963_v22  ;;  %v10165_v3 = vadd.f32 %v17717_v20, %v9964_v45  ;;  %v17726_v0 = vld [vmem:[#allocation36_spill] sm:$0xff] }
 0x438   : > { %v17284_v34 = vpop.f32.mrf.mxu0  ;;  %v10160_v18 = vadd.f32 %v10097_v37, %v9959_v36  ;;  %v9965_v11 = vadd.f32 %v13089_v1, %v9764_v14  ;;  %v9966_v48 = vadd.f32 %v13090_v59, %v9765_v57 }
 0x439   : > { %v17287_v8 = vpop.f32.mrf.mxu1  ;;  %v9969_v41 = vadd.f32 %v17256_v40, %v9768_v32  ;;  %v17728_v32 = vld [vmem:[#allocation17_spill] sm:$0xff] }
 0x43a   : > { %v17290_v53 = vpop.f32.mrf.mxu0  ;;  %v10166_v27 = vadd.f32 %v17246_v44, %v9965_v11  ;;  %v10167_v61 = vadd.f32 %v17250_v54, %v9966_v48  ;;  %v9767_v11 = vadd.f32 %v17718_v39, %v9566_v50 }
 0x43b   : > { %v17294_v43 = vpop.f32.mrf.mxu1 }
 0x43d   : > { %v13149_v17 = vpop.f32.mrf.mxu0 }
 0x43e   : > { %v10363_v12 = vadd.f32 %v13149_v17, %v10162_v7  ;;  %v13181_v47 = vpop.f32.mrf.mxu1  ;;  %v9766_v7 = vadd.f32 %v17220_v49, %v9565_v24  ;;  %v9769_v17 = vadd.f32 %v17224_v21, %v9568_v56  ;;  %v17716_v49 = vld [vmem:[#allocation27_spill] sm:$0xff]  ;;  %v17721_v21 = vld [vmem:[#allocation42_spill] sm:$0xff] }
 0x43f   : > { %v10298_v30 = vpop.f32.mrf.mxu0 }
 0x440   : > { %v10564_v35 = vadd.f32 %v13181_v47, %v10363_v12  ;;  %v10361_v58 = vadd.f32 %v10298_v30, %v10160_v18  ;;  %v10499_v42 = vpop.f32.mrf.mxu1  ;;  %v9571_v18 = vadd.f32 %v17230_v10, %v17186_v46  ;;  %v9967_v26 = vadd.f32 %v17716_v49, %v9766_v7  ;;  %v17719_v30 = vld [vmem:[#allocation44_spill] sm:$0xff] }
 0x441   : > { %v13150_v37 = vpop.f32.mrf.mxu0  ;;  %v17722_v46 = vld [vmem:[#allocation32_spill] sm:$0xff] }
 0x442   : > { %v10580_v2 = vmax.f32 %v10564_v35, 0.0  ;;  %v10562_v15 = vadd.f32 %v10499_v42, %v10361_v58  ;;  %v10364_v36 = vadd.f32 %v13150_v37, %v10163_v55  ;;  %v13182_v13 = vpop.f32.mrf.mxu1  ;;  %v17720_v55 = vld [vmem:[#allocation13_spill] sm:$0xff]  ;;  %v10170_v58 = vadd.f32 %v17721_v21, %v9969_v41 }
 0x443   : > { %v10301_v1 = vpop.f32.mrf.mxu0  ;;  %v9569_v35 = vadd.f32 %v17720_v55, %v17719_v30  ;;  %v9970_v10 = vadd.f32 %v17722_v46, %v9769_v17  ;;  %v10168_v24 = vadd.f32 %v17726_v0, %v9967_v26 }
 0x444   : > { %10596 = vst [vmem:[%s16588_s12 + $0x110] sm:$0xff] %v10580_v2  ;;  %v10578_v16 = vmax.f32 %v10562_v15, 0.0  ;;  %v10565_v23 = vadd.f32 %v13182_v13, %v10364_v36  ;;  %v10362_v52 = vadd.f32 %v10301_v1, %v10161_v60  ;;  %v10502_v6 = vpop.f32.mrf.mxu1  ;;  %v17723_v60 = vld [vmem:[#allocation22_spill] sm:$0xff]  ;;  %v17727_v1 = vld [vmem:[#allocation23_spill] sm:$0xff] }
 0x445   : > { %v13153_v38 = vpop.f32.mrf.mxu0  ;;  %v9772_v2 = vadd.f32 %v17723_v60, %v9571_v18  ;;  %v17724_v15 = vld [vmem:[#allocation10_spill] sm:$0xff]  ;;  %v9968_v48 = vadd.f32 %v17727_v1, %v9767_v11  ;;  %v9770_v56 = vadd.f32 %v17728_v32, %v9569_v35 }
 0x446   : > { %10594 = vst [vmem:[%s16588_s12 + $0x100] sm:$0xff] %v10578_v16  ;;  %v10581_v19 = vmax.f32 %v10565_v23, 0.0  ;;  %v10563_v44 = vadd.f32 %v10502_v6, %v10362_v52  ;;  %v10367_v59 = vadd.f32 %v13153_v38, %v10166_v27  ;;  %v13185_v25 = vpop.f32.mrf.mxu1  ;;  %v17725_v36 = vld [vmem:[#allocation46_spill] sm:$0xff]  ;;  %v17730_v38 = vld [vmem:[#allocation16_spill] sm:$0xff] }
 0x447   : > { %v10314_v14 = vpop.f32.mrf.mxu0  ;;  %v9572_v13 = vadd.f32 %v17725_v36, %v17724_v15 }
 0x448   : > { %10597 = vst [vmem:[%s16588_s12 + $0x118] sm:$0xff] %v10581_v19  ;;  %v10579_v29 = vmax.f32 %v10563_v44, 0.0  ;;  %v10568_v62 = vadd.f32 %v13185_v25, %v10367_v59  ;;  %v10365_v63 = vadd.f32 %v10314_v14, %v10164_v5  ;;  %v10515_v4 = vpop.f32.mrf.mxu1  ;;  %v17729_v5 = vld [vmem:[#allocation24_spill] sm:$0xff]  ;;  %v9973_v19 = vadd.f32 %v17274_v33, %v9772_v2  ;;  %v17731_v59 = vld [vmem:[#allocation11_spill] sm:$0xff] }
 0x449   : > { %v13154_v12 = vpop.f32.mrf.mxu0  ;;  %v9570_v45 = vadd.f32 %v17730_v38, %v17729_v5  ;;  %v10171_v25 = vadd.f32 %v17731_v59, %v9970_v10 }
 0x44a   : > { %10595 = vst [vmem:[%s16588_s12 + $0x108] sm:$0xff] %v10579_v29  ;;  %v10584_v40 = vmax.f32 %v10568_v62, 0.0  ;;  %v10566_v47 = vadd.f32 %v10515_v4, %v10365_v63  ;;  %v10368_v54 = vadd.f32 %v13154_v12, %v10167_v61  ;;  %v13186_v31 = vpop.f32.mrf.mxu1  ;;  %v17732_v61 = vld [vmem:[#allocation39_spill] sm:$0xff]  ;;  %v9971_v62 = vadd.f32 %v17279_v28, %v9770_v56 }
 0x44b   : > { %v10317_v42 = vpop.f32.mrf.mxu0  ;;  %v9773_v29 = vadd.f32 %v17732_v61, %v9572_v13  ;;  %v17733_v4 = vld [vmem:[#allocation35_spill] sm:$0xff] }
 0x44c   : > { %10600 = vst [vmem:[%s16588_s12 + $0x130] sm:$0xff] %v10584_v40  ;;  %v10582_v57 = vmax.f32 %v10566_v47, 0.0  ;;  %v10569_v9 = vadd.f32 %v13186_v31, %v10368_v54  ;;  %v10366_v22 = vadd.f32 %v10317_v42, %v10165_v3  ;;  %v10518_v37 = vpop.f32.mrf.mxu1  ;;  %v10169_v17 = vadd.f32 %v17733_v4, %v9968_v48  ;;  %v17734_v12 = vld [vmem:[#allocation43_spill] sm:$0xff]  ;;  %v17735_v3 = vld [vmem:[#allocation9_spill] sm:$0xff] }
 0x44d   : > { %v13157_v27 = vpop.f32.mrf.mxu0  ;;  %v9771_v20 = vadd.f32 %v17734_v12, %v9570_v45  ;;  %v10174_v40 = vadd.f32 %v17735_v3, %v9973_v19  ;;  %v9974_v54 = vadd.f32 %v17284_v34, %v9773_v29  ;;  %v10172_v30 = vadd.f32 %v17281_v51, %v9971_v62 }
 0x44e   : > { %10598 = vst [vmem:[%s16588_s12 + $0x120] sm:$0xff] %v10582_v57  ;;  %v10585_v16 = vmax.f32 %v10569_v9, 0.0  ;;  %v10567_v23 = vadd.f32 %v10518_v37, %v10366_v22  ;;  %v10371_v52 = vadd.f32 %v13157_v27, %v10170_v58  ;;  %v13189_v6 = vpop.f32.mrf.mxu1 }
 0x44f   : > { %v10330_v44 = vpop.f32.mrf.mxu0  ;;  %v9972_v35 = vadd.f32 %v17290_v53, %v9771_v20  ;;  %v10175_v34 = vadd.f32 %v17287_v8, %v9974_v54 }
 0x450   : > { %10601 = vst [vmem:[%s16588_s12 + $0x138] sm:$0xff] %v10585_v16  ;;  %v10583_v7 = vmax.f32 %v10567_v23, 0.0  ;;  %v10572_v50 = vadd.f32 %v13189_v6, %v10371_v52  ;;  %v10369_v41 = vadd.f32 %v10330_v44, %v10168_v24  ;;  %v10531_v14 = vpop.f32.mrf.mxu1 }
 0x451   : > { %v13158_v63 = vpop.f32.mrf.mxu0  ;;  %v10173_v53 = vadd.f32 %v17294_v43, %v9972_v35 }
 0x452   : > { %10599 = vst [vmem:[%s16588_s12 + $0x128] sm:$0xff] %v10583_v7  ;;  %v10588_v18 = vmax.f32 %v10572_v50, 0.0  ;;  %v10570_v33 = vadd.f32 %v10531_v14, %v10369_v41  ;;  %v10372_v49 = vadd.f32 %v13158_v63, %v10171_v25  ;;  %v13190_v26 = vpop.f32.mrf.mxu1 }
 0x453   : > { %v10333_v47 = vpop.f32.mrf.mxu0 }
 0x454   : > { %10604 = vst [vmem:[%s16588_s12 + $0x150] sm:$0xff] %v10588_v18  ;;  %v10586_v31 = vmax.f32 %v10570_v33, 0.0  ;;  %v10573_v28 = vadd.f32 %v13190_v26, %v10372_v49  ;;  %v10370_v39 = vadd.f32 %v10333_v47, %v10169_v17  ;;  %v10534_v11 = vpop.f32.mrf.mxu1 }
 0x455   : > { %v13161_v55 = vpop.f32.mrf.mxu0 }
 0x456   : > { %10602 = vst [vmem:[%s16588_s12 + $0x140] sm:$0xff] %v10586_v31  ;;  %v10589_v21 = vmax.f32 %v10573_v28, 0.0  ;;  %v10571_v58 = vadd.f32 %v10534_v11, %v10370_v39  ;;  %v10375_v42 = vadd.f32 %v13161_v55, %v10174_v40  ;;  %v13193_v46 = vpop.f32.mrf.mxu1 }
 0x457   : > { %v10346_v10 = vpop.f32.mrf.mxu0 }
 0x458   : > { %10605 = vst [vmem:[%s16588_s12 + $0x158] sm:$0xff] %v10589_v21  ;;  %v10587_v57 = vmax.f32 %v10571_v58, 0.0  ;;  %v10576_v9 = vadd.f32 %v13193_v46, %v10375_v42  ;;  %v10373_v22 = vadd.f32 %v10346_v10, %v10172_v30  ;;  %v10547_v51 = vpop.f32.mrf.mxu1 }
 0x459   : > { %v13162_v37 = vpop.f32.mrf.mxu0 }
 0x45a   : > { %10603 = vst [vmem:[%s16588_s12 + $0x148] sm:$0xff] %v10587_v57  ;;  %v10592_v60 = vmax.f32 %v10576_v9, 0.0  ;;  %v10574_v2 = vadd.f32 %v10547_v51, %v10373_v22  ;;  %v10376_v15 = vadd.f32 %v13162_v37, %v10175_v34  ;;  %v13194_v36 = vpop.f32.mrf.mxu1 }
 0x45b   : > { %v10349_v13 = vpop.f32.mrf.mxu0 }
 0x45c   : > { %10608 = vst [vmem:[%s16588_s12 + $0x170] sm:$0xff] %v10592_v60  ;;  %v10590_v8 = vmax.f32 %v10574_v2, 0.0  ;;  %v10577_v0 = vadd.f32 %v13194_v36, %v10376_v15  ;;  %v10374_v24 = vadd.f32 %v10349_v13, %v10173_v53  ;;  %v10550_v27 = vpop.f32.mrf.mxu1 }
 0x45e   : > { %10606 = vst [vmem:[%s16588_s12 + $0x160] sm:$0xff] %v10590_v8  ;;  %v10593_v1 = vmax.f32 %v10577_v0, 0.0  ;;  %v10575_v43 = vadd.f32 %v10550_v27, %v10374_v24 }
 0x460   : > { %10609 = vst [vmem:[%s16588_s12 + $0x178] sm:$0xff] %v10593_v1  ;;  %v10591_v48 = vmax.f32 %v10575_v43, 0.0 }
 0x462   : > { %10607 = vst [vmem:[%s16588_s12 + $0x168] sm:$0xff] %v10591_v48 }
 0x463   : > { %13536 = shalt.err (!%p13533_p0)
}
 0x464   : > { %s13537_s26 = scalar_lea.hbm %s17369_s18, 6144  ;;  %s13541_s10 = scalar_lea.hbm %s17423_s6, 12288 }
 0x465   : > { %p13538_p1 = scmp.ne.s32.totalorder %s17369_s18, %s13537_s26  ;;  %p13542_p4 = scmp.lt.s32.totalorder %s17369_s18, %s17423_s6 }
 0x466   : > { %p13543_p7 = scmp.lt.s32.totalorder %s13541_s10, %s13537_s26 }
 0x467   : > { %p13539_p2 = pnand %p13538_p1, %p13668_p5 }
 0x468   : > { %p13544_p8 = por %p13543_p7, %p13542_p4 }
 0x469   : > { %p13540_p3 = pneg %p13539_p2 }
 0x46b   : > { %p13545_p6 = pnand %p13544_p8, %p13540_p3 }
 0x46d   : > { %13548 = shalt.err (!%p13545_p6)
}
 0x46e   : > { %s13593_s14 = smov 128   ;;  %s13594_s16 = smov 8  }
 0x46f   : > { %13200 = dma.vmem_to_hbm [thread:$0]  (%p13668_p5), %s17372_s15, 6144, %s17369_s18, %s17377_s25, %s13593_s14, %s13593_s14, %s13594_s16  }
 0x470 PF: > { %p13212_p9 = scmp.ge.s32.totalorder %s13587_s24, 2  ;;  %s10639_s17 = sand.u32 1, %s13575_s21  }
 0x471   : > { %p17736_p10 = scmp.ne.s32.totalorder %s17426_s8, 0  ;;  %s10640_s19 = scalar_lea.sflag [#allocation5], %s10639_s17 }
 0x473   : > { %p13207_p11 = pnand %p13212_p9, %p17736_p10 }
 0x475   : > { %p13208_p12 = pneg %p13207_p11 }
 0x477   : > { %13570 = dma.done.wait (%p13208_p12), %s10640_s19, 6144  }
 0x478   : > { %13572 = vsyncadd (%p13208_p12), %s10640_s19, 4294961152  ;;  %p17_p13 = scmp.ge.s32.totalorder %s13655_s27, 4   ;;  %s17737_s21 = smov %s13579_s22 }
 0x479   : > { %s17738_s22 = smov %s13583_s23  ;;  %s17739_s23 = smov %s13666_s30 }
 0x47a   : > { %s17740_s24 = smov %s13655_s27  ;;  %19 = sbr.rel (!%p17_p13) target bundleno = 4 (0x4), region = 84 }
 0x47f   :  { %10645 = vsyncpa [#allocation4], 1 }
 0x480   :  { %10647 = vsyncpa [#allocation4 + $0x1], 1 }
 0x481   :  { %10648 = vsyncpa [#allocation5], 1 }
 0x482   :  { %10650 = vsyncpa [#allocation5 + $0x1], 1 }

</bundles_post_ra>
